<compile_context>
chip_gen: v7x
topology: tpu7x:2x2x1
jax: 0.10.0
libtpu: 0.0.40
codegen_flags: <defaults>
</compile_context>

<pallas_src>
from functools import partial

import jax
import jax.numpy as jnp
from jax.experimental import pallas as pl
from jax.experimental.pallas import tpu as pltpu

EPS = 1e-5      # PyTorch GroupNorm default eps
TILE_E = 512    # edge rows per grid step (multiple of 128 lanes for the hi vector)


def _relu(x):
    return jnp.maximum(x, 0.0)


def _gn1(x, gamma, beta, c_real):
    # nn.GroupNorm(num_groups=1, C) on a 2-D (rows, C_pad) input whose padded
    # columns are exactly zero: statistics over the real C channels only.
    c_pad = x.shape[-1]
    mu = jnp.sum(x, axis=-1, keepdims=True) * (1.0 / c_real)
    xc = x - mu
    # sum over padded cols of (0 - mu)^2 is (c_pad - c_real)*mu^2 -> subtract it.
    var = (jnp.sum(xc * xc, axis=-1, keepdims=True)
           - (c_pad - c_real) * mu * mu) * (1.0 / c_real)
    var = jnp.maximum(var, 0.0)
    return xc * jax.lax.rsqrt(var + EPS) * gamma + beta


def att_kernel(n_agt, n_ctx, n_ctx_p,
               hi_ref, rel_ref, agts_hi_ref, ctx_wi_ref, agts_ref,
               w1_ref, w2_ref, wq_ref, wc1_ref, wc2_ref, wa_ref, wl_ref,
               aff_ctx_ref, aff_agt_ref,
               out_ref, acc_ref):
    e = pl.program_id(0)

    # ---- prologue (hoisted out of the epilogue): acc starts as agts @ Wa ----
    @pl.when(e == 0)
    def _():
        acc_ref[...] = jnp.dot(agts_ref[...].astype(jnp.bfloat16), wa_ref[...],
                               preferred_element_type=jnp.float32)

    # packed (1, C) bias / affine rows (f32, VPU math); padded cols are zero.
    b1, g2, be2, gq, bq = (aff_ctx_ref[i:i + 1, :] for i in range(5))
    gc, bc, gng, gnb, gl, bl = (aff_agt_ref[i:i + 1, :] for i in range(6))

    # ---- self.dist : Linear(2, n_ctx) as VPU broadcast-FMAs (K=2 would waste the MXU)
    rel = rel_ref[...]                                     # [tE, 2]  f32
    w1 = w1_ref[...]                                       # [2, n_ctx_p] f32
    d = _relu(rel[:, 0:1] * w1[0:1, :] + rel[:, 1:2] * w1[1:2, :] + b1)
    d = _relu(_gn1(jnp.dot(d.astype(jnp.bfloat16), w2_ref[...],
                           preferred_element_type=jnp.float32), g2, be2, n_ctx))

    # ---- self.query ----
    q = _relu(_gn1(jnp.dot(agts_hi_ref[...], wq_ref[...],
                           preferred_element_type=jnp.float32), gq, bq, n_ctx))

    # ---- self.ctx : three accumulated MXU dots (no lane-axis concatenate) ----
    c = jnp.dot(d.astype(jnp.bfloat16), wc1_ref[0:n_ctx_p, :],
                preferred_element_type=jnp.float32)
    c += jnp.dot(q.astype(jnp.bfloat16), wc1_ref[n_ctx_p:2 * n_ctx_p, :],
                 preferred_element_type=jnp.float32)
    c += jnp.dot(ctx_wi_ref[...], wc1_ref[2 * n_ctx_p:3 * n_ctx_p, :],
                 preferred_element_type=jnp.float32)
    c = _relu(_gn1(c, gc, bc, n_agt))
    c = jnp.dot(c.astype(jnp.bfloat16), wc2_ref[...],
                preferred_element_type=jnp.float32)        # [tE, n_agt_p] f32

    # ---- index_add_ : scatter-add via an in-kernel one-hot matmul on the MXU ----
    # TODO(synk): for production-size graphs (N >> 1K) replace this full-N
    # one-hot with a node-windowed scatter (edges sorted by hi + scalar-
    # prefetched per-tile node-block offsets) to drop O(N*E) -> O(E*window).
    n_nodes, tile_e = acc_ref.shape[0], hi_ref.shape[1]
    iota_n = jax.lax.broadcasted_iota(jnp.int32, (n_nodes, tile_e), 0)
    oh = (iota_n == hi_ref[...]).astype(jnp.bfloat16)      # padded cols (hi = -1) -> 0
    acc_ref[...] += jnp.dot(oh, c.astype(jnp.bfloat16),
                            preferred_element_type=jnp.float32)

    # ---- node-side finalize on the last edge tile ----
    @pl.when(e == pl.num_programs(0) - 1)
    def _():
        agts = agts_ref[...]                               # f32 residual (padded cols 0)
        a = _relu(_gn1(acc_ref[...], gng, gnb, n_agt))
        a = _gn1(jnp.dot(a.astype(jnp.bfloat16), wl_ref[...],
                         preferred_element_type=jnp.float32), gl, bl, n_agt)
        out_ref[...] = _relu(a + agts)


def _round_up(x, m):
    return ((x + m - 1) // m) * m


def _vmem_limit_bytes():
    # Generation-aware VMEM budget: ~75% of physical, capped at 100 MiB
    # (v5e/v6e: 96 MiB, v7x: 48 MiB).  Fallback if the query is unavailable.
    try:
        cap = int(pltpu.get_tpu_info().vmem_capacity_bytes)
    except Exception:
        cap = 64 * 1024 * 1024
    return min(100 * 1024 * 1024, int(cap * 3 // 4))


def init_params(key, n_agt, n_ctx):
    ks = jax.random.split(key, 16)
    s = 0.2
    nrm = lambda k, shp, dt: (jax.random.normal(k, shp, jnp.float32) * s).astype(dt)
    aff = lambda k, c: (1.0 + 0.1 * jax.random.normal(k, (1, c), jnp.float32),
                        0.1 * jax.random.normal(jax.random.fold_in(k, 1),
                                                (1, c), jnp.float32))
    p = {}
    p['w1'] = nrm(ks[0], (2, n_ctx), jnp.float32)          # used on the VPU, keep f32
    p['b1'] = nrm(ks[1], (1, n_ctx), jnp.float32)
    p['w2'] = nrm(ks[2], (n_ctx, n_ctx), jnp.bfloat16)
    p['g2'], p['be2'] = aff(ks[3], n_ctx)
    p['wq'] = nrm(ks[4], (n_agt, n_ctx), jnp.bfloat16)
    p['gq'], p['bq'] = aff(ks[5], n_ctx)
    p['wc1'] = nrm(ks[6], (3 * n_ctx, n_agt), jnp.bfloat16)
    p['gc'], p['bc'] = aff(ks[7], n_agt)
    p['wc2'] = nrm(ks[8], (n_agt, n_agt), jnp.bfloat16)
    p['wa'] = nrm(ks[9], (n_agt, n_agt), jnp.bfloat16)
    p['gn_g'], p['gn_b'] = aff(ks[10], n_agt)
    p['wl'] = nrm(ks[11], (n_agt, n_agt), jnp.bfloat16)
    p['gl'], p['bl'] = aff(ks[12], n_agt)
    return p


def att_forward(agts, agt_idcs, agt_ctrs, ctx, ctx_idcs, ctx_ctrs, dist_th, p):
    """Glue: build (hi, wi) pairs exactly like Att.forward, gather + zero-pad
    edge features / feature dims to tile-quantized static shapes, then run the
    fused Pallas kernel."""
    # TODO(synk): the empty-ctx fast path (len(ctx) == 0, which skips self.norm)
    # and the all-graphs-empty case are not implemented (dynamic control flow).
    batch_size = len(agt_idcs)
    hi_list, wi_list = [], []
    hi_count, wi_count = 0, 0
    for i in range(batch_size):
        d = agt_ctrs[i][:, None, :] - ctx_ctrs[i][None, :, :]
        d = jnp.sqrt(jnp.sum(d * d, axis=2))
        ii, jj = jnp.nonzero(d <= dist_th)          # host-side, dynamic length
        if int(ii.shape[0]) == 0:
            continue                                # NB: matches original (counts not bumped)
        hi_list.append(ii + hi_count)
        wi_list.append(jj + wi_count)
        hi_count += int(agt_idcs[i].shape[0])
        wi_count += int(ctx_idcs[i].shape[0])
    hi = jnp.concatenate(hi_list, 0).astype(jnp.int32)
    wi = jnp.concatenate(wi_list, 0).astype(jnp.int32)
    agt_ctrs_c = jnp.concatenate(agt_ctrs, 0)
    ctx_ctrs_c = jnp.concatenate(ctx_ctrs, 0)

    rel = agt_ctrs_c[hi] - ctx_ctrs_c[wi]                       # [E, 2] f32
    agts_hi = agts[hi].astype(jnp.bfloat16)                     # [E, n_agt] (MXU LHS)
    ctx_wi = ctx[wi].astype(jnp.bfloat16)                       # [E, n_ctx] (MXU LHS)

    N, n_agt = agts.shape
    n_ctx = p['w1'].shape[1]
    n_agt_p = _round_up(n_agt, 128)                             # lane-dense feature dims
    n_ctx_p = _round_up(n_ctx, 128)

    padc = lambda x, t: jnp.pad(x, ((0, 0), (0, t - x.shape[1])))
    pad2 = lambda x, r, c: jnp.pad(x, ((0, r - x.shape[0]), (0, c - x.shape[1])))

    # pad E to a multiple of TILE_E; padding edges get hi = -1 (zero one-hot column)
    E = int(hi.shape[0])
    E_pad = max(TILE_E, ((E + TILE_E - 1) // TILE_E) * TILE_E)
    hi2d = jnp.pad(hi, (0, E_pad - E), constant_values=-1)[None, :]   # [1, E_pad] int32
    rel_p = jnp.pad(rel, ((0, E_pad - E), (0, 0)))
    agts_hi_p = pad2(agts_hi, E_pad, n_agt_p)
    ctx_wi_p = pad2(ctx_wi, E_pad, n_ctx_p)
    agts_p = padc(agts, n_agt_p)                                # f32 resident / residual

    # zero-padded weights & affines: padded channels stay exactly 0 end-to-end.
    w1_p = padc(p['w1'], n_ctx_p)
    w2_p = pad2(p['w2'], n_ctx_p, n_ctx_p)
    wq_p = pad2(p['wq'], n_agt_p, n_ctx_p)
    wc1_p = jnp.concatenate(
        [pad2(p['wc1'][i * n_ctx:(i + 1) * n_ctx], n_ctx_p, n_agt_p) for i in range(3)],
        axis=0)                                                 # [3*n_ctx_p, n_agt_p]
    wc2_p = pad2(p['wc2'], n_agt_p, n_agt_p)
    wa_p = pad2(p['wa'], n_agt_p, n_agt_p)
    wl_p = pad2(p['wl'], n_agt_p, n_agt_p)
    aff_ctx = jnp.concatenate(
        [padc(p[k], n_ctx_p) for k in ('b1', 'g2', 'be2', 'gq', 'bq')], 0)
    aff_agt = jnp.concatenate(
        [padc(p[k], n_agt_p) for k in ('gc', 'bc', 'gn_g', 'gn_b', 'gl', 'bl')], 0)

    def resident(shape):   # block == full array, same block every grid step
        return pl.BlockSpec(shape, lambda e: (0,) * len(shape))

    out = pl.pallas_call(
        partial(att_kernel, n_agt, n_ctx, n_ctx_p),
        out_shape=jax.ShapeDtypeStruct((N, n_agt_p), jnp.float32),
        grid_spec=pltpu.PrefetchScalarGridSpec(
            num_scalar_prefetch=0,
            grid=(E_pad // TILE_E,),
            in_specs=[
                pl.BlockSpec((1, TILE_E), lambda e: (0, e)),          # hi
                pl.BlockSpec((TILE_E, 2), lambda e: (e, 0)),          # rel
                pl.BlockSpec((TILE_E, n_agt_p), lambda e: (e, 0)),    # agts[hi]
                pl.BlockSpec((TILE_E, n_ctx_p), lambda e: (e, 0)),    # ctx[wi]
                resident((N, n_agt_p)),                               # agts (+residual)
                resident((2, n_ctx_p)),                               # w1
                resident((n_ctx_p, n_ctx_p)),                         # w2
                resident((n_agt_p, n_ctx_p)),                         # wq
                resident((3 * n_ctx_p, n_agt_p)),                     # wc1 (fused, sliced in-kernel)
                resident((n_agt_p, n_agt_p)),                         # wc2
                resident((n_agt_p, n_agt_p)),                         # wa
                resident((n_agt_p, n_agt_p)),                         # wl
                resident((5, n_ctx_p)),                               # packed ctx-side affines
                resident((6, n_agt_p)),                               # packed agt-side affines
            ],
            out_specs=pl.BlockSpec((N, n_agt_p), lambda e: (0, 0)),
            scratch_shapes=[pltpu.VMEM((N, n_agt_p), jnp.float32)]),
        compiler_params=pltpu.CompilerParams(
            # TODO(synk): on v7x, split the edge axis across the two TensorCores
            # with per-core partial accumulators + a combine step.
            dimension_semantics=("arbitrary",),        # accumulation across edge tiles
            vmem_limit_bytes=_vmem_limit_bytes()),
    )(hi2d, rel_p, agts_hi_p, ctx_wi_p, agts_p,
      w1_p, w2_p, wq_p, wc1_p, wc2_p, wa_p, wl_p,
      aff_ctx, aff_agt)
    return out[:, :n_agt], (rel, agts_hi, ctx_wi, hi)


def ref_forward(agts, rel, agts_hi, ctx_wi, hi, p):
    """Pure-JAX f32 reference matching the PyTorch semantics (for verification)."""
    f32 = lambda x: x.astype(jnp.float32)

    def gn(x, g, b):
        mu = x.mean(-1, keepdims=True)
        var = ((x - mu) ** 2).mean(-1, keepdims=True)
        return (x - mu) / jnp.sqrt(var + EPS) * g + b

    relu = lambda x: jnp.maximum(x, 0.0)
    d = relu(rel @ p['w1'] + p['b1'])
    d = relu(gn(d @ f32(p['w2']), p['g2'], p['be2']))
    q = relu(gn(f32(agts_hi) @ f32(p['wq']), p['gq'], p['bq']))
    cat = jnp.concatenate([d, q, f32(ctx_wi)], axis=1)
    c = relu(gn(cat @ f32(p['wc1']), p['gc'], p['bc']))
    c = c @ f32(p['wc2'])
    a = agts @ f32(p['wa'])
    a = a.at[hi].add(c)
    a = relu(gn(a, p['gn_g'], p['gn_b']))
    a = gn(a @ f32(p['wl']), p['gl'], p['bl'])
    return relu(a + agts)


if __name__ == "__main__":
    n_agt, n_ctx = 32, 32
    key = jax.random.PRNGKey(0)
    kp, k1, k2, k3, k4 = jax.random.split(key, 5)

    params = init_params(kp, n_agt, n_ctx)

    # batch of 2 graphs: 6 + 10 agent nodes, 12 + 12 context nodes
    n_a = [6, 10]
    n_c = [12, 12]
    agts = jax.random.normal(k1, (sum(n_a), n_agt), jnp.float32)
    ctx = jax.random.normal(k2, (sum(n_c), n_ctx), jnp.float32)

    ka = jax.random.split(k3, len(n_a))
    kc = jax.random.split(k4, len(n_c))
    agt_ctrs = [jax.random.uniform(ka[i], (n_a[i], 2), jnp.float32) * 2.0
                for i in range(len(n_a))]
    ctx_ctrs = [jax.random.uniform(kc[i], (n_c[i], 2), jnp.float32) * 2.0
                for i in range(len(n_c))]
    agt_idcs = [jnp.arange(n, dtype=jnp.int32) for n in n_a]
    ctx_idcs = [jnp.arange(n, dtype=jnp.int32) for n in n_c]
    dist_th = 3.0   # > max possible distance in [0,2]^2 -> every pair connects
    # E = 6*12 + 10*12 = 192 edges -> padded to 512 -> 1 edge tile in the grid

    out, (rel, agts_hi, ctx_wi, hi) = att_forward(
        agts, agt_idcs, agt_ctrs, ctx, ctx_idcs, ctx_ctrs, dist_th, params)
    out = jax.block_until_ready(out)

    ref = ref_forward(agts, rel, agts_hi, ctx_wi, hi, params)
    assert out.shape == agts.shape and out.dtype == jnp.float32
    err = float(jnp.max(jnp.abs(out - ref)))
    assert jnp.allclose(out, ref, rtol=2e-2, atol=2e-2), err

    print("KERNEL_OK")
</pallas_src>

<mosaic_0001>
module attributes {stable_mosaic.version = 11 : i64} {
  func.func @att_kernel(%arg0: i32, %arg1: memref<1x512xi32, #tpu.memory_space<vmem>>, %arg2: memref<512x2xf32, #tpu.memory_space<vmem>>, %arg3: memref<512x128xbf16, #tpu.memory_space<vmem>>, %arg4: memref<512x128xbf16, #tpu.memory_space<vmem>>, %arg5: memref<16x128xf32, #tpu.memory_space<vmem>>, %arg6: memref<2x128xf32, #tpu.memory_space<vmem>>, %arg7: memref<128x128xbf16, #tpu.memory_space<vmem>>, %arg8: memref<128x128xbf16, #tpu.memory_space<vmem>>, %arg9: memref<384x128xbf16, #tpu.memory_space<vmem>>, %arg10: memref<128x128xbf16, #tpu.memory_space<vmem>>, %arg11: memref<128x128xbf16, #tpu.memory_space<vmem>>, %arg12: memref<128x128xbf16, #tpu.memory_space<vmem>>, %arg13: memref<5x128xf32, #tpu.memory_space<vmem>>, %arg14: memref<6x128xf32, #tpu.memory_space<vmem>>, %arg15: memref<16x128xf32, #tpu.memory_space<vmem>>, %arg16: memref<16x128xf32, #tpu.memory_space<vmem>>) attributes {dimension_semantics = [#tpu.dimension_semantics<arbitrary>], iteration_bounds = array<i64: 1>, scalar_prefetch = 0 : i64, scratch_operands = 1 : i64, tpu.core_type = #tpu.core_type<tc>, window_params = [{transform_indices = @transform_0, window_bounds = array<i64: 1, 512>}, {transform_indices = @transform_1, window_bounds = array<i64: 512, 2>}, {transform_indices = @transform_2, window_bounds = array<i64: 512, 128>}, {transform_indices = @transform_3, window_bounds = array<i64: 512, 128>}, {pipeline_mode = #tpu.pipeline_mode<synchronous>, transform_indices = @transform_4, window_bounds = array<i64: 16, 128>}, {pipeline_mode = #tpu.pipeline_mode<synchronous>, transform_indices = @transform_5, window_bounds = array<i64: 2, 128>}, {pipeline_mode = #tpu.pipeline_mode<synchronous>, transform_indices = @transform_6, window_bounds = array<i64: 128, 128>}, {pipeline_mode = #tpu.pipeline_mode<synchronous>, transform_indices = @transform_7, window_bounds = array<i64: 128, 128>}, {pipeline_mode = #tpu.pipeline_mode<synchronous>, transform_indices = @transform_8, window_bounds = array<i64: 384, 128>}, {pipeline_mode = #tpu.pipeline_mode<synchronous>, transform_indices = @transform_9, window_bounds = array<i64: 128, 128>}, {pipeline_mode = #tpu.pipeline_mode<synchronous>, transform_indices = @transform_10, window_bounds = array<i64: 128, 128>}, {pipeline_mode = #tpu.pipeline_mode<synchronous>, transform_indices = @transform_11, window_bounds = array<i64: 128, 128>}, {pipeline_mode = #tpu.pipeline_mode<synchronous>, transform_indices = @transform_12, window_bounds = array<i64: 5, 128>}, {pipeline_mode = #tpu.pipeline_mode<synchronous>, transform_indices = @transform_13, window_bounds = array<i64: 6, 128>}, {pipeline_mode = #tpu.pipeline_mode<synchronous>, transform_indices = @transform_14, window_bounds = array<i64: 16, 128>}]} {
    %c0_i32 = arith.constant 0 : i32
    %0 = arith.cmpi eq, %arg0, %c0_i32 : i32
    %1 = arith.extui %0 : i1 to i32
    %c0_i32_0 = arith.constant 0 : i32
    %2 = arith.cmpi ne, %1, %c0_i32_0 : i32
    scf.if %2 {
      %c0_74 = arith.constant 0 : index
      %c0_75 = arith.constant 0 : index
      %150 = vector.load %arg5[%c0_74, %c0_75] : memref<16x128xf32, #tpu.memory_space<vmem>>, vector<16x128xf32>
      %151 = arith.truncf %150 : vector<16x128xf32> to vector<16x128xbf16>
      %c0_76 = arith.constant 0 : index
      %c0_77 = arith.constant 0 : index
      %152 = vector.load %arg11[%c0_76, %c0_77] : memref<128x128xbf16, #tpu.memory_space<vmem>>, vector<128x128xbf16>
      %cst_78 = arith.constant dense<0.000000e+00> : vector<16x128xf32>
      %153 = tpu.matmul %151, %152, %cst_78 {dimension_numbers = #tpu.dot_dimension_numbers<[1], [0], [0], [1], [0, 0, 1, 1], [], []>} : vector<16x128xbf16>, vector<128x128xbf16>, vector<16x128xf32> -> vector<16x128xf32>
      %c0_79 = arith.constant 0 : index
      %c0_80 = arith.constant 0 : index
      %154 = vector.load %arg16[%c0_79, %c0_80] : memref<16x128xf32, #tpu.memory_space<vmem>>, vector<16x128xf32>
      tpu.vector_store %arg16[%c0_79, %c0_80], %153 {strides = array<i32>} : memref<16x128xf32, #tpu.memory_space<vmem>>, vector<16x128xf32>,
    } else {
    }
    %c0 = arith.constant 0 : index
    %c0_1 = arith.constant 0 : index
    %3 = vector.load %arg13[%c0, %c0_1] : memref<5x128xf32, #tpu.memory_space<vmem>>, vector<1x128xf32>
    %c1 = arith.constant 1 : index
    %c0_2 = arith.constant 0 : index
    %4 = vector.load %arg13[%c1, %c0_2] : memref<5x128xf32, #tpu.memory_space<vmem>>, vector<1x128xf32>
    %c2 = arith.constant 2 : index
    %c0_3 = arith.constant 0 : index
    %5 = vector.load %arg13[%c2, %c0_3] : memref<5x128xf32, #tpu.memory_space<vmem>>, vector<1x128xf32>
    %c3 = arith.constant 3 : index
    %c0_4 = arith.constant 0 : index
    %6 = vector.load %arg13[%c3, %c0_4] : memref<5x128xf32, #tpu.memory_space<vmem>>, vector<1x128xf32>
    %c4 = arith.constant 4 : index
    %c0_5 = arith.constant 0 : index
    %7 = vector.load %arg13[%c4, %c0_5] : memref<5x128xf32, #tpu.memory_space<vmem>>, vector<1x128xf32>
    %c0_6 = arith.constant 0 : index
    %c0_7 = arith.constant 0 : index
    %8 = vector.load %arg14[%c0_6, %c0_7] : memref<6x128xf32, #tpu.memory_space<vmem>>, vector<1x128xf32>
    %c1_8 = arith.constant 1 : index
    %c0_9 = arith.constant 0 : index
    %9 = vector.load %arg14[%c1_8, %c0_9] : memref<6x128xf32, #tpu.memory_space<vmem>>, vector<1x128xf32>
    %c2_10 = arith.constant 2 : index
    %c0_11 = arith.constant 0 : index
    %10 = vector.load %arg14[%c2_10, %c0_11] : memref<6x128xf32, #tpu.memory_space<vmem>>, vector<1x128xf32>
    %c3_12 = arith.constant 3 : index
    %c0_13 = arith.constant 0 : index
    %11 = vector.load %arg14[%c3_12, %c0_13] : memref<6x128xf32, #tpu.memory_space<vmem>>, vector<1x128xf32>
    %c4_14 = arith.constant 4 : index
    %c0_15 = arith.constant 0 : index
    %12 = vector.load %arg14[%c4_14, %c0_15] : memref<6x128xf32, #tpu.memory_space<vmem>>, vector<1x128xf32>
    %c5 = arith.constant 5 : index
    %c0_16 = arith.constant 0 : index
    %13 = vector.load %arg14[%c5, %c0_16] : memref<6x128xf32, #tpu.memory_space<vmem>>, vector<1x128xf32>
    %c0_17 = arith.constant 0 : index
    %c0_18 = arith.constant 0 : index
    %14 = vector.load %arg2[%c0_17, %c0_18] : memref<512x2xf32, #tpu.memory_space<vmem>>, vector<512x2xf32>
    %c0_19 = arith.constant 0 : index
    %c0_20 = arith.constant 0 : index
    %15 = vector.load %arg6[%c0_19, %c0_20] : memref<2x128xf32, #tpu.memory_space<vmem>>, vector<2x128xf32>
    %16 = vector.extract_strided_slice %14 {offsets = [0, 0], sizes = [512, 1], strides = [1, 1]} : vector<512x2xf32> to vector<512x1xf32>
    %17 = vector.extract_strided_slice %15 {offsets = [0, 0], sizes = [1, 128], strides = [1, 1]} : vector<2x128xf32> to vector<1x128xf32>
    %18 = vector.broadcast %16 : vector<512x1xf32> to vector<512x128xf32>
    %19 = vector.broadcast %17 : vector<1x128xf32> to vector<512x128xf32>
    %20 = arith.mulf %18, %19 : vector<512x128xf32>
    %21 = vector.extract_strided_slice %14 {offsets = [0, 1], sizes = [512, 1], strides = [1, 1]} : vector<512x2xf32> to vector<512x1xf32>
    %22 = vector.extract_strided_slice %15 {offsets = [1, 0], sizes = [1, 128], strides = [1, 1]} : vector<2x128xf32> to vector<1x128xf32>
    %23 = vector.broadcast %21 : vector<512x1xf32> to vector<512x128xf32>
    %24 = vector.broadcast %22 : vector<1x128xf32> to vector<512x128xf32>
    %25 = arith.mulf %23, %24 : vector<512x128xf32>
    %26 = arith.addf %20, %25 : vector<512x128xf32>
    %27 = vector.broadcast %3 : vector<1x128xf32> to vector<512x128xf32>
    %28 = arith.addf %26, %27 : vector<512x128xf32>
    %cst = arith.constant 0.000000e+00 : f32
    %29 = vector.broadcast %cst : f32 to vector<512x128xf32>
    %30 = arith.maximumf %28, %29 : vector<512x128xf32>
    %31 = arith.truncf %30 : vector<512x128xf32> to vector<512x128xbf16>
    %c0_21 = arith.constant 0 : index
    %c0_22 = arith.constant 0 : index
    %32 = vector.load %arg7[%c0_21, %c0_22] : memref<128x128xbf16, #tpu.memory_space<vmem>>, vector<128x128xbf16>
    %cst_23 = arith.constant dense<0.000000e+00> : vector<512x128xf32>
    %33 = tpu.matmul %31, %32, %cst_23 {dimension_numbers = #tpu.dot_dimension_numbers<[1], [0], [0], [1], [0, 0, 1, 1], [], []>} : vector<512x128xbf16>, vector<128x128xbf16>, vector<512x128xf32> -> vector<512x128xf32>
    %cst_24 = arith.constant dense<0.000000e+00> : vector<512xf32>
    %34 = vector.multi_reduction <add>, %33, %cst_24 [1] : vector<512x128xf32> to vector<512xf32>
    %35 = vector.shape_cast %34 : vector<512xf32> to vector<512x1xf32>
    %cst_25 = arith.constant 3.125000e-02 : f32
    %36 = vector.broadcast %cst_25 : f32 to vector<512x1xf32>
    %37 = arith.mulf %35, %36 : vector<512x1xf32>
    %38 = vector.broadcast %37 : vector<512x1xf32> to vector<512x128xf32>
    %39 = arith.subf %33, %38 : vector<512x128xf32>
    %40 = arith.mulf %39, %39 : vector<512x128xf32>
    %cst_26 = arith.constant dense<0.000000e+00> : vector<512xf32>
    %41 = vector.multi_reduction <add>, %40, %cst_26 [1] : vector<512x128xf32> to vector<512xf32>
    %42 = vector.shape_cast %41 : vector<512xf32> to vector<512x1xf32>
    %cst_27 = arith.constant 9.600000e+01 : f32
    %43 = vector.broadcast %cst_27 : f32 to vector<512x1xf32>
    %44 = arith.mulf %43, %37 : vector<512x1xf32>
    %45 = arith.mulf %44, %37 : vector<512x1xf32>
    %46 = arith.subf %42, %45 : vector<512x1xf32>
    %cst_28 = arith.constant 3.125000e-02 : f32
    %47 = vector.broadcast %cst_28 : f32 to vector<512x1xf32>
    %48 = arith.mulf %46, %47 : vector<512x1xf32>
    %cst_29 = arith.constant 0.000000e+00 : f32
    %49 = vector.broadcast %cst_29 : f32 to vector<512x1xf32>
    %50 = arith.maximumf %48, %49 : vector<512x1xf32>
    %cst_30 = arith.constant 9.99999974E-6 : f32
    %51 = vector.broadcast %cst_30 : f32 to vector<512x1xf32>
    %52 = arith.addf %50, %51 : vector<512x1xf32>
    %53 = math.rsqrt %52 : vector<512x1xf32>
    %54 = vector.broadcast %53 : vector<512x1xf32> to vector<512x128xf32>
    %55 = arith.mulf %39, %54 : vector<512x128xf32>
    %56 = vector.broadcast %4 : vector<1x128xf32> to vector<512x128xf32>
    %57 = arith.mulf %55, %56 : vector<512x128xf32>
    %58 = vector.broadcast %5 : vector<1x128xf32> to vector<512x128xf32>
    %59 = arith.addf %57, %58 : vector<512x128xf32>
    %cst_31 = arith.constant 0.000000e+00 : f32
    %60 = vector.broadcast %cst_31 : f32 to vector<512x128xf32>
    %61 = arith.maximumf %59, %60 : vector<512x128xf32>
    %c0_32 = arith.constant 0 : index
    %c0_33 = arith.constant 0 : index
    %62 = vector.load %arg3[%c0_32, %c0_33] : memref<512x128xbf16, #tpu.memory_space<vmem>>, vector<512x128xbf16>
    %c0_34 = arith.constant 0 : index
    %c0_35 = arith.constant 0 : index
    %63 = vector.load %arg8[%c0_34, %c0_35] : memref<128x128xbf16, #tpu.memory_space<vmem>>, vector<128x128xbf16>
    %cst_36 = arith.constant dense<0.000000e+00> : vector<512x128xf32>
    %64 = tpu.matmul %62, %63, %cst_36 {dimension_numbers = #tpu.dot_dimension_numbers<[1], [0], [0], [1], [0, 0, 1, 1], [], []>} : vector<512x128xbf16>, vector<128x128xbf16>, vector<512x128xf32> -> vector<512x128xf32>
    %cst_37 = arith.constant dense<0.000000e+00> : vector<512xf32>
    %65 = vector.multi_reduction <add>, %64, %cst_37 [1] : vector<512x128xf32> to vector<512xf32>
    %66 = vector.shape_cast %65 : vector<512xf32> to vector<512x1xf32>
    %cst_38 = arith.constant 3.125000e-02 : f32
    %67 = vector.broadcast %cst_38 : f32 to vector<512x1xf32>
    %68 = arith.mulf %66, %67 : vector<512x1xf32>
    %69 = vector.broadcast %68 : vector<512x1xf32> to vector<512x128xf32>
    %70 = arith.subf %64, %69 : vector<512x128xf32>
    %71 = arith.mulf %70, %70 : vector<512x128xf32>
    %cst_39 = arith.constant dense<0.000000e+00> : vector<512xf32>
    %72 = vector.multi_reduction <add>, %71, %cst_39 [1] : vector<512x128xf32> to vector<512xf32>
    %73 = vector.shape_cast %72 : vector<512xf32> to vector<512x1xf32>
    %cst_40 = arith.constant 9.600000e+01 : f32
    %74 = vector.broadcast %cst_40 : f32 to vector<512x1xf32>
    %75 = arith.mulf %74, %68 : vector<512x1xf32>
    %76 = arith.mulf %75, %68 : vector<512x1xf32>
    %77 = arith.subf %73, %76 : vector<512x1xf32>
    %cst_41 = arith.constant 3.125000e-02 : f32
    %78 = vector.broadcast %cst_41 : f32 to vector<512x1xf32>
    %79 = arith.mulf %77, %78 : vector<512x1xf32>
    %cst_42 = arith.constant 0.000000e+00 : f32
    %80 = vector.broadcast %cst_42 : f32 to vector<512x1xf32>
    %81 = arith.maximumf %79, %80 : vector<512x1xf32>
    %cst_43 = arith.constant 9.99999974E-6 : f32
    %82 = vector.broadcast %cst_43 : f32 to vector<512x1xf32>
    %83 = arith.addf %81, %82 : vector<512x1xf32>
    %84 = math.rsqrt %83 : vector<512x1xf32>
    %85 = vector.broadcast %84 : vector<512x1xf32> to vector<512x128xf32>
    %86 = arith.mulf %70, %85 : vector<512x128xf32>
    %87 = vector.broadcast %6 : vector<1x128xf32> to vector<512x128xf32>
    %88 = arith.mulf %86, %87 : vector<512x128xf32>
    %89 = vector.broadcast %7 : vector<1x128xf32> to vector<512x128xf32>
    %90 = arith.addf %88, %89 : vector<512x128xf32>
    %cst_44 = arith.constant 0.000000e+00 : f32
    %91 = vector.broadcast %cst_44 : f32 to vector<512x128xf32>
    %92 = arith.maximumf %90, %91 : vector<512x128xf32>
    %93 = arith.truncf %61 : vector<512x128xf32> to vector<512x128xbf16>
    %c0_45 = arith.constant 0 : index
    %c0_46 = arith.constant 0 : index
    %94 = vector.load %arg9[%c0_45, %c0_46] : memref<384x128xbf16, #tpu.memory_space<vmem>>, vector<128x128xbf16>
    %cst_47 = arith.constant dense<0.000000e+00> : vector<512x128xf32>
    %95 = tpu.matmul %93, %94, %cst_47 {dimension_numbers = #tpu.dot_dimension_numbers<[1], [0], [0], [1], [0, 0, 1, 1], [], []>} : vector<512x128xbf16>, vector<128x128xbf16>, vector<512x128xf32> -> vector<512x128xf32>
    %96 = arith.truncf %92 : vector<512x128xf32> to vector<512x128xbf16>
    %c128 = arith.constant 128 : index
    %c0_48 = arith.constant 0 : index
    %97 = vector.load %arg9[%c128, %c0_48] : memref<384x128xbf16, #tpu.memory_space<vmem>>, vector<128x128xbf16>
    %cst_49 = arith.constant dense<0.000000e+00> : vector<512x128xf32>
    %98 = tpu.matmul %96, %97, %cst_49 {dimension_numbers = #tpu.dot_dimension_numbers<[1], [0], [0], [1], [0, 0, 1, 1], [], []>} : vector<512x128xbf16>, vector<128x128xbf16>, vector<512x128xf32> -> vector<512x128xf32>
    %99 = arith.addf %95, %98 : vector<512x128xf32>
    %c0_50 = arith.constant 0 : index
    %c0_51 = arith.constant 0 : index
    %100 = vector.load %arg4[%c0_50, %c0_51] : memref<512x128xbf16, #tpu.memory_space<vmem>>, vector<512x128xbf16>
    %c256 = arith.constant 256 : index
    %c0_52 = arith.constant 0 : index
    %101 = vector.load %arg9[%c256, %c0_52] : memref<384x128xbf16, #tpu.memory_space<vmem>>, vector<128x128xbf16>
    %cst_53 = arith.constant dense<0.000000e+00> : vector<512x128xf32>
    %102 = tpu.matmul %100, %101, %cst_53 {dimension_numbers = #tpu.dot_dimension_numbers<[1], [0], [0], [1], [0, 0, 1, 1], [], []>} : vector<512x128xbf16>, vector<128x128xbf16>, vector<512x128xf32> -> vector<512x128xf32>
    %103 = arith.addf %99, %102 : vector<512x128xf32>
    %cst_54 = arith.constant dense<0.000000e+00> : vector<512xf32>
    %104 = vector.multi_reduction <add>, %103, %cst_54 [1] : vector<512x128xf32> to vector<512xf32>
    %105 = vector.shape_cast %104 : vector<512xf32> to vector<512x1xf32>
    %cst_55 = arith.constant 3.125000e-02 : f32
    %106 = vector.broadcast %cst_55 : f32 to vector<512x1xf32>
    %107 = arith.mulf %105, %106 : vector<512x1xf32>
    %108 = vector.broadcast %107 : vector<512x1xf32> to vector<512x128xf32>
    %109 = arith.subf %103, %108 : vector<512x128xf32>
    %110 = arith.mulf %109, %109 : vector<512x128xf32>
    %cst_56 = arith.constant dense<0.000000e+00> : vector<512xf32>
    %111 = vector.multi_reduction <add>, %110, %cst_56 [1] : vector<512x128xf32> to vector<512xf32>
    %112 = vector.shape_cast %111 : vector<512xf32> to vector<512x1xf32>
    %cst_57 = arith.constant 9.600000e+01 : f32
    %113 = vector.broadcast %cst_57 : f32 to vector<512x1xf32>
    %114 = arith.mulf %113, %107 : vector<512x1xf32>
    %115 = arith.mulf %114, %107 : vector<512x1xf32>
    %116 = arith.subf %112, %115 : vector<512x1xf32>
    %cst_58 = arith.constant 3.125000e-02 : f32
    %117 = vector.broadcast %cst_58 : f32 to vector<512x1xf32>
    %118 = arith.mulf %116, %117 : vector<512x1xf32>
    %cst_59 = arith.constant 0.000000e+00 : f32
    %119 = vector.broadcast %cst_59 : f32 to vector<512x1xf32>
    %120 = arith.maximumf %118, %119 : vector<512x1xf32>
    %cst_60 = arith.constant 9.99999974E-6 : f32
    %121 = vector.broadcast %cst_60 : f32 to vector<512x1xf32>
    %122 = arith.addf %120, %121 : vector<512x1xf32>
    %123 = math.rsqrt %122 : vector<512x1xf32>
    %124 = vector.broadcast %123 : vector<512x1xf32> to vector<512x128xf32>
    %125 = arith.mulf %109, %124 : vector<512x128xf32>
    %126 = vector.broadcast %8 : vector<1x128xf32> to vector<512x128xf32>
    %127 = arith.mulf %125, %126 : vector<512x128xf32>
    %128 = vector.broadcast %9 : vector<1x128xf32> to vector<512x128xf32>
    %129 = arith.addf %127, %128 : vector<512x128xf32>
    %cst_61 = arith.constant 0.000000e+00 : f32
    %130 = vector.broadcast %cst_61 : f32 to vector<512x128xf32>
    %131 = arith.maximumf %129, %130 : vector<512x128xf32>
    %132 = arith.truncf %131 : vector<512x128xf32> to vector<512x128xbf16>
    %c0_62 = arith.constant 0 : index
    %c0_63 = arith.constant 0 : index
    %133 = vector.load %arg10[%c0_62, %c0_63] : memref<128x128xbf16, #tpu.memory_space<vmem>>, vector<128x128xbf16>
    %cst_64 = arith.constant dense<0.000000e+00> : vector<512x128xf32>
    %134 = tpu.matmul %132, %133, %cst_64 {dimension_numbers = #tpu.dot_dimension_numbers<[1], [0], [0], [1], [0, 0, 1, 1], [], []>} : vector<512x128xbf16>, vector<128x128xbf16>, vector<512x128xf32> -> vector<512x128xf32>
    %135 = tpu.iota {dimensions = array<i32: 0>} : vector<16x512xi32>
    %c0_65 = arith.constant 0 : index
    %c0_66 = arith.constant 0 : index
    %136 = vector.load %arg1[%c0_65, %c0_66] : memref<1x512xi32, #tpu.memory_space<vmem>>, vector<1x512xi32>
    %137 = vector.broadcast %136 : vector<1x512xi32> to vector<16x512xi32>
    %138 = arith.cmpi eq, %135, %137 : vector<16x512xi32>
    %139 = arith.extui %138 : vector<16x512xi1> to vector<16x512xi32>
    %140 = arith.sitofp %139 : vector<16x512xi32> to vector<16x512xf32>
    %141 = arith.truncf %140 : vector<16x512xf32> to vector<16x512xbf16>
    %c0_67 = arith.constant 0 : index
    %c0_68 = arith.constant 0 : index
    %142 = vector.load %arg16[%c0_67, %c0_68] : memref<16x128xf32, #tpu.memory_space<vmem>>, vector<16x128xf32>
    %143 = arith.truncf %134 : vector<512x128xf32> to vector<512x128xbf16>
    %cst_69 = arith.constant dense<0.000000e+00> : vector<16x128xf32>
    %144 = tpu.matmul %141, %143, %cst_69 {dimension_numbers = #tpu.dot_dimension_numbers<[1], [0], [0], [1], [0, 0, 1, 1], [], []>} : vector<16x512xbf16>, vector<512x128xbf16>, vector<16x128xf32> -> vector<16x128xf32>
    %145 = arith.addf %142, %144 : vector<16x128xf32>
    %c0_70 = arith.constant 0 : index
    %c0_71 = arith.constant 0 : index
    %146 = vector.load %arg16[%c0_70, %c0_71] : memref<16x128xf32, #tpu.memory_space<vmem>>, vector<16x128xf32>
    tpu.vector_store %arg16[%c0_70, %c0_71], %145 {strides = array<i32>} : memref<16x128xf32, #tpu.memory_space<vmem>>, vector<16x128xf32>,
    %c0_i32_72 = arith.constant 0 : i32
    %147 = arith.cmpi eq, %arg0, %c0_i32_72 : i32
    %148 = arith.extui %147 : i1 to i32
    %c0_i32_73 = arith.constant 0 : i32
    %149 = arith.cmpi ne, %148, %c0_i32_73 : i32
    scf.if %149 {
      %c0_74 = arith.constant 0 : index
      %c0_75 = arith.constant 0 : index
      %150 = vector.load %arg5[%c0_74, %c0_75] : memref<16x128xf32, #tpu.memory_space<vmem>>, vector<16x128xf32>
      %c0_76 = arith.constant 0 : index
      %c0_77 = arith.constant 0 : index
      %151 = vector.load %arg16[%c0_76, %c0_77] : memref<16x128xf32, #tpu.memory_space<vmem>>, vector<16x128xf32>
      %cst_78 = arith.constant dense<0.000000e+00> : vector<16xf32>
      %152 = vector.multi_reduction <add>, %151, %cst_78 [1] : vector<16x128xf32> to vector<16xf32>
      %153 = vector.shape_cast %152 : vector<16xf32> to vector<16x1xf32>
      %cst_79 = arith.constant 3.125000e-02 : f32
      %154 = vector.broadcast %cst_79 : f32 to vector<16x1xf32>
      %155 = arith.mulf %153, %154 : vector<16x1xf32>
      %156 = vector.broadcast %155 : vector<16x1xf32> to vector<16x128xf32>
      %157 = arith.subf %151, %156 : vector<16x128xf32>
      %158 = arith.mulf %157, %157 : vector<16x128xf32>
      %cst_80 = arith.constant dense<0.000000e+00> : vector<16xf32>
      %159 = vector.multi_reduction <add>, %158, %cst_80 [1] : vector<16x128xf32> to vector<16xf32>
      %160 = vector.shape_cast %159 : vector<16xf32> to vector<16x1xf32>
      %cst_81 = arith.constant 9.600000e+01 : f32
      %161 = vector.broadcast %cst_81 : f32 to vector<16x1xf32>
      %162 = arith.mulf %161, %155 : vector<16x1xf32>
      %163 = arith.mulf %162, %155 : vector<16x1xf32>
      %164 = arith.subf %160, %163 : vector<16x1xf32>
      %cst_82 = arith.constant 3.125000e-02 : f32
      %165 = vector.broadcast %cst_82 : f32 to vector<16x1xf32>
      %166 = arith.mulf %164, %165 : vector<16x1xf32>
      %cst_83 = arith.constant 0.000000e+00 : f32
      %167 = vector.broadcast %cst_83 : f32 to vector<16x1xf32>
      %168 = arith.maximumf %166, %167 : vector<16x1xf32>
      %cst_84 = arith.constant 9.99999974E-6 : f32
      %169 = vector.broadcast %cst_84 : f32 to vector<16x1xf32>
      %170 = arith.addf %168, %169 : vector<16x1xf32>
      %171 = math.rsqrt %170 : vector<16x1xf32>
      %172 = vector.broadcast %171 : vector<16x1xf32> to vector<16x128xf32>
      %173 = arith.mulf %157, %172 : vector<16x128xf32>
      %174 = vector.broadcast %10 : vector<1x128xf32> to vector<16x128xf32>
      %175 = arith.mulf %173, %174 : vector<16x128xf32>
      %176 = vector.broadcast %11 : vector<1x128xf32> to vector<16x128xf32>
      %177 = arith.addf %175, %176 : vector<16x128xf32>
      %cst_85 = arith.constant 0.000000e+00 : f32
      %178 = vector.broadcast %cst_85 : f32 to vector<16x128xf32>
      %179 = arith.maximumf %177, %178 : vector<16x128xf32>
      %180 = arith.truncf %179 : vector<16x128xf32> to vector<16x128xbf16>
      %c0_86 = arith.constant 0 : index
      %c0_87 = arith.constant 0 : index
      %181 = vector.load %arg12[%c0_86, %c0_87] : memref<128x128xbf16, #tpu.memory_space<vmem>>, vector<128x128xbf16>
      %cst_88 = arith.constant dense<0.000000e+00> : vector<16x128xf32>
      %182 = tpu.matmul %180, %181, %cst_88 {dimension_numbers = #tpu.dot_dimension_numbers<[1], [0], [0], [1], [0, 0, 1, 1], [], []>} : vector<16x128xbf16>, vector<128x128xbf16>, vector<16x128xf32> -> vector<16x128xf32>
      %cst_89 = arith.constant dense<0.000000e+00> : vector<16xf32>
      %183 = vector.multi_reduction <add>, %182, %cst_89 [1] : vector<16x128xf32> to vector<16xf32>
      %184 = vector.shape_cast %183 : vector<16xf32> to vector<16x1xf32>
      %cst_90 = arith.constant 3.125000e-02 : f32
      %185 = vector.broadcast %cst_90 : f32 to vector<16x1xf32>
      %186 = arith.mulf %184, %185 : vector<16x1xf32>
      %187 = vector.broadcast %186 : vector<16x1xf32> to vector<16x128xf32>
      %188 = arith.subf %182, %187 : vector<16x128xf32>
      %189 = arith.mulf %188, %188 : vector<16x128xf32>
      %cst_91 = arith.constant dense<0.000000e+00> : vector<16xf32>
      %190 = vector.multi_reduction <add>, %189, %cst_91 [1] : vector<16x128xf32> to vector<16xf32>
      %191 = vector.shape_cast %190 : vector<16xf32> to vector<16x1xf32>
      %cst_92 = arith.constant 9.600000e+01 : f32
      %192 = vector.broadcast %cst_92 : f32 to vector<16x1xf32>
      %193 = arith.mulf %192, %186 : vector<16x1xf32>
      %194 = arith.mulf %193, %186 : vector<16x1xf32>
      %195 = arith.subf %191, %194 : vector<16x1xf32>
      %cst_93 = arith.constant 3.125000e-02 : f32
      %196 = vector.broadcast %cst_93 : f32 to vector<16x1xf32>
      %197 = arith.mulf %195, %196 : vector<16x1xf32>
      %cst_94 = arith.constant 0.000000e+00 : f32
      %198 = vector.broadcast %cst_94 : f32 to vector<16x1xf32>
      %199 = arith.maximumf %197, %198 : vector<16x1xf32>
      %cst_95 = arith.constant 9.99999974E-6 : f32
      %200 = vector.broadcast %cst_95 : f32 to vector<16x1xf32>
      %201 = arith.addf %199, %200 : vector<16x1xf32>
      %202 = math.rsqrt %201 : vector<16x1xf32>
      %203 = vector.broadcast %202 : vector<16x1xf32> to vector<16x128xf32>
      %204 = arith.mulf %188, %203 : vector<16x128xf32>
      %205 = vector.broadcast %12 : vector<1x128xf32> to vector<16x128xf32>
      %206 = arith.mulf %204, %205 : vector<16x128xf32>
      %207 = vector.broadcast %13 : vector<1x128xf32> to vector<16x128xf32>
      %208 = arith.addf %206, %207 : vector<16x128xf32>
      %209 = arith.addf %208, %150 : vector<16x128xf32>
      %cst_96 = arith.constant 0.000000e+00 : f32
      %210 = vector.broadcast %cst_96 : f32 to vector<16x128xf32>
      %211 = arith.maximumf %209, %210 : vector<16x128xf32>
      %c0_97 = arith.constant 0 : index
      %c0_98 = arith.constant 0 : index
      %212 = vector.load %arg15[%c0_97, %c0_98] : memref<16x128xf32, #tpu.memory_space<vmem>>, vector<16x128xf32>
      tpu.vector_store %arg15[%c0_97, %c0_98], %211 {strides = array<i32>} : memref<16x128xf32, #tpu.memory_space<vmem>>, vector<16x128xf32>,
    } else {
    }
    return
  }
  func.func @transform_0(%arg0: i32) -> (i32, i32) {
    %c0_i32 = arith.constant 0 : i32
    %c0_i32_0 = arith.constant 0 : i32
    return %c0_i32, %arg0 : i32, i32
  }
  func.func @transform_1(%arg0: i32) -> (i32, i32) {
    %c0_i32 = arith.constant 0 : i32
    %c0_i32_0 = arith.constant 0 : i32
    return %arg0, %c0_i32 : i32, i32
  }
  func.func @transform_2(%arg0: i32) -> (i32, i32) {
    %c0_i32 = arith.constant 0 : i32
    %c0_i32_0 = arith.constant 0 : i32
    return %arg0, %c0_i32 : i32, i32
  }
  func.func @transform_3(%arg0: i32) -> (i32, i32) {
    %c0_i32 = arith.constant 0 : i32
    %c0_i32_0 = arith.constant 0 : i32
    return %arg0, %c0_i32 : i32, i32
  }
  func.func @transform_4(%arg0: i32) -> (i32, i32) {
    %c0_i32 = arith.constant 0 : i32
    %c0_i32_0 = arith.constant 0 : i32
    %c0_i32_1 = arith.constant 0 : i32
    return %c0_i32, %c0_i32_0 : i32, i32
  }
  func.func @transform_5(%arg0: i32) -> (i32, i32) {
    %c0_i32 = arith.constant 0 : i32
    %c0_i32_0 = arith.constant 0 : i32
    %c0_i32_1 = arith.constant 0 : i32
    return %c0_i32, %c0_i32_0 : i32, i32
  }
  func.func @transform_6(%arg0: i32) -> (i32, i32) {
    %c0_i32 = arith.constant 0 : i32
    %c0_i32_0 = arith.constant 0 : i32
    %c0_i32_1 = arith.constant 0 : i32
    return %c0_i32, %c0_i32_0 : i32, i32
  }
  func.func @transform_7(%arg0: i32) -> (i32, i32) {
    %c0_i32 = arith.constant 0 : i32
    %c0_i32_0 = arith.constant 0 : i32
    %c0_i32_1 = arith.constant 0 : i32
    return %c0_i32, %c0_i32_0 : i32, i32
  }
  func.func @transform_8(%arg0: i32) -> (i32, i32) {
    %c0_i32 = arith.constant 0 : i32
    %c0_i32_0 = arith.constant 0 : i32
    %c0_i32_1 = arith.constant 0 : i32
    return %c0_i32, %c0_i32_0 : i32, i32
  }
  func.func @transform_9(%arg0: i32) -> (i32, i32) {
    %c0_i32 = arith.constant 0 : i32
    %c0_i32_0 = arith.constant 0 : i32
    %c0_i32_1 = arith.constant 0 : i32
    return %c0_i32, %c0_i32_0 : i32, i32
  }
  func.func @transform_10(%arg0: i32) -> (i32, i32) {
    %c0_i32 = arith.constant 0 : i32
    %c0_i32_0 = arith.constant 0 : i32
    %c0_i32_1 = arith.constant 0 : i32
    return %c0_i32, %c0_i32_0 : i32, i32
  }
  func.func @transform_11(%arg0: i32) -> (i32, i32) {
    %c0_i32 = arith.constant 0 : i32
    %c0_i32_0 = arith.constant 0 : i32
    %c0_i32_1 = arith.constant 0 : i32
    return %c0_i32, %c0_i32_0 : i32, i32
  }
  func.func @transform_12(%arg0: i32) -> (i32, i32) {
    %c0_i32 = arith.constant 0 : i32
    %c0_i32_0 = arith.constant 0 : i32
    %c0_i32_1 = arith.constant 0 : i32
    return %c0_i32, %c0_i32_0 : i32, i32
  }
  func.func @transform_13(%arg0: i32) -> (i32, i32) {
    %c0_i32 = arith.constant 0 : i32
    %c0_i32_0 = arith.constant 0 : i32
    %c0_i32_1 = arith.constant 0 : i32
    return %c0_i32, %c0_i32_0 : i32, i32
  }
  func.func @transform_14(%arg0: i32) -> (i32, i32) {
    %c0_i32 = arith.constant 0 : i32
    %c0_i32_0 = arith.constant 0 : i32
    %c0_i32_1 = arith.constant 0 : i32
    return %c0_i32, %c0_i32_0 : i32, i32
  }
}

</mosaic_0001>

<bundles_post_ra>
// kernel: tpu_custom_call.1
= control target key start
LH: loop header
LB: loop body
LE: loop exit
PB: predicated region body
PF: predicated region fallthrough
CT: control target
= control target key end

     0   :  { %19 = vsyncpa [#allocation4], 0  ;;  %s15190_s0 = inlined_call_operand.vmem [shape: s32[1,512], index: 0, kind: input, shape index: {}]   ;;  %s15191_s1 = inlined_call_operand.vmem [shape: f32[512,2], index: 1, kind: input, shape index: {}]   ;;  %s15192_s2 = inlined_call_operand.vmem [shape: bf16[512,128], index: 2, kind: input, shape index: {}]   ;;  %s15193_s3 = inlined_call_operand.vmem [shape: bf16[512,128], index: 3, kind: input, shape index: {}]   ;;  %s15194_s4 = inlined_call_operand.vmem [shape: f32[16,128], index: 4, kind: input, shape index: {}]   ;;  %s15195_s5 = inlined_call_operand.vmem [shape: f32[2,128], index: 5, kind: input, shape index: {}]   ;;  %s15196_s6 = inlined_call_operand.hbm [shape: bf16[128,128], index: 6, kind: input, shape index: {}]   ;;  %s15197_s7 = inlined_call_operand.hbm [shape: bf16[128,128], index: 7, kind: input, shape index: {}]   ;;  %s15198_s8 = inlined_call_operand.hbm [shape: bf16[384,128], index: 8, kind: input, shape index: {}]   ;;  %s15199_s9 = inlined_call_operand.hbm [shape: bf16[128,128], index: 9, kind: input, shape index: {}]   ;;  %s15200_s10 = inlined_call_operand.hbm [shape: bf16[128,128], index: 10, kind: input, shape index: {}]   ;;  %s15201_s11 = inlined_call_operand.hbm [shape: bf16[128,128], index: 11, kind: input, shape index: {}]   ;;  %s15202_s12 = inlined_call_operand.vmem [shape: f32[5,128], index: 12, kind: input, shape index: {}]   ;;  %s15203_s13 = inlined_call_operand.vmem [shape: f32[6,128], index: 13, kind: input, shape index: {}]   ;;  %s15204_s14 = inlined_call_operand.hbm [shape: f32[16,128], index: 14, kind: output, shape index: {}]  }
   0x1   :  { %20 = vsyncpa [#allocation7], 0 }
   0x2   :  { %21 = vsyncpa [#allocation10], 0 }
   0x3   :  { %22 = vsyncpa [#allocation13], 0 }
   0x4   :  { %23 = vsyncpa [#allocation5], 0  ;;  %s9820_s29 = smov [#allocation6]   ;;  %s9821_s15 = smov [#allocation9]  }
   0x5   :  { %s53_s30 = sshll.u32 %s9820_s29, 4  ;;  %s77_s16 = sshll.u32 %s9821_s15, 4  ;;  %s54_s30 = int_to_ptr.vmem [resolvable:$true] %s53_s30  ;;  %s9911_s16 = int_to_ptr.vmem [resolvable:$true] %s77_s16 }
   0x6   :  { %s9656_s19 = scalar_lea.hbm %s15197_s7, 1024 }
   0x7   :  { %p9657_p0 = scmp.ne.s32.totalorder %s15197_s7, %s9656_s19  ;;  %p9660_p1 = scmp.lt.u32.totalorder %s9656_s19, %s15197_s7 }
   0x9   :  { %p9662_p2 = pnand %p9660_p1, %p9657_p0 }
   0xb   :  { %9665 = shalt.err (!%p9662_p2)
}
   0xc   :  { %s9666_s24 = scalar_lea.vmem %s54_s30, 1024  ;;  %p9671_p4 = scmp.lt.s32.totalorder %s54_s30, %s54_s30 }
   0xd   :  { %p9667_p3 = scmp.ne.s32.totalorder %s54_s30, %s9666_s24  ;;  %p9672_p5 = scmp.lt.s32.totalorder %s9666_s24, %s9666_s24 }
   0xf   :  { %p9673_p6 = por %p9672_p5, %p9671_p4 }
  0x11   :  { %p9674_p7 = pnand %p9673_p6, %p9667_p3 }
  0x13   :  { %9677 = shalt.err (!%p9674_p7)
}
  0x14   :  { %s9822_s25 = smov 64   ;;  %s9823_s26 = smov 4  }
  0x15   :  { %59 = dma.hbm_to_vmem [thread:$0]  %s15197_s7, 1024, %s54_s30, [#allocation7], %s9822_s25, %s9822_s25, %s9823_s26  }
  0x16   :  { %s9678_s17 = scalar_lea.hbm %s15199_s9, 1024 }
  0x17   :  { %p9679_p8 = scmp.ne.s32.totalorder %s15199_s9, %s9678_s17  ;;  %p9682_p9 = scmp.lt.u32.totalorder %s9678_s17, %s15199_s9 }
  0x19   :  { %p9684_p10 = pnand %p9682_p9, %p9679_p8 }
  0x1b   :  { %9687 = shalt.err (!%p9684_p10)
}
  0x1c   :  { %s9688_s22 = scalar_lea.vmem %s9911_s16, 1024  ;;  %p9693_p12 = scmp.lt.s32.totalorder %s9911_s16, %s9911_s16 }
  0x1d   :  { %p9689_p11 = scmp.ne.s32.totalorder %s9911_s16, %s9688_s22  ;;  %p9694_p13 = scmp.lt.s32.totalorder %s9688_s22, %s9688_s22 }
  0x1f   :  { %p9695_p0 = por %p9694_p13, %p9693_p12 }
  0x21   :  { %p9696_p1 = pnand %p9695_p0, %p9689_p11 }
  0x23   :  { %9699 = shalt.err (!%p9696_p1)
}
  0x24   :  { %83 = dma.hbm_to_vmem [thread:$0]  %s15199_s9, 1024, %s9911_s16, [#allocation10], %s9822_s25, %s9822_s25, %s9823_s26  }
  0x25   :  { %s9824_s23 = smov [#allocation3]   ;;  %s9825_s27 = smov [#allocation8]  }
  0x26   :  { %s41_s24 = sshll.u32 %s9824_s23, 4  ;;  %s65_s28 = sshll.u32 %s9825_s27, 4  ;;  %s42_s24 = int_to_ptr.vmem [resolvable:$true] %s41_s24  ;;  %s9948_s28 = int_to_ptr.vmem [resolvable:$true] %s65_s28 }
  0x27   :  { %s9700_s17 = scalar_lea.hbm %s15196_s6, 1024 }
  0x28   :  { %p9701_p2 = scmp.ne.s32.totalorder %s15196_s6, %s9700_s17  ;;  %p9704_p3 = scmp.lt.u32.totalorder %s9700_s17, %s15196_s6 }
  0x2a   :  { %p9706_p4 = pnand %p9704_p3, %p9701_p2 }
  0x2c   :  { %9709 = shalt.err (!%p9706_p4)
}
  0x2d   :  { %s9710_s9 = scalar_lea.vmem %s42_s24, 1024  ;;  %p9715_p6 = scmp.lt.s32.totalorder %s42_s24, %s42_s24 }
  0x2e   :  { %p9711_p5 = scmp.ne.s32.totalorder %s42_s24, %s9710_s9  ;;  %p9716_p7 = scmp.lt.s32.totalorder %s9710_s9, %s9710_s9 }
  0x30   :  { %p9717_p8 = por %p9716_p7, %p9715_p6 }
  0x32   :  { %p9718_p9 = pnand %p9717_p8, %p9711_p5 }
  0x34   :  { %9721 = shalt.err (!%p9718_p9)
}
  0x35   :  { %47 = dma.hbm_to_vmem [thread:$0]  %s15196_s6, 1024, %s42_s24, [#allocation4], %s9822_s25, %s9822_s25, %s9823_s26  }
  0x36   :  { %s9722_s23 = scalar_lea.hbm %s15198_s8, 3072 }
  0x37   :  { %p9723_p10 = scmp.ne.s32.totalorder %s15198_s8, %s9722_s23  ;;  %p9726_p11 = scmp.lt.u32.totalorder %s9722_s23, %s15198_s8 }
  0x39   :  { %p9728_p12 = pnand %p9726_p11, %p9723_p10 }
  0x3b   :  { %9731 = shalt.err (!%p9728_p12)
}
  0x3c   :  { %s9732_s18 = scalar_lea.vmem %s9948_s28, 3072  ;;  %p9737_p0 = scmp.lt.s32.totalorder %s9948_s28, %s9948_s28 }
  0x3d   :  { %p9733_p13 = scmp.ne.s32.totalorder %s9948_s28, %s9732_s18  ;;  %p9738_p1 = scmp.lt.s32.totalorder %s9732_s18, %s9732_s18 }
  0x3f   :  { %p9739_p2 = por %p9738_p1, %p9737_p0 }
  0x41   :  { %p9740_p3 = pnand %p9739_p2, %p9733_p13 }
  0x43   :  { %9743 = shalt.err (!%p9740_p3)
}
  0x44   :  { %71 = dma.hbm_to_vmem [thread:$0]  %s15198_s8, 3072, %s9948_s28, [#allocation7], %s9822_s25, %s9822_s25, %s9823_s26  }
  0x45   :  { %s9826_s19 = smov [#allocation11]   ;;  %s9827_s21 = smov [#allocation12]  }
  0x46   :  { %s89_s20 = sshll.u32 %s9826_s19, 4  ;;  %s101_s9 = sshll.u32 %s9827_s21, 4  ;;  %s90_s20 = int_to_ptr.vmem [resolvable:$true] %s89_s20  ;;  %s9985_s9 = int_to_ptr.vmem [resolvable:$true] %s101_s9 }
  0x47   :  { %s9744_s7 = scalar_lea.hbm %s15200_s10, 1024 }
  0x48   :  { %p9745_p4 = scmp.ne.s32.totalorder %s15200_s10, %s9744_s7  ;;  %p9748_p5 = scmp.lt.u32.totalorder %s9744_s7, %s15200_s10 }
  0x4a   :  { %p9750_p6 = pnand %p9748_p5, %p9745_p4 }
  0x4c   :  { %9753 = shalt.err (!%p9750_p6)
}
  0x4d   :  { %s9754_s8 = scalar_lea.vmem %s90_s20, 1024  ;;  %p9759_p8 = scmp.lt.s32.totalorder %s90_s20, %s90_s20 }
  0x4e   :  { %p9755_p7 = scmp.ne.s32.totalorder %s90_s20, %s9754_s8  ;;  %p9760_p9 = scmp.lt.s32.totalorder %s9754_s8, %s9754_s8 }
  0x50   :  { %p9761_p10 = por %p9760_p9, %p9759_p8 }
  0x52   :  { %p9762_p11 = pnand %p9761_p10, %p9755_p7 }
  0x54   :  { %9765 = shalt.err (!%p9762_p11)
}
  0x55   :  { %95 = dma.hbm_to_vmem [thread:$0]  %s15200_s10, 1024, %s90_s20, [#allocation10], %s9822_s25, %s9822_s25, %s9823_s26  }
  0x56   :  { %s9766_s6 = scalar_lea.hbm %s15201_s11, 1024 }
  0x57   :  { %p9767_p12 = scmp.ne.s32.totalorder %s15201_s11, %s9766_s6  ;;  %p9770_p13 = scmp.lt.u32.totalorder %s9766_s6, %s15201_s11 }
  0x59   :  { %p9772_p0 = pnand %p9770_p13, %p9767_p12 }
  0x5b   :  { %9775 = shalt.err (!%p9772_p0)
}
  0x5c   :  { %s9776_s22 = scalar_lea.vmem %s9985_s9, 1024  ;;  %p9781_p2 = scmp.lt.s32.totalorder %s9985_s9, %s9985_s9 }
  0x5d   :  { %p9777_p1 = scmp.ne.s32.totalorder %s9985_s9, %s9776_s22  ;;  %p9782_p3 = scmp.lt.s32.totalorder %s9776_s22, %s9776_s22 }
  0x5f   :  { %p9783_p4 = por %p9782_p3, %p9781_p2 }
  0x61   :  { %p9784_p5 = pnand %p9783_p4, %p9777_p1 }
  0x63   :  { %9787 = shalt.err (!%p9784_p5)
}
  0x64   :  { %107 = dma.hbm_to_vmem [thread:$0]  %s15201_s11, 1024, %s9985_s9, [#allocation13], %s9822_s25, %s9822_s25, %s9823_s26  }
  0x65   :  { %9810 = dma.done.wait [#allocation4], 1024  }
  0x66   :  { %9811 = vsyncadd [#allocation4], 4294966272 }
  0x67   :  { %9812 = dma.done.wait [#allocation7], 4096  }
  0x68   :  { %9813 = vsyncadd [#allocation7], 4294963200 }
  0x69   :  { %9814 = dma.done.wait [#allocation10], 2048  }
  0x6a   :  { %9815 = vsyncadd [#allocation10], 4294965248 }
  0x6b   :  { %9816 = dma.done.wait [#allocation13], 1024  }
  0x6c   :  { %9817 = vsyncadd [#allocation13], 4294966272  ;;  %v9828_v0 = vmov 1   ;;  %v15205_v1 = vmov 0.0   ;;  %v10028_v2 = vld [vmem:[%s15191_s1 + $0x10] sm:$0xff]  ;;  %v10033_v3 = vld [vmem:[%s15191_s1] sm:$0xff] }
  0x6d   :  { %9063 = vset.pattern.permute.xlu0 %v9828_v0  ;;  %9061 = vset.pattern.permute.xlu1 %v9828_v0  ;;  %v10040_v4 = vld [vmem:[%s15191_s1 + $0x30] sm:$0xff]  ;;  %v10045_v5 = vld [vmem:[%s15191_s1 + $0x8] sm:$0xff]  ;;  %v259_v7 = vld [vmem:[%s15191_s1 + $0x18] sm:$0xff]  ;;  %v9830_v8 = vmov 0   ;;  %vm9831_vm0 = vmmov 0  }
  0x6e   :  { %8381 = vmatprep.subr.bf16.mxu0 %v15205_v1  ;;  %718 = vperm.xlu0 %9063, %v10028_v2   ;;  %v10052_v6 = vld [vmem:[%s15191_s1 + $0x50] sm:$0xff]  ;;  %v9127_v10 = vld [vmem:[#allocation11] sm:$0xff]   ;;  %v9128_v11 = vld [vmem:[#allocation11 + $0x8] sm:$0xff]  }
  0x6f   :  { %710 = vperm.xlu1 %9061, %v10033_v3   ;;  %v10062_v9 = vld [vmem:[%s15191_s1 + $0x70] sm:$0xff]  ;;  %8382 = vmatpush3.bf16.msra.mxu0 %v9127_v10  ;;  %v260_v13 = vld [vmem:[%s15191_s1 + $0x20] sm:$0xff]  ;;  %v9130_v17 = vld [vmem:[#allocation11 + $0x18] sm:$0xff]  }
  0x70   :  { %v10069_v12 = vld [vmem:[%s15191_s1 + $0x90] sm:$0xff]  ;;  %8383 = vmatprep.subr.bf16.mxu0 %v15205_v1  ;;  %8397 = vmatprep.mubr.msk.bf16.mxu0 %vm9831_vm0, %v15205_v1  ;;  %v9135_v18 = vld [vmem:[#allocation3] sm:$0xff]   ;;  %v261_v20 = vld [vmem:[%s15191_s1 + $0x28] sm:$0xff] }
  0x71   :  { %v9129_v14 = vld [vmem:[#allocation11 + $0x10] sm:$0xff]   ;;  %v9131_v21 = vld [vmem:[#allocation11 + $0x20] sm:$0xff]   ;;  %v9136_v22 = vld [vmem:[#allocation3 + $0x8] sm:$0xff]   ;;  %8901 = vmatprep.subr.bf16.mxu1 %v9135_v18 }
  0x72   :  { %734 = vperm.xlu0 %9063, %v10040_v4   ;;  %v10079_v15 = vld [vmem:[%s15191_s1 + $0xb0] sm:$0xff]  ;;  %8909 = vmatpush3.bf16.msra.mxu1 %v9135_v18  ;;  %v263_v24 = vld [vmem:[%s15191_s1 + $0x38] sm:$0xff]  ;;  %v9132_v25 = vld [vmem:[#allocation11 + $0x28] sm:$0xff]  }
  0x73   :  { %714 = vperm.xlu1 %9061, %v10045_v5   ;;  %8384 = vmatpush3.bf16.msra.mxu0 %v9128_v11  ;;  %v10087_v16 = vld [vmem:[%s15191_s1 + $0xd0] sm:$0xff]  ;;  %v9138_v27 = vld [vmem:[#allocation3 + $0x18] sm:$0xff]   ;;  %v135_v30 = vld [vmem:[%s15194_s4] sm:$0xff] }
  0x74   :  { %8385 = vmatprep.subr.bf16.mxu0 %v15205_v1  ;;  %v10096_v19 = vld [vmem:[%s15191_s1 + $0xf0] sm:$0xff]  ;;  %8902 = vmatprep.subr.bf16.mxu1 %v9136_v22  ;;  %v9134_v29 = vld [vmem:[#allocation11 + $0x38] sm:$0xff]   ;;  %v136_v31 = vld [vmem:[%s15194_s4 + $0x8] sm:$0xff] }
  0x75   :  { %v10106_v23 = vld [vmem:[%s15191_s1 + $0x110] sm:$0xff]  ;;  %v9139_v32 = vld [vmem:[#allocation3 + $0x20] sm:$0xff]   ;;  %v137_v34 = vpack.c.bf16 %v136_v31, %v135_v30  ;;  %v9140_v35 = vld [vmem:[#allocation3 + $0x28] sm:$0xff]  }
  0x76   :  { %750 = vperm.xlu0 %9063, %v10052_v6   ;;  %v9137_v26 = vld [vmem:[#allocation3 + $0x10] sm:$0xff]   ;;  %8910 = vmatpush3.bf16.msra.mxu1 %v9136_v22  ;;  %v264_v33 = vld [vmem:[%s15191_s1 + $0x40] sm:$0xff]  ;;  %v265_v37 = vld [vmem:[%s15191_s1 + $0x48] sm:$0xff] }
  0x77   :  { %9062 = vset.pattern.permute.xlu1 %v9830_v8  ;;  %8386 = vmatpush3.bf16.msra.mxu0 %v9129_v14  ;;  %v9133_v28 = vld [vmem:[#allocation11 + $0x30] sm:$0xff]   ;;  %v9142_v38 = vld [vmem:[#allocation3 + $0x38] sm:$0xff]   ;;  %v269_v40 = vld [vmem:[%s15191_s1 + $0x68] sm:$0xff] }
  0x78   :  { %338 = vperm.xlu1 %9062, %v259_v7   ;;  %8387 = vmatprep.subr.bf16.mxu0 %v15205_v1  ;;  %v9141_v36 = vld [vmem:[#allocation3 + $0x30] sm:$0xff]   ;;  %v267_v39 = vld [vmem:[%s15191_s1 + $0x58] sm:$0xff]  ;;  %v268_v41 = vld [vmem:[%s15191_s1 + $0x60] sm:$0xff] }
  0x79   :  { %8903 = vmatprep.subr.bf16.mxu1 %v9137_v26  ;;  %v273_v42 = vld [vmem:[%s15191_s1 + $0x88] sm:$0xff]  ;;  %v271_v44 = vld [vmem:[%s15191_s1 + $0x78] sm:$0xff]  ;;  %v272_v46 = vld [vmem:[%s15191_s1 + $0x80] sm:$0xff] }
  0x7a   :  { %766 = vperm.xlu0 %9063, %v10062_v9   ;;  %8911 = vmatpush3.bf16.msra.mxu1 %v9137_v26  ;;  %v277_v43 = vld [vmem:[%s15191_s1 + $0xa8] sm:$0xff]  ;;  %v275_v49 = vld [vmem:[%s15191_s1 + $0x98] sm:$0xff]  ;;  %v276_v51 = vld [vmem:[%s15191_s1 + $0xa0] sm:$0xff] }
  0x7b   :  { %8388 = vmatpush3.bf16.msra.mxu0 %v9130_v17  ;;  %8904 = vmatprep.subr.bf16.mxu1 %v9138_v27  ;;  %v10166_v45 = vld [vmem:[%s15191_s1 + $0xc8] sm:$0xff]  ;;  %v10209_v52 = vld [vmem:[%s15191_s1 + $0x130] sm:$0xff]  ;;  %v279_v56 = vld [vmem:[%s15191_s1 + $0xb8] sm:$0xff] }
  0x7c   :  { %9064 = vset.pattern.permute.xlu1 %v9828_v0  ;;  %8389 = vmatprep.subr.bf16.mxu0 %v15205_v1  ;;  %v10178_v47 = vld [vmem:[%s15191_s1 + $0xe8] sm:$0xff]  ;;  %v10222_v54 = vld [vmem:[%s15191_s1 + $0x150] sm:$0xff] }
  0x7d   :  { %722 = vperm.xlu1 %9064, %v259_v7   ;;  %v10186_v48 = vld [vmem:[%s15191_s1 + $0x108] sm:$0xff]  ;;  %v10240_v59 = vld [vmem:[%s15191_s1 + $0x170] sm:$0xff] }
  0x7e   :  { %782 = vperm.xlu0 %9063, %v10069_v12   ;;  %8912 = vmatpush3.bf16.msra.mxu1 %v9138_v27  ;;  %v10199_v50 = vld [vmem:[%s15191_s1 + $0x128] sm:$0xff]  ;;  %v10280_v11 = vld [vmem:[%s15191_s1 + $0x1b0] sm:$0xff] }
  0x7f   :  { %8390 = vmatpush3.bf16.msra.mxu0 %v9131_v21  ;;  %8905 = vmatprep.subr.bf16.mxu1 %v9139_v32  ;;  %v10215_v53 = vld [vmem:[%s15191_s1 + $0x148] sm:$0xff]  ;;  %v10333_v30 = vld [vmem:[%s15191_s1 + $0x1f0] sm:$0xff] }
  0x80   :  { %8391 = vmatprep.subr.bf16.mxu0 %v15205_v1  ;;  %v10228_v55 = vld [vmem:[%s15191_s1 + $0x168] sm:$0xff] }
  0x81   :  { %9065 = vset.pattern.permute.xlu1 %v9830_v8  ;;  %v10251_v62 = vld [vmem:[%s15191_s1 + $0x188] sm:$0xff] }
  0x82   :  { %343 = vperm.xlu1 %9065, %v260_v13   ;;  %798 = vperm.xlu0 %9063, %v10079_v15   ;;  %v10271_v7 = vld [vmem:[%s15191_s1 + $0x1a8] sm:$0xff] }
  0x83   :  { %8392 = vmatpush3.bf16.msra.mxu0 %v9132_v25  ;;  %8913 = vmatpush3.bf16.msra.mxu1 %v9139_v32  ;;  %v10289_v14 = vld [vmem:[%s15191_s1 + $0x1c8] sm:$0xff] }
  0x84   :  { %8393 = vmatprep.subr.bf16.mxu0 %v15205_v1  ;;  %8906 = vmatprep.subr.bf16.mxu1 %v9140_v35 }
  0x86   :  { %9066 = vset.pattern.permute.xlu1 %v9828_v0  ;;  %814 = vperm.xlu0 %9063, %v10087_v16  }
  0x87   :  { %726 = vperm.xlu1 %9066, %v260_v13   ;;  %8394 = vmatpush3.bf16.msra.mxu0 %v9133_v28  ;;  %v641_v13 = vlaneseq  ;;  %v284_v28 = vld [vmem:[%s15191_s1 + $0xe0] sm:$0xff] }
  0x88   :  { %8395 = vmatprep.subr.bf16.mxu0 %v15205_v1  ;;  %8914 = vmatpush3.bf16.msra.mxu1 %v9140_v35 }
  0x89   :  { %8907 = vmatprep.subr.bf16.mxu1 %v9141_v36 }
  0x8a   :  { %830 = vperm.xlu0 %9063, %v10096_v19  }
  0x8b   :  { %730 = vperm.xlu1 %9066, %v261_v20   ;;  %8396 = vmatpush3.bf16.msra.mxu0 %v9134_v29 }
  0x8c   :  { %8401 = vmatprep.subr.bf16.mxu0 %v9135_v18  ;;  %8915 = vmatpush3.bf16.msra.mxu1 %v9141_v36 }
  0x8d   :  { %8908 = vmatprep.subr.bf16.mxu1 %v9142_v38 }
  0x8e   :  { %846 = vperm.xlu0 %9063, %v10106_v23   ;;  %8398 = vmatmul.mubr.bf16.vlgmr.msra.gmra.mrb[0].mxu0 %v137_v34 }
  0x8f   :  { %9067 = vset.pattern.permute.xlu1 %v9830_v8  ;;  %8402 = vmatpush3.bf16.msra.mxu0 %v9135_v18  ;;  %v10297_v18 = vshrl.u32 %v641_v13, 7 }
  0x90   :  { %358 = vperm.xlu1 %9067, %v263_v24   ;;  %8403 = vmatprep.subr.bf16.mxu0 %v9136_v22 }
  0x91   :  { %8916 = vmatpush3.bf16.msra.mxu1 %v9142_v38  ;;  %15635 = vst [vmem:[#allocation20_spill] sm:$0xff] %v10297_v18  ;;  %v15207_v25 = vsub.s32 0, %v10297_v18 }
  0x92   :  { %9096 = vset.pattern.permute.xlu0 %v9830_v8 }
  0x93   :  { %323 = vperm.xlu0 %9096, %v10033_v3   ;;  %8404 = vmatpush3.bf16.msra.mxu0 %v9136_v22  ;;  %v280_v3 = vld [vmem:[%s15191_s1 + $0xc0] sm:$0xff]  ;;  %v15208_v22 = vsub.s32 1, %v10297_v18 }
  0x94   :  { %9068 = vset.pattern.permute.xlu1 %v9828_v0  ;;  %8405 = vmatprep.subr.bf16.mxu0 %v9137_v26 }
  0x95   :  { %738 = vperm.xlu1 %9068, %v263_v24   ;;  %v10316_v24 = vld [vmem:[%s15191_s1 + $0x1e8] sm:$0xff] }
  0x97   :  { %328 = vperm.xlu0 %9096, %v10045_v5   ;;  %8406 = vmatpush3.bf16.msra.mxu0 %v9137_v26 }
  0x98   :  { %8407 = vmatprep.subr.bf16.mxu0 %v9138_v27 }
  0x99   :  { %9069 = vset.pattern.permute.xlu1 %v9830_v8 }
  0x9a   :  { %363 = vperm.xlu1 %9069, %v264_v33  }
  0x9b   :  { %333 = vperm.xlu0 %9096, %v10028_v2   ;;  %8408 = vmatpush3.bf16.msra.mxu0 %v9138_v27 }
  0x9c   :  { %8409 = vmatprep.subr.bf16.mxu0 %v9139_v32 }
  0x9e   :  { %9070 = vset.pattern.permute.xlu1 %v9828_v0 }
  0x9f   :  { %742 = vperm.xlu1 %9070, %v264_v33   ;;  %348 = vperm.xlu0 %9096, %v261_v20  }
  0xa0   :  { %8410 = vmatpush3.bf16.msra.mxu0 %v9139_v32 }
  0xa1   :  { %8411 = vmatprep.subr.bf16.mxu0 %v9140_v35 }
  0xa3   :  { %746 = vperm.xlu1 %9070, %v265_v37   ;;  %353 = vperm.xlu0 %9096, %v10040_v4   ;;  %v10263_v4 = vld [vmem:[%s15191_s1 + $0x190] sm:$0xff] }
  0xa4   :  { %8412 = vmatpush3.bf16.msra.mxu0 %v9140_v35 }
  0xa5   :  { %8413 = vmatprep.subr.bf16.mxu0 %v9141_v36 }
  0xa7   :  { %9071 = vset.pattern.permute.xlu1 %v9830_v8  ;;  %368 = vperm.xlu0 %9096, %v265_v37  }
  0xa8   :  { %378 = vperm.xlu1 %9071, %v267_v39   ;;  %8414 = vmatpush3.bf16.msra.mxu0 %v9141_v36 }
  0xa9   :  { %8415 = vmatprep.subr.bf16.mxu0 %v9142_v38 }
  0xab   :  { %373 = vperm.xlu0 %9096, %v10052_v6  }
  0xac   :  { %9072 = vset.pattern.permute.xlu1 %v9828_v0  ;;  %8416 = vmatpush3.bf16.msra.mxu0 %v9142_v38 }
  0xad   :  { %754 = vperm.xlu1 %9072, %v267_v39  }
  0xaf   :  { %388 = vperm.xlu0 %9096, %v269_v40  }
  0xb1   :  { %9073 = vset.pattern.permute.xlu1 %v9830_v8 }
  0xb2   :  { %383 = vperm.xlu1 %9073, %v268_v41  }
  0xb3   :  { %393 = vperm.xlu0 %9096, %v10062_v9  }
  0xb6   :  { %9074 = vset.pattern.permute.xlu1 %v9828_v0 }
  0xb7   :  { %758 = vperm.xlu1 %9074, %v268_v41   ;;  %408 = vperm.xlu0 %9096, %v273_v42  }
  0xbb   :  { %762 = vperm.xlu1 %9074, %v269_v40   ;;  %413 = vperm.xlu0 %9096, %v10069_v12  }
  0xbf   :  { %9075 = vset.pattern.permute.xlu1 %v9830_v8  ;;  %428 = vperm.xlu0 %9096, %v277_v43  }
  0xc0   :  { %398 = vperm.xlu1 %9075, %v271_v44  }
  0xc3   :  { %433 = vperm.xlu0 %9096, %v10079_v15   ;;  %v283_v15 = vld [vmem:[%s15191_s1 + $0xd8] sm:$0xff] }
  0xc4   :  { %9076 = vset.pattern.permute.xlu1 %v9828_v0 }
  0xc5   :  { %770 = vperm.xlu1 %9076, %v271_v44  }
  0xc7   :  { %448 = vperm.xlu0 %9096, %v10166_v45  }
  0xc9   :  { %9077 = vset.pattern.permute.xlu1 %v9830_v8 }
  0xca   :  { %403 = vperm.xlu1 %9077, %v272_v46  }
  0xcb   :  { %453 = vperm.xlu0 %9096, %v10087_v16  }
  0xce   :  { %9078 = vset.pattern.permute.xlu1 %v9828_v0 }
  0xcf   :  { %774 = vperm.xlu1 %9078, %v272_v46   ;;  %468 = vperm.xlu0 %9096, %v10178_v47  }
  0xd3   :  { %778 = vperm.xlu1 %9078, %v273_v42   ;;  %473 = vperm.xlu0 %9096, %v10096_v19   ;;  %v10303_v19 = vld [vmem:[%s15191_s1 + $0x1d0] sm:$0xff]  ;;  %v10352_v42 = vld [vmem:[%s15202_s12] ss:$0 sm:$0xff] }
  0xd7   :  { %9079 = vset.pattern.permute.xlu1 %v9830_v8  ;;  %488 = vperm.xlu0 %9096, %v10186_v48  }
  0xd8   :  { %418 = vperm.xlu1 %9079, %v275_v49  }
  0xdb   :  { %493 = vperm.xlu0 %9096, %v10106_v23   ;;  %v320_v23 = vld [vmem:[%s15195_s5] sm:$0x3] }
  0xdc   :  { %9080 = vset.pattern.permute.xlu1 %v9828_v0  ;;  %v10326_v29 = vrot.slane %v320_v23, %v15208_v22  ;;  %v10337_v31 = vrot.slane %v320_v23, %v15207_v25 }
  0xdd   :  { %786 = vperm.xlu1 %9080, %v275_v49  }
  0xdf   :  { %508 = vperm.xlu0 %9096, %v10199_v50  }
  0xe1   :  { %9081 = vset.pattern.permute.xlu1 %v9830_v8 }
  0xe2   :  { %423 = vperm.xlu1 %9081, %v276_v51  }
  0xe3   :  { %513 = vperm.xlu0 %9096, %v10209_v52  }
  0xe6   :  { %9082 = vset.pattern.permute.xlu1 %v9828_v0 }
  0xe7   :  { %790 = vperm.xlu1 %9082, %v276_v51   ;;  %528 = vperm.xlu0 %9096, %v10215_v53  }
  0xeb   :  { %794 = vperm.xlu1 %9082, %v277_v43   ;;  %533 = vperm.xlu0 %9096, %v10222_v54  }
  0xed   :  { %v10233_v58 = vpop.permute.xlu0 %718 }
  0xee   :  { %v711_v57 = vpop.permute.xlu1 %710  ;;  %v971_v46 = vmul.f32 %v10326_v29, %v10233_v58 }
  0xef   :  { %9083 = vset.pattern.permute.xlu1 %v9830_v8  ;;  %548 = vperm.xlu0 %9096, %v10228_v55   ;;  %v969_v33 = vmul.f32 %v10326_v29, %v711_v57 }
  0xf0   :  { %438 = vperm.xlu1 %9083, %v279_v56  }
  0xf1   :  { %v10244_v61 = vpop.permute.xlu0 %734 }
  0xf2   :  { %v10242_v60 = vpop.permute.xlu1 %714 }
  0xf3   :  { %553 = vperm.xlu0 %9096, %v10240_v59   ;;  %v970_v40 = vmul.f32 %v10326_v29, %v10242_v60 }
  0xf4   :  { %9084 = vset.pattern.permute.xlu1 %v9828_v0 }
  0xf5   :  { %802 = vperm.xlu1 %9084, %v279_v56   ;;  %v10253_v63 = vpop.permute.xlu0 %750 }
  0xf7   :  { %v339_v2 = vpop.permute.xlu1 %338  ;;  %568 = vperm.xlu0 %9096, %v10251_v62  }
  0xf8   :  { %v648_v38 = vmul.f32 %v10337_v31, %v339_v2 }
  0xf9   :  { %9085 = vset.pattern.permute.xlu1 %v9830_v8  ;;  %v10265_v5 = vpop.permute.xlu0 %766 }
  0xfa   :  { %443 = vperm.xlu1 %9085, %v280_v3  }
  0xfb   :  { %573 = vperm.xlu0 %9096, %v10263_v4  }
  0xfc   :  { %v723_v6 = vpop.permute.xlu1 %722 }
  0xfd   :  { %v10274_v9 = vpop.permute.xlu0 %782  ;;  %v972_v36 = vmul.f32 %v10326_v29, %v723_v6 }
  0xfe   :  { %9086 = vset.pattern.permute.xlu1 %v9828_v0 }
  0xff   :  { %806 = vperm.xlu1 %9086, %v280_v3   ;;  %588 = vperm.xlu0 %9096, %v10271_v7   ;;  %v1036_v43 = vadd.f32 %v972_v36, %v648_v38 }
 0x101   :  { %v344_v10 = vpop.permute.xlu1 %343  ;;  %v10282_v12 = vpop.permute.xlu0 %798  ;;  %v1104_v3 = vadd.f32 %v10352_v42, %v1036_v43 }
 0x102   :  { %v649_v56 = vmul.f32 %v10337_v31, %v344_v10 }
 0x103   :  { %810 = vperm.xlu1 %9086, %v10166_v45   ;;  %593 = vperm.xlu0 %9096, %v10280_v11  }
 0x105   :  { %v10294_v17 = vpop.permute.xlu0 %814 }
 0x106   :  { %v727_v16 = vpop.permute.xlu1 %726 }
 0x107   :  { %9087 = vset.pattern.permute.xlu1 %v9830_v8  ;;  %608 = vperm.xlu0 %9096, %v10289_v14   ;;  %v973_v44 = vmul.f32 %v10326_v29, %v727_v16 }
 0x108   :  { %458 = vperm.xlu1 %9087, %v283_v15  }
 0x109   :  { %v10305_v21 = vpop.permute.xlu0 %830  ;;  %v1037_v6 = vadd.f32 %v973_v44, %v649_v56 }
 0x10a   :  { %v731_v20 = vpop.permute.xlu1 %730 }
 0x10b   :  { %613 = vperm.xlu0 %9096, %v10303_v19   ;;  %v1105_v36 = vadd.f32 %v10352_v42, %v1037_v6 }
 0x10c   :  { %9088 = vset.pattern.permute.xlu1 %v9828_v0 }
 0x10d   :  { %818 = vperm.xlu1 %9088, %v283_v15   ;;  %v10319_v26 = vpop.permute.xlu0 %846 }
 0x10f   :  { %v359_v27 = vpop.permute.xlu1 %358  ;;  %628 = vperm.xlu0 %9096, %v10316_v24  }
 0x111   :  { %9089 = vset.pattern.permute.xlu1 %v9830_v8 }
 0x112   :  { %463 = vperm.xlu1 %9089, %v284_v28   ;;  %v324_v32 = vpop.permute.xlu0 %323 }
 0x113   :  { %v645_v34 = vmul.f32 %v10337_v31, %v324_v32  ;;  %633 = vperm.xlu0 %9096, %v10333_v30  }
 0x114   :  { %v739_v35 = vpop.permute.xlu1 %738 }
 0x115   :  { %v1033_v37 = vadd.f32 %v969_v33, %v645_v34  ;;  %v976_v58 = vmul.f32 %v10326_v29, %v739_v35  ;;  %v975_v34 = vmul.f32 %v10326_v29, %v10244_v61  ;;  %v1168_v35 = vmax.f32 %v1104_v3, 0.0 }
 0x116   :  { %9090 = vset.pattern.permute.xlu1 %v9828_v0  ;;  %v329_v39 = vpop.permute.xlu0 %328 }
 0x117   :  { %822 = vperm.xlu1 %9090, %v284_v28   ;;  %v646_v41 = vmul.f32 %v10337_v31, %v329_v39  ;;  %9124 = vset.pattern.permute.xlu0 %v9828_v0  ;;  %v1101_v49 = vadd.f32 %v10352_v42, %v1033_v37  ;;  %v652_v28 = vmul.f32 %v10337_v31, %v359_v27 }
 0x118   :  { %862 = vperm.xlu0 %9124, %v10209_v52   ;;  %v287_v52 = vld [vmem:[%s15191_s1 + $0xf8] sm:$0xff] }
 0x119   :  { %v364_v45 = vpop.permute.xlu1 %363  ;;  %v1034_v51 = vadd.f32 %v970_v40, %v646_v41  ;;  %v1165_v15 = vmax.f32 %v1101_v49, 0.0 }
 0x11a   :  { %v334_v57 = vpop.permute.xlu0 %333  ;;  %v653_v41 = vmul.f32 %v10337_v31, %v364_v45  ;;  %v288_v45 = vld [vmem:[%s15191_s1 + $0x100] sm:$0xff] }
 0x11b   :  { %826 = vperm.xlu1 %9090, %v10178_v47   ;;  %v1102_v60 = vadd.f32 %v10352_v42, %v1034_v51  ;;  %v647_v2 = vmul.f32 %v10337_v31, %v334_v57  ;;  %v974_v47 = vmul.f32 %v10326_v29, %v731_v20  ;;  %v1040_v20 = vadd.f32 %v976_v58, %v652_v28 }
 0x11c   :  { %878 = vperm.xlu0 %9124, %v10222_v54  }
 0x11d   :  { %v1035_v13 = vadd.f32 %v971_v46, %v647_v2  ;;  %v1166_v16 = vmax.f32 %v1102_v60, 0.0  ;;  %v1108_v46 = vadd.f32 %v10352_v42, %v1040_v20 }
 0x11e   :  { %v743_v10 = vpop.permute.xlu1 %742  ;;  %v349_v23 = vpop.permute.xlu0 %348 }
 0x11f   :  { %9091 = vset.pattern.permute.xlu1 %v9830_v8  ;;  %v1103_v32 = vadd.f32 %v10352_v42, %v1035_v13  ;;  %v650_v54 = vmul.f32 %v10337_v31, %v349_v23  ;;  %v1229_v33 = vpack.c.bf16 %v1166_v16, %v1165_v15  ;;  %v977_v38 = vmul.f32 %v10326_v29, %v743_v10 }
 0x120   :  { %478 = vperm.xlu1 %9091, %v287_v52   ;;  %894 = vperm.xlu0 %9124, %v10240_v59   ;;  %v1169_v59 = vmax.f32 %v1105_v36, 0.0  ;;  %v1172_v15 = vmax.f32 %v1108_v46, 0.0 }
 0x121   :  { %v1167_v37 = vmax.f32 %v1103_v32, 0.0  ;;  %v1038_v39 = vadd.f32 %v974_v47, %v650_v54  ;;  %8417 = vmatprep.mubr.bf16.mxu0 %v1229_v33  ;;  %v1041_v49 = vadd.f32 %v977_v38, %v653_v41  ;;  %v291_v41 = vld [vmem:[%s15191_s1 + $0x118] sm:$0xff] }
 0x122   :  { %v747_v27 = vpop.permute.xlu1 %746  ;;  %v354_v40 = vpop.permute.xlu0 %353 }
 0x123   :  { %v1106_v43 = vadd.f32 %v10352_v42, %v1038_v39  ;;  %v651_v44 = vmul.f32 %v10337_v31, %v354_v40  ;;  %v1230_v61 = vpack.c.bf16 %v1168_v35, %v1167_v37  ;;  %v978_v2 = vmul.f32 %v10326_v29, %v747_v27 }
 0x124   :  { %9092 = vset.pattern.permute.xlu1 %v9828_v0  ;;  %910 = vperm.xlu0 %9124, %v10263_v4   ;;  %v1109_v58 = vadd.f32 %v10352_v42, %v1041_v49 }
 0x125   :  { %834 = vperm.xlu1 %9092, %v287_v52   ;;  %v1039_v51 = vadd.f32 %v975_v34, %v651_v44  ;;  %8418 = vmatmul.mubr.bf16.vlgmr.msra.gmra.mrb[4].mxu0 %v1230_v61  ;;  %v1170_v56 = vmax.f32 %v1106_v43, 0.0  ;;  %v979_v52 = vmul.f32 %v10326_v29, %v10253_v63 }
 0x126   :  { %v369_v57 = vpop.permute.xlu0 %368  ;;  %v1173_v33 = vmax.f32 %v1109_v58, 0.0 }
 0x127   :  { %v379_v60 = vpop.permute.xlu1 %378  ;;  %v1107_v3 = vadd.f32 %v10352_v42, %v1039_v51  ;;  %v654_v4 = vmul.f32 %v10337_v31, %v369_v57  ;;  %v1231_v6 = vpack.c.bf16 %v1170_v56, %v1169_v59 }
 0x128   :  { %926 = vperm.xlu0 %9124, %v10280_v11   ;;  %v656_v63 = vmul.f32 %v10337_v31, %v379_v60 }
 0x129   :  { %9093 = vset.pattern.permute.xlu1 %v9830_v8  ;;  %v1042_v13 = vadd.f32 %v978_v2, %v654_v4  ;;  %8421 = vmatprep.mubr.bf16.mxu0 %v1231_v6  ;;  %v1171_v10 = vmax.f32 %v1107_v3, 0.0  ;;  %v292_v3 = vld [vmem:[%s15191_s1 + $0x120] sm:$0xff]  ;;  %v983_v4 = vmul.f32 %v10326_v29, %v10265_v5 }
 0x12a   :  { %483 = vperm.xlu1 %9093, %v288_v45   ;;  %v374_v16 = vpop.permute.xlu0 %373 }
 0x12b   :  { %v1110_v47 = vadd.f32 %v10352_v42, %v1042_v13  ;;  %v655_v23 = vmul.f32 %v10337_v31, %v374_v16  ;;  %v1232_v32 = vpack.c.bf16 %v1172_v15, %v1171_v10 }
 0x12c   :  { %v755_v28 = vpop.permute.xlu1 %754  ;;  %942 = vperm.xlu0 %9124, %v10303_v19  }
 0x12d   :  { %v980_v11 = vmul.f32 %v10326_v29, %v755_v28  ;;  %v1043_v54 = vadd.f32 %v979_v52, %v655_v23  ;;  %8422 = vmatmul.mubr.bf16.gmra.mrb[8].mxu0 %v1232_v32  ;;  %v1174_v34 = vmax.f32 %v1110_v47, 0.0 }
 0x12e   :  { %9094 = vset.pattern.permute.xlu1 %v9828_v0  ;;  %v389_v20 = vpop.permute.xlu0 %388 }
 0x12f   :  { %v1044_v35 = vadd.f32 %v980_v11, %v656_v63  ;;  %838 = vperm.xlu1 %9094, %v288_v45   ;;  %v1111_v36 = vadd.f32 %v10352_v42, %v1043_v54  ;;  %v1233_v37 = vpack.c.bf16 %v1174_v34, %v1173_v33  ;;  %v295_v34 = vld [vmem:[%s15191_s1 + $0x138] sm:$0xff] }
 0x130   :  { %958 = vperm.xlu0 %9124, %v10333_v30   ;;  %v658_v30 = vmul.f32 %v10337_v31, %v389_v20 }
 0x131   :  { %v1112_v38 = vadd.f32 %v10352_v42, %v1044_v35  ;;  %v384_v39 = vpop.permute.xlu1 %383  ;;  %8425 = vmatprep.mubr.bf16.mxu0 %v1233_v37  ;;  %v1175_v27 = vmax.f32 %v1111_v36, 0.0 }
 0x132   :  { %v394_v43 = vpop.permute.xlu0 %393  ;;  %v657_v61 = vmul.f32 %v10337_v31, %v384_v39 }
 0x133   :  { %842 = vperm.xlu1 %9094, %v10186_v48   ;;  %v1176_v19 = vmax.f32 %v1112_v38, 0.0  ;;  %v659_v60 = vmul.f32 %v10337_v31, %v394_v43 }
 0x135   :  { %v1234_v40 = vpack.c.bf16 %v1176_v19, %v1175_v27  ;;  %v1047_v13 = vadd.f32 %v983_v4, %v659_v60 }
 0x136   :  { %v759_v44 = vpop.permute.xlu1 %758  ;;  %v409_v51 = vpop.permute.xlu0 %408 }
 0x137   :  { %v981_v59 = vmul.f32 %v10326_v29, %v759_v44  ;;  %9095 = vset.pattern.permute.xlu1 %v9830_v8  ;;  %8426 = vmatmul.mubr.bf16.gmra.mrb[12].mxu0 %v1234_v40  ;;  %v1115_v23 = vadd.f32 %v10352_v42, %v1047_v13  ;;  %v662_v39 = vmul.f32 %v10337_v31, %v409_v51 }
 0x138   :  { %498 = vperm.xlu1 %9095, %v291_v41  }
 0x139   :  { %v1045_v46 = vadd.f32 %v981_v59, %v657_v61  ;;  %v1179_v11 = vmax.f32 %v1115_v23, 0.0  ;;  %v296_v59 = vld [vmem:[%s15191_s1 + $0x140] sm:$0xff] }
 0x13a   :  { %v763_v48 = vpop.permute.xlu1 %762  ;;  %v414_v58 = vpop.permute.xlu0 %413 }
 0x13b   :  { %v982_v49 = vmul.f32 %v10326_v29, %v763_v48  ;;  %v1113_v56 = vadd.f32 %v10352_v42, %v1045_v46  ;;  %v663_v43 = vmul.f32 %v10337_v31, %v414_v58 }
 0x13c   :  { %9097 = vset.pattern.permute.xlu1 %v9828_v0 }
 0x13d   :  { %v1046_v57 = vadd.f32 %v982_v49, %v658_v30  ;;  %850 = vperm.xlu1 %9097, %v291_v41   ;;  %v1177_v6 = vmax.f32 %v1113_v56, 0.0  ;;  %v987_v30 = vmul.f32 %v10326_v29, %v10274_v9 }
 0x13e   :  { %v10428_v5 = vpop.permute.xlu0 %428 }
 0x13f   :  { %v1114_v45 = vadd.f32 %v10352_v42, %v1046_v57  ;;  %v399_v2 = vpop.permute.xlu1 %398  ;;  %v1051_v51 = vadd.f32 %v987_v30, %v663_v43 }
 0x140   :  { %v660_v16 = vmul.f32 %v10337_v31, %v399_v2 }
 0x141   :  { %9098 = vset.pattern.permute.xlu1 %v9830_v8  ;;  %v1178_v52 = vmax.f32 %v1114_v45, 0.0  ;;  %v1119_v2 = vadd.f32 %v10352_v42, %v1051_v51 }
 0x142   :  { %503 = vperm.xlu1 %9098, %v292_v3   ;;  %v10435_v35 = vpop.permute.xlu0 %433 }
 0x143   :  { %v1235_v10 = vpack.c.bf16 %v1178_v52, %v1177_v6  ;;  %v1183_v52 = vmax.f32 %v1119_v2, 0.0 }
 0x144   :  { %v771_v15 = vpop.permute.xlu1 %770 }
 0x145   :  { %v984_v47 = vmul.f32 %v10326_v29, %v771_v15  ;;  %8429 = vmatprep.mubr.bf16.mxu0 %v1235_v10  ;;  %v299_v10 = vld [vmem:[%s15191_s1 + $0x158] sm:$0xff] }
 0x146   :  { %9099 = vset.pattern.permute.xlu1 %v9828_v0  ;;  %v10442_v19 = vpop.permute.xlu0 %448 }
 0x147   :  { %v1048_v28 = vadd.f32 %v984_v47, %v660_v16  ;;  %854 = vperm.xlu1 %9099, %v292_v3  }
 0x149   :  { %v1116_v32 = vadd.f32 %v10352_v42, %v1048_v28  ;;  %v404_v63 = vpop.permute.xlu1 %403  ;;  %v9143_v28 = vld [vmem:[#allocation6] sm:$0xff]  }
 0x14a   :  { %v661_v20 = vmul.f32 %v10337_v31, %v404_v63  ;;  %v10454_v49 = vpop.permute.xlu0 %453  ;;  %8481 = vmatprep.subr.bf16.mxu0 %v9143_v28  ;;  %v666_v63 = vmul.f32 %v10337_v31, %v10428_v5  ;;  %v300_v5 = vld [vmem:[%s15191_s1 + $0x160] sm:$0xff] }
 0x14b   :  { %858 = vperm.xlu1 %9099, %v10199_v50   ;;  %v1180_v54 = vmax.f32 %v1116_v32, 0.0  ;;  %8482 = vmatpush3.bf16.msra.mxu0 %v9143_v28 }
 0x14d   :  { %v1236_v33 = vpack.c.bf16 %v1180_v54, %v1179_v11 }
 0x14e   :  { %v775_v36 = vpop.permute.xlu1 %774  ;;  %v10460_v3 = vpop.permute.xlu0 %468 }
 0x14f   :  { %v985_v37 = vmul.f32 %v10326_v29, %v775_v36  ;;  %9100 = vset.pattern.permute.xlu1 %v9830_v8  ;;  %8430 = vmatmul.mubr.bf16.gmra.mrb[16].mxu0 %v1236_v33  ;;  %v667_v36 = vmul.f32 %v10337_v31, %v10435_v35  ;;  %v9145_v35 = vld [vmem:[#allocation6 + $0x10] sm:$0xff]  }
 0x150   :  { %518 = vperm.xlu1 %9100, %v295_v34  }
 0x151   :  { %v1049_v38 = vadd.f32 %v985_v37, %v661_v20 }
 0x152   :  { %v779_v50 = vpop.permute.xlu1 %778  ;;  %v10467_v15 = vpop.permute.xlu0 %473 }
 0x153   :  { %v986_v27 = vmul.f32 %v10326_v29, %v779_v50  ;;  %v1117_v40 = vadd.f32 %v10352_v42, %v1049_v38  ;;  %v991_v38 = vmul.f32 %v10326_v29, %v10282_v12 }
 0x154   :  { %9101 = vset.pattern.permute.xlu1 %v9828_v0 }
 0x155   :  { %v1050_v41 = vadd.f32 %v986_v27, %v662_v39  ;;  %866 = vperm.xlu1 %9101, %v295_v34   ;;  %v1181_v46 = vmax.f32 %v1117_v40, 0.0  ;;  %v9144_v27 = vld [vmem:[#allocation6 + $0x8] sm:$0xff]   ;;  %v1055_v43 = vadd.f32 %v991_v38, %v667_v36  ;;  %v995_v36 = vmul.f32 %v10326_v29, %v10294_v17 }
 0x156   :  { %v10475_v54 = vpop.permute.xlu0 %488  ;;  %8483 = vmatprep.subr.bf16.mxu0 %v9144_v27 }
 0x157   :  { %v1118_v44 = vadd.f32 %v10352_v42, %v1050_v41  ;;  %v419_v61 = vpop.permute.xlu1 %418  ;;  %8484 = vmatpush3.bf16.msra.mxu0 %v9144_v27 }
 0x158   :  { %v664_v60 = vmul.f32 %v10337_v31, %v419_v61  ;;  %8485 = vmatprep.subr.bf16.mxu0 %v9145_v35 }
 0x159   :  { %9102 = vset.pattern.permute.xlu1 %v9830_v8  ;;  %v1182_v48 = vmax.f32 %v1118_v44, 0.0 }
 0x15a   :  { %523 = vperm.xlu1 %9102, %v296_v59   ;;  %v10488_v40 = vpop.permute.xlu0 %493 }
 0x15b   :  { %v1237_v56 = vpack.c.bf16 %v1182_v48, %v1181_v46  ;;  %v1123_v46 = vadd.f32 %v10352_v42, %v1055_v43  ;;  %8486 = vmatpush3.bf16.msra.mxu0 %v9145_v35 }
 0x15c   :  { %v787_v57 = vpop.permute.xlu1 %786 }
 0x15d   :  { %v988_v45 = vmul.f32 %v10326_v29, %v787_v57  ;;  %8433 = vmatprep.mubr.bf16.mxu0 %v1237_v56  ;;  %v1187_v2 = vmax.f32 %v1123_v46, 0.0  ;;  %v9148_v46 = vld [vmem:[#allocation6 + $0x28] sm:$0xff]  }
 0x15e   :  { %9103 = vset.pattern.permute.xlu1 %v9828_v0  ;;  %v10498_v56 = vpop.permute.xlu0 %508 }
 0x15f   :  { %v1052_v9 = vadd.f32 %v988_v45, %v664_v60  ;;  %870 = vperm.xlu1 %9103, %v296_v59  }
 0x161   :  { %v1120_v4 = vadd.f32 %v10352_v42, %v1052_v9  ;;  %v424_v6 = vpop.permute.xlu1 %423  ;;  %v10490_v41 = vpop.f32.mrb[0].mxu0 }
 0x162   :  { %v665_v47 = vmul.f32 %v10337_v31, %v424_v6  ;;  %15636 = vst [vmem:[#allocation21_spill] sm:$0xff] %v10490_v41  ;;  %v8399_v61 = vpop.f32.mrb[1].mxu0  ;;  %v303_v6 = vld [vmem:[%s15191_s1 + $0x178] sm:$0xff] }
 0x163   :  { %874 = vperm.xlu1 %9103, %v10215_v53   ;;  %v1184_v58 = vmax.f32 %v1120_v4, 0.0  ;;  %v10496_v51 = vpop.f32.mrb[2].mxu0 }
 0x164   :  { %15637 = vst [vmem:[#allocation22_spill] sm:$0xff] %v10496_v51  ;;  %v8400_v57 = vpop.f32.mrb[3].mxu0 }
 0x165   :  { %v1238_v13 = vpack.c.bf16 %v1184_v58, %v1183_v52  ;;  %v10505_v52 = vpop.permute.xlu0 %513  ;;  %v307_v57 = vld [vmem:[%s15191_s1 + $0x198] sm:$0xff] }
 0x166   :  { %v791_v16 = vpop.permute.xlu1 %790 }
 0x167   :  { %v989_v23 = vmul.f32 %v10326_v29, %v791_v16  ;;  %9104 = vset.pattern.permute.xlu1 %v9830_v8  ;;  %8434 = vmatmul.mubr.bf16.gmra.mrb[20].mxu0 %v1238_v13  ;;  %v9146_v16 = vld [vmem:[#allocation6 + $0x18] sm:$0xff]  }
 0x168   :  { %538 = vperm.xlu1 %9104, %v299_v10   ;;  %8487 = vmatprep.subr.bf16.mxu0 %v9146_v16 }
 0x169   :  { %v1053_v53 = vadd.f32 %v989_v23, %v665_v47  ;;  %8488 = vmatpush3.bf16.msra.mxu0 %v9146_v16  ;;  %v670_v23 = vmul.f32 %v10337_v31, %v10442_v19  ;;  %v304_v19 = vld [vmem:[%s15191_s1 + $0x180] sm:$0xff] }
 0x16a   :  { %v795_v32 = vpop.permute.xlu1 %794 }
 0x16b   :  { %v990_v11 = vmul.f32 %v10326_v29, %v795_v32  ;;  %v1121_v33 = vadd.f32 %v10352_v42, %v1053_v53  ;;  %v10513_v53 = vpop.permute.xlu0 %528 }
 0x16c   :  { %9105 = vset.pattern.permute.xlu1 %v9828_v0 }
 0x16d   :  { %v1054_v34 = vadd.f32 %v990_v11, %v666_v63  ;;  %882 = vperm.xlu1 %9105, %v299_v10   ;;  %v1185_v50 = vmax.f32 %v1121_v33, 0.0  ;;  %v671_v11 = vmul.f32 %v10337_v31, %v10454_v49 }
 0x16f   :  { %v1122_v20 = vadd.f32 %v10352_v42, %v1054_v34  ;;  %v439_v37 = vpop.permute.xlu1 %438  ;;  %v10526_v38 = vpop.permute.xlu0 %533 }
 0x170   :  { %v668_v30 = vmul.f32 %v10337_v31, %v439_v37 }
 0x171   :  { %9106 = vset.pattern.permute.xlu1 %v9830_v8  ;;  %v1186_v39 = vmax.f32 %v1122_v20, 0.0 }
 0x172   :  { %543 = vperm.xlu1 %9106, %v300_v5  }
 0x173   :  { %v1239_v44 = vpack.c.bf16 %v1186_v39, %v1185_v50  ;;  %v1059_v50 = vadd.f32 %v995_v36, %v671_v11 }
 0x174   :  { %v803_v59 = vpop.permute.xlu1 %802 }
 0x175   :  { %v992_v12 = vmul.f32 %v10326_v29, %v803_v59  ;;  %8437 = vmatprep.mubr.bf16.mxu0 %v1239_v44  ;;  %v1127_v17 = vadd.f32 %v10352_v42, %v1059_v50  ;;  %v10532_v44 = vpop.permute.xlu0 %548 }
 0x176   :  { %9107 = vset.pattern.permute.xlu1 %v9828_v0 }
 0x177   :  { %v1056_v48 = vadd.f32 %v992_v12, %v668_v30  ;;  %886 = vperm.xlu1 %9107, %v300_v5   ;;  %v9147_v5 = vld [vmem:[#allocation6 + $0x20] sm:$0xff]   ;;  %v1191_v30 = vmax.f32 %v1127_v17, 0.0 }
 0x178   :  { %8489 = vmatprep.subr.bf16.mxu0 %v9147_v5 }
 0x179   :  { %v1124_v60 = vadd.f32 %v10352_v42, %v1056_v48  ;;  %v444_v45 = vpop.permute.xlu1 %443  ;;  %8490 = vmatpush3.bf16.msra.mxu0 %v9147_v5 }
 0x17a   :  { %v669_v13 = vmul.f32 %v10337_v31, %v444_v45  ;;  %8491 = vmatprep.subr.bf16.mxu0 %v9148_v46 }
 0x17b   :  { %890 = vperm.xlu1 %9107, %v10228_v55   ;;  %v1188_v9 = vmax.f32 %v1124_v60, 0.0  ;;  %v10539_v60 = vpop.permute.xlu0 %553 }
 0x17d   :  { %v1240_v4 = vpack.c.bf16 %v1188_v9, %v1187_v2  ;;  %8492 = vmatpush3.bf16.msra.mxu0 %v9148_v46 }
 0x17e   :  { %v807_v58 = vpop.permute.xlu1 %806 }
 0x17f   :  { %v993_v10 = vmul.f32 %v10326_v29, %v807_v58  ;;  %9108 = vset.pattern.permute.xlu1 %v9830_v8  ;;  %8438 = vmatmul.mubr.bf16.gmra.mrb[24].mxu0 %v1240_v4  ;;  %v674_v58 = vmul.f32 %v10337_v31, %v10460_v3  ;;  %v308_v3 = vld [vmem:[%s15191_s1 + $0x1a0] sm:$0xff] }
 0x180   :  { %558 = vperm.xlu1 %9108, %v303_v6  }
 0x181   :  { %v1057_v55 = vadd.f32 %v993_v10, %v669_v13  ;;  %v10547_v10 = vpop.permute.xlu0 %568 }
 0x182   :  { %v811_v47 = vpop.permute.xlu1 %810 }
 0x183   :  { %v994_v28 = vmul.f32 %v10326_v29, %v811_v47  ;;  %v1125_v32 = vadd.f32 %v10352_v42, %v1057_v55  ;;  %v675_v47 = vmul.f32 %v10337_v31, %v10467_v15 }
 0x184   :  { %9109 = vset.pattern.permute.xlu1 %v9828_v0 }
 0x185   :  { %v1058_v63 = vadd.f32 %v994_v28, %v670_v23  ;;  %898 = vperm.xlu1 %9109, %v303_v6   ;;  %v1189_v20 = vmax.f32 %v1125_v32, 0.0  ;;  %v999_v32 = vmul.f32 %v10326_v29, %v10305_v21 }
 0x187   :  { %v1126_v33 = vadd.f32 %v10352_v42, %v1058_v63  ;;  %v459_v34 = vpop.permute.xlu1 %458 }
 0x188   :  { %v672_v27 = vmul.f32 %v10337_v31, %v459_v34  ;;  %v9150_v34 = vld [vmem:[#allocation6 + $0x38] sm:$0xff]  }
 0x189   :  { %9110 = vset.pattern.permute.xlu1 %v9830_v8  ;;  %v1190_v37 = vmax.f32 %v1126_v33, 0.0  ;;  %v10560_v33 = vpop.permute.xlu0 %573 }
 0x18a   :  { %563 = vperm.xlu1 %9110, %v304_v19  }
 0x18b   :  { %v1241_v49 = vpack.c.bf16 %v1190_v37, %v1189_v20 }
 0x18c   :  { %v819_v39 = vpop.permute.xlu1 %818 }
 0x18d   :  { %v996_v35 = vmul.f32 %v10326_v29, %v819_v39  ;;  %8441 = vmatprep.mubr.bf16.mxu0 %v1241_v49  ;;  %v10566_v50 = vpop.permute.xlu0 %588 }
 0x18e   :  { %9111 = vset.pattern.permute.xlu1 %v9828_v0 }
 0x18f   :  { %v1060_v43 = vadd.f32 %v996_v35, %v672_v27  ;;  %902 = vperm.xlu1 %9111, %v304_v19   ;;  %v1063_v19 = vadd.f32 %v999_v32, %v675_v47 }
 0x191   :  { %v1128_v61 = vadd.f32 %v10352_v42, %v1060_v43  ;;  %v464_v59 = vpop.permute.xlu1 %463  ;;  %v1131_v21 = vadd.f32 %v10352_v42, %v1063_v19  ;;  %v311_v43 = vld [vmem:[%s15191_s1 + $0x1b8] sm:$0xff] }
 0x192   :  { %v673_v2 = vmul.f32 %v10337_v31, %v464_v59 }
 0x193   :  { %906 = vperm.xlu1 %9111, %v10251_v62   ;;  %v1192_v12 = vmax.f32 %v1128_v61, 0.0  ;;  %v9149_v62 = vld [vmem:[#allocation6 + $0x30] sm:$0xff]   ;;  %v1195_v27 = vmax.f32 %v1131_v21, 0.0  ;;  %v10573_v61 = vpop.permute.xlu0 %593 }
 0x194   :  { %8493 = vmatprep.subr.bf16.mxu0 %v9149_v62 }
 0x195   :  { %v1242_v48 = vpack.c.bf16 %v1192_v12, %v1191_v30  ;;  %8494 = vmatpush3.bf16.msra.mxu0 %v9149_v62  ;;  %v679_v62 = vmul.f32 %v10337_v31, %v10488_v40 }
 0x196   :  { %v823_v45 = vpop.permute.xlu1 %822  ;;  %8495 = vmatprep.subr.bf16.mxu0 %v9150_v34 }
 0x197   :  { %v997_v9 = vmul.f32 %v10326_v29, %v823_v45  ;;  %9112 = vset.pattern.permute.xlu1 %v9830_v8  ;;  %8442 = vmatmul.mubr.bf16.gmra.mrb[28].mxu0 %v1242_v48  ;;  %v678_v48 = vmul.f32 %v10337_v31, %v10475_v54  ;;  %v10581_v45 = vpop.permute.xlu0 %608  ;;  %v312_v54 = vld [vmem:[%s15191_s1 + $0x1c0] sm:$0xff] }
 0x198   :  { %578 = vperm.xlu1 %9112, %v307_v57  }
 0x199   :  { %v1061_v4 = vadd.f32 %v997_v9, %v673_v2  ;;  %8496 = vmatpush3.bf16.msra.mxu0 %v9150_v34 }
 0x19a   :  { %v827_v6 = vpop.permute.xlu1 %826 }
 0x19b   :  { %v998_v13 = vmul.f32 %v10326_v29, %v827_v6  ;;  %v1129_v16 = vadd.f32 %v10352_v42, %v1061_v4 }
 0x19c   :  { %9113 = vset.pattern.permute.xlu1 %v9828_v0 }
 0x19d   :  { %v1062_v55 = vadd.f32 %v998_v13, %v674_v58  ;;  %914 = vperm.xlu1 %9113, %v307_v57   ;;  %v1193_v63 = vmax.f32 %v1129_v16, 0.0  ;;  %v1003_v58 = vmul.f32 %v10326_v29, %v10319_v26 }
 0x19f   :  { %v1130_v23 = vadd.f32 %v10352_v42, %v1062_v55  ;;  %v479_v28 = vpop.permute.xlu1 %478  ;;  %v10594_v55 = vpop.permute.xlu0 %613  ;;  %v1067_v47 = vadd.f32 %v1003_v58, %v679_v62 }
 0x1a0   :  { %v676_v20 = vmul.f32 %v10337_v31, %v479_v28 }
 0x1a1   :  { %9114 = vset.pattern.permute.xlu1 %v9830_v8  ;;  %v1194_v11 = vmax.f32 %v1130_v23, 0.0  ;;  %v1135_v32 = vadd.f32 %v10352_v42, %v1067_v47 }
 0x1a2   :  { %583 = vperm.xlu1 %9114, %v308_v3  }
 0x1a3   :  { %v1243_v15 = vpack.c.bf16 %v1194_v11, %v1193_v63  ;;  %v10600_v63 = vpop.permute.xlu0 %628  ;;  %v1199_v19 = vmax.f32 %v1135_v32, 0.0 }
 0x1a4   :  { %v835_v36 = vpop.permute.xlu1 %834 }
 0x1a5   :  { %v1000_v37 = vmul.f32 %v10326_v29, %v835_v36  ;;  %8445 = vmatprep.mubr.bf16.mxu0 %v1243_v15  ;;  %v9151_v36 = vld [vmem:[%s15192_s2] sm:$0xff]  }
 0x1a6   :  { %9115 = vset.pattern.permute.xlu1 %v9828_v0 }
 0x1a7   :  { %v1064_v5 = vadd.f32 %v1000_v37, %v676_v20  ;;  %918 = vperm.xlu1 %9115, %v308_v3   ;;  %v315_v37 = vld [vmem:[%s15191_s1 + $0x1d8] sm:$0xff]  ;;  %v10610_v21 = vpop.permute.xlu0 %633 }
 0x1a9   :  { %v1132_v49 = vadd.f32 %v10352_v42, %v1064_v5  ;;  %v484_v39 = vpop.permute.xlu1 %483 }
 0x1aa   :  { %v677_v30 = vmul.f32 %v10337_v31, %v484_v39 }
 0x1ab   :  { %922 = vperm.xlu1 %9115, %v10271_v7   ;;  %v1196_v35 = vmax.f32 %v1132_v49, 0.0 }
 0x1ad   :  { %v1244_v17 = vpack.c.bf16 %v1196_v35, %v1195_v27  ;;  %v682_v35 = vmul.f32 %v10337_v31, %v10498_v56 }
 0x1ae   :  { %v839_v59 = vpop.permute.xlu1 %838 }
 0x1af   :  { %v1001_v12 = vmul.f32 %v10326_v29, %v839_v59  ;;  %9116 = vset.pattern.permute.xlu1 %v9830_v8  ;;  %8446 = vmatmul.mubr.bf16.gmra.mrb[32].mxu0 %v1244_v17  ;;  %v863_v59 = vpop.permute.xlu0 %862 }
 0x1b0   :  { %598 = vperm.xlu1 %9116, %v311_v43  }
 0x1b1   :  { %v1065_v46 = vadd.f32 %v1001_v12, %v677_v30  ;;  %v9153_v30 = vld [vmem:[%s15192_s2 + $0x10] sm:$0xff]  }
 0x1b2   :  { %v843_v7 = vpop.permute.xlu1 %842 }
 0x1b3   :  { %v1002_v57 = vmul.f32 %v10326_v29, %v843_v7  ;;  %v1133_v2 = vadd.f32 %v10352_v42, %v1065_v46  ;;  %v1007_v7 = vmul.f32 %v10326_v29, %v863_v59 }
 0x1b4   :  { %9117 = vset.pattern.permute.xlu1 %v9828_v0 }
 0x1b5   :  { %v1066_v9 = vadd.f32 %v1002_v57, %v678_v48  ;;  %930 = vperm.xlu1 %9117, %v311_v43   ;;  %v1197_v13 = vmax.f32 %v1133_v2, 0.0  ;;  %v9152_v43 = vld [vmem:[%s15192_s2 + $0x8] sm:$0xff]   ;;  %v316_v48 = vld [vmem:[%s15191_s1 + $0x1e0] sm:$0xff]  ;;  %v683_v2 = vmul.f32 %v10337_v31, %v10505_v52 }
 0x1b7   :  { %v1134_v4 = vadd.f32 %v10352_v42, %v1066_v9  ;;  %v499_v6 = vpop.permute.xlu1 %498 }
 0x1b8   :  { %v680_v28 = vmul.f32 %v10337_v31, %v499_v6 }
 0x1b9   :  { %9118 = vset.pattern.permute.xlu1 %v9830_v8  ;;  %v1198_v16 = vmax.f32 %v1134_v4, 0.0  ;;  %v1071_v4 = vadd.f32 %v1007_v7, %v683_v2  ;;  %v9161_v2 = vld [vmem:[%s15192_s2 + $0x50] sm:$0xff]  }
 0x1ba   :  { %603 = vperm.xlu1 %9118, %v312_v54  }
 0x1bb   :  { %v1245_v23 = vpack.c.bf16 %v1198_v16, %v1197_v13  ;;  %v9155_v13 = vld [vmem:[%s15192_s2 + $0x20] sm:$0xff]   ;;  %v1139_v47 = vadd.f32 %v10352_v42, %v1071_v4 }
 0x1bc   :  { %v851_v40 = vpop.permute.xlu1 %850 }
 0x1bd   :  { %v1004_v3 = vmul.f32 %v10326_v29, %v851_v40  ;;  %8449 = vmatprep.mubr.bf16.mxu0 %v1245_v23 }
 0x1be   :  { %9119 = vset.pattern.permute.xlu1 %v9828_v0 }
 0x1bf   :  { %v1068_v26 = vadd.f32 %v1004_v3, %v680_v28  ;;  %934 = vperm.xlu1 %9119, %v312_v54   ;;  %v9154_v54 = vld [vmem:[%s15192_s2 + $0x18] sm:$0xff]   ;;  %v1203_v3 = vmax.f32 %v1139_v47, 0.0 }
 0x1c1   :  { %v1136_v11 = vadd.f32 %v10352_v42, %v1068_v26  ;;  %v504_v34 = vpop.permute.xlu1 %503  ;;  %v9156_v26 = vld [vmem:[%s15192_s2 + $0x28] sm:$0xff]  }
 0x1c2   :  { %v681_v49 = vmul.f32 %v10337_v31, %v504_v34 }
 0x1c3   :  { %938 = vperm.xlu1 %9119, %v10289_v14   ;;  %v1200_v15 = vmax.f32 %v1136_v11, 0.0 }
 0x1c5   :  { %v1246_v20 = vpack.c.bf16 %v1200_v15, %v1199_v19  ;;  %v319_v19 = vld [vmem:[%s15191_s1 + $0x1f8] sm:$0xff]  ;;  %v9157_v15 = vld [vmem:[%s15192_s2 + $0x30] sm:$0xff]  }
 0x1c6   :  { %v855_v5 = vpop.permute.xlu1 %854 }
 0x1c7   :  { %v1005_v39 = vmul.f32 %v10326_v29, %v855_v5  ;;  %9120 = vset.pattern.permute.xlu1 %v9830_v8  ;;  %8450 = vmatmul.mubr.bf16.gmra.mrb[36].mxu0 %v1246_v20  ;;  %v686_v5 = vmul.f32 %v10337_v31, %v10513_v53 }
 0x1c8   :  { %618 = vperm.xlu1 %9120, %v315_v37   ;;  %8497 = vmatprep.mubr.bf16.mxu0 %v9151_v36 }
 0x1c9   :  { %v1069_v14 = vadd.f32 %v1005_v39, %v681_v49 }
 0x1ca   :  { %v859_v27 = vpop.permute.xlu1 %858 }
 0x1cb   :  { %v1006_v17 = vmul.f32 %v10326_v29, %v859_v27  ;;  %v1137_v46 = vadd.f32 %v10352_v42, %v1069_v14  ;;  %v879_v14 = vpop.permute.xlu0 %878 }
 0x1cc   :  { %9121 = vset.pattern.permute.xlu1 %v9828_v0 }
 0x1cd   :  { %v1070_v12 = vadd.f32 %v1006_v17, %v682_v35  ;;  %946 = vperm.xlu1 %9121, %v315_v37   ;;  %v1201_v9 = vmax.f32 %v1137_v46, 0.0  ;;  %v9159_v35 = vld [vmem:[%s15192_s2 + $0x40] sm:$0xff]   ;;  %v1011_v17 = vmul.f32 %v10326_v29, %v879_v14  ;;  %v691_v14 = vmul.f32 %v10337_v31, %v10539_v60 }
 0x1cf   :  { %v519_v56 = vpop.permute.xlu1 %518  ;;  %v1138_v57 = vadd.f32 %v10352_v42, %v1070_v12  ;;  %8498 = vmatmul.mubr.bf16.vlgmr.msra.gmra.mrb[40].mxu0 %v9152_v43 }
 0x1d0   :  { %8501 = vmatprep.mubr.bf16.mxu0 %v9153_v30  ;;  %v684_v16 = vmul.f32 %v10337_v31, %v519_v56 }
 0x1d1   :  { %9122 = vset.pattern.permute.xlu1 %v9830_v8  ;;  %v1202_v62 = vmax.f32 %v1138_v57, 0.0 }
 0x1d2   :  { %623 = vperm.xlu1 %9122, %v316_v48  }
 0x1d3   :  { %v1247_v6 = vpack.c.bf16 %v1202_v62, %v1201_v9 }
 0x1d4   :  { %v867_v58 = vpop.permute.xlu1 %866 }
 0x1d5   :  { %v1008_v52 = vmul.f32 %v10326_v29, %v867_v58  ;;  %8453 = vmatprep.mubr.bf16.mxu1 %v1247_v6  ;;  %v9162_v58 = vld [vmem:[%s15192_s2 + $0x58] sm:$0xff]  }
 0x1d6   :  { %9123 = vset.pattern.permute.xlu1 %v9828_v0 }
 0x1d7   :  { %v1072_v23 = vadd.f32 %v1008_v52, %v684_v16  ;;  %950 = vperm.xlu1 %9123, %v316_v48   ;;  %8502 = vmatmul.mubr.bf16.gmra.mrb[44].mxu0 %v9154_v54  ;;  %v9160_v48 = vld [vmem:[%s15192_s2 + $0x48] sm:$0xff]   ;;  %v9163_v52 = vld [vmem:[%s15192_s2 + $0x60] sm:$0xff]  }
 0x1d8   :  { %8505 = vmatprep.mubr.bf16.mxu0 %v9155_v13 }
 0x1d9   :  { %v1140_v40 = vadd.f32 %v10352_v42, %v1072_v23  ;;  %v524_v28 = vpop.permute.xlu1 %523 }
 0x1da   :  { %v685_v11 = vmul.f32 %v10337_v31, %v524_v28 }
 0x1db   :  { %954 = vperm.xlu1 %9123, %v10316_v24   ;;  %v1204_v32 = vmax.f32 %v1140_v40, 0.0 }
 0x1dd   :  { %v1248_v34 = vpack.c.bf16 %v1204_v32, %v1203_v3 }
 0x1de   :  { %v871_v36 = vpop.permute.xlu1 %870 }
 0x1df   :  { %v1009_v24 = vmul.f32 %v10326_v29, %v871_v36  ;;  %9125 = vset.pattern.permute.xlu1 %v9830_v8  ;;  %8454 = vmatmul.mubr.bf16.vlgmr.msra.gmra.mrb[0].mxu1 %v1248_v34  ;;  %v9158_v8 = vld [vmem:[%s15192_s2 + $0x38] sm:$0xff]  }
 0x1e0   :  { %638 = vperm.xlu1 %9125, %v319_v19   ;;  %8506 = vmatmul.mubr.bf16.gmra.mrb[48].mxu0 %v9156_v26  ;;  %v690_v26 = vmul.f32 %v10337_v31, %v10532_v44 }
 0x1e1   :  { %v1073_v20 = vadd.f32 %v1009_v24, %v685_v11  ;;  %8509 = vmatprep.mubr.bf16.mxu0 %v9157_v15  ;;  %v895_v15 = vpop.permute.xlu0 %894  ;;  %v9164_v24 = vld [vmem:[%s15192_s2 + $0x68] sm:$0xff]  }
 0x1e2   :  { %v875_v37 = vpop.permute.xlu1 %874  ;;  %v1015_v44 = vmul.f32 %v10326_v29, %v895_v15  ;;  %v9170_v15 = vld [vmem:[%s15192_s2 + $0x98] sm:$0xff]  }
 0x1e3   :  { %v1141_v49 = vadd.f32 %v10352_v42, %v1073_v20  ;;  %v1010_v39 = vmul.f32 %v10326_v29, %v875_v37  ;;  %v9165_v37 = vld [vmem:[%s15192_s2 + $0x70] sm:$0xff]  }
 0x1e4   :  { %9126 = vset.pattern.permute.xlu1 %v9828_v0  ;;  %v687_v0 = vmul.f32 %v10337_v31, %v10526_v38 }
 0x1e5   :  { %v1074_v27 = vadd.f32 %v1010_v39, %v686_v5  ;;  %962 = vperm.xlu1 %9126, %v319_v19   ;;  %v1205_v59 = vmax.f32 %v1141_v49, 0.0 }
 0x1e6   :  { %v1075_v12 = vadd.f32 %v1011_v17, %v687_v0  ;;  %v1079_v17 = vadd.f32 %v1015_v44, %v691_v14 }
 0x1e7   :  { %v1142_v53 = vadd.f32 %v10352_v42, %v1074_v27  ;;  %v539_v43 = vpop.permute.xlu1 %538 }
 0x1e8   :  { %8510 = vmatmul.mubr.bf16.gmra.mrb[52].mxu0 %v9158_v8  ;;  %v688_v46 = vmul.f32 %v10337_v31, %v539_v43  ;;  %v1143_v38 = vadd.f32 %v10352_v42, %v1075_v12  ;;  %v9167_v12 = vld [vmem:[%s15192_s2 + $0x80] sm:$0xff]  }
 0x1e9   :  { %v1206_v30 = vmax.f32 %v1142_v53, 0.0  ;;  %8513 = vmatprep.mubr.bf16.mxu0 %v9159_v35 }
 0x1ea   :  { %v1207_v6 = vmax.f32 %v1143_v38, 0.0 }
 0x1eb   :  { %v1249_v7 = vpack.c.bf16 %v1206_v30, %v1205_v59  ;;  %v9166_v30 = vld [vmem:[%s15192_s2 + $0x78] sm:$0xff]  }
 0x1ec   :  { %v883_v56 = vpop.permute.xlu1 %882 }
 0x1ed   :  { %v1012_v57 = vmul.f32 %v10326_v29, %v883_v56  ;;  %8457 = vmatprep.mubr.bf16.mxu1 %v1249_v7 }
 0x1ef   :  { %v1076_v9 = vadd.f32 %v1012_v57, %v688_v46  ;;  %v10733_v46 = vld [vmem:[%s15202_s12] ss:$0 sm:$0xff] }
 0x1f0   :  { %8514 = vmatmul.mubr.bf16.gmra.mrb[56].mxu0 %v9160_v48  ;;  %v1147_v7 = vadd.f32 %v10733_v46, %v1079_v17 }
 0x1f1   :  { %v1144_v62 = vadd.f32 %v10352_v42, %v1076_v9  ;;  %v544_v4 = vpop.permute.xlu1 %543  ;;  %8517 = vmatprep.mubr.bf16.mxu0 %v9161_v2 }
 0x1f2   :  { %v689_v13 = vmul.f32 %v10337_v31, %v544_v4  ;;  %v1211_v9 = vmax.f32 %v1147_v7, 0.0 }
 0x1f3   :  { %v1208_v54 = vmax.f32 %v1144_v62, 0.0 }
 0x1f5   :  { %v1250_v16 = vpack.c.bf16 %v1208_v54, %v1207_v6  ;;  %v9168_v6 = vld [vmem:[%s15192_s2 + $0x88] sm:$0xff]  }
 0x1f6   :  { %v887_v47 = vpop.permute.xlu1 %886 }
 0x1f7   :  { %v1013_v23 = vmul.f32 %v10326_v29, %v887_v47  ;;  %8458 = vmatmul.mubr.bf16.gmra.mrb[4].mxu1 %v1250_v16  ;;  %v9169_v16 = vld [vmem:[%s15192_s2 + $0x90] sm:$0xff]  }
 0x1f8   :  { %8518 = vmatmul.mubr.bf16.gmra.mrb[60].mxu0 %v9162_v58  ;;  %v10691_v28 = vpop.f32.mrb[4].mxu0 }
 0x1f9   :  { %v1077_v40 = vadd.f32 %v1013_v23, %v689_v13  ;;  %8521 = vmatprep.mubr.bf16.mxu0 %v9163_v52  ;;  %1618 = vadd.xlane.f32.xlu0 %v10691_v28  ;;  %v10694_v32 = vpop.f32.mrb[5].mxu0 }
 0x1fa   :  { %v891_v3 = vpop.permute.xlu1 %890  ;;  %15638 = vst [vmem:[#allocation23_spill] sm:$0xff] %v10694_v32  ;;  %v10700_v19 = vpop.f32.mrb[6].mxu0 }
 0x1fb   :  { %v1145_v11 = vadd.f32 %v10352_v42, %v1077_v40  ;;  %v1014_v34 = vmul.f32 %v10326_v29, %v891_v3  ;;  %v10702_v36 = vpop.f32.mrb[7].mxu0  ;;  %v694_v3 = vmul.f32 %v10337_v31, %v10547_v10 }
 0x1fc   :  { %15639 = vst [vmem:[#allocation24_spill] sm:$0xff] %v10702_v36 }
 0x1fd   :  { %v1078_v20 = vadd.f32 %v1014_v34, %v690_v26  ;;  %v1209_v39 = vmax.f32 %v1145_v11, 0.0  ;;  %v911_v34 = vpop.permute.xlu0 %910 }
 0x1ff   :  { %v1146_v5 = vadd.f32 %v10352_v42, %v1078_v20  ;;  %v559_v49 = vpop.permute.xlu1 %558  ;;  %v9171_v20 = vld [vmem:[%s15192_s2 + $0xa0] sm:$0xff]  }
 0x200   :  { %8522 = vmatmul.mubr.bf16.gmra.mrb[64].mxu0 %v9164_v24  ;;  %v10714_v8 = vpop.f32.mrb[8].mxu0  ;;  %v692_v53 = vmul.f32 %v10337_v31, %v559_v49  ;;  %v695_v49 = vmul.f32 %v10337_v31, %v10560_v33 }
 0x201   :  { %v1210_v27 = vmax.f32 %v1146_v5, 0.0  ;;  %8525 = vmatprep.mubr.bf16.mxu0 %v9165_v37  ;;  %v10716_v35 = vpop.f32.mrb[9].mxu0  ;;  %v1019_v37 = vmul.f32 %v10326_v29, %v911_v34 }
 0x202   :  { %15640 = vst [vmem:[#allocation25_spill] sm:$0xff] %v10716_v35  ;;  %v10719_v43 = vpop.f32.mrb[10].mxu0 }
 0x203   :  { %v1251_v59 = vpack.c.bf16 %v1210_v27, %v1209_v39  ;;  %v10721_v42 = vpop.f32.mrb[11].mxu0  ;;  %v1083_v14 = vadd.f32 %v1019_v37, %v695_v49  ;;  %v9177_v37 = vld [vmem:[%s15192_s2 + $0xd0] sm:$0xff]   ;;  %v699_v49 = vmul.f32 %v10337_v31, %v10573_v61 }
 0x204   :  { %v899_v0 = vpop.permute.xlu1 %898  ;;  %15641 = vst [vmem:[#allocation26_spill] sm:$0xff] %v10721_v42 }
 0x205   :  { %v1016_v60 = vmul.f32 %v10326_v29, %v899_v0  ;;  %8461 = vmatprep.mubr.bf16.mxu1 %v1251_v59  ;;  %v9172_v59 = vld [vmem:[%s15192_s2 + $0xa8] sm:$0xff]   ;;  %v1151_v33 = vadd.f32 %v10733_v46, %v1083_v14 }
 0x207   :  { %v1080_v56 = vadd.f32 %v1016_v60, %v692_v53 }
 0x208   :  { %8526 = vmatmul.mubr.bf16.gmra.mrb[68].mxu0 %v9166_v30  ;;  %v9173_v30 = vld [vmem:[%s15192_s2 + $0xb0] sm:$0xff]  }
 0x209   :  { %v1148_v48 = vadd.f32 %v10733_v46, %v1080_v56  ;;  %1620 = vadd.xlane.f32.xlu1 %v10700_v19  ;;  %v564_v57 = vpop.permute.xlu1 %563  ;;  %8529 = vmatprep.mubr.bf16.mxu0 %v9167_v12 }
 0x20a   :  { %v10738_v2 = vpop.f32.mrb[12].mxu0  ;;  %v693_v54 = vmul.f32 %v10337_v31, %v564_v57  ;;  %v1215_v57 = vmax.f32 %v1151_v33, 0.0 }
 0x20b   :  { %v10740_v38 = vpop.f32.mrb[13].mxu0  ;;  %v1212_v62 = vmax.f32 %v1148_v48, 0.0 }
 0x20c   :  { %v10742_v4 = vpop.f32.mrb[14].mxu0 }
 0x20d   :  { %v10748_v58 = vpop.f32.mrb[15].mxu0  ;;  %v1252_v13 = vpack.c.bf16 %v1212_v62, %v1211_v9 }
 0x20e   :  { %v903_v52 = vpop.permute.xlu1 %902 }
 0x20f   :  { %v1017_v47 = vmul.f32 %v10326_v29, %v903_v52  ;;  %8462 = vmatmul.mubr.bf16.gmra.mrb[8].mxu1 %v1252_v13  ;;  %v9175_v52 = vld [vmem:[%s15192_s2 + $0xc0] sm:$0xff]  }
 0x210   :  { %8530 = vmatmul.mubr.bf16.gmra.mrb[72].mxu0 %v9168_v6  ;;  %v9174_v6 = vld [vmem:[%s15192_s2 + $0xb8] sm:$0xff]  }
 0x211   :  { %v1081_v23 = vadd.f32 %v1017_v47, %v693_v54  ;;  %8533 = vmatprep.mubr.bf16.mxu0 %v9169_v16 }
 0x212   :  { %v907_v40 = vpop.permute.xlu1 %906 }
 0x213   :  { %v1149_v26 = vadd.f32 %v10733_v46, %v1081_v23  ;;  %v1018_v11 = vmul.f32 %v10326_v29, %v907_v40 }
 0x215   :  { %v1082_v24 = vadd.f32 %v1018_v11, %v694_v3  ;;  %v1213_v10 = vmax.f32 %v1149_v26, 0.0  ;;  %v698_v26 = vmul.f32 %v10337_v31, %v10566_v50 }
 0x217   :  { %v1150_v44 = vadd.f32 %v10733_v46, %v1082_v24  ;;  %v579_v5 = vpop.permute.xlu1 %578  ;;  %v9176_v24 = vld [vmem:[%s15192_s2 + $0xc8] sm:$0xff]  }
 0x218   :  { %8534 = vmatmul.mubr.bf16.gmra.mrb[76].mxu0 %v9170_v15  ;;  %v696_v27 = vmul.f32 %v10337_v31, %v579_v5  ;;  %v927_v15 = vpop.permute.xlu0 %926 }
 0x219   :  { %v1214_v39 = vmax.f32 %v1150_v44, 0.0  ;;  %8537 = vmatprep.mubr.bf16.mxu0 %v9171_v20  ;;  %v1023_v44 = vmul.f32 %v10326_v29, %v927_v15  ;;  %v702_v15 = vmul.f32 %v10337_v31, %v10581_v45  ;;  %v703_v45 = vmul.f32 %v10337_v31, %v10594_v55 }
 0x21b   :  { %v1253_v17 = vpack.c.bf16 %v1214_v39, %v1213_v10  ;;  %v1087_v14 = vadd.f32 %v1023_v44, %v699_v49  ;;  %v9182_v44 = vld [vmem:[%s15192_s2 + $0xf8] sm:$0xff]  }
 0x21c   :  { %v915_v53 = vpop.permute.xlu1 %914 }
 0x21d   :  { %v1020_v0 = vmul.f32 %v10326_v29, %v915_v53  ;;  %8465 = vmatprep.mubr.bf16.mxu1 %v1253_v17  ;;  %v1155_v61 = vadd.f32 %v10733_v46, %v1087_v14 }
 0x21f   :  { %v1084_v60 = vadd.f32 %v1020_v0, %v696_v27 }
 0x220   :  { %8538 = vmatmul.mubr.bf16.gmra.mrb[80].mxu0 %v9172_v59  ;;  %v9178_v59 = vld [vmem:[%s15192_s2 + $0xd8] sm:$0xff]  }
 0x221   :  { %v1152_v12 = vadd.f32 %v10733_v46, %v1084_v60  ;;  %v584_v7 = vpop.permute.xlu1 %583  ;;  %8541 = vmatprep.mubr.bf16.mxu0 %v9173_v30  ;;  %v9179_v30 = vld [vmem:[%s15192_s2 + $0xe0] sm:$0xff]  }
 0x222   :  { %v10778_v56 = vpop.f32.mrb[16].mxu0  ;;  %v697_v54 = vmul.f32 %v10337_v31, %v584_v7 }
 0x223   :  { %15642 = vst [vmem:[#allocation27_spill] sm:$0xff] %v10778_v56  ;;  %v10780_v48 = vpop.f32.mrb[17].mxu0  ;;  %v1216_v9 = vmax.f32 %v1152_v12, 0.0 }
 0x224   :  { %15643 = vst [vmem:[#allocation28_spill] sm:$0xff] %v10780_v48  ;;  %v10782_v62 = vpop.f32.mrb[18].mxu0 }
 0x225   :  { %15644 = vst [vmem:[#allocation29_spill] sm:$0xff] %v10782_v62  ;;  %v10788_v13 = vpop.f32.mrb[19].mxu0  ;;  %v1254_v16 = vpack.c.bf16 %v1216_v9, %v1215_v57  ;;  %v1219_v9 = vmax.f32 %v1155_v61, 0.0 }
 0x226   :  { %15645 = vst [vmem:[#allocation30_spill] sm:$0xff] %v10788_v13  ;;  %v919_v47 = vpop.permute.xlu1 %918 }
 0x227   :  { %v1021_v23 = vmul.f32 %v10326_v29, %v919_v47  ;;  %8466 = vmatmul.mubr.bf16.gmra.mrb[12].mxu1 %v1254_v16  ;;  %v9180_v16 = vld [vmem:[%s15192_s2 + $0xe8] sm:$0xff]  }
 0x228   :  { %8542 = vmatmul.mubr.bf16.gmra.mrb[84].mxu0 %v9174_v6 }
 0x229   :  { %v1085_v40 = vadd.f32 %v1021_v23, %v697_v54  ;;  %8545 = vmatprep.mubr.bf16.mxu0 %v9175_v52 }
 0x22a   :  { %v923_v3 = vpop.permute.xlu1 %922 }
 0x22b   :  { %v1153_v11 = vadd.f32 %v10733_v46, %v1085_v40  ;;  %v1022_v34 = vmul.f32 %v10326_v29, %v923_v3  ;;  %v9181_v40 = vld [vmem:[%s15192_s2 + $0xf0] sm:$0xff]   ;;  %s9833_s2 = smov [#allocation14]  }
 0x22c   :  { %s7909_s16 = sshll.u32 %s9833_s2, 4  ;;  %s7910_s16 = int_to_ptr.vmem [resolvable:$true] %s7909_s16 }
 0x22d   :  { %v1086_v20 = vadd.f32 %v1022_v34, %v698_v26  ;;  %v1217_v50 = vmax.f32 %v1153_v11, 0.0  ;;  %p9793_p7 = scmp.lt.s32.totalorder %s7910_s16, %s7910_s16 }
 0x22f   :  { %v1154_v5 = vadd.f32 %v10733_v46, %v1086_v20  ;;  %v599_v10 = vpop.permute.xlu1 %598 }
 0x230   :  { %8546 = vmatmul.mubr.bf16.gmra.mrb[88].mxu0 %v9176_v24  ;;  %v700_v27 = vmul.f32 %v10337_v31, %v599_v10 }
 0x231   :  { %v1218_v39 = vmax.f32 %v1154_v5, 0.0  ;;  %8549 = vmatprep.mubr.bf16.mxu0 %v9177_v37  ;;  %v943_v37 = vpop.permute.xlu0 %942 }
 0x232   :  { %v1027_v10 = vmul.f32 %v10326_v29, %v943_v37 }
 0x233   :  { %v1255_v17 = vpack.c.bf16 %v1218_v39, %v1217_v50 }
 0x234   :  { %v931_v53 = vpop.permute.xlu1 %930 }
 0x235   :  { %v1024_v0 = vmul.f32 %v10326_v29, %v931_v53  ;;  %8469 = vmatprep.mubr.bf16.mxu1 %v1255_v17  ;;  %v959_v37 = vpop.permute.xlu0 %958 }
 0x237   :  { %v1088_v33 = vadd.f32 %v1024_v0, %v700_v27  ;;  %v1091_v27 = vadd.f32 %v1027_v10, %v703_v45 }
 0x238   :  { %8550 = vmatmul.mubr.bf16.gmra.mrb[92].mxu0 %v9178_v59 }
 0x239   :  { %v1156_v60 = vadd.f32 %v10733_v46, %v1088_v33  ;;  %v604_v12 = vpop.permute.xlu1 %603  ;;  %8553 = vmatprep.mubr.bf16.mxu0 %v9179_v30  ;;  %v1159_v30 = vadd.f32 %v10733_v46, %v1091_v27 }
 0x23a   :  { %v10818_v7 = vpop.f32.mrb[20].mxu0  ;;  %v701_v52 = vmul.f32 %v10337_v31, %v604_v12 }
 0x23b   :  { %15646 = vst [vmem:[#allocation31_spill] sm:$0xff] %v10818_v7  ;;  %v10820_v57 = vpop.f32.mrb[21].mxu0  ;;  %v1220_v6 = vmax.f32 %v1156_v60, 0.0  ;;  %v1223_v55 = vmax.f32 %v1159_v30, 0.0 }
 0x23c   :  { %15647 = vst [vmem:[#allocation32_spill] sm:$0xff] %v10820_v57  ;;  %v10822_v54 = vpop.f32.mrb[22].mxu0 }
 0x23d   :  { %15648 = vst [vmem:[#allocation33_spill] sm:$0xff] %v10822_v54  ;;  %v10828_v47 = vpop.f32.mrb[23].mxu0  ;;  %v1256_v23 = vpack.c.bf16 %v1220_v6, %v1219_v9 }
 0x23e   :  { %15649 = vst [vmem:[#allocation34_spill] sm:$0xff] %v10828_v47  ;;  %v935_v3 = vpop.permute.xlu1 %934 }
 0x23f   :  { %v1025_v26 = vmul.f32 %v10326_v29, %v935_v3  ;;  %8470 = vmatmul.mubr.bf16.gmra.mrb[16].mxu1 %v1256_v23 }
 0x240   :  { %8554 = vmatmul.mubr.bf16.gmra.mrb[96].mxu0 %v9180_v16 }
 0x241   :  { %v1089_v11 = vadd.f32 %v1025_v26, %v701_v52  ;;  %8557 = vmatprep.mubr.bf16.mxu0 %v9181_v40 }
 0x242   :  { %v939_v34 = vpop.permute.xlu1 %938 }
 0x243   :  { %v1157_v24 = vadd.f32 %v10733_v46, %v1089_v11  ;;  %v1026_v20 = vmul.f32 %v10326_v29, %v939_v34 }
 0x245   :  { %v1090_v5 = vadd.f32 %v1026_v20, %v702_v15  ;;  %v1221_v39 = vmax.f32 %v1157_v24, 0.0  ;;  %v706_v15 = vmul.f32 %v10337_v31, %v10600_v63 }
 0x247   :  { %v1158_v50 = vadd.f32 %v10733_v46, %v1090_v5  ;;  %v619_v49 = vpop.permute.xlu1 %618  ;;  %v1031_v5 = vmul.f32 %v10326_v29, %v959_v37 }
 0x248   :  { %8558 = vmatmul.mubr.bf16.gmra.mrb[100].mxu0 %v9182_v44  ;;  %v704_v17 = vmul.f32 %v10337_v31, %v619_v49 }
 0x249   :  { %v1222_v14 = vmax.f32 %v1158_v50, 0.0 }
 0x24b   :  { %v1257_v53 = vpack.c.bf16 %v1222_v14, %v1221_v39  ;;  %v707_v39 = vmul.f32 %v10337_v31, %v10610_v21 }
 0x24c   :  { %v947_v59 = vpop.permute.xlu1 %946 }
 0x24d   :  { %v1028_v0 = vmul.f32 %v10326_v29, %v947_v59  ;;  %8473 = vmatprep.mubr.bf16.mxu1 %v1257_v53  ;;  %v1095_v14 = vadd.f32 %v1031_v5, %v707_v39 }
 0x24f   :  { %v1092_v61 = vadd.f32 %v1028_v0, %v704_v17  ;;  %v1163_v59 = vadd.f32 %v10733_v46, %v1095_v14 }
 0x251   :  { %v1160_v33 = vadd.f32 %v10733_v46, %v1092_v61  ;;  %v624_v60 = vpop.permute.xlu1 %623 }
 0x252   :  { %v10849_v12 = vpop.f32.mrb[24].mxu0  ;;  %v705_v52 = vmul.f32 %v10337_v31, %v624_v60  ;;  %v1227_v60 = vmax.f32 %v1163_v59, 0.0 }
 0x253   :  { %15650 = vst [vmem:[#allocation35_spill] sm:$0xff] %v10849_v12  ;;  %v10851_v9 = vpop.f32.mrb[25].mxu0  ;;  %v1224_v6 = vmax.f32 %v1160_v33, 0.0 }
 0x254   :  { %15651 = vst [vmem:[#allocation36_spill] sm:$0xff] %v10851_v9  ;;  %v10853_v16 = vpop.f32.mrb[26].mxu0 }
 0x255   :  { %15652 = vst [vmem:[#allocation37_spill] sm:$0xff] %v10853_v16  ;;  %v10856_v23 = vpop.f32.mrb[27].mxu0  ;;  %v1258_v40 = vpack.c.bf16 %v1224_v6, %v1223_v55 }
 0x256   :  { %15653 = vst [vmem:[#allocation38_spill] sm:$0xff] %v10856_v23  ;;  %v951_v3 = vpop.permute.xlu1 %950 }
 0x257   :  { %v1029_v26 = vmul.f32 %v10326_v29, %v951_v3  ;;  %8474 = vmatmul.mubr.bf16.gmra.mrb[20].mxu1 %v1258_v40 }
 0x259   :  { %v1093_v11 = vadd.f32 %v1029_v26, %v705_v52 }
 0x25a   :  { %v955_v34 = vpop.permute.xlu1 %954 }
 0x25b   :  { %v1161_v24 = vadd.f32 %v10733_v46, %v1093_v11  ;;  %v1030_v20 = vmul.f32 %v10326_v29, %v955_v34 }
 0x25d   :  { %v1094_v44 = vadd.f32 %v1030_v20, %v706_v15  ;;  %v1225_v49 = vmax.f32 %v1161_v24, 0.0 }
 0x25f   :  { %v1162_v10 = vadd.f32 %v10733_v46, %v1094_v44  ;;  %v639_v50 = vpop.permute.xlu1 %638 }
 0x260   :  { %v708_v27 = vmul.f32 %v10337_v31, %v639_v50 }
 0x261   :  { %v1226_v45 = vmax.f32 %v1162_v10, 0.0 }
 0x263   :  { %v1259_v63 = vpack.c.bf16 %v1226_v45, %v1225_v49 }
 0x264   :  { %v963_v17 = vpop.permute.xlu1 %962 }
 0x265   :  { %v1032_v53 = vmul.f32 %v10326_v29, %v963_v17  ;;  %8477 = vmatprep.mubr.bf16.mxu1 %v1259_v63 }
 0x267   :  { %v1096_v0 = vadd.f32 %v1032_v53, %v708_v27 }
 0x269   :  { %v1164_v30 = vadd.f32 %v10733_v46, %v1096_v0 }
 0x26a   :  { %v10871_v61 = vpop.f32.mrb[28].mxu0 }
 0x26b   :  { %15654 = vst [vmem:[#allocation39_spill] sm:$0xff] %v10871_v61  ;;  %v10873_v33 = vpop.f32.mrb[29].mxu0  ;;  %v1228_v21 = vmax.f32 %v1164_v30, 0.0 }
 0x26c   :  { %15655 = vst [vmem:[#allocation40_spill] sm:$0xff] %v10873_v33  ;;  %v10875_v55 = vpop.f32.mrb[30].mxu0 }
 0x26d   :  { %15656 = vst [vmem:[#allocation41_spill] sm:$0xff] %v10875_v55  ;;  %v10877_v6 = vpop.f32.mrb[31].mxu0  ;;  %v1260_v31 = vpack.c.bf16 %v1228_v21, %v1227_v60 }
 0x26e   :  { %15657 = vst [vmem:[#allocation42_spill] sm:$0xff] %v10877_v6 }
 0x26f   :  { %8478 = vmatmul.mubr.bf16.gmra.mrb[24].mxu1 %v1260_v31 }
 0x282   :  { %v10879_v52 = vpop.f32.mrb[32].mxu0 }
 0x283   :  { %15658 = vst [vmem:[#allocation43_spill] sm:$0xff] %v10879_v52  ;;  %v10881_v29 = vpop.f32.mrb[33].mxu0 }
 0x284   :  { %15659 = vst [vmem:[#allocation44_spill] sm:$0xff] %v10881_v29  ;;  %v10883_v40 = vpop.f32.mrb[34].mxu0 }
 0x285   :  { %15660 = vst [vmem:[#allocation45_spill] sm:$0xff] %v10883_v40  ;;  %v10885_v3 = vpop.f32.mrb[35].mxu0 }
 0x286   :  { %15661 = vst [vmem:[#allocation46_spill] sm:$0xff] %v10885_v3  ;;  %v1619_v46 = vpop.xlane.xlu0 %1618 }
 0x287   :  { %v10887_v26 = vmul.f32 0.03125, %v1619_v46 }
 0x289   :  { %15662 = vst [vmem:[#allocation47_spill] sm:$0xff] %v10887_v26  ;;  %v10891_v11 = vsub.f32 %v10691_v28, %v10887_v26 }
 0x28b   :  { %15663 = vst [vmem:[#allocation48_spill] sm:$0xff] %v10891_v11 }
 0x296   :  { %v1621_v34 = vpop.xlane.xlu1 %1620 }
 0x297   :  { %v10893_v15 = vmul.f32 0.03125, %v1621_v34 }
 0x299   :  { %15664 = vst [vmem:[#allocation49_spill] sm:$0xff] %v10893_v15  ;;  %v10897_v24 = vsub.f32 %v10700_v19, %v10893_v15 }
 0x29a   :  { %v10899_v20 = vpop.f32.mrb[36].mxu0 }
 0x29b   :  { %15665 = vst [vmem:[#allocation50_spill] sm:$0xff] %v10897_v24  ;;  %15666 = vst [vmem:[#allocation51_spill] sm:$0xff] %v10899_v20  ;;  %v10901_v37 = vpop.f32.mrb[37].mxu0 }
 0x29c   :  { %15667 = vst [vmem:[#allocation52_spill] sm:$0xff] %v10901_v37  ;;  %v10903_v44 = vpop.f32.mrb[38].mxu0 }
 0x29d   :  { %15668 = vst [vmem:[#allocation53_spill] sm:$0xff] %v10903_v44  ;;  %v10905_v5 = vpop.f32.mrb[39].mxu0 }
 0x29e   :  { %15669 = vst [vmem:[#allocation54_spill] sm:$0xff] %v10905_v5 }
 0x2a2   :  { %v10907_v10 = vpop.f32.mrb[40].mxu0 }
 0x2a3   :  { %15670 = vst [vmem:[#allocation55_spill] sm:$0xff] %v10907_v10  ;;  %v10909_v50 = vpop.f32.mrb[41].mxu0 }
 0x2a4   :  { %15671 = vst [vmem:[#allocation56_spill] sm:$0xff] %v10909_v50  ;;  %v10911_v28 = vpop.f32.mrb[42].mxu0 }
 0x2a5   :  { %15672 = vst [vmem:[#allocation57_spill] sm:$0xff] %v10911_v28  ;;  %v10913_v49 = vpop.f32.mrb[43].mxu0 }
 0x2a6   :  { %15673 = vst [vmem:[#allocation58_spill] sm:$0xff] %v10913_v49 }
 0x2aa   :  { %v10915_v39 = vpop.f32.mrb[44].mxu0 }
 0x2ab   :  { %15674 = vst [vmem:[#allocation59_spill] sm:$0xff] %v10915_v39  ;;  %v10917_v19 = vpop.f32.mrb[45].mxu0 }
 0x2ac   :  { %15675 = vst [vmem:[#allocation60_spill] sm:$0xff] %v10917_v19  ;;  %v10919_v45 = vpop.f32.mrb[46].mxu0 }
 0x2ad   :  { %15676 = vst [vmem:[#allocation61_spill] sm:$0xff] %v10919_v45  ;;  %v10921_v14 = vpop.f32.mrb[47].mxu0 }
 0x2ae   :  { %15677 = vst [vmem:[#allocation62_spill] sm:$0xff] %v10921_v14 }
 0x2b2   :  { %v10923_v27 = vpop.f32.mrb[0].mxu1 }
 0x2b3   :  { %v10925_v63 = vpop.f32.mrb[1].mxu1  ;;  %1690 = vadd.xlane.f32.xlu0 %v10923_v27  ;;  %v10928_v17 = vpop.f32.mrb[48].mxu0 }
 0x2b4   :  { %15678 = vst [vmem:[#allocation63_spill] sm:$0xff] %v10928_v17  ;;  %v10930_v53 = vpop.f32.mrb[2].mxu1  ;;  %v10932_v59 = vpop.f32.mrb[49].mxu0 }
 0x2b5   :  { %15679 = vst [vmem:[#allocation64_spill] sm:$0xff] %v10930_v53  ;;  %v10934_v0 = vpop.f32.mrb[3].mxu1  ;;  %1692 = vadd.xlane.f32.xlu1 %v10930_v53  ;;  %v10937_v30 = vpop.f32.mrb[50].mxu0 }
 0x2b6   :  { %v10939_v60 = vpop.f32.mrb[51].mxu0 }
 0x2b7   :  { %15680 = vst [vmem:[#allocation65_spill] sm:$0xff] %v10939_v60  ;;  %1614 = vadd.xlane.f32.xlu0 %v10694_v32 }
 0x2b9   :  { %1616 = vadd.xlane.f32.xlu1 %v10702_v36 }
 0x2bb   :  { %1686 = vadd.xlane.f32.xlu0 %v10925_v63  ;;  %v10944_v21 = vpop.f32.mrb[52].mxu0 }
 0x2bc   :  { %v10946_v31 = vpop.f32.mrb[53].mxu0 }
 0x2bd   :  { %15681 = vst [vmem:[#allocation66_spill] sm:$0xff] %v10946_v31  ;;  %1688 = vadd.xlane.f32.xlu1 %v10934_v0  ;;  %v10949_v46 = vpop.f32.mrb[54].mxu0 }
 0x2be   :  { %15682 = vst [vmem:[#allocation67_spill] sm:$0xff] %v10949_v46  ;;  %v10951_v34 = vpop.f32.mrb[55].mxu0 }
 0x2bf   :  { %15683 = vst [vmem:[#allocation68_spill] sm:$0xff] %v10951_v34  ;;  %1626 = vadd.xlane.f32.xlu0 %v10714_v8 }
 0x2c1   :  { %1628 = vadd.xlane.f32.xlu1 %v10719_v43 }
 0x2c3   :  { %1622 = vadd.xlane.f32.xlu0 %v10716_v35  ;;  %v10956_v1 = vpop.f32.mrb[56].mxu0 }
 0x2c4   :  { %v10958_v25 = vpop.f32.mrb[57].mxu0 }
 0x2c5   :  { %1624 = vadd.xlane.f32.xlu1 %v10721_v42  ;;  %v10961_v22 = vpop.f32.mrb[58].mxu0 }
 0x2c6   :  { %v10963_v51 = vpop.f32.mrb[59].mxu0 }
 0x2c7   :  { %1634 = vadd.xlane.f32.xlu0 %v10738_v2 }
 0x2c9   :  { %1636 = vadd.xlane.f32.xlu1 %v10742_v4 }
 0x2ca   :  { %v10967_v41 = vpop.f32.mrb[4].mxu1 }
 0x2cb   :  { %15684 = vst [vmem:[#allocation69_spill] sm:$0xff] %v10967_v41  ;;  %v10969_v18 = vpop.f32.mrb[5].mxu1  ;;  %1630 = vadd.xlane.f32.xlu0 %v10740_v38  ;;  %v10972_v53 = vpop.f32.mrb[60].mxu0 }
 0x2cc   :  { %15685 = vst [vmem:[#allocation70_spill] sm:$0xff] %v10969_v18  ;;  %v10974_v15 = vpop.f32.mrb[6].mxu1  ;;  %v10976_v26 = vpop.f32.mrb[61].mxu0 }
 0x2cd   :  { %15686 = vst [vmem:[#allocation71_spill] sm:$0xff] %v10974_v15  ;;  %v10978_v42 = vpop.f32.mrb[7].mxu1  ;;  %1632 = vadd.xlane.f32.xlu1 %v10748_v58  ;;  %v10981_v35 = vpop.f32.mrb[62].mxu0 }
 0x2ce   :  { %15687 = vst [vmem:[#allocation72_spill] sm:$0xff] %v10978_v42  ;;  %v10983_v24 = vpop.f32.mrb[63].mxu0 }
 0x2cf   :  { %1642 = vadd.xlane.f32.xlu0 %v10778_v56 }
 0x2d1   :  { %1644 = vadd.xlane.f32.xlu1 %v10782_v62 }
 0x2d3   :  { %1638 = vadd.xlane.f32.xlu0 %v10780_v48  ;;  %v10988_v41 = vpop.f32.mrb[64].mxu0 }
 0x2d4   :  { %v10990_v18 = vpop.f32.mrb[65].mxu0 }
 0x2d5   :  { %1640 = vadd.xlane.f32.xlu1 %v10788_v13  ;;  %v10993_v15 = vpop.f32.mrb[66].mxu0 }
 0x2d6   :  { %v10995_v42 = vpop.f32.mrb[67].mxu0 }
 0x2d7   :  { %15688 = vst [vmem:[#allocation73_spill] sm:$0xff] %v10995_v42  ;;  %1650 = vadd.xlane.f32.xlu0 %v10818_v7 }
 0x2d9   :  { %1652 = vadd.xlane.f32.xlu1 %v10822_v54 }
 0x2db   :  { %1646 = vadd.xlane.f32.xlu0 %v10820_v57  ;;  %v11000_v11 = vpop.f32.mrb[68].mxu0 }
 0x2dc   :  { %v11002_v36 = vpop.f32.mrb[69].mxu0 }
 0x2dd   :  { %1648 = vadd.xlane.f32.xlu1 %v10828_v47  ;;  %v11005_v32 = vpop.f32.mrb[70].mxu0 }
 0x2de   :  { %15689 = vst [vmem:[#allocation74_spill] sm:$0xff] %v11005_v32  ;;  %v11007_v48 = vpop.f32.mrb[71].mxu0 }
 0x2df   :  { %15690 = vst [vmem:[#allocation75_spill] sm:$0xff] %v11007_v48  ;;  %1658 = vadd.xlane.f32.xlu0 %v10849_v12 }
 0x2e1   :  { %1660 = vadd.xlane.f32.xlu1 %v10853_v16 }
 0x2e2   :  { %v11011_v13 = vpop.f32.mrb[8].mxu1 }
 0x2e3   :  { %15691 = vst [vmem:[#allocation76_spill] sm:$0xff] %v11011_v13  ;;  %v11013_v7 = vpop.f32.mrb[9].mxu1  ;;  %1654 = vadd.xlane.f32.xlu0 %v10851_v9  ;;  %v11016_v57 = vpop.f32.mrb[72].mxu0 }
 0x2e4   :  { %15692 = vst [vmem:[#allocation77_spill] sm:$0xff] %v11013_v7  ;;  %15693 = vst [vmem:[#allocation78_spill] sm:$0xff] %v11016_v57  ;;  %v11018_v54 = vpop.f32.mrb[10].mxu1  ;;  %v11020_v62 = vpop.f32.mrb[73].mxu0 }
 0x2e5   :  { %15694 = vst [vmem:[#allocation79_spill] sm:$0xff] %v11018_v54  ;;  %15695 = vst [vmem:[#allocation80_spill] sm:$0xff] %v11020_v62  ;;  %v11022_v47 = vpop.f32.mrb[11].mxu1  ;;  %1656 = vadd.xlane.f32.xlu1 %v10856_v23  ;;  %v11025_v56 = vpop.f32.mrb[74].mxu0 }
 0x2e6   :  { %15696 = vst [vmem:[#allocation81_spill] sm:$0xff] %v11022_v47  ;;  %15697 = vst [vmem:[#allocation82_spill] sm:$0xff] %v11025_v56  ;;  %v11027_v12 = vpop.f32.mrb[75].mxu0 }
 0x2e7   :  { %15698 = vst [vmem:[#allocation83_spill] sm:$0xff] %v11027_v12  ;;  %1666 = vadd.xlane.f32.xlu0 %v10871_v61 }
 0x2e9   :  { %1668 = vadd.xlane.f32.xlu1 %v10875_v55 }
 0x2eb   :  { %1662 = vadd.xlane.f32.xlu0 %v10873_v33  ;;  %v11032_v13 = vpop.f32.mrb[76].mxu0 }
 0x2ec   :  { %15699 = vst [vmem:[#allocation84_spill] sm:$0xff] %v11032_v13  ;;  %v11034_v7 = vpop.f32.mrb[77].mxu0 }
 0x2ed   :  { %15700 = vst [vmem:[#allocation85_spill] sm:$0xff] %v11034_v7  ;;  %1664 = vadd.xlane.f32.xlu1 %v10877_v6  ;;  %v11037_v54 = vpop.f32.mrb[78].mxu0 }
 0x2ee   :  { %15701 = vst [vmem:[#allocation86_spill] sm:$0xff] %v11037_v54  ;;  %v11039_v47 = vpop.f32.mrb[79].mxu0 }
 0x2ef   :  { %15702 = vst [vmem:[#allocation87_spill] sm:$0xff] %v11039_v47  ;;  %1674 = vadd.xlane.f32.xlu0 %v10879_v52 }
 0x2f1   :  { %1676 = vadd.xlane.f32.xlu1 %v10883_v40 }
 0x2f3   :  { %1670 = vadd.xlane.f32.xlu0 %v10881_v29  ;;  %v11044_v61 = vpop.f32.mrb[80].mxu0 }
 0x2f4   :  { %15703 = vst [vmem:[#allocation88_spill] sm:$0xff] %v11044_v61  ;;  %v11046_v55 = vpop.f32.mrb[81].mxu0 }
 0x2f5   :  { %15704 = vst [vmem:[#allocation89_spill] sm:$0xff] %v11046_v55  ;;  %1672 = vadd.xlane.f32.xlu1 %v10885_v3  ;;  %v11049_v33 = vpop.f32.mrb[82].mxu0 }
 0x2f6   :  { %15705 = vst [vmem:[#allocation90_spill] sm:$0xff] %v11049_v33  ;;  %v11051_v23 = vpop.f32.mrb[83].mxu0 }
 0x2f7   :  { %15706 = vst [vmem:[#allocation91_spill] sm:$0xff] %v11051_v23  ;;  %1682 = vadd.xlane.f32.xlu0 %v10899_v20 }
 0x2f9   :  { %1684 = vadd.xlane.f32.xlu1 %v10903_v44 }
 0x2fa   :  { %v11055_v6 = vpop.f32.mrb[12].mxu1 }
 0x2fb   :  { %15707 = vst [vmem:[#allocation92_spill] sm:$0xff] %v11055_v6  ;;  %v11057_v52 = vpop.f32.mrb[13].mxu1  ;;  %1678 = vadd.xlane.f32.xlu0 %v10901_v37  ;;  %v11060_v29 = vpop.f32.mrb[84].mxu0 }
 0x2fc   :  { %15708 = vst [vmem:[#allocation93_spill] sm:$0xff] %v11057_v52  ;;  %15709 = vst [vmem:[#allocation94_spill] sm:$0xff] %v11060_v29  ;;  %v11062_v40 = vpop.f32.mrb[14].mxu1  ;;  %v11064_v9 = vpop.f32.mrb[85].mxu0 }
 0x2fd   :  { %15710 = vst [vmem:[#allocation95_spill] sm:$0xff] %v11062_v40  ;;  %15711 = vst [vmem:[#allocation96_spill] sm:$0xff] %v11064_v9  ;;  %v11066_v3 = vpop.f32.mrb[15].mxu1  ;;  %1680 = vadd.xlane.f32.xlu1 %v10905_v5  ;;  %v11069_v16 = vpop.f32.mrb[86].mxu0 }
 0x2fe   :  { %15712 = vst [vmem:[#allocation97_spill] sm:$0xff] %v11066_v3  ;;  %15713 = vst [vmem:[#allocation98_spill] sm:$0xff] %v11069_v16  ;;  %v11071_v20 = vpop.f32.mrb[87].mxu0 }
 0x2ff   :  { %15714 = vst [vmem:[#allocation99_spill] sm:$0xff] %v11071_v20  ;;  %3387 = vadd.xlane.f32.xlu0 %v10907_v10 }
 0x301   :  { %3383 = vadd.xlane.f32.xlu1 %v10909_v50 }
 0x303   :  { %3385 = vadd.xlane.f32.xlu0 %v10913_v49  ;;  %v11076_v6 = vpop.f32.mrb[88].mxu0 }
 0x304   :  { %15715 = vst [vmem:[#allocation100_spill] sm:$0xff] %v11076_v6  ;;  %v11078_v52 = vpop.f32.mrb[89].mxu0 }
 0x305   :  { %15716 = vst [vmem:[#allocation101_spill] sm:$0xff] %v11078_v52  ;;  %3389 = vadd.xlane.f32.xlu1 %v10911_v28  ;;  %v11081_v40 = vpop.f32.mrb[90].mxu0 }
 0x306   :  { %15717 = vst [vmem:[#allocation102_spill] sm:$0xff] %v11081_v40  ;;  %v11083_v3 = vpop.f32.mrb[91].mxu0 }
 0x307   :  { %15718 = vst [vmem:[#allocation103_spill] sm:$0xff] %v11083_v3  ;;  %3395 = vadd.xlane.f32.xlu0 %v10915_v39 }
 0x309   :  { %3397 = vadd.xlane.f32.xlu1 %v10919_v45 }
 0x30b   :  { %3391 = vadd.xlane.f32.xlu0 %v10917_v19  ;;  %v11088_v10 = vpop.f32.mrb[92].mxu0 }
 0x30c   :  { %15719 = vst [vmem:[#allocation104_spill] sm:$0xff] %v11088_v10  ;;  %v11090_v50 = vpop.f32.mrb[93].mxu0 }
 0x30d   :  { %15720 = vst [vmem:[#allocation105_spill] sm:$0xff] %v11090_v50  ;;  %3393 = vadd.xlane.f32.xlu1 %v10921_v14  ;;  %v11093_v49 = vpop.f32.mrb[94].mxu0 }
 0x30e   :  { %15721 = vst [vmem:[#allocation106_spill] sm:$0xff] %v11093_v49  ;;  %v11095_v5 = vpop.f32.mrb[95].mxu0 }
 0x30f   :  { %15722 = vst [vmem:[#allocation107_spill] sm:$0xff] %v11095_v5  ;;  %3403 = vadd.xlane.f32.xlu0 %v10928_v17 }
 0x311   :  { %3405 = vadd.xlane.f32.xlu1 %v10937_v30 }
 0x312   :  { %v11099_v28 = vpop.f32.mrb[16].mxu1 }
 0x313   :  { %15723 = vst [vmem:[#allocation108_spill] sm:$0xff] %v11099_v28  ;;  %v11101_v39 = vpop.f32.mrb[17].mxu1  ;;  %3399 = vadd.xlane.f32.xlu0 %v10932_v59  ;;  %v11104_v45 = vpop.f32.mrb[96].mxu0 }
 0x314   :  { %15724 = vst [vmem:[#allocation109_spill] sm:$0xff] %v11101_v39  ;;  %15725 = vst [vmem:[#allocation110_spill] sm:$0xff] %v11104_v45  ;;  %v11106_v19 = vpop.f32.mrb[18].mxu1  ;;  %v11108_v37 = vpop.f32.mrb[97].mxu0 }
 0x315   :  { %15726 = vst [vmem:[#allocation111_spill] sm:$0xff] %v11106_v19  ;;  %15727 = vst [vmem:[#allocation112_spill] sm:$0xff] %v11108_v37  ;;  %v11110_v14 = vpop.f32.mrb[19].mxu1  ;;  %3401 = vadd.xlane.f32.xlu1 %v10939_v60  ;;  %v11113_v44 = vpop.f32.mrb[98].mxu0 }
 0x316   :  { %15728 = vst [vmem:[#allocation113_spill] sm:$0xff] %v11110_v14  ;;  %15729 = vst [vmem:[#allocation114_spill] sm:$0xff] %v11113_v44  ;;  %v11115_v17 = vpop.f32.mrb[99].mxu0 }
 0x317   :  { %15730 = vst [vmem:[#allocation115_spill] sm:$0xff] %v11115_v17  ;;  %3411 = vadd.xlane.f32.xlu0 %v10944_v21 }
 0x319   :  { %3413 = vadd.xlane.f32.xlu1 %v10949_v46 }
 0x31b   :  { %3407 = vadd.xlane.f32.xlu0 %v10946_v31  ;;  %v11120_v28 = vpop.f32.mrb[100].mxu0 }
 0x31c   :  { %15731 = vst [vmem:[#allocation116_spill] sm:$0xff] %v11120_v28  ;;  %v11122_v39 = vpop.f32.mrb[101].mxu0 }
 0x31d   :  { %15732 = vst [vmem:[#allocation117_spill] sm:$0xff] %v11122_v39  ;;  %3409 = vadd.xlane.f32.xlu1 %v10951_v34  ;;  %v11125_v19 = vpop.f32.mrb[102].mxu0 }
 0x31e   :  { %15733 = vst [vmem:[#allocation118_spill] sm:$0xff] %v11125_v19  ;;  %v11127_v14 = vpop.f32.mrb[103].mxu0 }
 0x31f   :  { %15734 = vst [vmem:[#allocation119_spill] sm:$0xff] %v11127_v14  ;;  %3419 = vadd.xlane.f32.xlu0 %v10956_v1 }
 0x321   :  { %3421 = vadd.xlane.f32.xlu1 %v10961_v22 }
 0x323   :  { %3415 = vadd.xlane.f32.xlu0 %v10958_v25 }
 0x325   :  { %3417 = vadd.xlane.f32.xlu1 %v10963_v51 }
 0x327   :  { %3427 = vadd.xlane.f32.xlu0 %v10972_v53 }
 0x329   :  { %3429 = vadd.xlane.f32.xlu1 %v10981_v35 }
 0x32a   :  { %v11135_v46 = vpop.f32.mrb[20].mxu1 }
 0x32b   :  { %15735 = vst [vmem:[#allocation120_spill] sm:$0xff] %v11135_v46  ;;  %v11137_v31 = vpop.f32.mrb[21].mxu1  ;;  %3423 = vadd.xlane.f32.xlu0 %v10976_v26 }
 0x32c   :  { %15736 = vst [vmem:[#allocation121_spill] sm:$0xff] %v11137_v31  ;;  %v11140_v34 = vpop.f32.mrb[22].mxu1 }
 0x32d   :  { %15737 = vst [vmem:[#allocation122_spill] sm:$0xff] %v11140_v34  ;;  %v11142_v60 = vpop.f32.mrb[23].mxu1  ;;  %3425 = vadd.xlane.f32.xlu1 %v10983_v24 }
 0x32e   :  { %15738 = vst [vmem:[#allocation123_spill] sm:$0xff] %v11142_v60 }
 0x32f   :  { %3435 = vadd.xlane.f32.xlu0 %v10988_v41 }
 0x331   :  { %3437 = vadd.xlane.f32.xlu1 %v10993_v15 }
 0x333   :  { %3431 = vadd.xlane.f32.xlu0 %v10990_v18 }
 0x335   :  { %3433 = vadd.xlane.f32.xlu1 %v10995_v42 }
 0x337   :  { %3443 = vadd.xlane.f32.xlu0 %v11000_v11 }
 0x339   :  { %3445 = vadd.xlane.f32.xlu1 %v11005_v32 }
 0x33b   :  { %3439 = vadd.xlane.f32.xlu0 %v11002_v36 }
 0x33d   :  { %3441 = vadd.xlane.f32.xlu1 %v11007_v48 }
 0x33f   :  { %3451 = vadd.xlane.f32.xlu0 %v11016_v57 }
 0x340   :  { %v1691_v34 = vpop.xlane.xlu0 %1690 }
 0x341   :  { %v11154_v60 = vmul.f32 0.03125, %v1691_v34  ;;  %3453 = vadd.xlane.f32.xlu1 %v11025_v56 }
 0x342   :  { %v11157_v46 = vpop.f32.mrb[24].mxu1  ;;  %v11159_v31 = vpop.xlane.xlu1 %1692 }
 0x343   :  { %15739 = vst [vmem:[#allocation124_spill] sm:$0xff] %v11157_v46  ;;  %v11161_v42 = vpop.f32.mrb[25].mxu1  ;;  %3447 = vadd.xlane.f32.xlu0 %v11020_v62  ;;  %v11166_v32 = vsub.f32 %v10923_v27, %v11154_v60 }
 0x344   :  { %15740 = vst [vmem:[#allocation125_spill] sm:$0xff] %v11161_v42  ;;  %v11168_v48 = vpop.f32.mrb[26].mxu1  ;;  %v11170_v57 = vpop.xlane.xlu0 %1614 }
 0x345   :  { %15741 = vst [vmem:[#allocation126_spill] sm:$0xff] %v11166_v32  ;;  %15742 = vst [vmem:[#allocation127_spill] sm:$0xff] %v11168_v48  ;;  %v11172_v34 = vpop.f32.mrb[27].mxu1  ;;  %3449 = vadd.xlane.f32.xlu1 %v11027_v12 }
 0x346   :  { %15743 = vst [vmem:[#allocation128_spill] sm:$0xff] %v11172_v34  ;;  %v11175_v56 = vpop.xlane.xlu1 %1616 }
 0x347   :  { %3459 = vadd.xlane.f32.xlu0 %v11032_v13 }
 0x348   :  { %v1687_v46 = vpop.xlane.xlu0 %1686 }
 0x349   :  { %v11178_v42 = vmul.f32 0.03125, %v1687_v46  ;;  %3461 = vadd.xlane.f32.xlu1 %v11037_v54 }
 0x34a   :  { %v1689_v62 = vpop.xlane.xlu1 %1688 }
 0x34b   :  { %15744 = vst [vmem:[#allocation129_spill] sm:$0xff] %v11178_v42  ;;  %v11181_v27 = vmul.f32 0.03125, %v1689_v62  ;;  %3455 = vadd.xlane.f32.xlu0 %v11034_v7  ;;  %v11186_v48 = vsub.f32 %v10925_v63, %v11178_v42 }
 0x34c   :  { %v1627_v34 = vpop.xlane.xlu0 %1626 }
 0x34d   :  { %15745 = vst [vmem:[#allocation130_spill] sm:$0xff] %v11181_v27  ;;  %15746 = vst [vmem:[#allocation131_spill] sm:$0xff] %v11186_v48  ;;  %v11188_v12 = vmul.f32 0.03125, %v1627_v34  ;;  %3457 = vadd.xlane.f32.xlu1 %v11039_v47  ;;  %v11193_v46 = vsub.f32 %v10934_v0, %v11181_v27 }
 0x34e   :  { %v1629_v13 = vpop.xlane.xlu1 %1628 }
 0x34f   :  { %15747 = vst [vmem:[#allocation132_spill] sm:$0xff] %v11193_v46  ;;  %v11195_v54 = vmul.f32 0.03125, %v1629_v13  ;;  %3467 = vadd.xlane.f32.xlu0 %v11044_v61  ;;  %v11200_v62 = vsub.f32 %v10714_v8, %v11188_v12 }
 0x350   :  { %v11202_v63 = vpop.xlane.xlu0 %1622 }
 0x351   :  { %15748 = vst [vmem:[#allocation133_spill] sm:$0xff] %v11200_v62  ;;  %3469 = vadd.xlane.f32.xlu1 %v11049_v33  ;;  %v11207_v34 = vsub.f32 %v10719_v43, %v11195_v54 }
 0x352   :  { %v11209_v47 = vpop.xlane.xlu1 %1624 }
 0x353   :  { %15749 = vst [vmem:[#allocation134_spill] sm:$0xff] %v11207_v34  ;;  %3463 = vadd.xlane.f32.xlu0 %v11046_v55 }
 0x354   :  { %v1635_v13 = vpop.xlane.xlu0 %1634 }
 0x355   :  { %v11212_v0 = vmul.f32 0.03125, %v1635_v13  ;;  %3465 = vadd.xlane.f32.xlu1 %v11051_v23 }
 0x356   :  { %v1637_v61 = vpop.xlane.xlu1 %1636 }
 0x357   :  { %v11215_v8 = vmul.f32 0.03125, %v1637_v61  ;;  %3475 = vadd.xlane.f32.xlu0 %v11060_v29  ;;  %v11220_v33 = vsub.f32 %v10738_v2, %v11212_v0 }
 0x358   :  { %v1631_v43 = vpop.xlane.xlu0 %1630 }
 0x359   :  { %15750 = vst [vmem:[#allocation135_spill] sm:$0xff] %v11220_v33  ;;  %v11222_v7 = vmul.f32 0.03125, %v1631_v43  ;;  %3477 = vadd.xlane.f32.xlu1 %v11069_v16  ;;  %v11227_v13 = vsub.f32 %v10742_v4, %v11215_v8 }
 0x35a   :  { %v1633_v55 = vpop.xlane.xlu1 %1632 }
 0x35b   :  { %15751 = vst [vmem:[#allocation136_spill] sm:$0xff] %v11227_v13  ;;  %v11229_v23 = vmul.f32 0.03125, %v1633_v55  ;;  %3471 = vadd.xlane.f32.xlu0 %v11064_v9  ;;  %v11234_v61 = vsub.f32 %v10740_v38, %v11222_v7  ;;  %v15754_v55 = vld [vmem:[#allocation27_spill] sm:$0xff] }
 0x35c   :  { %v1643_v2 = vpop.xlane.xlu0 %1642 }
 0x35d   :  { %15752 = vst [vmem:[#allocation137_spill] sm:$0xff] %v11234_v61  ;;  %v11236_v29 = vmul.f32 0.03125, %v1643_v2  ;;  %3473 = vadd.xlane.f32.xlu1 %v11071_v20  ;;  %v11241_v43 = vsub.f32 %v10748_v58, %v11229_v23  ;;  %v15756_v2 = vld [vmem:[#allocation29_spill] sm:$0xff] }
 0x35e   :  { %v1645_v4 = vpop.xlane.xlu1 %1644 }
 0x35f   :  { %15753 = vst [vmem:[#allocation138_spill] sm:$0xff] %v11241_v43  ;;  %v11243_v16 = vmul.f32 0.03125, %v1645_v4  ;;  %3483 = vadd.xlane.f32.xlu0 %v11076_v6  ;;  %v11248_v9 = vsub.f32 %v15754_v55, %v11236_v29  ;;  %v15758_v4 = vld [vmem:[#allocation28_spill] sm:$0xff] }
 0x360   :  { %v1639_v38 = vpop.xlane.xlu0 %1638 }
 0x361   :  { %15755 = vst [vmem:[#allocation27_spill] sm:$0xff] %v11248_v9  ;;  %v11250_v27 = vmul.f32 0.03125, %v1639_v38  ;;  %3485 = vadd.xlane.f32.xlu1 %v11081_v40  ;;  %v11255_v20 = vsub.f32 %v15756_v2, %v11243_v16  ;;  %v15761_v38 = vld [vmem:[#allocation30_spill] sm:$0xff] }
 0x362   :  { %v1641_v58 = vpop.xlane.xlu1 %1640 }
 0x363   :  { %15757 = vst [vmem:[#allocation29_spill] sm:$0xff] %v11255_v20  ;;  %v11257_v42 = vmul.f32 0.03125, %v1641_v58  ;;  %3479 = vadd.xlane.f32.xlu0 %v11078_v52  ;;  %v11262_v6 = vsub.f32 %v15758_v4, %v11250_v27  ;;  %v15764_v58 = vld [vmem:[#allocation31_spill] sm:$0xff] }
 0x364   :  { %v1651_v55 = vpop.xlane.xlu0 %1650 }
 0x365   :  { %15759 = vst [vmem:[#allocation28_spill] sm:$0xff] %v11262_v6  ;;  %v11264_v9 = vmul.f32 0.03125, %v1651_v55  ;;  %3481 = vadd.xlane.f32.xlu1 %v11083_v3  ;;  %v11269_v40 = vsub.f32 %v15761_v38, %v11257_v42  ;;  %v15767_v55 = vld [vmem:[#allocation33_spill] sm:$0xff] }
 0x366   :  { %v1653_v2 = vpop.xlane.xlu1 %1652 }
 0x367   :  { %15760 = vst [vmem:[#allocation139_spill] sm:$0xff] %v11264_v9  ;;  %15762 = vst [vmem:[#allocation30_spill] sm:$0xff] %v11269_v40  ;;  %v11271_v20 = vmul.f32 0.03125, %v1653_v2  ;;  %3491 = vadd.xlane.f32.xlu0 %v11088_v10  ;;  %v11276_v52 = vsub.f32 %v15764_v58, %v11264_v9  ;;  %v15770_v2 = vld [vmem:[#allocation32_spill] sm:$0xff] }
 0x368   :  { %v1647_v4 = vpop.xlane.xlu0 %1646 }
 0x369   :  { %15763 = vst [vmem:[#allocation140_spill] sm:$0xff] %v11271_v20  ;;  %15765 = vst [vmem:[#allocation31_spill] sm:$0xff] %v11276_v52  ;;  %v11278_v6 = vmul.f32 0.03125, %v1647_v4  ;;  %3493 = vadd.xlane.f32.xlu1 %v11093_v49  ;;  %v11283_v3 = vsub.f32 %v15767_v55, %v11271_v20  ;;  %v15773_v4 = vld [vmem:[#allocation34_spill] sm:$0xff] }
 0x36a   :  { %v1649_v38 = vpop.xlane.xlu1 %1648 }
 0x36b   :  { %15766 = vst [vmem:[#allocation141_spill] sm:$0xff] %v11278_v6  ;;  %15768 = vst [vmem:[#allocation33_spill] sm:$0xff] %v11283_v3  ;;  %v11285_v40 = vmul.f32 0.03125, %v1649_v38  ;;  %3487 = vadd.xlane.f32.xlu0 %v11090_v50  ;;  %v11290_v10 = vsub.f32 %v15770_v2, %v11278_v6  ;;  %v15776_v38 = vld [vmem:[#allocation35_spill] sm:$0xff] }
 0x36c   :  { %v1659_v58 = vpop.xlane.xlu0 %1658 }
 0x36d   :  { %15769 = vst [vmem:[#allocation142_spill] sm:$0xff] %v11285_v40  ;;  %15771 = vst [vmem:[#allocation32_spill] sm:$0xff] %v11290_v10  ;;  %v11292_v9 = vmul.f32 0.03125, %v1659_v58  ;;  %3489 = vadd.xlane.f32.xlu1 %v11095_v5  ;;  %v11297_v49 = vsub.f32 %v15773_v4, %v11285_v40  ;;  %v15779_v58 = vld [vmem:[#allocation37_spill] sm:$0xff] }
 0x36e   :  { %v1661_v55 = vpop.xlane.xlu1 %1660 }
 0x36f   :  { %15772 = vst [vmem:[#allocation143_spill] sm:$0xff] %v11292_v9  ;;  %15774 = vst [vmem:[#allocation34_spill] sm:$0xff] %v11297_v49  ;;  %v11299_v20 = vmul.f32 0.03125, %v1661_v55  ;;  %3499 = vadd.xlane.f32.xlu0 %v11104_v45  ;;  %v11304_v50 = vsub.f32 %v15776_v38, %v11292_v9  ;;  %v15782_v55 = vld [vmem:[#allocation36_spill] sm:$0xff]  ;;  %v11321_v9 = vmul.f32 0.03125, %v11170_v57 }
 0x370   :  { %v1655_v2 = vpop.xlane.xlu0 %1654 }
 0x371   :  { %15775 = vst [vmem:[#allocation144_spill] sm:$0xff] %v11299_v20  ;;  %15777 = vst [vmem:[#allocation35_spill] sm:$0xff] %v11304_v50  ;;  %v11306_v6 = vmul.f32 0.03125, %v1655_v2  ;;  %3501 = vadd.xlane.f32.xlu1 %v11113_v44  ;;  %v11311_v5 = vsub.f32 %v15779_v58, %v11299_v20  ;;  %v15785_v58 = vld [vmem:[#allocation38_spill] sm:$0xff]  ;;  %v11331_v20 = vmul.f32 0.03125, %v11175_v56  ;;  %v15793_v56 = vld [vmem:[#allocation41_spill] sm:$0xff] }
 0x372   :  { %v1657_v4 = vpop.xlane.xlu1 %1656 }
 0x373   :  { %15778 = vst [vmem:[#allocation145_spill] sm:$0xff] %v11306_v6  ;;  %15780 = vst [vmem:[#allocation37_spill] sm:$0xff] %v11311_v5  ;;  %v11313_v40 = vmul.f32 0.03125, %v1657_v4  ;;  %3495 = vadd.xlane.f32.xlu0 %v11108_v37  ;;  %v11318_v45 = vsub.f32 %v15782_v55, %v11306_v6  ;;  %v15788_v55 = vld [vmem:[#allocation39_spill] sm:$0xff] }
 0x374   :  { %v1667_v38 = vpop.xlane.xlu0 %1666 }
 0x375   :  { %15781 = vst [vmem:[#allocation146_spill] sm:$0xff] %v11313_v40  ;;  %15783 = vst [vmem:[#allocation36_spill] sm:$0xff] %v11318_v45  ;;  %v11323_v2 = vmul.f32 0.03125, %v1667_v38  ;;  %3497 = vadd.xlane.f32.xlu1 %v11115_v17  ;;  %v11328_v44 = vsub.f32 %v15785_v58, %v11313_v40  ;;  %v15791_v58 = vld [vmem:[#allocation23_spill] sm:$0xff] }
 0x376   :  { %v1669_v4 = vpop.xlane.xlu1 %1668  ;;  %v11345_v17 = vsub.f32 %v15791_v58, %v11321_v9 }
 0x377   :  { %15784 = vst [vmem:[#allocation147_spill] sm:$0xff] %v11323_v2  ;;  %15786 = vst [vmem:[#allocation38_spill] sm:$0xff] %v11328_v44  ;;  %v11333_v37 = vmul.f32 0.03125, %v1669_v4  ;;  %3507 = vadd.xlane.f32.xlu0 %v11120_v28  ;;  %v11338_v57 = vsub.f32 %v15788_v55, %v11323_v2  ;;  %v15796_v55 = vld [vmem:[#allocation24_spill] sm:$0xff] }
 0x378   :  { %v1663_v38 = vpop.xlane.xlu0 %1662  ;;  %15792 = vst [vmem:[#allocation23_spill] sm:$0xff] %v11345_v17  ;;  %v11356_v28 = vsub.f32 %v15796_v55, %v11331_v20 }
 0x379   :  { %15787 = vst [vmem:[#allocation148_spill] sm:$0xff] %v11333_v37  ;;  %15789 = vst [vmem:[#allocation39_spill] sm:$0xff] %v11338_v57  ;;  %v11340_v6 = vmul.f32 0.03125, %v1663_v38  ;;  %3509 = vadd.xlane.f32.xlu1 %v11125_v19  ;;  %v11349_v40 = vsub.f32 %v15793_v56, %v11333_v37  ;;  %v15798_v38 = vld [vmem:[#allocation40_spill] sm:$0xff]  ;;  %v1870_v56 = vmul.f32 %v11345_v17, %v11345_v17 }
 0x37a   :  { %v1665_v4 = vpop.xlane.xlu1 %1664  ;;  %15797 = vst [vmem:[#allocation24_spill] sm:$0xff] %v11356_v28  ;;  %v1871_v55 = vmul.f32 %v11356_v28, %v11356_v28  ;;  %v15807_v17 = vld [vmem:[#allocation48_spill] sm:$0xff]  ;;  %v15811_v28 = vld [vmem:[#allocation50_spill] sm:$0xff] }
 0x37b   :  { %15790 = vst [vmem:[#allocation149_spill] sm:$0xff] %v11340_v6  ;;  %15794 = vst [vmem:[#allocation41_spill] sm:$0xff] %v11349_v40  ;;  %v11351_v44 = vmul.f32 0.03125, %v1665_v4  ;;  %3503 = vadd.xlane.f32.xlu0 %v11122_v39  ;;  %v11360_v19 = vsub.f32 %v15798_v38, %v11340_v6  ;;  %v15801_v4 = vld [vmem:[#allocation42_spill] sm:$0xff]  ;;  %v15804_v38 = vld [vmem:[#allocation43_spill] sm:$0xff] }
 0x37c   :  { %v1675_v2 = vpop.xlane.xlu0 %1674 }
 0x37d   :  { %15795 = vst [vmem:[#allocation150_spill] sm:$0xff] %v11351_v44  ;;  %15799 = vst [vmem:[#allocation40_spill] sm:$0xff] %v11360_v19  ;;  %v11362_v58 = vmul.f32 0.03125, %v1675_v2  ;;  %3505 = vadd.xlane.f32.xlu1 %v11127_v14  ;;  %v11369_v37 = vsub.f32 %v15801_v4, %v11351_v44  ;;  %v1872_v19 = vmul.f32 %v15807_v17, %v15807_v17  ;;  %v15808_v4 = vld [vmem:[#allocation45_spill] sm:$0xff] }
 0x37e   :  { %v1677_v39 = vpop.xlane.xlu1 %1676 }
 0x37f   :  { %15800 = vst [vmem:[#allocation151_spill] sm:$0xff] %v11362_v58  ;;  %15802 = vst [vmem:[#allocation42_spill] sm:$0xff] %v11369_v37  ;;  %v11371_v40 = vmul.f32 0.03125, %v1677_v39  ;;  %1934 = vadd.xlane.f32.xlu0 %v1870_v56  ;;  %v11377_v2 = vsub.f32 %v15804_v38, %v11362_v58  ;;  %v1873_v37 = vmul.f32 %v15811_v28, %v15811_v28  ;;  %v15812_v38 = vld [vmem:[#allocation44_spill] sm:$0xff] }
 0x380   :  { %v1671_v6 = vpop.xlane.xlu0 %1670 }
 0x381   :  { %15803 = vst [vmem:[#allocation152_spill] sm:$0xff] %v11371_v40  ;;  %15805 = vst [vmem:[#allocation43_spill] sm:$0xff] %v11377_v2  ;;  %v11379_v14 = vmul.f32 0.03125, %v1671_v6  ;;  %1936 = vadd.xlane.f32.xlu1 %v1871_v55  ;;  %v11385_v44 = vsub.f32 %v15808_v4, %v11371_v40  ;;  %v11396_v55 = vmul.f32 0.03125, %v11202_v63  ;;  %v15815_v4 = vld [vmem:[#allocation46_spill] sm:$0xff]  ;;  %v15834_v2 = vld [vmem:[#allocation71_spill] sm:$0xff] }
 0x382   :  { %v1673_v39 = vpop.xlane.xlu1 %1672 }
 0x383   :  { %15806 = vst [vmem:[#allocation153_spill] sm:$0xff] %v11379_v14  ;;  %15809 = vst [vmem:[#allocation45_spill] sm:$0xff] %v11385_v44  ;;  %v11387_v56 = vmul.f32 0.03125, %v1673_v39  ;;  %1938 = vadd.xlane.f32.xlu0 %v1872_v19  ;;  %v11393_v58 = vsub.f32 %v15812_v38, %v11379_v14  ;;  %v11405_v19 = vmul.f32 0.03125, %v11209_v47  ;;  %v15818_v44 = vld [vmem:[#allocation70_spill] sm:$0xff]  ;;  %v15819_v38 = vld [vmem:[#allocation51_spill] sm:$0xff] }
 0x384   :  { %v1683_v6 = vpop.xlane.xlu0 %1682  ;;  %v15825_v47 = vld [vmem:[#allocation53_spill] sm:$0xff] }
 0x385   :  { %15810 = vst [vmem:[#allocation154_spill] sm:$0xff] %v11387_v56  ;;  %15813 = vst [vmem:[#allocation44_spill] sm:$0xff] %v11393_v58  ;;  %v11398_v17 = vmul.f32 0.03125, %v1683_v6  ;;  %1940 = vadd.xlane.f32.xlu1 %v1873_v37  ;;  %v11402_v40 = vsub.f32 %v15815_v4, %v11387_v56  ;;  %v15822_v37 = vld [vmem:[#allocation72_spill] sm:$0xff]  ;;  %v15823_v4 = vld [vmem:[#allocation25_spill] sm:$0xff] }
 0x386   :  { %v1685_v39 = vpop.xlane.xlu1 %1684  ;;  %v11419_v56 = vsub.f32 %v15823_v4, %v11396_v55 }
 0x387   :  { %15814 = vst [vmem:[#allocation155_spill] sm:$0xff] %v11398_v17  ;;  %15816 = vst [vmem:[#allocation46_spill] sm:$0xff] %v11402_v40  ;;  %v11407_v28 = vmul.f32 0.03125, %v1685_v39  ;;  %1694 = vadd.xlane.f32.xlu0 %v15818_v44  ;;  %v11412_v14 = vsub.f32 %v15819_v38, %v11398_v17  ;;  %v15828_v44 = vld [vmem:[#allocation69_spill] sm:$0xff]  ;;  %v15829_v38 = vld [vmem:[#allocation26_spill] sm:$0xff] }
 0x388   :  { %v1679_v63 = vpop.xlane.xlu0 %1678  ;;  %15824 = vst [vmem:[#allocation25_spill] sm:$0xff] %v11419_v56  ;;  %v11430_v17 = vsub.f32 %v15829_v38, %v11405_v19 }
 0x389   :  { %15817 = vst [vmem:[#allocation156_spill] sm:$0xff] %v11407_v28  ;;  %15820 = vst [vmem:[#allocation51_spill] sm:$0xff] %v11412_v14  ;;  %v11414_v6 = vmul.f32 0.03125, %v1679_v63  ;;  %1696 = vadd.xlane.f32.xlu1 %v15822_v37  ;;  %v11423_v40 = vsub.f32 %v15825_v47, %v11407_v28  ;;  %v15831_v63 = vld [vmem:[#allocation52_spill] sm:$0xff]  ;;  %v1874_v47 = vmul.f32 %v11419_v56, %v11419_v56 }
 0x38a   :  { %v1681_v39 = vpop.xlane.xlu1 %1680  ;;  %15830 = vst [vmem:[#allocation26_spill] sm:$0xff] %v11430_v17  ;;  %v1875_v38 = vmul.f32 %v11430_v17, %v11430_v17 }
 0x38b   :  { %15821 = vst [vmem:[#allocation157_spill] sm:$0xff] %v11414_v6  ;;  %15826 = vst [vmem:[#allocation53_spill] sm:$0xff] %v11423_v40  ;;  %v11425_v58 = vmul.f32 0.03125, %v1681_v39  ;;  %1698 = vadd.xlane.f32.xlu0 %v15828_v44  ;;  %v11434_v37 = vsub.f32 %v15831_v63, %v11414_v6  ;;  %v15835_v39 = vld [vmem:[#allocation54_spill] sm:$0xff]  ;;  %v15838_v63 = vld [vmem:[#allocation55_spill] sm:$0xff] }
 0x38c   :  { %v3388_v14 = vpop.xlane.xlu0 %3387 }
 0x38d   :  { %15827 = vst [vmem:[#allocation158_spill] sm:$0xff] %v11425_v58  ;;  %15832 = vst [vmem:[#allocation52_spill] sm:$0xff] %v11434_v37  ;;  %v11436_v4 = vmul.f32 0.03125, %v3388_v14  ;;  %1700 = vadd.xlane.f32.xlu1 %v15834_v2  ;;  %v11443_v28 = vsub.f32 %v15835_v39, %v11425_v58  ;;  %v15840_v2 = vld [vmem:[#allocation56_spill] sm:$0xff] }
 0x38e   :  { %v3384_v44 = vpop.xlane.xlu1 %3383 }
 0x38f   :  { %15833 = vst [vmem:[#allocation159_spill] sm:$0xff] %v11436_v4  ;;  %15836 = vst [vmem:[#allocation54_spill] sm:$0xff] %v11443_v28  ;;  %v11445_v40 = vmul.f32 0.03125, %v3384_v44  ;;  %1942 = vadd.xlane.f32.xlu0 %v1874_v47  ;;  %v11451_v14 = vsub.f32 %v15838_v63, %v11436_v4 }
 0x390   :  { %v3386_v6 = vpop.xlane.xlu0 %3385 }
 0x391   :  { %15837 = vst [vmem:[#allocation160_spill] sm:$0xff] %v11445_v40  ;;  %15839 = vst [vmem:[#allocation55_spill] sm:$0xff] %v11451_v14  ;;  %1944 = vadd.xlane.f32.xlu1 %v1875_v38  ;;  %v3641_v56 = vmul.f32 %v11451_v14, %v11451_v14  ;;  %v11457_v39 = vsub.f32 %v15840_v2, %v11445_v40  ;;  %v11459_v44 = vmul.f32 0.03125, %v3386_v6  ;;  %v15844_v38 = vld [vmem:[#allocation57_spill] sm:$0xff] }
 0x392   :  { %v3390_v58 = vpop.xlane.xlu1 %3389 }
 0x393   :  { %15841 = vst [vmem:[#allocation56_spill] sm:$0xff] %v11457_v39  ;;  %v11461_v47 = vmul.f32 0.03125, %v3390_v58  ;;  %3707 = vadd.xlane.f32.xlu0 %v3641_v56  ;;  %v3639_v63 = vmul.f32 %v11457_v39, %v11457_v39  ;;  %v15847_v58 = vld [vmem:[#allocation59_spill] sm:$0xff] }
 0x394   :  { %v3396_v17 = vpop.xlane.xlu0 %3395 }
 0x395   :  { %15842 = vst [vmem:[#allocation161_spill] sm:$0xff] %v11461_v47  ;;  %v11463_v28 = vmul.f32 0.03125, %v3396_v17  ;;  %v11469_v37 = vsub.f32 %v15844_v38, %v11461_v47  ;;  %v15849_v17 = vld [vmem:[#allocation58_spill] sm:$0xff] }
 0x396   :  { %v3398_v14 = vpop.xlane.xlu1 %3397  ;;  %v11481_v6 = vsub.f32 %v15849_v17, %v11459_v44  ;;  %v15854_v17 = vld [vmem:[#allocation61_spill] sm:$0xff] }
 0x397   :  { %15843 = vst [vmem:[#allocation162_spill] sm:$0xff] %v11463_v28  ;;  %15845 = vst [vmem:[#allocation57_spill] sm:$0xff] %v11469_v37  ;;  %v11471_v4 = vmul.f32 0.03125, %v3398_v14  ;;  %3703 = vadd.xlane.f32.xlu0 %v3639_v63  ;;  %v3642_v2 = vmul.f32 %v11469_v37, %v11469_v37  ;;  %v11477_v56 = vsub.f32 %v15847_v58, %v11463_v28  ;;  %v15852_v58 = vld [vmem:[#allocation60_spill] sm:$0xff] }
 0x398   :  { %15850 = vst [vmem:[#allocation58_spill] sm:$0xff] %v11481_v6  ;;  %v3392_v39 = vpop.xlane.xlu0 %3391  ;;  %v3640_v37 = vmul.f32 %v11481_v6, %v11481_v6 }
 0x399   :  { %15846 = vst [vmem:[#allocation163_spill] sm:$0xff] %v11471_v4  ;;  %15848 = vst [vmem:[#allocation59_spill] sm:$0xff] %v11477_v56  ;;  %v11483_v40 = vmul.f32 0.03125, %v3392_v39  ;;  %3709 = vadd.xlane.f32.xlu1 %v3642_v2  ;;  %v3645_v14 = vmul.f32 %v11477_v56, %v11477_v56  ;;  %v11497_v47 = vsub.f32 %v15854_v17, %v11471_v4  ;;  %v15859_v17 = vld [vmem:[#allocation62_spill] sm:$0xff] }
 0x39a   :  { %v3394_v38 = vpop.xlane.xlu1 %3393 }
 0x39b   :  { %15851 = vst [vmem:[#allocation164_spill] sm:$0xff] %v11483_v40  ;;  %v11487_v63 = vmul.f32 0.03125, %v3394_v38  ;;  %3715 = vadd.xlane.f32.xlu0 %v3645_v14  ;;  %v11493_v28 = vsub.f32 %v15852_v58, %v11483_v40  ;;  %15855 = vst [vmem:[#allocation61_spill] sm:$0xff] %v11497_v47  ;;  %v3646_v6 = vmul.f32 %v11497_v47, %v11497_v47  ;;  %v15857_v58 = vld [vmem:[#allocation63_spill] sm:$0xff] }
 0x39c   :  { %v3404_v39 = vpop.xlane.xlu0 %3403 }
 0x39d   :  { %15853 = vst [vmem:[#allocation60_spill] sm:$0xff] %v11493_v28  ;;  %v11499_v2 = vmul.f32 0.03125, %v3404_v39  ;;  %3705 = vadd.xlane.f32.xlu1 %v3640_v37  ;;  %v3643_v38 = vmul.f32 %v11493_v28, %v11493_v28  ;;  %v11513_v4 = vsub.f32 %v15859_v17, %v11487_v63 }
 0x39e   :  { %v3406_v56 = vpop.xlane.xlu1 %3405 }
 0x39f   :  { %v11503_v14 = vmul.f32 0.03125, %v3406_v56  ;;  %3711 = vadd.xlane.f32.xlu0 %v3643_v38  ;;  %v11509_v40 = vsub.f32 %v15857_v58, %v11499_v2  ;;  %15860 = vst [vmem:[#allocation62_spill] sm:$0xff] %v11513_v4  ;;  %v3644_v47 = vmul.f32 %v11513_v4, %v11513_v4 }
 0x3a0   :  { %v3400_v39 = vpop.xlane.xlu0 %3399 }
 0x3a1   :  { %15856 = vst [vmem:[#allocation165_spill] sm:$0xff] %v11503_v14  ;;  %15858 = vst [vmem:[#allocation63_spill] sm:$0xff] %v11509_v40  ;;  %v11515_v37 = vmul.f32 0.03125, %v3400_v39  ;;  %3717 = vadd.xlane.f32.xlu1 %v3646_v6  ;;  %v3649_v56 = vmul.f32 %v11509_v40, %v11509_v40  ;;  %v11529_v17 = vsub.f32 %v10937_v30, %v11503_v14  ;;  %v15867_v30 = vld [vmem:[#allocation65_spill] sm:$0xff] }
 0x3a2   :  { %v3402_v28 = vpop.xlane.xlu1 %3401 }
 0x3a3   :  { %15861 = vst [vmem:[#allocation166_spill] sm:$0xff] %v11515_v37  ;;  %v11519_v38 = vmul.f32 0.03125, %v3402_v28  ;;  %3723 = vadd.xlane.f32.xlu0 %v3649_v56  ;;  %v11525_v58 = vsub.f32 %v10932_v59, %v11515_v37  ;;  %15864 = vst [vmem:[#allocation169_spill] sm:$0xff] %v11529_v17  ;;  %v3650_v4 = vmul.f32 %v11529_v17, %v11529_v17  ;;  %v15870_v17 = vld [vmem:[#allocation66_spill] sm:$0xff] }
 0x3a4   :  { %v3412_v39 = vpop.xlane.xlu0 %3411 }
 0x3a5   :  { %15862 = vst [vmem:[#allocation167_spill] sm:$0xff] %v11519_v38  ;;  %15863 = vst [vmem:[#allocation168_spill] sm:$0xff] %v11525_v58  ;;  %v11531_v6 = vmul.f32 0.03125, %v3412_v39  ;;  %3713 = vadd.xlane.f32.xlu1 %v3644_v47  ;;  %v3647_v28 = vmul.f32 %v11525_v58, %v11525_v58  ;;  %v11545_v37 = vsub.f32 %v15867_v30, %v11519_v38  ;;  %v9183_v47 = vld [vmem:[#allocation8 + $0x40] sm:$0xff]   ;;  %v15872_v38 = vld [vmem:[#allocation67_spill] sm:$0xff] }
 0x3a6   :  { %v3414_v40 = vpop.xlane.xlu1 %3413  ;;  %8561 = vmatprep.subr.bf16.mxu1 %v9183_v47 }
 0x3a7   :  { %15865 = vst [vmem:[#allocation170_spill] sm:$0xff] %v11531_v6  ;;  %v11535_v56 = vmul.f32 0.03125, %v3414_v40  ;;  %3719 = vadd.xlane.f32.xlu0 %v3647_v28  ;;  %v11541_v59 = vsub.f32 %v10944_v21, %v11531_v6  ;;  %15868 = vst [vmem:[#allocation65_spill] sm:$0xff] %v11545_v37  ;;  %v3648_v21 = vmul.f32 %v11545_v37, %v11545_v37  ;;  %8562 = vmatpush3.bf16.msra.mxu1 %v9183_v47  ;;  %v9184_v6 = vld [vmem:[#allocation8 + $0x48] sm:$0xff]   ;;  %v15875_v47 = vld [vmem:[#allocation68_spill] sm:$0xff] }
 0x3a8   :  { %v3408_v39 = vpop.xlane.xlu0 %3407  ;;  %8563 = vmatprep.subr.bf16.mxu1 %v9184_v6 }
 0x3a9   :  { %15866 = vst [vmem:[#allocation171_spill] sm:$0xff] %v11541_v59  ;;  %v11547_v14 = vmul.f32 0.03125, %v3408_v39  ;;  %3725 = vadd.xlane.f32.xlu1 %v3650_v4  ;;  %v3653_v40 = vmul.f32 %v11541_v59, %v11541_v59  ;;  %v11561_v39 = vsub.f32 %v15872_v38, %v11535_v56 }
 0x3aa   :  { %v3410_v28 = vpop.xlane.xlu1 %3409 }
 0x3ab   :  { %15869 = vst [vmem:[#allocation172_spill] sm:$0xff] %v11547_v14  ;;  %v11551_v58 = vmul.f32 0.03125, %v3410_v28  ;;  %3731 = vadd.xlane.f32.xlu0 %v3653_v40  ;;  %v11557_v30 = vsub.f32 %v15870_v17, %v11547_v14  ;;  %15873 = vst [vmem:[#allocation67_spill] sm:$0xff] %v11561_v39  ;;  %v3654_v17 = vmul.f32 %v11561_v39, %v11561_v39  ;;  %8564 = vmatpush3.bf16.msra.mxu1 %v9184_v6  ;;  %v9185_v14 = vld [vmem:[#allocation8 + $0x50] sm:$0xff]  }
 0x3ac   :  { %v3420_v4 = vpop.xlane.xlu0 %3419  ;;  %8565 = vmatprep.subr.bf16.mxu1 %v9185_v14 }
 0x3ad   :  { %15871 = vst [vmem:[#allocation66_spill] sm:$0xff] %v11557_v30  ;;  %v11563_v59 = vmul.f32 0.03125, %v3420_v4  ;;  %3721 = vadd.xlane.f32.xlu1 %v3648_v21  ;;  %v3651_v40 = vmul.f32 %v11557_v30, %v11557_v30  ;;  %v11577_v4 = vsub.f32 %v15875_v47, %v11551_v58 }
 0x3ae   :  { %v3422_v28 = vpop.xlane.xlu1 %3421 }
 0x3af   :  { %v11567_v37 = vmul.f32 0.03125, %v3422_v28  ;;  %3727 = vadd.xlane.f32.xlu0 %v3651_v40  ;;  %v11573_v38 = vsub.f32 %v10956_v1, %v11563_v59  ;;  %15876 = vst [vmem:[#allocation68_spill] sm:$0xff] %v11577_v4  ;;  %v3652_v1 = vmul.f32 %v11577_v4, %v11577_v4  ;;  %8566 = vmatpush3.bf16.msra.mxu1 %v9185_v14 }
 0x3b0   :  { %v3416_v21 = vpop.xlane.xlu0 %3415 }
 0x3b1   :  { %15874 = vst [vmem:[#allocation173_spill] sm:$0xff] %v11573_v38  ;;  %v11579_v30 = vmul.f32 0.03125, %v3416_v21  ;;  %3733 = vadd.xlane.f32.xlu1 %v3654_v17  ;;  %v3657_v40 = vmul.f32 %v11573_v38, %v11573_v38  ;;  %v11593_v6 = vsub.f32 %v10961_v22, %v11567_v37  ;;  %v9186_v21 = vld [vmem:[#allocation8 + $0x58] sm:$0xff]  }
 0x3b2   :  { %v3418_v28 = vpop.xlane.xlu1 %3417  ;;  %8567 = vmatprep.subr.bf16.mxu1 %v9186_v21 }
 0x3b3   :  { %v11583_v39 = vmul.f32 0.03125, %v3418_v28  ;;  %3739 = vadd.xlane.f32.xlu0 %v3657_v40  ;;  %v11589_v47 = vsub.f32 %v10958_v25, %v11579_v30  ;;  %15879 = vst [vmem:[#allocation176_spill] sm:$0xff] %v11593_v6  ;;  %v3658_v25 = vmul.f32 %v11593_v6, %v11593_v6  ;;  %8568 = vmatpush3.bf16.msra.mxu1 %v9186_v21 }
 0x3b4   :  { %v3428_v17 = vpop.xlane.xlu0 %3427 }
 0x3b5   :  { %15877 = vst [vmem:[#allocation174_spill] sm:$0xff] %v11583_v39  ;;  %15878 = vst [vmem:[#allocation175_spill] sm:$0xff] %v11589_v47  ;;  %v11595_v38 = vmul.f32 0.03125, %v3428_v17  ;;  %3729 = vadd.xlane.f32.xlu1 %v3652_v1  ;;  %v3655_v40 = vmul.f32 %v11589_v47, %v11589_v47  ;;  %v11609_v14 = vsub.f32 %v10963_v51, %v11583_v39  ;;  %v9187_v17 = vld [vmem:[#allocation8 + $0x60] sm:$0xff]  }
 0x3b6   :  { %v3430_v28 = vpop.xlane.xlu1 %3429  ;;  %8569 = vmatprep.subr.bf16.mxu1 %v9187_v17 }
 0x3b7   :  { %15880 = vst [vmem:[#allocation177_spill] sm:$0xff] %v11595_v38  ;;  %v11599_v4 = vmul.f32 0.03125, %v3430_v28  ;;  %3735 = vadd.xlane.f32.xlu0 %v3655_v40  ;;  %v11605_v22 = vsub.f32 %v10972_v53, %v11595_v38  ;;  %15883 = vst [vmem:[#allocation180_spill] sm:$0xff] %v11609_v14  ;;  %v3656_v53 = vmul.f32 %v11609_v14, %v11609_v14  ;;  %8570 = vmatpush3.bf16.msra.mxu1 %v9187_v17 }
 0x3b8   :  { %v3424_v1 = vpop.xlane.xlu0 %3423 }
 0x3b9   :  { %15881 = vst [vmem:[#allocation178_spill] sm:$0xff] %v11599_v4  ;;  %15882 = vst [vmem:[#allocation179_spill] sm:$0xff] %v11605_v22  ;;  %v11611_v47 = vmul.f32 0.03125, %v3424_v1  ;;  %3741 = vadd.xlane.f32.xlu1 %v3658_v25  ;;  %v3661_v40 = vmul.f32 %v11605_v22, %v11605_v22  ;;  %v11625_v21 = vsub.f32 %v10981_v35, %v11599_v4  ;;  %v9188_v1 = vld [vmem:[#allocation8 + $0x68] sm:$0xff]   ;;  %v11628_v22 = vmul.f32 0.03125, %v11159_v31 }
 0x3ba   :  { %v3426_v28 = vpop.xlane.xlu1 %3425  ;;  %8571 = vmatprep.subr.bf16.mxu1 %v9188_v1 }
 0x3bb   :  { %15884 = vst [vmem:[#allocation181_spill] sm:$0xff] %v11611_v47  ;;  %v11615_v6 = vmul.f32 0.03125, %v3426_v28  ;;  %3747 = vadd.xlane.f32.xlu0 %v3661_v40  ;;  %v11621_v51 = vsub.f32 %v10976_v26, %v11611_v47  ;;  %15887 = vst [vmem:[#allocation184_spill] sm:$0xff] %v11625_v21  ;;  %v3662_v35 = vmul.f32 %v11625_v21, %v11625_v21  ;;  %8572 = vmatpush3.bf16.msra.mxu1 %v9188_v1  ;;  %v15893_v47 = vld [vmem:[#allocation49_spill] sm:$0xff] }
 0x3bc   :  { %v3436_v25 = vpop.xlane.xlu0 %3435  ;;  %15888 = vst [vmem:[#allocation185_spill] sm:$0xff] %v11628_v22  ;;  %v2065_v4 = vmul.f32 96.0, %v15893_v47  ;;  %v2063_v1 = vmul.f32 96.0, %v11331_v20 }
 0x3bd   :  { %15885 = vst [vmem:[#allocation182_spill] sm:$0xff] %v11615_v6  ;;  %15886 = vst [vmem:[#allocation183_spill] sm:$0xff] %v11621_v51  ;;  %v11630_v28 = vmul.f32 0.03125, %v3436_v25  ;;  %3737 = vadd.xlane.f32.xlu1 %v3656_v53  ;;  %v3659_v40 = vmul.f32 %v11621_v51, %v11621_v51  ;;  %v11644_v31 = vsub.f32 %v10983_v24, %v11615_v6  ;;  %v15892_v25 = vld [vmem:[#allocation47_spill] sm:$0xff]  ;;  %v2062_v24 = vmul.f32 96.0, %v11321_v9 }
 0x3be   :  { %v3438_v14 = vpop.xlane.xlu1 %3437  ;;  %v2064_v51 = vmul.f32 96.0, %v15892_v25 }
 0x3bf   :  { %15889 = vst [vmem:[#allocation186_spill] sm:$0xff] %v11630_v28  ;;  %v11634_v26 = vmul.f32 0.03125, %v3438_v14  ;;  %3743 = vadd.xlane.f32.xlu0 %v3659_v40  ;;  %v11640_v17 = vsub.f32 %v10988_v41, %v11630_v28  ;;  %15891 = vst [vmem:[#allocation188_spill] sm:$0xff] %v11644_v31  ;;  %v9189_v14 = vld [vmem:[#allocation8 + $0x70] sm:$0xff]  }
 0x3c0   :  { %v3432_v53 = vpop.xlane.xlu0 %3431  ;;  %v15894_v41 = vld [vmem:[#allocation64_spill] sm:$0xff]  ;;  %8573 = vmatprep.subr.bf16.mxu1 %v9189_v14 }
 0x3c1   :  { %15890 = vst [vmem:[#allocation187_spill] sm:$0xff] %v11640_v17  ;;  %v11648_v39 = vmul.f32 0.03125, %v3432_v53  ;;  %3749 = vadd.xlane.f32.xlu1 %v3662_v35  ;;  %v3665_v40 = vmul.f32 %v11640_v17, %v11640_v17  ;;  %v11654_v21 = vsub.f32 %v15894_v41, %v11628_v22  ;;  %v3660_v53 = vmul.f32 %v11644_v31, %v11644_v31 }
 0x3c2   :  { %v3434_v28 = vpop.xlane.xlu1 %3433  ;;  %v11668_v41 = vsub.f32 %v10993_v15, %v11634_v26  ;;  %8574 = vmatpush3.bf16.msra.mxu1 %v9189_v14  ;;  %v11671_v22 = vmul.f32 %v2064_v51, %v15892_v25  ;;  %v11678_v31 = vmul.f32 %v11166_v32, %v11166_v32  ;;  %v2068_v51 = vmul.f32 96.0, %v11188_v12 }
 0x3c3   :  { %15895 = vst [vmem:[#allocation47_spill] sm:$0xff] %v11654_v21  ;;  %v11658_v6 = vmul.f32 0.03125, %v3434_v28  ;;  %3755 = vadd.xlane.f32.xlu0 %v3665_v40  ;;  %v11664_v35 = vsub.f32 %v10990_v18, %v11648_v39  ;;  %v11674_v28 = vmul.f32 %v2065_v4, %v15893_v47  ;;  %v9190_v40 = vld [vmem:[#allocation8 + $0x78] sm:$0xff]   ;;  %v11686_v15 = vmul.f32 %v11654_v21, %v11654_v21 }
 0x3c4   :  { %15897 = vst [vmem:[#allocation64_spill] sm:$0xff] %v11668_v41  ;;  %v3444_v17 = vpop.xlane.xlu0 %3443  ;;  %15898 = vst [vmem:[#allocation189_spill] sm:$0xff] %v11678_v31  ;;  %v11690_v4 = vmul.f32 %v2062_v24, %v11321_v9  ;;  %v11693_v47 = vmul.f32 %v2063_v1, %v11331_v20  ;;  %8575 = vmatprep.subr.bf16.mxu1 %v9190_v40  ;;  %v2069_v14 = vmul.f32 96.0, %v11195_v54  ;;  %v15901_v9 = vld [vmem:[#allocation73_spill] sm:$0xff] }
 0x3c5   :  { %15896 = vst [vmem:[#allocation49_spill] sm:$0xff] %v11664_v35  ;;  %v11680_v38 = vmul.f32 0.03125, %v3444_v17  ;;  %3745 = vadd.xlane.f32.xlu1 %v3660_v53  ;;  %v3663_v18 = vmul.f32 %v11664_v35, %v11664_v35  ;;  %15899 = vst [vmem:[#allocation190_spill] sm:$0xff] %v11686_v15  ;;  %v2066_v17 = vmul.f32 96.0, %v11396_v55  ;;  %v3666_v21 = vmul.f32 %v11668_v41, %v11668_v41 }
 0x3c6   :  { %v3446_v25 = vpop.xlane.xlu1 %3445  ;;  %v11707_v24 = vsub.f32 %v15901_v9, %v11658_v6  ;;  %8576 = vmatpush3.bf16.msra.mxu1 %v9190_v40  ;;  %v11711_v1 = vmul.f32 %v11200_v62, %v11200_v62  ;;  %v11727_v9 = vmul.f32 %v2068_v51, %v11188_v12  ;;  %v2072_v62 = vmul.f32 96.0, %v11212_v0 }
 0x3c7   :  { %v11697_v53 = vmul.f32 0.03125, %v3446_v25  ;;  %3751 = vadd.xlane.f32.xlu0 %v3663_v18  ;;  %v11703_v32 = vsub.f32 %v11000_v11, %v11680_v38  ;;  %v2067_v25 = vmul.f32 96.0, %v11405_v19  ;;  %v11716_v18 = vmul.f32 %v11186_v48, %v11186_v48 }
 0x3c8   :  { %15902 = vst [vmem:[#allocation73_spill] sm:$0xff] %v11707_v24  ;;  %v3440_v20 = vpop.xlane.xlu0 %3439  ;;  %v11720_v11 = vmul.f32 %v11193_v46, %v11193_v46  ;;  %15905 = vst [vmem:[#allocation194_spill] sm:$0xff] %v11727_v9  ;;  %v11732_v48 = vmul.f32 %v11207_v34, %v11207_v34  ;;  %v11735_v31 = vmul.f32 %v2066_v17, %v11396_v55  ;;  %v15910_v34 = vld [vmem:[#allocation74_spill] sm:$0xff]  ;;  %v2070_v17 = vmul.f32 96.0, %v11222_v7 }
 0x3c9   :  { %15900 = vst [vmem:[#allocation191_spill] sm:$0xff] %v11703_v32  ;;  %15903 = vst [vmem:[#allocation192_spill] sm:$0xff] %v11716_v18  ;;  %v11722_v15 = vmul.f32 0.03125, %v3440_v20  ;;  %3757 = vadd.xlane.f32.xlu1 %v3666_v21  ;;  %v3669_v40 = vmul.f32 %v11703_v32, %v11703_v32  ;;  %v11738_v20 = vmul.f32 %v2069_v14, %v11195_v54  ;;  %v2073_v21 = vmul.f32 96.0, %v11215_v8 }
 0x3ca   :  { %15904 = vst [vmem:[#allocation193_spill] sm:$0xff] %v11720_v11  ;;  %v3442_v41 = vpop.xlane.xlu1 %3441  ;;  %15906 = vst [vmem:[#allocation195_spill] sm:$0xff] %v11732_v48  ;;  %v3664_v12 = vmul.f32 %v11707_v24, %v11707_v24  ;;  %v11751_v9 = vsub.f32 %v15910_v34, %v11697_v53  ;;  %v11754_v54 = vmul.f32 %v2067_v25, %v11405_v19  ;;  %v2071_v14 = vmul.f32 96.0, %v11229_v23 }
 0x3cb   :  { %15907 = vst [vmem:[#allocation196_spill] sm:$0xff] %v11735_v31  ;;  %15908 = vst [vmem:[#allocation197_spill] sm:$0xff] %v11738_v20  ;;  %v11741_v46 = vmul.f32 0.03125, %v3442_v41  ;;  %3763 = vadd.xlane.f32.xlu0 %v3669_v40  ;;  %v11747_v51 = vsub.f32 %v11002_v36, %v11722_v15  ;;  %v11758_v41 = vmul.f32 %v11220_v33, %v11220_v33 }
 0x3cc   :  { %15911 = vst [vmem:[#allocation74_spill] sm:$0xff] %v11751_v9  ;;  %v3452_v55 = vpop.xlane.xlu0 %3451  ;;  %15912 = vst [vmem:[#allocation199_spill] sm:$0xff] %v11754_v54  ;;  %v11768_v34 = vmul.f32 %v11227_v13, %v11227_v13  ;;  %v11771_v19 = vmul.f32 %v2072_v62, %v11212_v0  ;;  %v11775_v33 = vmul.f32 %v11234_v61, %v11234_v61  ;;  %v15918_v62 = vld [vmem:[#allocation78_spill] sm:$0xff]  ;;  %v15920_v61 = vld [vmem:[#allocation75_spill] sm:$0xff] }
 0x3cd   :  { %15909 = vst [vmem:[#allocation198_spill] sm:$0xff] %v11747_v51  ;;  %15913 = vst [vmem:[#allocation200_spill] sm:$0xff] %v11758_v41  ;;  %v11762_v40 = vmul.f32 0.03125, %v3452_v55  ;;  %3753 = vadd.xlane.f32.xlu1 %v3664_v12  ;;  %v3667_v36 = vmul.f32 %v11747_v51, %v11747_v51  ;;  %v11778_v20 = vmul.f32 %v2073_v21, %v11215_v8  ;;  %v2076_v12 = vmul.f32 96.0, %v11236_v29 }
 0x3ce   :  { %15914 = vst [vmem:[#allocation201_spill] sm:$0xff] %v11768_v34  ;;  %15915 = vst [vmem:[#allocation202_spill] sm:$0xff] %v11771_v19  ;;  %v3454_v25 = vpop.xlane.xlu1 %3453  ;;  %v2100_v55 = vmul.f32 96.0, %v11154_v60  ;;  %v3670_v13 = vmul.f32 %v11751_v9, %v11751_v9  ;;  %v11792_v19 = vsub.f32 %v15920_v61, %v11741_v46  ;;  %v11796_v21 = vmul.f32 %v11241_v43, %v11241_v43 }
 0x3cf   :  { %15916 = vst [vmem:[#allocation203_spill] sm:$0xff] %v11775_v33  ;;  %15917 = vst [vmem:[#allocation204_spill] sm:$0xff] %v11778_v20  ;;  %v11782_v32 = vmul.f32 0.03125, %v3454_v25  ;;  %3759 = vadd.xlane.f32.xlu0 %v3667_v36  ;;  %v11788_v0 = vsub.f32 %v15918_v62, %v11762_v40  ;;  %v11799_v25 = vmul.f32 %v2070_v17, %v11222_v7  ;;  %v2077_v20 = vmul.f32 96.0, %v11243_v16  ;;  %v15925_v62 = vld [vmem:[#allocation27_spill] sm:$0xff]  ;;  %v15928_v17 = vld [vmem:[#allocation129_spill] sm:$0xff] }
 0x3d0   :  { %15921 = vst [vmem:[#allocation75_spill] sm:$0xff] %v11792_v19  ;;  %v3448_v8 = vpop.xlane.xlu0 %3447  ;;  %15922 = vst [vmem:[#allocation205_spill] sm:$0xff] %v11796_v21  ;;  %v11802_v36 = vmul.f32 %v2071_v14, %v11229_v23  ;;  %v11811_v51 = vmul.f32 %v15925_v62, %v15925_v62  ;;  %v2074_v43 = vmul.f32 96.0, %v11250_v27  ;;  %v11815_v7 = vmul.f32 %v2076_v12, %v11236_v29  ;;  %v15932_v29 = vld [vmem:[#allocation82_spill] sm:$0xff] }
 0x3d1   :  { %15919 = vst [vmem:[#allocation78_spill] sm:$0xff] %v11788_v0  ;;  %15923 = vst [vmem:[#allocation206_spill] sm:$0xff] %v11799_v25  ;;  %v11805_v9 = vmul.f32 0.03125, %v3448_v8  ;;  %3765 = vadd.xlane.f32.xlu1 %v3670_v13  ;;  %v3673_v61 = vmul.f32 %v11788_v0, %v11788_v0  ;;  %v2075_v23 = vmul.f32 96.0, %v11257_v42  ;;  %v2098_v14 = vmul.f32 96.0, %v15928_v17  ;;  %v15934_v0 = vld [vmem:[#allocation28_spill] sm:$0xff] }
 0x3d2   :  { %15924 = vst [vmem:[#allocation207_spill] sm:$0xff] %v11802_v36  ;;  %15926 = vst [vmem:[#allocation208_spill] sm:$0xff] %v11811_v51  ;;  %v3450_v11 = vpop.xlane.xlu1 %3449  ;;  %v11820_v8 = vmul.f32 %v2100_v55, %v11154_v60  ;;  %v3668_v62 = vmul.f32 %v11792_v19, %v11792_v19  ;;  %v15930_v36 = vld [vmem:[#allocation80_spill] sm:$0xff]  ;;  %v11832_v12 = vsub.f32 %v15932_v29, %v11782_v32  ;;  %v15936_v60 = vld [vmem:[#allocation29_spill] sm:$0xff] }
 0x3d3   :  { %15927 = vst [vmem:[#allocation209_spill] sm:$0xff] %v11815_v7  ;;  %v11822_v13 = vmul.f32 0.03125, %v3450_v11  ;;  %3771 = vadd.xlane.f32.xlu0 %v3673_v61  ;;  %v11828_v25 = vsub.f32 %v15930_v36, %v11805_v9  ;;  %v11836_v24 = vmul.f32 %v15934_v0, %v15934_v0  ;;  %v11840_v11 = vmul.f32 %v15936_v60, %v15936_v60  ;;  %v15939_v61 = vld [vmem:[#allocation130_spill] sm:$0xff] }
 0x3d4   :  { %15929 = vst [vmem:[#allocation129_spill] sm:$0xff] %v11820_v8  ;;  %15933 = vst [vmem:[#allocation82_spill] sm:$0xff] %v11832_v12  ;;  %v3460_v7 = vpop.xlane.xlu0 %3459  ;;  %v11843_v55 = vmul.f32 %v2077_v20, %v11243_v16  ;;  %v2099_v8 = vmul.f32 96.0, %v15939_v61  ;;  %v15940_v19 = vld [vmem:[#allocation30_spill] sm:$0xff]  ;;  %v11855_v0 = vmul.f32 %v2074_v43, %v11250_v27  ;;  %v11859_v16 = vmul.f32 %v11276_v52, %v11276_v52  ;;  %v15947_v43 = vld [vmem:[#allocation84_spill] sm:$0xff] }
 0x3d5   :  { %15931 = vst [vmem:[#allocation80_spill] sm:$0xff] %v11828_v25  ;;  %15935 = vst [vmem:[#allocation210_spill] sm:$0xff] %v11836_v24  ;;  %v11846_v36 = vmul.f32 0.03125, %v3460_v7  ;;  %3761 = vadd.xlane.f32.xlu1 %v3668_v62  ;;  %v3671_v29 = vmul.f32 %v11828_v25, %v11828_v25  ;;  %v11852_v35 = vmul.f32 %v15940_v19, %v15940_v19  ;;  %v15969_v25 = vld [vmem:[#allocation42_spill] sm:$0xff] }
 0x3d6   :  { %15937 = vst [vmem:[#allocation211_spill] sm:$0xff] %v11840_v11  ;;  %15938 = vst [vmem:[#allocation212_spill] sm:$0xff] %v11843_v55  ;;  %v3462_v60 = vpop.xlane.xlu1 %3461  ;;  %v11863_v20 = vmul.f32 %v11283_v3, %v11283_v3  ;;  %v11866_v62 = vmul.f32 %v2075_v23, %v11257_v42  ;;  %v11869_v7 = vmul.f32 %v2098_v14, %v15928_v17  ;;  %v15949_v55 = vld [vmem:[#allocation83_spill] sm:$0xff] }
 0x3d7   :  { %15941 = vst [vmem:[#allocation130_spill] sm:$0xff] %v11852_v35  ;;  %15942 = vst [vmem:[#allocation213_spill] sm:$0xff] %v11855_v0  ;;  %v11871_v19 = vmul.f32 0.03125, %v3462_v60  ;;  %3767 = vadd.xlane.f32.xlu0 %v3671_v29  ;;  %v3674_v27 = vmul.f32 %v11832_v12, %v11832_v12  ;;  %v11877_v52 = vsub.f32 %v15947_v43, %v11846_v36  ;;  %v15967_v12 = vld [vmem:[#allocation40_spill] sm:$0xff]  ;;  %v16009_v35 = vld [vmem:[#allocation147_spill] sm:$0xff] }
 0x3d8   :  { %15943 = vst [vmem:[#allocation214_spill] sm:$0xff] %v11859_v16  ;;  %15944 = vst [vmem:[#allocation215_spill] sm:$0xff] %v11863_v20  ;;  %v11881_v3 = vsub.f32 %v15949_v55, %v11822_v13  ;;  %v3456_v0 = vpop.xlane.xlu0 %3455  ;;  %v11885_v42 = vmul.f32 %v11290_v10, %v11290_v10  ;;  %v11889_v23 = vmul.f32 %v11297_v49, %v11297_v49  ;;  %v15963_v10 = vld [vmem:[#allocation85_spill] sm:$0xff]  ;;  %v3832_v16 = vmul.f32 96.0, %v11459_v44 }
 0x3d9   :  { %15945 = vst [vmem:[#allocation216_spill] sm:$0xff] %v11866_v62  ;;  %15946 = vst [vmem:[#allocation217_spill] sm:$0xff] %v11869_v7  ;;  %v11893_v17 = vmul.f32 %v11304_v50, %v11304_v50  ;;  %v11896_v14 = vmul.f32 %v2099_v8, %v15939_v61  ;;  %v11898_v60 = vmul.f32 0.03125, %v3456_v0  ;;  %3773 = vadd.xlane.f32.xlu1 %v3674_v27  ;;  %v15957_v50 = vld [vmem:[#allocation38_spill] sm:$0xff]  ;;  %v15960_v8 = vld [vmem:[#allocation41_spill] sm:$0xff]  ;;  %v2088_v51 = vmul.f32 96.0, %v16009_v35 }
 0x3da   :  { %15948 = vst [vmem:[#allocation84_spill] sm:$0xff] %v11877_v52  ;;  %15950 = vst [vmem:[#allocation83_spill] sm:$0xff] %v11881_v3  ;;  %v3677_v55 = vmul.f32 %v11877_v52, %v11877_v52  ;;  %v11904_v29 = vmul.f32 %v11318_v45, %v11318_v45  ;;  %v11908_v43 = vmul.f32 %v11311_v5, %v11311_v5  ;;  %v3458_v7 = vpop.xlane.xlu1 %3457  ;;  %v15962_v27 = vld [vmem:[#allocation139_spill] sm:$0xff]  ;;  %v15965_v62 = vld [vmem:[#allocation86_spill] sm:$0xff] }
 0x3db   :  { %15951 = vst [vmem:[#allocation218_spill] sm:$0xff] %v11885_v42  ;;  %15952 = vst [vmem:[#allocation219_spill] sm:$0xff] %v11889_v23  ;;  %v11912_v49 = vmul.f32 %v15957_v50, %v15957_v50  ;;  %v11916_v0 = vmul.f32 %v11338_v57, %v11338_v57  ;;  %v11920_v61 = vmul.f32 %v15960_v8, %v15960_v8  ;;  %v11923_v45 = vmul.f32 0.03125, %v3458_v7 }
 0x3dc   :  { %15953 = vst [vmem:[#allocation220_spill] sm:$0xff] %v11893_v17  ;;  %15954 = vst [vmem:[#allocation221_spill] sm:$0xff] %v11896_v14  ;;  %v2080_v14 = vmul.f32 96.0, %v15962_v27  ;;  %3779 = vadd.xlane.f32.xlu0 %v3677_v55  ;;  %v3672_v5 = vmul.f32 %v11881_v3, %v11881_v3  ;;  %v11929_v50 = vsub.f32 %v15963_v10, %v11898_v60  ;;  %v3468_v52 = vpop.xlane.xlu0 %3467  ;;  %v15971_v55 = vld [vmem:[#allocation141_spill] sm:$0xff]  ;;  %v15972_v3 = vld [vmem:[#allocation140_spill] sm:$0xff] }
 0x3dd   :  { %15955 = vst [vmem:[#allocation222_spill] sm:$0xff] %v11904_v29  ;;  %15956 = vst [vmem:[#allocation223_spill] sm:$0xff] %v11908_v43  ;;  %v11933_v57 = vsub.f32 %v15965_v62, %v11871_v19  ;;  %v11937_v8 = vmul.f32 %v15967_v12, %v15967_v12  ;;  %v11941_v7 = vmul.f32 %v15969_v25, %v15969_v25  ;;  %v2078_v18 = vmul.f32 96.0, %v15971_v55  ;;  %v15973_v62 = vld [vmem:[#allocation43_spill] sm:$0xff]  ;;  %v15975_v12 = vld [vmem:[#allocation142_spill] sm:$0xff] }
 0x3de   :  { %15958 = vst [vmem:[#allocation224_spill] sm:$0xff] %v11912_v49  ;;  %15959 = vst [vmem:[#allocation225_spill] sm:$0xff] %v11916_v0  ;;  %v11945_v0 = vmul.f32 0.03125, %v3468_v52  ;;  %3769 = vadd.xlane.f32.xlu1 %v3672_v5  ;;  %v3675_v10 = vmul.f32 %v11929_v50, %v11929_v50  ;;  %v11951_v43 = vmul.f32 %v15973_v62, %v15973_v62  ;;  %v3470_v49 = vpop.xlane.xlu1 %3469  ;;  %v15976_v17 = vld [vmem:[#allocation44_spill] sm:$0xff]  ;;  %v15980_v52 = vld [vmem:[#allocation45_spill] sm:$0xff] }
 0x3df   :  { %15961 = vst [vmem:[#allocation226_spill] sm:$0xff] %v11920_v61  ;;  %15964 = vst [vmem:[#allocation139_spill] sm:$0xff] %v11929_v50  ;;  %v2081_v61 = vmul.f32 96.0, %v15972_v3  ;;  %v11956_v25 = vmul.f32 %v15976_v17, %v15976_v17  ;;  %v11964_v5 = vmul.f32 %v15980_v52, %v15980_v52  ;;  %v11967_v50 = vmul.f32 %v2080_v14, %v15962_v27  ;;  %v15983_v17 = vld [vmem:[#allocation88_spill] sm:$0xff]  ;;  %v15987_v52 = vld [vmem:[#allocation51_spill] sm:$0xff] }
 0x3e0   :  { %15966 = vst [vmem:[#allocation85_spill] sm:$0xff] %v11933_v57  ;;  %15968 = vst [vmem:[#allocation86_spill] sm:$0xff] %v11937_v8  ;;  %v2079_v8 = vmul.f32 96.0, %v15975_v12  ;;  %v11969_v62 = vmul.f32 0.03125, %v3470_v49  ;;  %3775 = vadd.xlane.f32.xlu0 %v3675_v10  ;;  %v3464_v20 = vpop.xlane.xlu0 %3463  ;;  %v11986_v49 = vmul.f32 %v2078_v18, %v15971_v55  ;;  %v15991_v27 = vld [vmem:[#allocation143_spill] sm:$0xff] }
 0x3e1   :  { %15970 = vst [vmem:[#allocation227_spill] sm:$0xff] %v11941_v7  ;;  %15974 = vst [vmem:[#allocation141_spill] sm:$0xff] %v11951_v43  ;;  %v15978_v7 = vld [vmem:[#allocation46_spill] sm:$0xff]  ;;  %v3678_v43 = vmul.f32 %v11933_v57, %v11933_v57  ;;  %v11989_v14 = vmul.f32 %v2081_v61, %v15972_v3  ;;  %v2084_v10 = vmul.f32 96.0, %v15991_v27  ;;  %v15995_v55 = vld [vmem:[#allocation159_spill] sm:$0xff] }
 0x3e2   :  { %15977 = vst [vmem:[#allocation140_spill] sm:$0xff] %v11956_v25  ;;  %v11960_v29 = vmul.f32 %v15978_v7, %v15978_v7  ;;  %15981 = vst [vmem:[#allocation228_spill] sm:$0xff] %v11964_v5  ;;  %v11975_v25 = vsub.f32 %v15983_v17, %v11945_v0  ;;  %v15985_v7 = vld [vmem:[#allocation87_spill] sm:$0xff]  ;;  %v11983_v5 = vmul.f32 %v15987_v52, %v15987_v52  ;;  %v3466_v18 = vpop.xlane.xlu1 %3465  ;;  %v15996_v3 = vld [vmem:[#allocation52_spill] sm:$0xff] }
 0x3e3   :  { %15982 = vst [vmem:[#allocation229_spill] sm:$0xff] %v11967_v50  ;;  %15989 = vst [vmem:[#allocation231_spill] sm:$0xff] %v11986_v49  ;;  %v11992_v50 = vmul.f32 0.03125, %v3464_v20  ;;  %3781 = vadd.xlane.f32.xlu1 %v3678_v43  ;;  %v12001_v52 = vmul.f32 %v2079_v8, %v15975_v12  ;;  %v3833_v49 = vmul.f32 96.0, %v15995_v55  ;;  %v12006_v61 = vmul.f32 %v15996_v3, %v15996_v3  ;;  %v15998_v20 = vld [vmem:[#allocation145_spill] sm:$0xff]  ;;  %v15999_v43 = vld [vmem:[#allocation144_spill] sm:$0xff] }
 0x3e4   :  { %15979 = vst [vmem:[#allocation142_spill] sm:$0xff] %v11960_v29  ;;  %15984 = vst [vmem:[#allocation88_spill] sm:$0xff] %v11975_v25  ;;  %v11979_v29 = vsub.f32 %v15985_v7, %v11923_v45  ;;  %v3681_v17 = vmul.f32 %v11975_v25, %v11975_v25  ;;  %v15992_v7 = vld [vmem:[#allocation53_spill] sm:$0xff]  ;;  %v12010_v23 = vmul.f32 0.03125, %v3466_v18  ;;  %v3476_v3 = vpop.xlane.xlu0 %3475  ;;  %v12025_v18 = vmul.f32 %v2084_v10, %v15991_v27 }
 0x3e5   :  { %15988 = vst [vmem:[#allocation230_spill] sm:$0xff] %v11983_v5  ;;  %15990 = vst [vmem:[#allocation232_spill] sm:$0xff] %v11989_v14  ;;  %v11998_v57 = vmul.f32 %v15992_v7, %v15992_v7  ;;  %v2082_v14 = vmul.f32 96.0, %v15998_v20  ;;  %v2085_v5 = vmul.f32 96.0, %v15999_v43  ;;  %v16000_v12 = vld [vmem:[#allocation89_spill] sm:$0xff]  ;;  %v12028_v11 = vmul.f32 0.03125, %v3476_v3 }
 0x3e6   :  { %15986 = vst [vmem:[#allocation87_spill] sm:$0xff] %v11979_v29  ;;  %15994 = vst [vmem:[#allocation233_spill] sm:$0xff] %v12001_v52  ;;  %3787 = vadd.xlane.f32.xlu0 %v3681_v17  ;;  %v3676_v7 = vmul.f32 %v11979_v29, %v11979_v29  ;;  %v12016_v8 = vsub.f32 %v16000_v12, %v11992_v50  ;;  %v16002_v52 = vld [vmem:[#allocation90_spill] sm:$0xff]  ;;  %v3478_v24 = vpop.xlane.xlu1 %3477  ;;  %v12038_v34 = vmul.f32 %v3833_v49, %v15995_v55  ;;  %v16011_v27 = vld [vmem:[#allocation161_spill] sm:$0xff] }
 0x3e7   :  { %15993 = vst [vmem:[#allocation143_spill] sm:$0xff] %v11998_v57  ;;  %15997 = vst [vmem:[#allocation159_spill] sm:$0xff] %v12006_v61  ;;  %v12020_v25 = vsub.f32 %v16002_v52, %v11969_v62  ;;  %v16004_v57 = vld [vmem:[#allocation160_spill] sm:$0xff]  ;;  %v16006_v17 = vld [vmem:[#allocation146_spill] sm:$0xff]  ;;  %v3834_v10 = vmul.f32 96.0, %v16011_v27  ;;  %v12047_v3 = vmul.f32 0.03125, %v3478_v24 }
 0x3e8   :  { %16001 = vst [vmem:[#allocation145_spill] sm:$0xff] %v12016_v8  ;;  %v3831_v61 = vmul.f32 96.0, %v16004_v57  ;;  %16005 = vst [vmem:[#allocation89_spill] sm:$0xff] %v12025_v18  ;;  %v2083_v42 = vmul.f32 96.0, %v16006_v17  ;;  %3777 = vadd.xlane.f32.xlu1 %v3676_v7  ;;  %v3679_v12 = vmul.f32 %v12016_v8, %v12016_v8  ;;  %v16007_v29 = vld [vmem:[#allocation54_spill] sm:$0xff]  ;;  %v12042_v18 = vmul.f32 %v2082_v14, %v15998_v20  ;;  %v16016_v49 = vld [vmem:[#allocation91_spill] sm:$0xff]  ;;  %v3472_v21 = vpop.xlane.xlu0 %3471 }
 0x3e9   :  { %16003 = vst [vmem:[#allocation144_spill] sm:$0xff] %v12020_v25  ;;  %v12034_v52 = vmul.f32 %v16007_v29, %v16007_v29  ;;  %16010 = vst [vmem:[#allocation160_spill] sm:$0xff] %v12038_v34  ;;  %v12045_v7 = vmul.f32 %v2085_v5, %v15999_v43  ;;  %v3682_v29 = vmul.f32 %v12020_v25, %v12020_v25  ;;  %v16014_v8 = vld [vmem:[#allocation94_spill] sm:$0xff]  ;;  %v16021_v20 = vld [vmem:[#allocation148_spill] sm:$0xff] }
 0x3ea   :  { %16012 = vst [vmem:[#allocation146_spill] sm:$0xff] %v12042_v18  ;;  %3783 = vadd.xlane.f32.xlu0 %v3679_v12  ;;  %v12057_v55 = vsub.f32 %v16016_v49, %v12010_v23  ;;  %v12060_v14 = vmul.f32 %v3831_v61, %v16004_v57  ;;  %v12063_v5 = vmul.f32 %v3832_v16, %v11459_v44  ;;  %v2089_v43 = vmul.f32 96.0, %v16021_v20  ;;  %v16022_v49 = vld [vmem:[#allocation162_spill] sm:$0xff]  ;;  %v3474_v57 = vpop.xlane.xlu1 %3473  ;;  %v16025_v16 = vld [vmem:[#allocation163_spill] sm:$0xff]  ;;  %v16026_v61 = vld [vmem:[#allocation149_spill] sm:$0xff] }
 0x3eb   :  { %16008 = vst [vmem:[#allocation90_spill] sm:$0xff] %v12034_v52  ;;  %16013 = vst [vmem:[#allocation147_spill] sm:$0xff] %v12045_v7  ;;  %v12053_v52 = vsub.f32 %v16014_v8, %v12028_v11  ;;  %v12066_v24 = vmul.f32 %v2083_v42, %v16006_v17  ;;  %v12069_v12 = vmul.f32 0.03125, %v3472_v21  ;;  %v3837_v7 = vmul.f32 96.0, %v16022_v49 }
 0x3ec   :  { %16017 = vst [vmem:[#allocation94_spill] sm:$0xff] %v12057_v55  ;;  %16018 = vst [vmem:[#allocation91_spill] sm:$0xff] %v12060_v14  ;;  %3789 = vadd.xlane.f32.xlu1 %v3682_v29  ;;  %v12075_v18 = vmul.f32 %v2088_v51, %v16009_v35  ;;  %v12078_v44 = vmul.f32 %v3834_v10, %v16011_v27  ;;  %v3838_v42 = vmul.f32 96.0, %v16025_v16  ;;  %v2086_v17 = vmul.f32 96.0, %v16026_v61  ;;  %v16030_v51 = vld [vmem:[#allocation98_spill] sm:$0xff]  ;;  %v3484_v10 = vpop.xlane.xlu0 %3483 }
 0x3ed   :  { %16015 = vst [vmem:[#allocation161_spill] sm:$0xff] %v12053_v52  ;;  %16019 = vst [vmem:[#allocation234_spill] sm:$0xff] %v12063_v5  ;;  %v3685_v8 = vmul.f32 %v12053_v52, %v12053_v52  ;;  %v12083_v25 = vmul.f32 0.03125, %v3474_v57  ;;  %v3680_v29 = vmul.f32 %v12057_v55, %v12057_v55  ;;  %v16028_v52 = vld [vmem:[#allocation96_spill] sm:$0xff]  ;;  %v12093_v27 = vsub.f32 %v16030_v51, %v12047_v3 }
 0x3ee   :  { %16020 = vst [vmem:[#allocation235_spill] sm:$0xff] %v12066_v24  ;;  %16023 = vst [vmem:[#allocation148_spill] sm:$0xff] %v12075_v18  ;;  %v16027_v24 = vld [vmem:[#allocation150_spill] sm:$0xff]  ;;  %v12089_v35 = vsub.f32 %v16028_v52, %v12069_v12  ;;  %v16032_v18 = vld [vmem:[#allocation164_spill] sm:$0xff]  ;;  %v12098_v57 = vmul.f32 %v2089_v43, %v16021_v20  ;;  %v12101_v41 = vmul.f32 0.03125, %v3484_v10  ;;  %v12106_v55 = vmul.f32 %v3837_v7, %v16022_v49  ;;  %v3486_v33 = vpop.xlane.xlu1 %3485 }
 0x3ef   :  { %16024 = vst [vmem:[#allocation162_spill] sm:$0xff] %v12078_v44  ;;  %v2087_v21 = vmul.f32 96.0, %v16027_v24  ;;  %3795 = vadd.xlane.f32.xlu0 %v3685_v8  ;;  %16031 = vst [vmem:[#allocation149_spill] sm:$0xff] %v12093_v27  ;;  %v3835_v5 = vmul.f32 96.0, %v16032_v18  ;;  %v3836_v44 = vmul.f32 96.0, %v11487_v63  ;;  %v16034_v8 = vld [vmem:[#allocation151_spill] sm:$0xff]  ;;  %v12110_v54 = vmul.f32 %v3838_v42, %v16025_v16 }
 0x3f0   :  { %16029 = vst [vmem:[#allocation163_spill] sm:$0xff] %v12089_v35  ;;  %16033 = vst [vmem:[#allocation150_spill] sm:$0xff] %v12098_v57  ;;  %v2092_v14 = vmul.f32 96.0, %v16034_v8  ;;  %3785 = vadd.xlane.f32.xlu1 %v3680_v29  ;;  %v3683_v52 = vmul.f32 %v12089_v35, %v12089_v35  ;;  %v16036_v51 = vld [vmem:[#allocation152_spill] sm:$0xff]  ;;  %v3841_v20 = vmul.f32 96.0, %v11499_v2  ;;  %v12114_v43 = vmul.f32 %v2086_v17, %v16026_v61  ;;  %v16042_v16 = vld [vmem:[#allocation99_spill] sm:$0xff]  ;;  %v3480_v35 = vpop.xlane.xlu0 %3479 }
 0x3f1   :  { %16035 = vst [vmem:[#allocation96_spill] sm:$0xff] %v12106_v55  ;;  %v2093_v34 = vmul.f32 96.0, %v16036_v51  ;;  %16037 = vst [vmem:[#allocation98_spill] sm:$0xff] %v12110_v54  ;;  %v12117_v10 = vmul.f32 %v2087_v21, %v16027_v24  ;;  %v12119_v29 = vmul.f32 0.03125, %v3486_v33  ;;  %v3686_v7 = vmul.f32 %v12093_v27, %v12093_v27  ;;  %v16040_v49 = vld [vmem:[#allocation100_spill] sm:$0xff]  ;;  %v16046_v33 = vld [vmem:[#allocation153_spill] sm:$0xff] }
 0x3f2   :  { %16038 = vst [vmem:[#allocation164_spill] sm:$0xff] %v12114_v43  ;;  %v12125_v57 = vsub.f32 %v16040_v49, %v12101_v41  ;;  %v12129_v42 = vsub.f32 %v16042_v16, %v12083_v25  ;;  %v12132_v61 = vmul.f32 %v3835_v5, %v16032_v18  ;;  %v12135_v24 = vmul.f32 %v3836_v44, %v11487_v63  ;;  %v16049_v16 = vld [vmem:[#allocation165_spill] sm:$0xff]  ;;  %v3482_v18 = vpop.xlane.xlu1 %3481  ;;  %v16052_v5 = vld [vmem:[#allocation166_spill] sm:$0xff] }
 0x3f3   :  { %16039 = vst [vmem:[#allocation151_spill] sm:$0xff] %v12117_v10  ;;  %3791 = vadd.xlane.f32.xlu0 %v3683_v52  ;;  %v2090_v17 = vmul.f32 96.0, %v16046_v33  ;;  %v12139_v21 = vmul.f32 %v2092_v14, %v16034_v8  ;;  %v12141_v52 = vmul.f32 0.03125, %v3480_v35  ;;  %v3842_v10 = vmul.f32 96.0, %v16049_v16  ;;  %v16053_v27 = vld [vmem:[#allocation154_spill] sm:$0xff]  ;;  %v16054_v8 = vld [vmem:[#allocation155_spill] sm:$0xff] }
 0x3f4   :  { %16041 = vst [vmem:[#allocation152_spill] sm:$0xff] %v12125_v57  ;;  %16043 = vst [vmem:[#allocation100_spill] sm:$0xff] %v12129_v42  ;;  %3797 = vadd.xlane.f32.xlu1 %v3686_v7  ;;  %v3689_v49 = vmul.f32 %v12125_v57, %v12125_v57  ;;  %v12147_v43 = vmul.f32 %v2093_v34, %v16036_v51  ;;  %v12150_v63 = vmul.f32 %v3841_v20, %v11499_v2  ;;  %v16055_v57 = vld [vmem:[#allocation101_spill] sm:$0xff]  ;;  %v16057_v51 = vld [vmem:[#allocation102_spill] sm:$0xff]  ;;  %v3492_v20 = vpop.xlane.xlu0 %3491 }
 0x3f5   :  { %16044 = vst [vmem:[#allocation99_spill] sm:$0xff] %v12132_v61  ;;  %16045 = vst [vmem:[#allocation236_spill] sm:$0xff] %v12135_v24  ;;  %v3839_v44 = vmul.f32 96.0, %v16052_v5  ;;  %v2091_v14 = vmul.f32 96.0, %v16053_v27  ;;  %v2096_v35 = vmul.f32 96.0, %v16054_v8  ;;  %v3684_v7 = vmul.f32 %v12129_v42, %v12129_v42 }
 0x3f6   :  { %16047 = vst [vmem:[#allocation153_spill] sm:$0xff] %v12139_v21  ;;  %16048 = vst [vmem:[#allocation237_spill] sm:$0xff] %v12141_v52  ;;  %v12155_v21 = vmul.f32 0.03125, %v3482_v18  ;;  %v12161_v34 = vsub.f32 %v16055_v57, %v12141_v52  ;;  %v12165_v2 = vsub.f32 %v16057_v51, %v12119_v29  ;;  %v12170_v18 = vmul.f32 %v2090_v17, %v16046_v33  ;;  %v16064_v51 = vld [vmem:[#allocation157_spill] sm:$0xff]  ;;  %v3494_v48 = vpop.xlane.xlu1 %3493 }
 0x3f7   :  { %16050 = vst [vmem:[#allocation165_spill] sm:$0xff] %v12147_v43  ;;  %16051 = vst [vmem:[#allocation238_spill] sm:$0xff] %v12150_v63  ;;  %3803 = vadd.xlane.f32.xlu0 %v3689_v49  ;;  %v16059_v43 = vld [vmem:[#allocation170_spill] sm:$0xff]  ;;  %v16060_v63 = vld [vmem:[#allocation167_spill] sm:$0xff]  ;;  %v12173_v55 = vmul.f32 0.03125, %v3492_v20  ;;  %v12178_v42 = vmul.f32 %v3842_v10, %v16049_v16  ;;  %v2094_v31 = vmul.f32 96.0, %v16064_v51  ;;  %v12182_v52 = vmul.f32 %v3839_v44, %v16052_v5 }
 0x3f8   :  { %16056 = vst [vmem:[#allocation166_spill] sm:$0xff] %v12161_v34  ;;  %16058 = vst [vmem:[#allocation154_spill] sm:$0xff] %v12165_v2  ;;  %v3845_v24 = vmul.f32 96.0, %v16059_v43  ;;  %v3840_v54 = vmul.f32 96.0, %v16060_v63  ;;  %v16062_v49 = vld [vmem:[#allocation156_spill] sm:$0xff]  ;;  %3793 = vadd.xlane.f32.xlu1 %v3684_v7  ;;  %v3687_v57 = vmul.f32 %v12161_v34, %v12161_v34  ;;  %v3846_v33 = vmul.f32 96.0, %v11535_v56  ;;  %v3488_v34 = vpop.xlane.xlu0 %3487 }
 0x3f9   :  { %16061 = vst [vmem:[#allocation155_spill] sm:$0xff] %v12170_v18  ;;  %v2097_v61 = vmul.f32 96.0, %v16062_v49  ;;  %16063 = vst [vmem:[#allocation101_spill] sm:$0xff] %v12178_v42  ;;  %v12186_v17 = vmul.f32 %v2091_v14, %v16053_v27  ;;  %v12189_v20 = vmul.f32 %v2096_v35, %v16054_v8  ;;  %v12191_v7 = vmul.f32 0.03125, %v3494_v48  ;;  %v16068_v16 = vld [vmem:[#allocation104_spill] sm:$0xff]  ;;  %v16070_v5 = vld [vmem:[#allocation103_spill] sm:$0xff] }
 0x3fa   :  { %16065 = vst [vmem:[#allocation102_spill] sm:$0xff] %v12182_v52  ;;  %v3690_v10 = vmul.f32 %v12165_v2, %v12165_v2  ;;  %v12197_v18 = vsub.f32 %v16068_v16, %v12173_v55  ;;  %v12201_v44 = vsub.f32 %v16070_v5, %v12155_v21  ;;  %v12204_v27 = vmul.f32 %v3845_v24, %v16059_v43  ;;  %v16074_v48 = vld [vmem:[#allocation158_spill] sm:$0xff]  ;;  %v16076_v5 = vld [vmem:[#allocation172_spill] sm:$0xff]  ;;  %v3490_v43 = vpop.xlane.xlu1 %3489 }
 0x3fb   :  { %16066 = vst [vmem:[#allocation170_spill] sm:$0xff] %v12186_v17  ;;  %16067 = vst [vmem:[#allocation167_spill] sm:$0xff] %v12189_v20  ;;  %3799 = vadd.xlane.f32.xlu0 %v3687_v57  ;;  %v12207_v14 = vmul.f32 %v3840_v54, %v16060_v63  ;;  %v2095_v8 = vmul.f32 96.0, %v16074_v48  ;;  %v12211_v35 = vmul.f32 %v2097_v61, %v16062_v49  ;;  %v12213_v57 = vmul.f32 0.03125, %v3488_v34  ;;  %v16084_v2 = vld [vmem:[#allocation174_spill] sm:$0xff] }
 0x3fc   :  { %16069 = vst [vmem:[#allocation156_spill] sm:$0xff] %v12197_v18  ;;  %16071 = vst [vmem:[#allocation157_spill] sm:$0xff] %v12201_v44  ;;  %3805 = vadd.xlane.f32.xlu1 %v3690_v10  ;;  %v3693_v16 = vmul.f32 %v12197_v18, %v12197_v18  ;;  %v3843_v20 = vmul.f32 96.0, %v16076_v5  ;;  %v12219_v17 = vmul.f32 %v2094_v31, %v16064_v51  ;;  %v3849_v24 = vmul.f32 96.0, %v11563_v59  ;;  %v16079_v10 = vld [vmem:[#allocation105_spill] sm:$0xff]  ;;  %v16081_v51 = vld [vmem:[#allocation106_spill] sm:$0xff] }
 0x3fd   :  { %16072 = vst [vmem:[#allocation104_spill] sm:$0xff] %v12204_v27  ;;  %16073 = vst [vmem:[#allocation103_spill] sm:$0xff] %v12207_v14  ;;  %v12222_v54 = vmul.f32 %v3846_v33, %v11535_v56  ;;  %v3844_v61 = vmul.f32 96.0, %v11551_v58  ;;  %v3850_v63 = vmul.f32 96.0, %v11567_v37  ;;  %v12227_v34 = vmul.f32 0.03125, %v3490_v43  ;;  %v3500_v33 = vpop.xlane.xlu0 %3499 }
 0x3fe   :  { %16075 = vst [vmem:[#allocation158_spill] sm:$0xff] %v12211_v35  ;;  %16077 = vst [vmem:[#allocation172_spill] sm:$0xff] %v12219_v17  ;;  %v3688_v49 = vmul.f32 %v12201_v44, %v12201_v44  ;;  %v12233_v31 = vsub.f32 %v16079_v10, %v12213_v57  ;;  %v12237_v56 = vsub.f32 %v16081_v51, %v12191_v7  ;;  %v3847_v35 = vmul.f32 96.0, %v11579_v30  ;;  %v16083_v17 = vld [vmem:[#allocation177_spill] sm:$0xff]  ;;  %v16086_v51 = vld [vmem:[#allocation178_spill] sm:$0xff]  ;;  %v3502_v27 = vpop.xlane.xlu1 %3501 }
 0x3ff   :  { %16078 = vst [vmem:[#allocation239_spill] sm:$0xff] %v12222_v54  ;;  %3811 = vadd.xlane.f32.xlu0 %v3693_v16  ;;  %v3853_v18 = vmul.f32 96.0, %v16083_v17  ;;  %v3848_v43 = vmul.f32 96.0, %v16084_v2  ;;  %v12243_v16 = vmul.f32 %v2095_v8, %v16074_v48  ;;  %v12245_v54 = vmul.f32 0.03125, %v3500_v33  ;;  %v16089_v8 = vld [vmem:[#allocation181_spill] sm:$0xff] }
 0x400   :  { %16080 = vst [vmem:[#allocation105_spill] sm:$0xff] %v12233_v31  ;;  %16082 = vst [vmem:[#allocation106_spill] sm:$0xff] %v12237_v56  ;;  %3801 = vadd.xlane.f32.xlu1 %v3688_v49  ;;  %v3691_v10 = vmul.f32 %v12233_v31, %v12233_v31  ;;  %v12250_v44 = vmul.f32 %v3843_v20, %v16076_v5  ;;  %v3854_v14 = vmul.f32 96.0, %v16086_v51  ;;  %v3851_v49 = vmul.f32 96.0, %v16089_v8  ;;  %v16090_v5 = vld [vmem:[#allocation110_spill] sm:$0xff] }
 0x401   :  { %16085 = vst [vmem:[#allocation177_spill] sm:$0xff] %v12243_v16  ;;  %v12254_v42 = vmul.f32 %v3849_v24, %v11563_v59  ;;  %v12257_v52 = vmul.f32 %v3844_v61, %v11551_v58  ;;  %v12260_v48 = vmul.f32 %v3850_v63, %v11567_v37  ;;  %v12263_v33 = vmul.f32 0.03125, %v3502_v27  ;;  %v16092_v59 = vld [vmem:[#allocation107_spill] sm:$0xff]  ;;  %v3496_v58 = vpop.xlane.xlu0 %3495  ;;  %v16097_v63 = vld [vmem:[#allocation185_spill] sm:$0xff]  ;;  %v16099_v31 = vld [vmem:[#allocation182_spill] sm:$0xff] }
 0x402   :  { %v3694_v20 = vmul.f32 %v12237_v56, %v12237_v56  ;;  %v12269_v16 = vsub.f32 %v16090_v5, %v12245_v54  ;;  %v12273_v24 = vsub.f32 %v16092_v59, %v12227_v34  ;;  %v12276_v37 = vmul.f32 %v3847_v35, %v11579_v30  ;;  %v3498_v35 = vpop.xlane.xlu1 %3497 }
 0x403   :  { %16087 = vst [vmem:[#allocation174_spill] sm:$0xff] %v12257_v52  ;;  %16088 = vst [vmem:[#allocation178_spill] sm:$0xff] %v12260_v48  ;;  %3807 = vadd.xlane.f32.xlu0 %v3691_v10  ;;  %v12279_v61 = vmul.f32 %v3853_v18, %v16083_v17  ;;  %v12282_v27 = vmul.f32 %v3848_v43, %v16084_v2  ;;  %v2101_v10 = vmul.f32 96.0, %v16097_v63  ;;  %v12285_v56 = vmul.f32 0.03125, %v3496_v58  ;;  %v16101_v17 = vld [vmem:[#allocation186_spill] sm:$0xff] }
 0x404   :  { %16091 = vst [vmem:[#allocation181_spill] sm:$0xff] %v12269_v16  ;;  %16093 = vst [vmem:[#allocation110_spill] sm:$0xff] %v12273_v24  ;;  %3813 = vadd.xlane.f32.xlu1 %v3694_v20  ;;  %v3697_v5 = vmul.f32 %v12269_v16, %v12269_v16  ;;  %v12290_v59 = vmul.f32 %v3854_v14, %v16086_v51  ;;  %v3852_v30 = vmul.f32 96.0, %v16099_v31  ;;  %v3857_v2 = vmul.f32 96.0, %v16101_v17  ;;  %v16102_v14 = vld [vmem:[#allocation112_spill] sm:$0xff]  ;;  %v16104_v16 = vld [vmem:[#allocation114_spill] sm:$0xff] }
 0x405   :  { %16094 = vst [vmem:[#allocation107_spill] sm:$0xff] %v12276_v37  ;;  %16095 = vst [vmem:[#allocation240_spill] sm:$0xff] %v12279_v61  ;;  %v12294_v18 = vmul.f32 %v3851_v49, %v16089_v8  ;;  %v3855_v43 = vmul.f32 96.0, %v11648_v39  ;;  %v3858_v58 = vmul.f32 96.0, %v11634_v26  ;;  %v3692_v20 = vmul.f32 %v12273_v24, %v12273_v24  ;;  %v3508_v49 = vpop.xlane.xlu0 %3507 }
 0x406   :  { %16096 = vst [vmem:[#allocation241_spill] sm:$0xff] %v12282_v27  ;;  %16098 = vst [vmem:[#allocation185_spill] sm:$0xff] %v12290_v59  ;;  %v12299_v27 = vmul.f32 0.03125, %v3498_v35  ;;  %v12305_v51 = vsub.f32 %v16102_v14, %v12285_v56  ;;  %v12309_v8 = vsub.f32 %v16104_v16, %v12263_v33  ;;  %v3861_v59 = vmul.f32 96.0, %v11680_v38  ;;  %v3510_v48 = vpop.xlane.xlu1 %3509 }
 0x407   :  { %16100 = vst [vmem:[#allocation182_spill] sm:$0xff] %v12294_v18  ;;  %3819 = vadd.xlane.f32.xlu0 %v3697_v5  ;;  %v3856_v18 = vmul.f32 96.0, %v11658_v6  ;;  %v3862_v35 = vmul.f32 96.0, %v11697_v53  ;;  %v12315_v5 = vmul.f32 %v2101_v10, %v16097_v63  ;;  %v12317_v61 = vmul.f32 0.03125, %v3508_v49 }
 0x408   :  { %16103 = vst [vmem:[#allocation186_spill] sm:$0xff] %v12305_v51  ;;  %16105 = vst [vmem:[#allocation112_spill] sm:$0xff] %v12309_v8  ;;  %3809 = vadd.xlane.f32.xlu1 %v3692_v20  ;;  %v3695_v14 = vmul.f32 %v12305_v51, %v12305_v51  ;;  %v12322_v24 = vmul.f32 %v3852_v30, %v16099_v31  ;;  %v3859_v16 = vmul.f32 96.0, %v11722_v15  ;;  %v3860_v10 = vmul.f32 96.0, %v11741_v46  ;;  %v16107_v30 = vld [vmem:[#allocation116_spill] sm:$0xff] }
 0x409   :  { %16106 = vst [vmem:[#allocation114_spill] sm:$0xff] %v12315_v5  ;;  %v12326_v37 = vmul.f32 %v3857_v2, %v16101_v17  ;;  %v12329_v52 = vmul.f32 %v3855_v43, %v11648_v39  ;;  %v12332_v63 = vmul.f32 %v3858_v58, %v11634_v26  ;;  %v12335_v20 = vmul.f32 0.03125, %v3510_v48  ;;  %v16109_v17 = vld [vmem:[#allocation115_spill] sm:$0xff]  ;;  %v3504_v39 = vpop.xlane.xlu0 %3503  ;;  %v16115_v5 = vld [vmem:[#allocation118_spill] sm:$0xff] }
 0x40a   :  { %v3698_v31 = vmul.f32 %v12309_v8, %v12309_v8  ;;  %v12341_v49 = vsub.f32 %v16107_v30, %v12317_v61  ;;  %v12345_v2 = vsub.f32 %v16109_v17, %v12299_v27  ;;  %v12348_v26 = vmul.f32 %v3861_v59, %v11680_v38  ;;  %v3506_v59 = vpop.xlane.xlu1 %3505 }
 0x40b   :  { %3815 = vadd.xlane.f32.xlu0 %v3695_v14  ;;  %v12351_v43 = vmul.f32 %v3856_v18, %v11658_v6  ;;  %v12354_v48 = vmul.f32 %v3862_v35, %v11697_v53  ;;  %v3865_v58 = vmul.f32 96.0, %v11762_v40  ;;  %v12357_v14 = vmul.f32 0.03125, %v3504_v39 }
 0x40c   :  { %16108 = vst [vmem:[#allocation116_spill] sm:$0xff] %v12341_v49  ;;  %16110 = vst [vmem:[#allocation115_spill] sm:$0xff] %v12345_v2  ;;  %3821 = vadd.xlane.f32.xlu1 %v3698_v31  ;;  %v3701_v30 = vmul.f32 %v12341_v49, %v12341_v49  ;;  %v12362_v17 = vmul.f32 %v3859_v16, %v11722_v15  ;;  %v3866_v38 = vmul.f32 96.0, %v11782_v32  ;;  %v3863_v53 = vmul.f32 96.0, %v11805_v9  ;;  %v16113_v15 = vld [vmem:[#allocation117_spill] sm:$0xff] }
 0x40d   :  { %16111 = vst [vmem:[#allocation242_spill] sm:$0xff] %v12354_v48  ;;  %v12366_v6 = vmul.f32 %v3860_v10, %v11741_v46  ;;  %v3869_v18 = vmul.f32 96.0, %v11846_v36  ;;  %v3864_v35 = vmul.f32 96.0, %v11822_v13  ;;  %v12371_v39 = vmul.f32 0.03125, %v3506_v59  ;;  %v1935_v10 = vpop.xlane.xlu0 %1934 }
 0x40e   :  { %v3696_v31 = vmul.f32 %v12345_v2, %v12345_v2  ;;  %v12377_v16 = vsub.f32 %v16113_v15, %v12357_v14  ;;  %v12381_v46 = vsub.f32 %v16115_v5, %v12335_v20  ;;  %v12384_v49 = vmul.f32 %v3865_v58, %v11762_v40  ;;  %v16118_v40 = vld [vmem:[#allocation119_spill] sm:$0xff] }
 0x40f   :  { %16112 = vst [vmem:[#allocation243_spill] sm:$0xff] %v12366_v6  ;;  %3827 = vadd.xlane.f32.xlu0 %v3701_v30  ;;  %v3867_v8 = vmul.f32 96.0, %v11898_v60  ;;  %v3870_v59 = vmul.f32 96.0, %v11871_v19  ;;  %v3868_v30 = vmul.f32 96.0, %v11923_v45  ;;  %v2190_v2 = vsub.f32 %v1935_v10, %v11690_v4  ;;  %v1937_v6 = vpop.xlane.xlu1 %1936 }
 0x410   :  { %16114 = vst [vmem:[#allocation117_spill] sm:$0xff] %v12377_v16  ;;  %16116 = vst [vmem:[#allocation118_spill] sm:$0xff] %v12381_v46  ;;  %3817 = vadd.xlane.f32.xlu1 %v3696_v31  ;;  %v3699_v15 = vmul.f32 %v12377_v16, %v12377_v16  ;;  %v12393_v51 = vmul.f32 %v3866_v38, %v11782_v32  ;;  %v3873_v5 = vmul.f32 96.0, %v11945_v0  ;;  %v3874_v4 = vmul.f32 96.0, %v11969_v62 }
 0x411   :  { %16117 = vst [vmem:[#allocation244_spill] sm:$0xff] %v12384_v49  ;;  %v12398_v58 = vsub.f32 %v16118_v40, %v12371_v39  ;;  %v12401_v49 = vmul.f32 %v3863_v53, %v11805_v9  ;;  %v12404_v48 = vmul.f32 %v3864_v35, %v11822_v13  ;;  %v2254_v31 = vmul.f32 0.03125, %v2190_v2  ;;  %v1939_v40 = vpop.xlane.xlu0 %1938 }
 0x412   :  { %v2191_v10 = vsub.f32 %v1937_v6, %v11693_v47  ;;  %v3702_v32 = vmul.f32 %v12381_v46, %v12381_v46  ;;  %v12411_v38 = vmul.f32 %v3869_v18, %v11846_v36  ;;  %v12414_v16 = vmul.f32 %v3867_v8, %v11898_v60  ;;  %v16126_v46 = vld [vmem:[#allocation81_spill] sm:$0xff] }
 0x413   :  { %16119 = vst [vmem:[#allocation119_spill] sm:$0xff] %v12398_v58  ;;  %3823 = vadd.xlane.f32.xlu0 %v3699_v15  ;;  %v12417_v9 = vmul.f32 %v3870_v59, %v11871_v19  ;;  %v12420_v13 = vmul.f32 %v3868_v30, %v11923_v45  ;;  %v3871_v2 = vmul.f32 96.0, %v11992_v50  ;;  %v2318_v47 = vmax.f32 %v2254_v31, 0.0  ;;  %v1941_v18 = vpop.xlane.xlu1 %1940 }
 0x414   :  { %v2255_v6 = vmul.f32 0.03125, %v2191_v10  ;;  %v2192_v53 = vsub.f32 %v1939_v40, %v11671_v22  ;;  %3829 = vadd.xlane.f32.xlu1 %v3702_v32  ;;  %v12425_v36 = vmul.f32 %v3873_v5, %v11945_v0  ;;  %v3700_v60 = vmul.f32 %v12398_v58, %v12398_v58 }
 0x415   :  { %v12430_v19 = vmul.f32 %v3874_v4, %v11969_v62  ;;  %v3877_v45 = vmul.f32 96.0, %v12028_v11  ;;  %v3872_v8 = vmul.f32 96.0, %v12010_v23  ;;  %v2382_v35 = vadd.f32 1e-05, %v2318_v47  ;;  %v12436_v0 = vpop.xlane.xlu0 %1694 }
 0x416   :  { %v2319_v59 = vmax.f32 %v2255_v6, 0.0  ;;  %v2256_v30 = vmul.f32 0.03125, %v2192_v53  ;;  %v2193_v22 = vsub.f32 %v1941_v18, %v11674_v28  ;;  %v12439_v15 = vmul.f32 %v3871_v2, %v11992_v50  ;;  %v16120_v53 = vld [vmem:[#allocation77_spill] sm:$0xff] }
 0x417   :  { %1946 = vadd.xlane.f32.xlu0 %v11711_v1  ;;  %v3875_v5 = vmul.f32 96.0, %v12069_v12  ;;  %v3878_v62 = vmul.f32 96.0, %v12047_v3  ;;  %v3876_v4 = vmul.f32 96.0, %v12083_v25  ;;  %9255 = vrsqrt.f32 %v2382_v35  ;;  %v12444_v40 = vpop.xlane.xlu1 %1696  ;;  %v16121_v18 = vld [vmem:[#allocation237_spill] sm:$0xff] }
 0x418   :  { %v2383_v31 = vadd.f32 1e-05, %v2319_v59  ;;  %v2320_v10 = vmax.f32 %v2256_v30, 0.0  ;;  %v2257_v32 = vmul.f32 0.03125, %v2193_v22  ;;  %3825 = vadd.xlane.f32.xlu1 %v3700_v60  ;;  %v12447_v28 = vmul.f32 %v3877_v45, %v12028_v11  ;;  %v16122_v30 = vld [vmem:[#allocation195_spill] sm:$0xff] }
 0x419   :  { %v12450_v1 = vmul.f32 %v3872_v8, %v12010_v23  ;;  %v3881_v50 = vmul.f32 96.0, %v12101_v41  ;;  %v3882_v2 = vmul.f32 96.0, %v12119_v29  ;;  %v3879_v35 = vmul.f32 96.0, %v16121_v18  ;;  %v12456_v60 = vpop.xlane.xlu0 %1698 }
 0x41a   :  { %9257 = vrsqrt.f32 %v2383_v31  ;;  %v2384_v47 = vadd.f32 1e-05, %v2320_v10  ;;  %v2321_v6 = vmax.f32 %v2257_v32, 0.0  ;;  %v12459_v59 = vmul.f32 %v3875_v5, %v12069_v12 }
 0x41b   :  { %1702 = vadd.xlane.f32.xlu0 %v16120_v53  ;;  %v12462_v11 = vmul.f32 %v3878_v62, %v12047_v3  ;;  %v12465_v23 = vmul.f32 %v3876_v4, %v12083_v25  ;;  %v3880_v45 = vmul.f32 96.0, %v12155_v21  ;;  %v3885_v22 = vmul.f32 96.0, %v12173_v55  ;;  %v12471_v10 = vpop.xlane.xlu1 %1700  ;;  %v16123_v62 = vld [vmem:[#allocation76_spill] sm:$0xff] }
 0x41c   :  { %9259 = vrsqrt.f32 %v2384_v47  ;;  %v2385_v8 = vadd.f32 1e-05, %v2321_v6  ;;  %1948 = vadd.xlane.f32.xlu1 %v16122_v30  ;;  %v3886_v31 = vmul.f32 96.0, %v12191_v7  ;;  %v12474_v12 = vmul.f32 %v3881_v50, %v12101_v41 }
 0x41d   :  { %v12477_v3 = vmul.f32 %v3882_v2, %v12119_v29  ;;  %v3883_v25 = vmul.f32 96.0, %v12213_v57  ;;  %v3884_v5 = vmul.f32 96.0, %v12227_v34  ;;  %v12483_v4 = vmul.f32 %v3879_v35, %v16121_v18  ;;  %v1943_v6 = vpop.xlane.xlu0 %1942 }
 0x41e   :  { %9261 = vrsqrt.f32 %v2385_v8  ;;  %v3889_v32 = vmul.f32 96.0, %v12245_v54  ;;  %v3890_v47 = vmul.f32 96.0, %v12263_v33  ;;  %v12488_v41 = vmul.f32 %v3880_v45, %v12155_v21  ;;  %v16125_v8 = vld [vmem:[#allocation196_spill] sm:$0xff] }
 0x41f   :  { %1706 = vadd.xlane.f32.xlu0 %v16123_v62  ;;  %v3887_v29 = vmul.f32 96.0, %v12285_v56  ;;  %v3893_v50 = vmul.f32 96.0, %v12317_v61  ;;  %v3888_v2 = vmul.f32 96.0, %v12299_v27  ;;  %v2194_v30 = vsub.f32 %v1943_v6, %v16125_v8  ;;  %v1945_v21 = vpop.xlane.xlu1 %1944 }
 0x420   :  { %16124 = vst [vmem:[#allocation237_spill] sm:$0xff] %v12488_v41  ;;  %1704 = vadd.xlane.f32.xlu1 %v16126_v46  ;;  %v12496_v18 = vmul.f32 %v3885_v22, %v12173_v55  ;;  %v12499_v35 = vmul.f32 %v3886_v31, %v12191_v7  ;;  %v3894_v58 = vmul.f32 96.0, %v12335_v20  ;;  %v12503_v45 = vmul.f32 %v3883_v25, %v12213_v57  ;;  %v16130_v55 = vld [vmem:[#allocation199_spill] sm:$0xff]  ;;  %v12521_v57 = vld [vmem:[%s15202_s12 + $0x1] ss:$0 sm:$0xff] }
 0x421   :  { %v12506_v62 = vmul.f32 %v3884_v5, %v12227_v34  ;;  %v3891_v53 = vmul.f32 96.0, %v12357_v14  ;;  %v3892_v6 = vmul.f32 96.0, %v12371_v39  ;;  %v9256_v8 = vpop.eup %9255  ;;  %v2258_v46 = vmul.f32 0.03125, %v2194_v30  ;;  %v16131_v41 = vld [vmem:[#allocation203_spill] sm:$0xff]  ;;  %v3708_v34 = vpop.xlane.xlu0 %3707 }
 0x422   :  { %16127 = vst [vmem:[#allocation195_spill] sm:$0xff] %v12499_v35  ;;  %16128 = vst [vmem:[#allocation196_spill] sm:$0xff] %v12503_v45  ;;  %v2195_v22 = vsub.f32 %v1945_v21, %v16130_v55  ;;  %v12513_v7 = vmul.f32 %v3889_v32, %v12245_v54  ;;  %v12516_v31 = vmul.f32 %v3890_v47, %v12263_v33  ;;  %v16137_v54 = vld [vmem:[#allocation23_spill] sm:$0xff]  ;;  %v16138_v21 = vld [vmem:[#allocation160_spill] sm:$0xff] }
 0x423   :  { %16129 = vst [vmem:[#allocation245_spill] sm:$0xff] %v12506_v62  ;;  %1950 = vadd.xlane.f32.xlu0 %v16131_v41  ;;  %v12524_v25 = vmul.f32 %v3887_v29, %v12285_v56  ;;  %v12527_v5 = vmul.f32 %v3893_v50, %v12317_v61  ;;  %v12530_v41 = vmul.f32 %v3888_v2, %v12299_v27  ;;  %v2322_v33 = vmax.f32 %v2258_v46, 0.0  ;;  %v12541_v56 = vld [vmem:[%s15202_s12 + $0x2] ss:$0 sm:$0xff]  ;;  %v16143_v46 = vld [vmem:[#allocation24_spill] sm:$0xff] }
 0x424   :  { %16132 = vst [vmem:[#allocation199_spill] sm:$0xff] %v12513_v7  ;;  %16133 = vst [vmem:[#allocation203_spill] sm:$0xff] %v12516_v31  ;;  %v2510_v32 = vmul.f32 %v9256_v8, %v16137_v54  ;;  %v9258_v30 = vpop.eup %9257  ;;  %v2259_v47 = vmul.f32 0.03125, %v2195_v22  ;;  %v3961_v55 = vsub.f32 %v3708_v34, %v16138_v21  ;;  %v16139_v31 = vld [vmem:[#allocation79_spill] sm:$0xff]  ;;  %v12536_v62 = vmul.f32 %v3894_v58, %v12335_v20  ;;  %v16145_v34 = vld [vmem:[#allocation200_spill] sm:$0xff] }
 0x425   :  { %16134 = vst [vmem:[#allocation246_spill] sm:$0xff] %v12524_v25  ;;  %16135 = vst [vmem:[#allocation247_spill] sm:$0xff] %v12527_v5  ;;  %1708 = vadd.xlane.f32.xlu1 %v16139_v31  ;;  %v12544_v61 = vmul.f32 %v3891_v53, %v12357_v14  ;;  %v12547_v27 = vmul.f32 %v3892_v6, %v12371_v39  ;;  %v2511_v29 = vmul.f32 %v9258_v30, %v16143_v46  ;;  %v16146_v54 = vld [vmem:[#allocation48_spill] sm:$0xff]  ;;  %v3704_v39 = vpop.xlane.xlu0 %3703  ;;  %v16148_v46 = vld [vmem:[#allocation91_spill] sm:$0xff] }
 0x426   :  { %16136 = vst [vmem:[#allocation248_spill] sm:$0xff] %v12530_v41  ;;  %16140 = vst [vmem:[#allocation23_spill] sm:$0xff] %v12536_v62  ;;  %v2578_v50 = vmul.f32 %v12521_v57, %v2510_v32  ;;  %v9260_v2 = vpop.eup %9259  ;;  %v12552_v8 = vmul.f32 0.03125, %v12436_v0  ;;  %v2386_v20 = vadd.f32 1e-05, %v2322_v33  ;;  %v2323_v58 = vmax.f32 %v2259_v47, 0.0 }
 0x427   :  { %16141 = vst [vmem:[#allocation160_spill] sm:$0xff] %v12544_v61  ;;  %16142 = vst [vmem:[#allocation249_spill] sm:$0xff] %v12547_v27  ;;  %v4025_v22 = vmul.f32 0.03125, %v3961_v55  ;;  %1954 = vadd.xlane.f32.xlu0 %v16145_v34  ;;  %v2512_v21 = vmul.f32 %v9260_v2, %v16146_v54  ;;  %v12557_v14 = vmul.f32 0.03125, %v12444_v40  ;;  %v2579_v53 = vmul.f32 %v12521_v57, %v2511_v29  ;;  %v16149_v47 = vld [vmem:[#allocation205_spill] sm:$0xff]  ;;  %v16150_v55 = vld [vmem:[#allocation50_spill] sm:$0xff]  ;;  %v3710_v40 = vpop.xlane.xlu1 %3709 }
 0x428   :  { %16144 = vst [vmem:[#allocation24_spill] sm:$0xff] %v12552_v8  ;;  %v2646_v6 = vadd.f32 %v12541_v56, %v2578_v50  ;;  %v9262_v32 = vpop.eup %9261  ;;  %9263 = vrsqrt.f32 %v2386_v20  ;;  %v2387_v30 = vadd.f32 1e-05, %v2323_v58  ;;  %v3959_v33 = vsub.f32 %v3704_v39, %v16148_v46  ;;  %v16152_v20 = vld [vmem:[#allocation162_spill] sm:$0xff]  ;;  %v16213_v35 = vld [vmem:[#allocation168_spill] sm:$0xff] }
 0x429   :  { %16147 = vst [vmem:[#allocation200_spill] sm:$0xff] %v12557_v14  ;;  %v4089_v0 = vmax.f32 %v4025_v22, 0.0  ;;  %1952 = vadd.xlane.f32.xlu1 %v16149_v47  ;;  %v2513_v34 = vmul.f32 %v9262_v32, %v16150_v55  ;;  %v12565_v2 = vmul.f32 0.03125, %v12456_v60  ;;  %v2647_v54 = vadd.f32 %v12541_v56, %v2579_v53  ;;  %v16153_v22 = vld [vmem:[#allocation93_spill] sm:$0xff]  ;;  %v3716_v39 = vpop.xlane.xlu0 %3715  ;;  %v16154_v53 = vld [vmem:[#allocation96_spill] sm:$0xff]  ;;  %v16196_v25 = vld [vmem:[#allocation218_spill] sm:$0xff] }
 0x42a   :  { %v2580_v29 = vmul.f32 %v12521_v57, %v2512_v21  ;;  %9265 = vrsqrt.f32 %v2387_v30  ;;  %v4023_v31 = vmul.f32 0.03125, %v3959_v33  ;;  %v3962_v58 = vsub.f32 %v3710_v40, %v16152_v20  ;;  %v16155_v21 = vld [vmem:[#allocation201_spill] sm:$0xff]  ;;  %v16157_v33 = vld [vmem:[#allocation70_spill] sm:$0xff] }
 0x42b   :  { %16151 = vst [vmem:[#allocation48_spill] sm:$0xff] %v12565_v2  ;;  %v4153_v50 = vadd.f32 1e-05, %v4089_v0  ;;  %1710 = vadd.xlane.f32.xlu0 %v16153_v22  ;;  %v2710_v46 = vmax.f32 %v2646_v6, 0.0  ;;  %v2711_v47 = vmax.f32 %v2647_v54, 0.0  ;;  %v2581_v32 = vmul.f32 %v12521_v57, %v2513_v34  ;;  %v3706_v0 = vpop.xlane.xlu1 %3705 }
 0x42c   :  { %v2648_v60 = vadd.f32 %v12541_v56, %v2580_v29  ;;  %v4087_v55 = vmax.f32 %v4023_v31, 0.0  ;;  %v4026_v27 = vmul.f32 0.03125, %v3962_v58  ;;  %v3965_v62 = vsub.f32 %v3716_v39, %v16154_v53  ;;  %v16161_v58 = vld [vmem:[#allocation92_spill] sm:$0xff] }
 0x42d   :  { %9267 = vrsqrt.f32 %v4153_v50  ;;  %1956 = vadd.xlane.f32.xlu1 %v16155_v21  ;;  %v12576_v30 = vmul.f32 0.03125, %v12471_v10  ;;  %v12580_v40 = vsub.f32 %v16157_v33, %v12552_v8  ;;  %v12582_v6 = vpack.c.bf16 %v2711_v47, %v2710_v46  ;;  %v16160_v50 = vld [vmem:[#allocation234_spill] sm:$0xff]  ;;  %v3712_v39 = vpop.xlane.xlu0 %3711  ;;  %v16162_v10 = vld [vmem:[#allocation69_spill] sm:$0xff]  ;;  %v16164_v21 = vld [vmem:[#allocation72_spill] sm:$0xff] }
 0x42e   :  { %v2649_v34 = vadd.f32 %v12541_v56, %v2581_v32  ;;  %v4151_v54 = vadd.f32 1e-05, %v4087_v55  ;;  %v4090_v29 = vmax.f32 %v4026_v27, 0.0  ;;  %v4029_v31 = vmul.f32 0.03125, %v3965_v62  ;;  %v16166_v62 = vld [vmem:[#allocation97_spill] sm:$0xff] }
 0x42f   :  { %16156 = vst [vmem:[#allocation91_spill] sm:$0xff] %v12576_v30  ;;  %16158 = vst [vmem:[#allocation205_spill] sm:$0xff] %v12580_v40  ;;  %v3960_v20 = vsub.f32 %v3706_v0, %v16160_v50  ;;  %1714 = vadd.xlane.f32.xlu0 %v16161_v58  ;;  %v12589_v53 = vsub.f32 %v16162_v10, %v12565_v2  ;;  %v12593_v33 = vsub.f32 %v16164_v21, %v12557_v14  ;;  %v16167_v0 = vld [vmem:[#allocation99_spill] sm:$0xff]  ;;  %v3718_v8 = vpop.xlane.xlu1 %3717  ;;  %v16176_v14 = vld [vmem:[#allocation26_spill] sm:$0xff] }
 0x430   :  { %16159 = vst [vmem:[#allocation50_spill] sm:$0xff] %v12582_v6  ;;  %v2712_v46 = vmax.f32 %v2648_v60, 0.0  ;;  %v2713_v47 = vmax.f32 %v2649_v34, 0.0  ;;  %9269 = vrsqrt.f32 %v4151_v54  ;;  %v4154_v32 = vadd.f32 1e-05, %v4090_v29  ;;  %v16168_v10 = vld [vmem:[#allocation71_spill] sm:$0xff] }
 0x431   :  { %16163 = vst [vmem:[#allocation162_spill] sm:$0xff] %v12589_v53  ;;  %16165 = vst [vmem:[#allocation96_spill] sm:$0xff] %v12593_v33  ;;  %v4093_v55 = vmax.f32 %v4029_v31, 0.0  ;;  %v4024_v27 = vmul.f32 0.03125, %v3960_v20  ;;  %1712 = vadd.xlane.f32.xlu1 %v16166_v62  ;;  %v3963_v50 = vsub.f32 %v3712_v39, %v16167_v0  ;;  %v12599_v6 = vmul.f32 %v12580_v40, %v12580_v40  ;;  %v16171_v29 = vld [vmem:[#allocation98_spill] sm:$0xff]  ;;  %v3724_v0 = vpop.xlane.xlu0 %3723  ;;  %v16186_v58 = vld [vmem:[#allocation56_spill] sm:$0xff] }
 0x432   :  { %v12603_v2 = vsub.f32 %v16168_v10, %v12576_v30  ;;  %v12605_v21 = vpack.c.bf16 %v2713_v47, %v2712_v46  ;;  %v9264_v60 = vpop.eup %9263  ;;  %9271 = vrsqrt.f32 %v4154_v32  ;;  %v3966_v31 = vsub.f32 %v3718_v8, %v16171_v29  ;;  %v16172_v20 = vld [vmem:[#allocation210_spill] sm:$0xff]  ;;  %v16173_v46 = vld [vmem:[#allocation25_spill] sm:$0xff]  ;;  %v16175_v29 = vld [vmem:[#allocation95_spill] sm:$0xff] }
 0x433   :  { %v4157_v34 = vadd.f32 1e-05, %v4093_v55  ;;  %v4088_v54 = vmax.f32 %v4024_v27, 0.0  ;;  %1958 = vadd.xlane.f32.xlu0 %v16172_v20  ;;  %v4027_v39 = vmul.f32 0.03125, %v3963_v50  ;;  %v12611_v40 = vmul.f32 %v12589_v53, %v12589_v53  ;;  %v16174_v27 = vld [vmem:[#allocation238_spill] sm:$0xff]  ;;  %v3714_v20 = vpop.xlane.xlu1 %3713 }
 0x434   :  { %16169 = vst [vmem:[#allocation201_spill] sm:$0xff] %v12603_v2  ;;  %16170 = vst [vmem:[#allocation70_spill] sm:$0xff] %v12605_v21  ;;  %v12615_v10 = vmul.f32 %v12593_v33, %v12593_v33  ;;  %v2514_v47 = vmul.f32 %v9264_v60, %v16173_v46  ;;  %v9266_v30 = vpop.eup %9265  ;;  %v4030_v55 = vmul.f32 0.03125, %v3966_v31  ;;  %v3969_v8 = vsub.f32 %v3724_v0, %v16174_v27  ;;  %v16178_v46 = vld [vmem:[#allocation208_spill] sm:$0xff]  ;;  %v16179_v0 = vld [vmem:[#allocation55_spill] sm:$0xff] }
 0x435   :  { %9273 = vrsqrt.f32 %v4157_v34  ;;  %v4152_v32 = vadd.f32 1e-05, %v4088_v54  ;;  %1716 = vadd.xlane.f32.xlu1 %v16175_v29  ;;  %v4091_v50 = vmax.f32 %v4027_v39, 0.0  ;;  %v12622_v53 = vmul.f32 %v12603_v2, %v12603_v2  ;;  %v16177_v54 = vld [vmem:[#allocation236_spill] sm:$0xff]  ;;  %v12631_v39 = vld [vmem:[%s15202_s12 + $0x3] ss:$0 sm:$0xff]  ;;  %v3720_v29 = vpop.xlane.xlu0 %3719 }
 0x436   :  { %v2515_v21 = vmul.f32 %v9266_v30, %v16176_v14  ;;  %v2582_v33 = vmul.f32 %v12521_v57, %v2514_v47  ;;  %v4094_v60 = vmax.f32 %v4030_v55, 0.0  ;;  %v4033_v34 = vmul.f32 0.03125, %v3969_v8  ;;  %v16181_v8 = vld [vmem:[#allocation102_spill] sm:$0xff] }
 0x437   :  { %v9268_v62 = vpop.eup %9267  ;;  %9275 = vrsqrt.f32 %v4152_v32  ;;  %v3964_v31 = vsub.f32 %v3714_v20, %v16177_v54  ;;  %1962 = vadd.xlane.f32.xlu0 %v16178_v46  ;;  %v4155_v2 = vadd.f32 1e-05, %v4091_v50  ;;  %v3967_v20 = vsub.f32 %v3720_v29, %v16181_v8  ;;  %v16182_v54 = vld [vmem:[#allocation130_spill] sm:$0xff] }
 0x438   :  { %v4281_v27 = vmul.f32 %v9268_v62, %v16179_v0  ;;  %v2583_v14 = vmul.f32 %v12521_v57, %v2515_v21  ;;  %v12636_v30 = vadd.f32 %v12541_v56, %v2582_v33  ;;  %v4158_v47 = vadd.f32 1e-05, %v4094_v60  ;;  %v12643_v46 = vld [vmem:[%s15202_s12 + $0x4] ss:$0 sm:$0xff]  ;;  %v3726_v62 = vpop.xlane.xlu1 %3725  ;;  %v16185_v0 = vld [vmem:[#allocation101_spill] sm:$0xff] }
 0x439   :  { %v4097_v32 = vmax.f32 %v4033_v34, 0.0  ;;  %v4028_v55 = vmul.f32 0.03125, %v3964_v31  ;;  %1960 = vadd.xlane.f32.xlu1 %v16182_v54  ;;  %9277 = vrsqrt.f32 %v4155_v2  ;;  %v4031_v34 = vmul.f32 0.03125, %v3967_v20  ;;  %v16184_v31 = vld [vmem:[#allocation109_spill] sm:$0xff]  ;;  %v3732_v54 = vpop.xlane.xlu0 %3731 }
 0x43a   :  { %16180 = vst [vmem:[#allocation234_spill] sm:$0xff] %v12636_v30  ;;  %v4349_v50 = vmul.f32 %v12631_v39, %v4281_v27  ;;  %v12647_v57 = vadd.f32 %v12541_v56, %v2583_v14  ;;  %v9270_v21 = vpop.eup %9269  ;;  %9279 = vrsqrt.f32 %v4158_v47  ;;  %v3970_v8 = vsub.f32 %v3726_v62, %v16185_v0  ;;  %v16187_v30 = vld [vmem:[#allocation104_spill] sm:$0xff] }
 0x43b   :  { %v4161_v60 = vadd.f32 1e-05, %v4097_v32  ;;  %v4092_v29 = vmax.f32 %v4028_v55, 0.0  ;;  %1718 = vadd.xlane.f32.xlu0 %v16184_v31  ;;  %v4279_v2 = vmul.f32 %v9270_v21, %v16186_v58  ;;  %v4095_v33 = vmax.f32 %v4031_v34, 0.0  ;;  %v16188_v32 = vld [vmem:[#allocation211_spill] sm:$0xff]  ;;  %v16189_v55 = vld [vmem:[#allocation57_spill] sm:$0xff] }
 0x43c   :  { %16183 = vst [vmem:[#allocation69_spill] sm:$0xff] %v12647_v57  ;;  %v4417_v22 = vadd.f32 %v12643_v46, %v4349_v50  ;;  %v9272_v56 = vpop.eup %9271  ;;  %v3973_v47 = vsub.f32 %v3732_v54, %v16187_v30  ;;  %v4034_v31 = vmul.f32 0.03125, %v3970_v8  ;;  %v3722_v61 = vpop.xlane.xlu1 %3721  ;;  %v12659_v58 = vld [vmem:[#allocation8] sm:$0xff]   ;;  %v16191_v34 = vld [vmem:[#allocation108_spill] sm:$0xff] }
 0x43d   :  { %9281 = vrsqrt.f32 %v4161_v60  ;;  %v4156_v14 = vadd.f32 1e-05, %v4092_v29  ;;  %1964 = vadd.xlane.f32.xlu1 %v16188_v32  ;;  %v4282_v20 = vmul.f32 %v9272_v56, %v16189_v55  ;;  %v4347_v62 = vmul.f32 %v12631_v39, %v4279_v2  ;;  %v16190_v60 = vld [vmem:[#allocation103_spill] sm:$0xff]  ;;  %v3728_v54 = vpop.xlane.xlu0 %3727  ;;  %8641 = vmatprep.subr.bf16.mxu1 %v12659_v58 }
 0x43e   :  { %v4481_v0 = vmax.f32 %v4417_v22, 0.0  ;;  %v4159_v21 = vadd.f32 1e-05, %v4095_v33  ;;  %v4037_v27 = vmul.f32 0.03125, %v3973_v47  ;;  %v3968_v29 = vsub.f32 %v3722_v61, %v16190_v60  ;;  %v16192_v56 = vld [vmem:[#allocation59_spill] sm:$0xff]  ;;  %v16193_v47 = vld [vmem:[#allocation113_spill] sm:$0xff] }
 0x43f   :  { %v9274_v50 = vpop.eup %9273  ;;  %9283 = vrsqrt.f32 %v4156_v14  ;;  %1722 = vadd.xlane.f32.xlu0 %v16191_v34  ;;  %v4098_v30 = vmax.f32 %v4034_v31, 0.0  ;;  %v4415_v32 = vadd.f32 %v12643_v46, %v4347_v62  ;;  %v4350_v8 = vmul.f32 %v12631_v39, %v4282_v20  ;;  %v16194_v31 = vld [vmem:[#allocation58_spill] sm:$0xff] }
 0x440   :  { %v4285_v55 = vmul.f32 %v9274_v50, %v16192_v56  ;;  %9285 = vrsqrt.f32 %v4159_v21  ;;  %v4101_v2 = vmax.f32 %v4037_v27, 0.0  ;;  %v4032_v14 = vmul.f32 0.03125, %v3968_v29  ;;  %v3734_v60 = vpop.xlane.xlu1 %3733  ;;  %v16195_v56 = vld [vmem:[#allocation239_spill] sm:$0xff] }
 0x441   :  { %v9276_v22 = vpop.eup %9275  ;;  %v3971_v33 = vsub.f32 %v3728_v54, %v12250_v44  ;;  %1720 = vadd.xlane.f32.xlu1 %v16193_v47  ;;  %v4162_v61 = vadd.f32 1e-05, %v4098_v30  ;;  %v4479_v57 = vmax.f32 %v4415_v32, 0.0  ;;  %v4418_v62 = vadd.f32 %v12643_v46, %v4350_v8  ;;  %v3740_v21 = vpop.xlane.xlu0 %3739 }
 0x442   :  { %v4280_v34 = vmul.f32 %v9276_v22, %v16194_v31  ;;  %v4165_v20 = vadd.f32 1e-05, %v4101_v2  ;;  %v4096_v41 = vmax.f32 %v4032_v14, 0.0  ;;  %v3974_v5 = vsub.f32 %v3734_v60, %v16195_v56  ;;  %v16197_v2 = vld [vmem:[#allocation111_spill] sm:$0xff] }
 0x443   :  { %v4035_v50 = vmul.f32 0.03125, %v3971_v33  ;;  %1966 = vadd.xlane.f32.xlu0 %v16196_v25  ;;  %v9278_v27 = vpop.eup %9277  ;;  %9287 = vrsqrt.f32 %v4162_v61  ;;  %v4482_v29 = vmax.f32 %v4418_v62, 0.0  ;;  %v4353_v30 = vmul.f32 %v12631_v39, %v4285_v55  ;;  %v16198_v61 = vld [vmem:[#allocation60_spill] sm:$0xff]  ;;  %v16199_v62 = vld [vmem:[#allocation174_spill] sm:$0xff] }
 0x444   :  { %v4348_v44 = vmul.f32 %v12631_v39, %v4280_v34  ;;  %v9280_v54 = vpop.eup %9279  ;;  %9289 = vrsqrt.f32 %v4165_v20  ;;  %v4160_v32 = vadd.f32 1e-05, %v4096_v41  ;;  %v4038_v8 = vmul.f32 0.03125, %v3974_v5  ;;  %v3730_v33 = vpop.xlane.xlu1 %3729  ;;  %v16200_v41 = vld [vmem:[#allocation214_spill] sm:$0xff] }
 0x445   :  { %v4099_v22 = vmax.f32 %v4035_v50, 0.0  ;;  %1724 = vadd.xlane.f32.xlu1 %v16197_v2  ;;  %v3977_v14 = vsub.f32 %v3740_v21, %v12254_v42  ;;  %v4592_v60 = vpack.c.bf16 %v4482_v29, %v4481_v0  ;;  %v4283_v31 = vmul.f32 %v9278_v27, %v16198_v61  ;;  %v3736_v50 = vpop.xlane.xlu0 %3735  ;;  %v16201_v21 = vld [vmem:[#allocation61_spill] sm:$0xff]  ;;  %v16202_v29 = vld [vmem:[#allocation107_spill] sm:$0xff] }
 0x446   :  { %v4416_v25 = vadd.f32 %v12643_v46, %v4348_v44  ;;  %9291 = vrsqrt.f32 %v4160_v32  ;;  %v4102_v55 = vmax.f32 %v4038_v8, 0.0  ;;  %v3972_v20 = vsub.f32 %v3730_v33, %v16199_v62  ;;  %v16203_v32 = vld [vmem:[#allocation219_spill] sm:$0xff]  ;;  %v16204_v62 = vld [vmem:[#allocation62_spill] sm:$0xff] }
 0x447   :  { %v12679_v56 = vpop.eup %9281  ;;  %v4163_v34 = vadd.f32 1e-05, %v4099_v22  ;;  %1970 = vadd.xlane.f32.xlu0 %v16200_v41  ;;  %v4041_v5 = vmul.f32 0.03125, %v3977_v14  ;;  %v4351_v42 = vmul.f32 %v12631_v39, %v4283_v31  ;;  %v4286_v47 = vmul.f32 %v9280_v54, %v16201_v21  ;;  %v16205_v54 = vld [vmem:[#allocation178_spill] sm:$0xff] }
 0x448   :  { %v4480_v2 = vmax.f32 %v4416_v25, 0.0  ;;  %v4166_v0 = vadd.f32 1e-05, %v4102_v55  ;;  %v4036_v27 = vmul.f32 0.03125, %v3972_v20  ;;  %v3975_v61 = vsub.f32 %v3736_v50, %v16202_v29  ;;  %v3742_v8 = vpop.xlane.xlu1 %3741  ;;  %v9192_v55 = vld [vmem:[#allocation8 + $0x8] sm:$0xff]  }
 0x449   :  { %v9284_v44 = vpop.eup %9283  ;;  %9293 = vrsqrt.f32 %v4163_v34  ;;  %1968 = vadd.xlane.f32.xlu1 %v16203_v32  ;;  %v4105_v22 = vmax.f32 %v4041_v5, 0.0  ;;  %v4419_v14 = vadd.f32 %v12643_v46, %v4351_v42  ;;  %v3978_v21 = vsub.f32 %v3742_v8, %v16205_v54  ;;  %v16206_v34 = vld [vmem:[#allocation121_spill] sm:$0xff]  ;;  %v3748_v50 = vpop.xlane.xlu0 %3747  ;;  %v16207_v32 = vld [vmem:[#allocation240_spill] sm:$0xff] }
 0x44a   :  { %v4591_v33 = vpack.c.bf16 %v4480_v2, %v4479_v57  ;;  %v4284_v41 = vmul.f32 %v9284_v44, %v16204_v62  ;;  %v9286_v25 = vpop.eup %9285  ;;  %9295 = vrsqrt.f32 %v4166_v0  ;;  %v4100_v31 = vmax.f32 %v4036_v27, 0.0  ;;  %v16208_v27 = vld [vmem:[#allocation215_spill] sm:$0xff]  ;;  %v16210_v54 = vld [vmem:[#allocation241_spill] sm:$0xff] }
 0x44b   :  { %v4039_v7 = vmul.f32 0.03125, %v3975_v61  ;;  %1726 = vadd.xlane.f32.xlu0 %v16206_v34  ;;  %v4169_v20 = vadd.f32 1e-05, %v4105_v22  ;;  %v4483_v29 = vmax.f32 %v4419_v14, 0.0  ;;  %v4354_v57 = vmul.f32 %v12631_v39, %v4286_v47 }
 0x44c   :  { %8577 = vmatprep.mubr.bf16.mxu1 %v4591_v33  ;;  %v4352_v5 = vmul.f32 %v12631_v39, %v4284_v41  ;;  %v4164_v2 = vadd.f32 1e-05, %v4100_v31  ;;  %v4042_v42 = vmul.f32 0.03125, %v3978_v21  ;;  %v3981_v0 = vsub.f32 %v3748_v50, %v16207_v32  ;;  %v3738_v8 = vpop.xlane.xlu1 %3737  ;;  %v16209_v31 = vld [vmem:[#allocation120_spill] sm:$0xff] }
 0x44d   :  { %v4103_v44 = vmax.f32 %v4039_v7, 0.0  ;;  %1972 = vadd.xlane.f32.xlu1 %v16208_v27  ;;  %8578 = vmatmul.mubr.bf16.vlgmr.msra.gmra.mrb[28].mxu1 %v4592_v60  ;;  %v9288_v61 = vpop.eup %9287  ;;  %9297 = vrsqrt.f32 %v4169_v20  ;;  %v4421_v33 = vadd.f32 %v12643_v46, %v4353_v30  ;;  %v4422_v62 = vadd.f32 %v12643_v46, %v4354_v57  ;;  %v9193_v60 = vld [vmem:[#allocation8 + $0x10] sm:$0xff]   ;;  %v3744_v20 = vpop.xlane.xlu0 %3743  ;;  %v16211_v27 = vld [vmem:[#allocation182_spill] sm:$0xff] }
 0x44e   :  { %v4420_v22 = vadd.f32 %v12643_v46, %v4352_v5  ;;  %8642 = vmatpush3.bf16.msra.mxu1 %v12659_v58  ;;  %v12699_v47 = vpop.eup %9289  ;;  %9299 = vrsqrt.f32 %v4164_v2  ;;  %v4106_v41 = vmax.f32 %v4042_v42, 0.0  ;;  %v4045_v14 = vmul.f32 0.03125, %v3981_v0  ;;  %v16212_v2 = vld [vmem:[#allocation123_spill] sm:$0xff] }
 0x44f   :  { %v4167_v7 = vadd.f32 1e-05, %v4103_v44  ;;  %1730 = vadd.xlane.f32.xlu0 %v16209_v31  ;;  %8643 = vmatprep.subr.bf16.mxu1 %v9192_v55  ;;  %v3976_v21 = vsub.f32 %v3738_v8, %v16210_v54  ;;  %v4485_v5 = vmax.f32 %v4421_v33, 0.0  ;;  %v4486_v30 = vmax.f32 %v4422_v62, 0.0  ;;  %v16214_v62 = vld [vmem:[#allocation185_spill] sm:$0xff] }
 0x450   :  { %v4484_v50 = vmax.f32 %v4420_v22, 0.0  ;;  %v9292_v32 = vpop.eup %9291  ;;  %v4170_v57 = vadd.f32 1e-05, %v4106_v41  ;;  %v4109_v58 = vmax.f32 %v4045_v14, 0.0  ;;  %v3979_v34 = vsub.f32 %v3744_v20, %v16211_v27  ;;  %v3750_v42 = vpop.xlane.xlu1 %3749  ;;  %v16215_v41 = vld [vmem:[#allocation222_spill] sm:$0xff]  ;;  %v9194_v14 = vld [vmem:[#allocation8 + $0x18] sm:$0xff]  }
 0x451   :  { %9301 = vrsqrt.f32 %v4167_v7  ;;  %1728 = vadd.xlane.f32.xlu1 %v16212_v2  ;;  %v4040_v44 = vmul.f32 0.03125, %v3976_v21  ;;  %v4594_v31 = vpack.c.bf16 %v4486_v30, %v4485_v5  ;;  %v4287_v45 = vmul.f32 %v9286_v25, %v16213_v35  ;;  %v3756_v20 = vpop.xlane.xlu0 %3755  ;;  %v16216_v21 = vld [vmem:[#allocation65_spill] sm:$0xff]  ;;  %v16217_v35 = vld [vmem:[#allocation63_spill] sm:$0xff] }
 0x452   :  { %v4593_v0 = vpack.c.bf16 %v4484_v50, %v4483_v29  ;;  %8644 = vmatpush3.bf16.msra.mxu1 %v9192_v55  ;;  %9303 = vrsqrt.f32 %v4170_v57  ;;  %v4173_v22 = vadd.f32 1e-05, %v4109_v58  ;;  %v4043_v33 = vmul.f32 0.03125, %v3979_v34  ;;  %v16218_v57 = vld [vmem:[#allocation122_spill] sm:$0xff] }
 0x453   :  { %v12706_v8 = vpop.eup %9293  ;;  %v3982_v7 = vsub.f32 %v3750_v42, %v16214_v62  ;;  %1974 = vadd.xlane.f32.xlu0 %v16215_v41  ;;  %8645 = vmatprep.subr.bf16.mxu1 %v9193_v60  ;;  %v4104_v54 = vmax.f32 %v4040_v44, 0.0  ;;  %v4288_v29 = vmul.f32 %v9292_v32, %v16216_v21  ;;  %v4355_v50 = vmul.f32 %v12631_v39, %v4287_v45  ;;  %v16219_v45 = vld [vmem:[#allocation169_spill] sm:$0xff] }
 0x454   :  { %8581 = vmatprep.mubr.bf16.mxu1 %v4593_v0  ;;  %v4289_v25 = vmul.f32 %v12679_v56, %v16217_v35  ;;  %v12714_v55 = vpop.eup %9295  ;;  %9305 = vrsqrt.f32 %v4173_v22  ;;  %v4107_v34 = vmax.f32 %v4043_v33, 0.0  ;;  %v3985_v30 = vsub.f32 %v3756_v20, %v12326_v37  ;;  %v3746_v27 = vpop.xlane.xlu1 %3745  ;;  %v16220_v33 = vld [vmem:[#allocation220_spill] sm:$0xff]  ;;  %v9195_v37 = vld [vmem:[#allocation8 + $0x20] sm:$0xff]  }
 0x455   :  { %v4046_v5 = vmul.f32 0.03125, %v3982_v7  ;;  %1732 = vadd.xlane.f32.xlu1 %v16218_v57  ;;  %8582 = vmatmul.mubr.bf16.gmra.mrb[32].mxu1 %v4594_v31  ;;  %v4168_v58 = vadd.f32 1e-05, %v4104_v54  ;;  %v4356_v44 = vmul.f32 %v12631_v39, %v4288_v29  ;;  %v4423_v32 = vadd.f32 %v12643_v46, %v4355_v50  ;;  %v3752_v31 = vpop.xlane.xlu0 %3751  ;;  %v16221_v50 = vld [vmem:[#allocation224_spill] sm:$0xff] }
 0x456   :  { %v4290_v42 = vmul.f32 %v9288_v61, %v16219_v45  ;;  %8646 = vmatpush3.bf16.msra.mxu1 %v9193_v60  ;;  %v4171_v56 = vadd.f32 1e-05, %v4107_v34  ;;  %v4049_v62 = vmul.f32 0.03125, %v3985_v30  ;;  %v3980_v22 = vsub.f32 %v3746_v27, %v12322_v24  ;;  %v9196_v45 = vld [vmem:[#allocation8 + $0x28] sm:$0xff]  }
 0x457   :  { %v4110_v0 = vmax.f32 %v4046_v5, 0.0  ;;  %1978 = vadd.xlane.f32.xlu0 %v16220_v33  ;;  %8647 = vmatprep.subr.bf16.mxu1 %v9194_v14  ;;  %v12723_v7 = vpop.eup %9297  ;;  %9307 = vrsqrt.f32 %v4168_v58  ;;  %v4424_v41 = vadd.f32 %v12643_v46, %v4356_v44  ;;  %v4487_v54 = vmax.f32 %v4423_v32, 0.0  ;;  %v16222_v32 = vld [vmem:[#allocation125_spill] sm:$0xff] }
 0x458   :  { %v4357_v20 = vmul.f32 %v12631_v39, %v4289_v25  ;;  %v9300_v61 = vpop.eup %9299  ;;  %9309 = vrsqrt.f32 %v4171_v56  ;;  %v4113_v21 = vmax.f32 %v4049_v62, 0.0  ;;  %v4044_v29 = vmul.f32 0.03125, %v3980_v22  ;;  %v3758_v35 = vpop.xlane.xlu1 %3757 }
 0x459   :  { %v4174_v60 = vadd.f32 1e-05, %v4110_v0  ;;  %1976 = vadd.xlane.f32.xlu1 %v16221_v50  ;;  %v3983_v24 = vsub.f32 %v3752_v31, %v12329_v52  ;;  %v4488_v34 = vmax.f32 %v4424_v41, 0.0  ;;  %v4358_v5 = vmul.f32 %v12631_v39, %v4290_v42  ;;  %v3764_v52 = vpop.xlane.xlu0 %3763  ;;  %v16223_v41 = vld [vmem:[#allocation223_spill] sm:$0xff] }
 0x45a   :  { %v4425_v30 = vadd.f32 %v12643_v46, %v4357_v20  ;;  %8648 = vmatpush3.bf16.msra.mxu1 %v9194_v14  ;;  %v4177_v25 = vadd.f32 1e-05, %v4113_v21  ;;  %v4108_v27 = vmax.f32 %v4044_v29, 0.0  ;;  %v3986_v44 = vsub.f32 %v3758_v35, %v12332_v63  ;;  %v16224_v21 = vld [vmem:[#allocation66_spill] sm:$0xff] }
 0x45b   :  { %v12731_v58 = vpop.eup %9301  ;;  %9311 = vrsqrt.f32 %v4174_v60  ;;  %1734 = vadd.xlane.f32.xlu0 %v16222_v32  ;;  %8649 = vmatprep.subr.bf16.mxu1 %v9195_v37  ;;  %v4047_v56 = vmul.f32 0.03125, %v3983_v24  ;;  %v4595_v0 = vpack.c.bf16 %v4488_v34, %v4487_v54  ;;  %v4426_v62 = vadd.f32 %v12643_v46, %v4358_v5  ;;  %v16225_v54 = vld [vmem:[#allocation68_spill] sm:$0xff] }
 0x45c   :  { %v4489_v42 = vmax.f32 %v4425_v30, 0.0  ;;  %v12736_v22 = vpop.eup %9303  ;;  %9313 = vrsqrt.f32 %v4177_v25  ;;  %v4172_v14 = vadd.f32 1e-05, %v4108_v27  ;;  %v4050_v33 = vmul.f32 0.03125, %v3986_v44  ;;  %v3754_v60 = vpop.xlane.xlu1 %3753 }
 0x45d   :  { %v3989_v31 = vsub.f32 %v3764_v52, %v12348_v26  ;;  %1980 = vadd.xlane.f32.xlu1 %v16223_v41  ;;  %v4111_v63 = vmax.f32 %v4047_v56, 0.0  ;;  %8585 = vmatprep.mubr.bf16.mxu1 %v4595_v0  ;;  %v4490_v20 = vmax.f32 %v4426_v62, 0.0  ;;  %v4291_v29 = vmul.f32 %v12706_v8, %v16224_v21  ;;  %v16226_v26 = vld [vmem:[#allocation124_spill] sm:$0xff]  ;;  %v3760_v27 = vpop.xlane.xlu0 %3759 }
 0x45e   :  { %v4292_v50 = vmul.f32 %v9300_v61, %v16225_v54  ;;  %8650 = vmatpush3.bf16.msra.mxu1 %v9195_v37  ;;  %v12743_v24 = vpop.eup %9305  ;;  %9315 = vrsqrt.f32 %v4172_v14  ;;  %v4114_v35 = vmax.f32 %v4050_v33, 0.0  ;;  %v3984_v5 = vsub.f32 %v3754_v60, %v12351_v43  ;;  %v9197_v56 = vld [vmem:[#allocation8 + $0x30] sm:$0xff]  }
 0x45f   :  { %v4053_v34 = vmul.f32 0.03125, %v3989_v31  ;;  %1738 = vadd.xlane.f32.xlu0 %v16226_v26  ;;  %8651 = vmatprep.subr.bf16.mxu1 %v9196_v45  ;;  %v4175_v30 = vadd.f32 1e-05, %v4111_v63  ;;  %v4596_v25 = vpack.c.bf16 %v4490_v20, %v4489_v42  ;;  %v4359_v44 = vmul.f32 %v12631_v39, %v4291_v29  ;;  %v16227_v62 = vld [vmem:[#allocation128_spill] sm:$0xff]  ;;  %v16228_v31 = vld [vmem:[#allocation171_spill] sm:$0xff]  ;;  %v16230_v29 = vld [vmem:[#allocation242_spill] sm:$0xff] }
 0x460   :  { %v4360_v8 = vmul.f32 %v12631_v39, %v4292_v50  ;;  %v4178_v61 = vadd.f32 1e-05, %v4114_v35  ;;  %v4048_v52 = vmul.f32 0.03125, %v3984_v5  ;;  %v3987_v0 = vsub.f32 %v3760_v27, %v12362_v17  ;;  %v3766_v43 = vpop.xlane.xlu1 %3765  ;;  %v16229_v17 = vld [vmem:[#allocation86_spill] sm:$0xff]  ;;  %v16231_v5 = vld [vmem:[#allocation67_spill] sm:$0xff] }
 0x461   :  { %v4117_v37 = vmax.f32 %v4053_v34, 0.0  ;;  %1736 = vadd.xlane.f32.xlu1 %v16227_v62  ;;  %v9308_v14 = vpop.eup %9307  ;;  %9317 = vrsqrt.f32 %v4175_v30  ;;  %8586 = vmatmul.mubr.bf16.gmra.mrb[36].mxu1 %v4596_v25  ;;  %v4427_v33 = vadd.f32 %v12643_v46, %v4359_v44  ;;  %v4293_v41 = vmul.f32 %v12699_v47, %v16228_v31  ;;  %v3772_v50 = vpop.xlane.xlu0 %3771  ;;  %v9198_v25 = vld [vmem:[#allocation8 + $0x38] sm:$0xff]  }
 0x462   :  { %v4428_v42 = vadd.f32 %v12643_v46, %v4360_v8  ;;  %v12755_v63 = vpop.eup %9309  ;;  %9319 = vrsqrt.f32 %v4178_v61  ;;  %v4112_v60 = vmax.f32 %v4048_v52, 0.0  ;;  %v4051_v21 = vmul.f32 0.03125, %v3987_v0  ;;  %8652 = vmatpush3.bf16.msra.mxu1 %v9196_v45  ;;  %v16232_v8 = vld [vmem:[#allocation244_spill] sm:$0xff] }
 0x463   :  { %v4181_v20 = vadd.f32 1e-05, %v4117_v37  ;;  %1982 = vadd.xlane.f32.xlu0 %v16229_v17  ;;  %v3990_v54 = vsub.f32 %v3766_v43, %v16230_v29  ;;  %v4491_v35 = vmax.f32 %v4427_v33, 0.0  ;;  %v4294_v30 = vmul.f32 %v12714_v55, %v16231_v5  ;;  %8653 = vmatprep.subr.bf16.mxu1 %v9197_v56  ;;  %v16233_v37 = vld [vmem:[#allocation127_spill] sm:$0xff] }
 0x464   :  { %v4492_v34 = vmax.f32 %v4428_v42, 0.0  ;;  %v4176_v27 = vadd.f32 1e-05, %v4112_v60  ;;  %v4115_v44 = vmax.f32 %v4051_v21, 0.0  ;;  %v3993_v61 = vsub.f32 %v3772_v50, %v16232_v8  ;;  %v3762_v33 = vpop.xlane.xlu1 %3761  ;;  %v16234_v17 = vld [vmem:[#allocation243_spill] sm:$0xff]  ;;  %v16235_v60 = vld [vmem:[#allocation225_spill] sm:$0xff] }
 0x465   :  { %v12761_v47 = vpop.eup %9311  ;;  %9321 = vrsqrt.f32 %v4181_v20  ;;  %1740 = vadd.xlane.f32.xlu1 %v16233_v37  ;;  %v4054_v45 = vmul.f32 0.03125, %v3990_v54  ;;  %v4361_v0 = vmul.f32 %v12631_v39, %v4293_v41  ;;  %v4362_v43 = vmul.f32 %v12631_v39, %v4294_v30  ;;  %v3768_v41 = vpop.xlane.xlu0 %3767  ;;  %v16236_v50 = vld [vmem:[#allocation175_spill] sm:$0xff] }
 0x466   :  { %v4597_v52 = vpack.c.bf16 %v4492_v34, %v4491_v35  ;;  %v12767_v42 = vpop.eup %9313  ;;  %9323 = vrsqrt.f32 %v4176_v27  ;;  %v4179_v55 = vadd.f32 1e-05, %v4115_v44  ;;  %v4057_v31 = vmul.f32 0.03125, %v3993_v61  ;;  %8654 = vmatpush3.bf16.msra.mxu1 %v9197_v56  ;;  %v16237_v44 = vld [vmem:[#allocation227_spill] sm:$0xff] }
 0x467   :  { %v3988_v20 = vsub.f32 %v3762_v33, %v16234_v17  ;;  %1986 = vadd.xlane.f32.xlu0 %v16235_v60  ;;  %v4118_v21 = vmax.f32 %v4054_v45, 0.0  ;;  %v4429_v29 = vadd.f32 %v12643_v46, %v4361_v0  ;;  %v4430_v54 = vadd.f32 %v12643_v46, %v4362_v43  ;;  %8655 = vmatprep.subr.bf16.mxu1 %v9198_v25  ;;  %v16239_v60 = vld [vmem:[#allocation140_spill] sm:$0xff] }
 0x468   :  { %8589 = vmatprep.mubr.bf16.mxu1 %v4597_v52  ;;  %v4295_v35 = vmul.f32 %v12731_v58, %v16236_v50  ;;  %v12775_v34 = vpop.eup %9315  ;;  %9325 = vrsqrt.f32 %v4179_v55  ;;  %v4121_v5 = vmax.f32 %v4057_v31, 0.0  ;;  %v3991_v27 = vsub.f32 %v3768_v41, %v12401_v49  ;;  %v3774_v45 = vpop.xlane.xlu1 %3773  ;;  %v16238_v52 = vld [vmem:[#allocation180_spill] sm:$0xff]  ;;  %v16240_v50 = vld [vmem:[#allocation226_spill] sm:$0xff] }
 0x469   :  { %v4052_v30 = vmul.f32 0.03125, %v3988_v20  ;;  %1984 = vadd.xlane.f32.xlu1 %v16237_v44  ;;  %v4182_v56 = vadd.f32 1e-05, %v4118_v21  ;;  %v4493_v8 = vmax.f32 %v4429_v29, 0.0  ;;  %v4494_v61 = vmax.f32 %v4430_v54, 0.0  ;;  %v3780_v31 = vpop.xlane.xlu0 %3779 }
 0x46a   :  { %v4296_v0 = vmul.f32 %v9308_v14, %v16238_v52  ;;  %v4185_v43 = vadd.f32 1e-05, %v4121_v5  ;;  %v4055_v17 = vmul.f32 0.03125, %v3991_v27  ;;  %v3994_v58 = vsub.f32 %v3774_v45, %v12393_v51  ;;  %8656 = vmatpush3.bf16.msra.mxu1 %v9198_v25  ;;  %v16243_v52 = vld [vmem:[#allocation141_spill] sm:$0xff] }
 0x46b   :  { %v4116_v33 = vmax.f32 %v4052_v30, 0.0  ;;  %1990 = vadd.xlane.f32.xlu0 %v16239_v60  ;;  %v12782_v55 = vpop.eup %9317  ;;  %9327 = vrsqrt.f32 %v4182_v56  ;;  %v4598_v49 = vpack.c.bf16 %v4494_v61, %v4493_v8  ;;  %v4363_v20 = vmul.f32 %v12631_v39, %v4295_v35  ;;  %v16241_v30 = vld [vmem:[#allocation173_spill] sm:$0xff]  ;;  %v16242_v61 = vld [vmem:[#allocation176_spill] sm:$0xff] }
 0x46c   :  { %v4364_v21 = vmul.f32 %v12631_v39, %v4296_v0  ;;  %v12786_v29 = vpop.eup %9319  ;;  %9329 = vrsqrt.f32 %v4185_v43  ;;  %v4119_v54 = vmax.f32 %v4055_v17, 0.0  ;;  %v4058_v41 = vmul.f32 0.03125, %v3994_v58  ;;  %v3770_v27 = vpop.xlane.xlu1 %3769 }
 0x46d   :  { %v4180_v14 = vadd.f32 1e-05, %v4116_v33  ;;  %1988 = vadd.xlane.f32.xlu1 %v16240_v50  ;;  %8590 = vmatmul.mubr.bf16.gmra.mrb[40].mxu1 %v4598_v49  ;;  %v3997_v51 = vsub.f32 %v3780_v31, %v12411_v38  ;;  %v4431_v25 = vadd.f32 %v12643_v46, %v4363_v20  ;;  %v4297_v35 = vmul.f32 %v12723_v7, %v16241_v30  ;;  %v3776_v17 = vpop.xlane.xlu0 %3775  ;;  %v16244_v31 = vld [vmem:[#allocation142_spill] sm:$0xff] }
 0x46e   :  { %v4432_v5 = vadd.f32 %v12643_v46, %v4364_v21  ;;  %v4183_v56 = vadd.f32 1e-05, %v4119_v54  ;;  %v4122_v8 = vmax.f32 %v4058_v41, 0.0  ;;  %v4298_v45 = vmul.f32 %v12736_v22, %v16242_v61 }
 0x46f   :  { %v12794_v44 = vpop.eup %9321  ;;  %9331 = vrsqrt.f32 %v4180_v14  ;;  %1994 = vadd.xlane.f32.xlu0 %v16243_v52  ;;  %v4061_v0 = vmul.f32 0.03125, %v3997_v51  ;;  %v4495_v38 = vmax.f32 %v4431_v25, 0.0  ;;  %v4365_v33 = vmul.f32 %v12631_v39, %v4297_v35 }
 0x470   :  { %v4496_v43 = vmax.f32 %v4432_v5, 0.0  ;;  %v12800_v58 = vpop.eup %9323  ;;  %9333 = vrsqrt.f32 %v4183_v56  ;;  %v4186_v7 = vadd.f32 1e-05, %v4122_v8  ;;  %v4366_v60 = vmul.f32 %v12631_v39, %v4298_v45  ;;  %v3782_v54 = vpop.xlane.xlu1 %3781  ;;  %v16245_v5 = vld [vmem:[#allocation159_spill] sm:$0xff] }
 0x471   :  { %v3992_v49 = vsub.f32 %v3770_v27, %v12404_v48  ;;  %1992 = vadd.xlane.f32.xlu1 %v16244_v31  ;;  %v4125_v20 = vmax.f32 %v4061_v0, 0.0  ;;  %v4433_v21 = vadd.f32 %v12643_v46, %v4365_v33  ;;  %v3995_v14 = vsub.f32 %v3776_v17, %v12414_v16  ;;  %v16246_v56 = vld [vmem:[#allocation183_spill] sm:$0xff]  ;;  %v16247_v0 = vld [vmem:[#allocation228_spill] sm:$0xff] }
 0x472   :  { %v4599_v22 = vpack.c.bf16 %v4496_v43, %v4495_v38  ;;  %v12807_v41 = vpop.eup %9325  ;;  %9335 = vrsqrt.f32 %v4186_v7  ;;  %v4434_v50 = vadd.f32 %v12643_v46, %v4366_v60  ;;  %v3998_v25 = vsub.f32 %v3782_v54, %v12417_v9  ;;  %v16248_v43 = vld [vmem:[#allocation188_spill] sm:$0xff]  ;;  %v16250_v54 = vld [vmem:[#allocation179_spill] sm:$0xff] }
 0x473   :  { %v4056_v51 = vmul.f32 0.03125, %v3992_v49  ;;  %1998 = vadd.xlane.f32.xlu0 %v16245_v5  ;;  %v4189_v48 = vadd.f32 1e-05, %v4125_v20  ;;  %v4497_v30 = vmax.f32 %v4433_v21, 0.0  ;;  %v4059_v35 = vmul.f32 0.03125, %v3995_v14  ;;  %v3788_v27 = vpop.xlane.xlu0 %3787 }
 0x474   :  { %8593 = vmatprep.mubr.bf16.mxu1 %v4599_v22  ;;  %v4299_v8 = vmul.f32 %v12755_v63, %v16246_v56  ;;  %v4498_v16 = vmax.f32 %v4434_v50, 0.0  ;;  %v4062_v45 = vmul.f32 0.03125, %v3998_v25  ;;  %v4001_v52 = vsub.f32 %v3788_v27, %v12425_v36  ;;  %v16249_v22 = vld [vmem:[#allocation230_spill] sm:$0xff] }
 0x475   :  { %v4120_v61 = vmax.f32 %v4056_v51, 0.0  ;;  %1996 = vadd.xlane.f32.xlu1 %v16247_v0  ;;  %v12816_v38 = vpop.eup %9327  ;;  %9337 = vrsqrt.f32 %v4189_v48  ;;  %v4123_v9 = vmax.f32 %v4059_v35, 0.0  ;;  %v4300_v33 = vmul.f32 %v12775_v34, %v16248_v43  ;;  %v3778_v7 = vpop.xlane.xlu1 %3777  ;;  %v16251_v48 = vld [vmem:[#allocation184_spill] sm:$0xff]  ;;  %v16252_v35 = vld [vmem:[#allocation90_spill] sm:$0xff] }
 0x476   :  { %v4367_v17 = vmul.f32 %v12631_v39, %v4299_v8  ;;  %v12821_v60 = vpop.eup %9329  ;;  %v4600_v63 = vpack.c.bf16 %v4498_v16, %v4497_v30  ;;  %v4126_v31 = vmax.f32 %v4062_v45, 0.0  ;;  %v4065_v20 = vmul.f32 0.03125, %v4001_v52  ;;  %v16253_v0 = vld [vmem:[#allocation192_spill] sm:$0xff] }
 0x477   :  { %v4184_v49 = vadd.f32 1e-05, %v4120_v61  ;;  %2002 = vadd.xlane.f32.xlu0 %v16249_v22  ;;  %v4187_v36 = vadd.f32 1e-05, %v4123_v9  ;;  %v4368_v21 = vmul.f32 %v12631_v39, %v4300_v33  ;;  %v4301_v50 = vmul.f32 %v12743_v24, %v16250_v54  ;;  %v3784_v34 = vpop.xlane.xlu0 %3783  ;;  %v16254_v22 = vld [vmem:[#allocation143_spill] sm:$0xff] }
 0x478   :  { %v4435_v14 = vadd.f32 %v12643_v46, %v4367_v17  ;;  %8594 = vmatmul.mubr.bf16.gmra.mrb[44].mxu1 %v4600_v63  ;;  %v4190_v25 = vadd.f32 1e-05, %v4126_v31  ;;  %v4129_v5 = vmax.f32 %v4065_v20, 0.0  ;;  %v4302_v30 = vmul.f32 %v12761_v47, %v16251_v48 }
 0x479   :  { %v12828_v51 = vpop.eup %9331  ;;  %9339 = vrsqrt.f32 %v4184_v49  ;;  %2000 = vadd.xlane.f32.xlu1 %v16252_v35  ;;  %v4436_v27 = vadd.f32 %v12643_v46, %v4368_v21  ;;  %v4369_v8 = vmul.f32 %v12631_v39, %v4301_v50  ;;  %v3790_v16 = vpop.xlane.xlu1 %3789  ;;  %v3996_v52 = vsub.f32 %v3778_v7, %v12420_v13 }
 0x47a   :  { %9341 = vrsqrt.f32 %v4187_v36  ;;  %v4499_v56 = vmax.f32 %v4435_v14, 0.0  ;;  %v12835_v24 = vpop.eup %9333  ;;  %v4193_v61 = vadd.f32 1e-05, %v4129_v5  ;;  %v4370_v45 = vmul.f32 %v12631_v39, %v4302_v30  ;;  %v16257_v30 = vld [vmem:[#allocation73_spill] sm:$0xff] }
 0x47b   :  { %9343 = vrsqrt.f32 %v4190_v25  ;;  %2006 = vadd.xlane.f32.xlu0 %v16253_v0  ;;  %v4500_v47 = vmax.f32 %v4436_v27, 0.0  ;;  %v4437_v9 = vadd.f32 %v12643_v46, %v4369_v8  ;;  %v3999_v43 = vsub.f32 %v3784_v34, %v12439_v15  ;;  %v16256_v25 = vld [vmem:[#allocation189_spill] sm:$0xff]  ;;  %v16258_v27 = vld [vmem:[#allocation187_spill] sm:$0xff] }
 0x47c   :  { %v4002_v33 = vsub.f32 %v3790_v16, %v12430_v19  ;;  %v3796_v17 = vpop.xlane.xlu0 %3795  ;;  %v12843_v63 = vpop.eup %9335  ;;  %9345 = vrsqrt.f32 %v4193_v61  ;;  %v4438_v49 = vadd.f32 %v12643_v46, %v4370_v45  ;;  %v4060_v31 = vmul.f32 0.03125, %v3996_v52  ;;  %v16255_v19 = vld [vmem:[#allocation49_spill] sm:$0xff] }
 0x47d   :  { %v4005_v20 = vsub.f32 %v3796_v17, %v12447_v28  ;;  %2004 = vadd.xlane.f32.xlu1 %v16254_v22  ;;  %v4601_v13 = vpack.c.bf16 %v4500_v47, %v4499_v56  ;;  %v4501_v7 = vmax.f32 %v4437_v9, 0.0  ;;  %v4063_v36 = vmul.f32 0.03125, %v3999_v43  ;;  %v3786_v14 = vpop.xlane.xlu1 %3785  ;;  %v16260_v43 = vld [vmem:[#allocation64_spill] sm:$0xff] }
 0x47e   :  { %v4066_v21 = vmul.f32 0.03125, %v4002_v33  ;;  %v4502_v54 = vmax.f32 %v4438_v49, 0.0  ;;  %v4124_v15 = vmax.f32 %v4060_v31, 0.0  ;;  %v4303_v34 = vmul.f32 %v12782_v55, %v16255_v19  ;;  %v16259_v55 = vld [vmem:[#allocation193_spill] sm:$0xff] }
 0x47f   :  { %v4069_v50 = vmul.f32 0.03125, %v4005_v20  ;;  %2010 = vadd.xlane.f32.xlu0 %v16256_v25  ;;  %v12851_v5 = vpop.eup %9337  ;;  %8597 = vmatprep.mubr.bf16.mxu1 %v4601_v13  ;;  %v4127_v48 = vmax.f32 %v4063_v36, 0.0  ;;  %v4304_v35 = vmul.f32 %v12800_v58, %v16257_v30  ;;  %v4305_v56 = vmul.f32 %v12767_v42, %v16258_v27 }
 0x480   :  { %v4130_v28 = vmax.f32 %v4066_v21, 0.0  ;;  %v3792_v8 = vpop.xlane.xlu0 %3791  ;;  %v4602_v16 = vpack.c.bf16 %v4502_v54, %v4501_v7  ;;  %v4188_v61 = vadd.f32 1e-05, %v4124_v15  ;;  %v4371_v52 = vmul.f32 %v12631_v39, %v4303_v34 }
 0x481   :  { %v4133_v45 = vmax.f32 %v4069_v50, 0.0  ;;  %2008 = vadd.xlane.f32.xlu1 %v16259_v55  ;;  %v4191_v0 = vadd.f32 1e-05, %v4127_v48  ;;  %v4372_v9 = vmul.f32 %v12631_v39, %v4304_v35  ;;  %v4306_v33 = vmul.f32 %v12786_v29, %v16260_v43  ;;  %v3798_v17 = vpop.xlane.xlu1 %3797  ;;  %v16261_v50 = vld [vmem:[#allocation190_spill] sm:$0xff]  ;;  %v16263_v55 = vld [vmem:[#allocation75_spill] sm:$0xff] }
 0x482   :  { %v4194_v47 = vadd.f32 1e-05, %v4130_v28  ;;  %8598 = vmatmul.mubr.bf16.gmra.mrb[48].mxu1 %v4602_v16  ;;  %9347 = vrsqrt.f32 %v4188_v61  ;;  %v4439_v49 = vadd.f32 %v12643_v46, %v4371_v52  ;;  %v4373_v31 = vmul.f32 %v12631_v39, %v4305_v56  ;;  %v16262_v56 = vld [vmem:[#allocation198_spill] sm:$0xff] }
 0x483   :  { %v12862_v58 = vpop.eup %9339  ;;  %v4197_v42 = vadd.f32 1e-05, %v4133_v45  ;;  %2014 = vadd.xlane.f32.xlu0 %v12599_v6  ;;  %9349 = vrsqrt.f32 %v4191_v0  ;;  %v4440_v22 = vadd.f32 %v12643_v46, %v4372_v9  ;;  %v4374_v13 = vmul.f32 %v12631_v39, %v4306_v33 }
 0x484   :  { %v12867_v20 = vpop.eup %9341  ;;  %v4000_v29 = vsub.f32 %v3786_v14, %v12450_v1  ;;  %v3804_v7 = vpop.xlane.xlu0 %3803  ;;  %9351 = vrsqrt.f32 %v4194_v47  ;;  %v4503_v21 = vmax.f32 %v4439_v49, 0.0  ;;  %v4441_v54 = vadd.f32 %v12643_v46, %v4373_v31  ;;  %v16264_v47 = vld [vmem:[#allocation191_spill] sm:$0xff]  ;;  %v16265_v49 = vld [vmem:[#allocation74_spill] sm:$0xff] }
 0x485   :  { %v12872_v36 = vpop.eup %9343  ;;  %v4003_v15 = vsub.f32 %v3792_v8, %v12459_v59  ;;  %2012 = vadd.xlane.f32.xlu1 %v16261_v50  ;;  %9353 = vrsqrt.f32 %v4197_v42  ;;  %v4504_v6 = vmax.f32 %v4440_v22, 0.0  ;;  %v4442_v19 = vadd.f32 %v12643_v46, %v4374_v13  ;;  %v3794_v25 = vpop.xlane.xlu1 %3793 }
 0x486   :  { %v4064_v34 = vmul.f32 0.03125, %v4000_v29  ;;  %v12878_v48 = vpop.eup %9345  ;;  %v4505_v1 = vmax.f32 %v4441_v54, 0.0  ;;  %v4006_v28 = vsub.f32 %v3798_v17, %v12462_v11  ;;  %v4009_v30 = vsub.f32 %v3804_v7, %v12474_v12 }
 0x487   :  { %v4067_v14 = vmul.f32 0.03125, %v4003_v15  ;;  %2018 = vadd.xlane.f32.xlu0 %v12611_v40  ;;  %v4603_v35 = vpack.c.bf16 %v4504_v6, %v4503_v21  ;;  %v4506_v59 = vmax.f32 %v4442_v19, 0.0  ;;  %v4307_v8 = vmul.f32 %v12807_v41, %v16262_v56 }
 0x488   :  { %v4128_v27 = vmax.f32 %v4064_v34, 0.0  ;;  %v3800_v16 = vpop.xlane.xlu0 %3799  ;;  %v4070_v45 = vmul.f32 0.03125, %v4006_v28  ;;  %v4073_v52 = vmul.f32 0.03125, %v4009_v30  ;;  %v4308_v0 = vmul.f32 %v12828_v51, %v16263_v55 }
 0x489   :  { %v4131_v61 = vmax.f32 %v4067_v14, 0.0  ;;  %2016 = vadd.xlane.f32.xlu1 %v12615_v10  ;;  %8601 = vmatprep.mubr.bf16.mxu1 %v4603_v35  ;;  %v4604_v11 = vpack.c.bf16 %v4506_v59, %v4505_v1  ;;  %v4375_v40 = vmul.f32 %v12631_v39, %v4307_v8  ;;  %v4309_v9 = vmul.f32 %v12794_v44, %v16264_v47  ;;  %v3806_v43 = vpop.xlane.xlu1 %3805 }
 0x48a   :  { %v4192_v12 = vadd.f32 1e-05, %v4128_v27  ;;  %v4134_v41 = vmax.f32 %v4070_v45, 0.0  ;;  %v4137_v17 = vmax.f32 %v4073_v52, 0.0  ;;  %v4376_v42 = vmul.f32 %v12631_v39, %v4308_v0  ;;  %v16268_v0 = vld [vmem:[#allocation78_spill] sm:$0xff] }
 0x48b   :  { %v4195_v33 = vadd.f32 1e-05, %v4131_v61  ;;  %8602 = vmatmul.mubr.bf16.gmra.mrb[52].mxu1 %v4604_v11  ;;  %v4443_v51 = vadd.f32 %v12643_v46, %v4375_v40  ;;  %v4310_v10 = vmul.f32 %v12816_v38, %v16265_v49  ;;  %v4377_v31 = vmul.f32 %v12631_v39, %v4309_v9  ;;  %v16266_v61 = vld [vmem:[#allocation80_spill] sm:$0xff] }
 0x48c   :  { %9355 = vrsqrt.f32 %v4192_v12  ;;  %v3812_v22 = vpop.xlane.xlu0 %3811  ;;  %v12896_v13 = vpop.eup %9347  ;;  %v4198_v44 = vadd.f32 1e-05, %v4134_v41  ;;  %v4201_v29 = vadd.f32 1e-05, %v4137_v17  ;;  %v4444_v7 = vadd.f32 %v12643_v46, %v4376_v42  ;;  %v16269_v41 = vld [vmem:[#allocation82_spill] sm:$0xff] }
 0x48d   :  { %9357 = vrsqrt.f32 %v4195_v33  ;;  %2020 = vadd.xlane.f32.xlu1 %v12622_v53  ;;  %v12900_v21 = vpop.eup %9349  ;;  %v4507_v54 = vmax.f32 %v4443_v51, 0.0  ;;  %v4378_v15 = vmul.f32 %v12631_v39, %v4310_v10  ;;  %v4445_v50 = vadd.f32 %v12643_v46, %v4377_v31  ;;  %v3802_v6 = vpop.xlane.xlu1 %3801 }
 0x48e   :  { %v4004_v38 = vsub.f32 %v3794_v25, %v12465_v23  ;;  %v12905_v19 = vpop.eup %9351  ;;  %9359 = vrsqrt.f32 %v4198_v44  ;;  %v4508_v34 = vmax.f32 %v4444_v7, 0.0  ;;  %v4007_v1 = vsub.f32 %v3800_v16, %v12483_v4  ;;  %v16267_v16 = vld [vmem:[#allocation83_spill] sm:$0xff] }
 0x48f   :  { %v4010_v14 = vsub.f32 %v3806_v43, %v12477_v3  ;;  %v12909_v28 = vpop.eup %9353  ;;  %9361 = vrsqrt.f32 %v4201_v29  ;;  %v4446_v53 = vadd.f32 %v12643_v46, %v4378_v15  ;;  %v4509_v30 = vmax.f32 %v4445_v50, 0.0  ;;  %v16270_v29 = vld [vmem:[#allocation237_spill] sm:$0xff] }
 0x490   :  { %v4068_v39 = vmul.f32 0.03125, %v4004_v38  ;;  %v3808_v35 = vpop.xlane.xlu0 %3807  ;;  %v4605_v59 = vpack.c.bf16 %v4508_v34, %v4507_v54  ;;  %v4071_v27 = vmul.f32 0.03125, %v4007_v1  ;;  %v4013_v25 = vsub.f32 %v3812_v22, %v12496_v18  ;;  %v12922_v18 = vld [vmem:[%s15202_s12 + $0x3] ss:$0 sm:$0xff] }
 0x491   :  { %v4074_v23 = vmul.f32 0.03125, %v4010_v14  ;;  %v4510_v56 = vmax.f32 %v4446_v53, 0.0  ;;  %v4311_v4 = vmul.f32 %v12835_v24, %v16266_v61  ;;  %v4312_v3 = vmul.f32 %v12862_v58, %v16267_v16  ;;  %v3814_v45 = vpop.xlane.xlu1 %3813  ;;  %v16271_v53 = vld [vmem:[#allocation196_spill] sm:$0xff] }
 0x492   :  { %v4132_v8 = vmax.f32 %v4068_v39, 0.0  ;;  %8605 = vmatprep.mubr.bf16.mxu1 %v4605_v59  ;;  %v4135_v52 = vmax.f32 %v4071_v27, 0.0  ;;  %v4077_v55 = vmul.f32 0.03125, %v4013_v25  ;;  %v4313_v11 = vmul.f32 %v12821_v60, %v16268_v0  ;;  %v12933_v60 = vld [vmem:[%s15202_s12 + $0x4] ss:$0 sm:$0xff]  ;;  %v16273_v25 = vld [vmem:[#allocation199_spill] sm:$0xff] }
 0x493   :  { %v4138_v46 = vmax.f32 %v4074_v23, 0.0  ;;  %v4606_v12 = vpack.c.bf16 %v4510_v56, %v4509_v30  ;;  %v4379_v24 = vmul.f32 %v12922_v18, %v4311_v4  ;;  %v4380_v47 = vmul.f32 %v12922_v18, %v4312_v3  ;;  %v16272_v23 = vld [vmem:[#allocation195_spill] sm:$0xff] }
 0x494   :  { %v4196_v40 = vadd.f32 1e-05, %v4132_v8  ;;  %v3820_v58 = vpop.xlane.xlu0 %3819  ;;  %v4199_v9 = vadd.f32 1e-05, %v4135_v52  ;;  %v4141_v33 = vmax.f32 %v4077_v55, 0.0  ;;  %v4314_v17 = vmul.f32 %v12843_v63, %v16269_v41  ;;  %v16274_v3 = vld [vmem:[#allocation139_spill] sm:$0xff] }
 0x495   :  { %v4202_v43 = vadd.f32 1e-05, %v4138_v46  ;;  %8606 = vmatmul.mubr.bf16.gmra.mrb[56].mxu1 %v4606_v12  ;;  %v4447_v51 = vadd.f32 %v12933_v60, %v4379_v24  ;;  %v4448_v49 = vadd.f32 %v12933_v60, %v4380_v47  ;;  %v4381_v10 = vmul.f32 %v12922_v18, %v4313_v11  ;;  %v12938_v31 = vpop.xlane.xlu1 %3809  ;;  %v16275_v0 = vld [vmem:[#allocation87_spill] sm:$0xff]  ;;  %v16276_v11 = vld [vmem:[#allocation84_spill] sm:$0xff] }
 0x496   :  { %v12928_v42 = vpop.eup %9355  ;;  %9363 = vrsqrt.f32 %v4196_v40  ;;  %v4205_v63 = vadd.f32 1e-05, %v4141_v33  ;;  %v4382_v44 = vmul.f32 %v12922_v18, %v4314_v17  ;;  %v4008_v7 = vsub.f32 %v3802_v6, %v16270_v29 }
 0x497   :  { %v12940_v22 = vpop.eup %9357  ;;  %9365 = vrsqrt.f32 %v4199_v9  ;;  %v4511_v54 = vmax.f32 %v4447_v51, 0.0  ;;  %v4512_v15 = vmax.f32 %v4448_v49, 0.0  ;;  %v4449_v50 = vadd.f32 %v12933_v60, %v4381_v10 }
 0x498   :  { %9367 = vrsqrt.f32 %v4202_v43  ;;  %v3816_v38 = vpop.xlane.xlu0 %3815  ;;  %v12945_v34 = vpop.eup %9359  ;;  %v4450_v1 = vadd.f32 %v12933_v60, %v4382_v44  ;;  %v4072_v14 = vmul.f32 0.03125, %v4008_v7  ;;  %v4011_v30 = vsub.f32 %v3808_v35, %v16271_v53 }
 0x499   :  { %9369 = vrsqrt.f32 %v4205_v63  ;;  %v12949_v39 = vpop.eup %9361  ;;  %v4607_v59 = vpack.c.bf16 %v4512_v15, %v4511_v54  ;;  %v4513_v27 = vmax.f32 %v4449_v50, 0.0  ;;  %v4014_v6 = vsub.f32 %v3814_v45, %v16272_v23  ;;  %v3822_v8 = vpop.xlane.xlu1 %3821  ;;  %v16278_v50 = vld [vmem:[#allocation245_spill] sm:$0xff] }
 0x49a   :  { %v4017_v56 = vsub.f32 %v3820_v58, %v16273_v25  ;;  %v4514_v61 = vmax.f32 %v4450_v1, 0.0  ;;  %v4136_v4 = vmax.f32 %v4072_v14, 0.0  ;;  %v4075_v16 = vmul.f32 0.03125, %v4011_v30 }
 0x49b   :  { %v4315_v52 = vmul.f32 %v12867_v20, %v16274_v3  ;;  %8609 = vmatprep.mubr.bf16.mxu1 %v4607_v59  ;;  %v4078_v46 = vmul.f32 0.03125, %v4014_v6  ;;  %v4316_v35 = vmul.f32 %v12896_v13, %v16275_v0  ;;  %v4317_v12 = vmul.f32 %v12851_v5, %v16276_v11  ;;  %v16277_v20 = vld [vmem:[#allocation85_spill] sm:$0xff]  ;;  %v16279_v59 = vld [vmem:[#allocation246_spill] sm:$0xff] }
 0x49c   :  { %v4081_v55 = vmul.f32 0.03125, %v4017_v56  ;;  %v3828_v40 = vpop.xlane.xlu0 %3827  ;;  %v4608_v45 = vpack.c.bf16 %v4514_v61, %v4513_v27  ;;  %v4200_v24 = vadd.f32 1e-05, %v4136_v4  ;;  %v4139_v47 = vmax.f32 %v4075_v16, 0.0  ;;  %v16280_v61 = vld [vmem:[#allocation203_spill] sm:$0xff]  ;;  %v16282_v11 = vld [vmem:[#allocation145_spill] sm:$0xff] }
 0x49d   :  { %v4383_v58 = vmul.f32 %v12922_v18, %v4315_v52  ;;  %v4142_v9 = vmax.f32 %v4078_v46, 0.0  ;;  %v4384_v33 = vmul.f32 %v12922_v18, %v4316_v35  ;;  %v4318_v41 = vmul.f32 %v12872_v36, %v16277_v20  ;;  %v12963_v17 = vpop.xlane.xlu1 %3817  ;;  %v16281_v52 = vld [vmem:[#allocation247_spill] sm:$0xff] }
 0x49e   :  { %v4145_v43 = vmax.f32 %v4081_v55, 0.0  ;;  %8610 = vmatmul.mubr.bf16.gmra.mrb[60].mxu1 %v4608_v45  ;;  %9371 = vrsqrt.f32 %v4200_v24  ;;  %v4203_v13 = vadd.f32 1e-05, %v4139_v47  ;;  %v4385_v51 = vmul.f32 %v12922_v18, %v4317_v12  ;;  %v16283_v12 = vld [vmem:[#allocation94_spill] sm:$0xff] }
 0x49f   :  { %v4451_v5 = vadd.f32 %v12933_v60, %v4383_v58  ;;  %v4206_v10 = vadd.f32 1e-05, %v4142_v9  ;;  %v4452_v44 = vadd.f32 %v12933_v60, %v4384_v33  ;;  %v4386_v29 = vmul.f32 %v12922_v18, %v4318_v41  ;;  %v16284_v9 = vld [vmem:[#allocation88_spill] sm:$0xff] }
 0x4a0   :  { %v12967_v49 = vpop.eup %9363  ;;  %v4209_v63 = vadd.f32 1e-05, %v4145_v43  ;;  %v12971_v7 = vpop.xlane.xlu0 %3823  ;;  %9373 = vrsqrt.f32 %v4203_v13  ;;  %v4453_v15 = vadd.f32 %v12933_v60, %v4385_v51  ;;  %v4012_v1 = vsub.f32 %v12938_v31, %v16278_v50 }
 0x4a1   :  { %v12973_v36 = vpop.eup %9365  ;;  %v4515_v54 = vmax.f32 %v4451_v5, 0.0  ;;  %9375 = vrsqrt.f32 %v4206_v10  ;;  %v4516_v53 = vmax.f32 %v4452_v44, 0.0  ;;  %v4454_v30 = vadd.f32 %v12933_v60, %v4386_v29  ;;  %v12982_v23 = vpop.xlane.xlu1 %3829  ;;  %v16285_v5 = vld [vmem:[#allocation144_spill] sm:$0xff] }
 0x4a2   :  { %v12978_v14 = vpop.eup %9367  ;;  %v4015_v27 = vsub.f32 %v3816_v38, %v16279_v59  ;;  %9377 = vrsqrt.f32 %v4209_v63  ;;  %v4517_v25 = vmax.f32 %v4453_v15, 0.0  ;;  %v4076_v56 = vmul.f32 0.03125, %v4012_v1  ;;  %v16286_v59 = vld [vmem:[#allocation248_spill] sm:$0xff] }
 0x4a3   :  { %v12984_v6 = vpop.eup %9369  ;;  %v4018_v4 = vsub.f32 %v3822_v8, %v16280_v61  ;;  %v4609_v16 = vpack.c.bf16 %v4516_v53, %v4515_v54  ;;  %v4518_v3 = vmax.f32 %v4454_v30, 0.0  ;;  %v4021_v46 = vsub.f32 %v3828_v40, %v16281_v52 }
 0x4a4   :  { %v4079_v31 = vmul.f32 0.03125, %v4015_v27  ;;  %v1947_v55 = vpop.xlane.xlu0 %1946  ;;  %v4140_v0 = vmax.f32 %v4076_v56, 0.0  ;;  %v4319_v38 = vmul.f32 %v12900_v21, %v16282_v11  ;;  %v4320_v45 = vmul.f32 %v12928_v42, %v16283_v12  ;;  %v16289_v11 = vld [vmem:[#allocation194_spill] sm:$0xff] }
 0x4a5   :  { %v4082_v35 = vmul.f32 0.03125, %v4018_v4  ;;  %8613 = vmatprep.mubr.bf16.mxu1 %v4609_v16  ;;  %v4610_v24 = vpack.c.bf16 %v4518_v3, %v4517_v25  ;;  %v4085_v58 = vmul.f32 0.03125, %v4021_v46  ;;  %v4321_v8 = vmul.f32 %v12878_v48, %v16284_v9  ;;  %v12994_v43 = vpop.xlane.xlu1 %3825  ;;  %v16287_v4 = vld [vmem:[#allocation160_spill] sm:$0xff] }
 0x4a6   :  { %v4143_v47 = vmax.f32 %v4079_v31, 0.0  ;;  %v4204_v33 = vadd.f32 1e-05, %v4140_v0  ;;  %v4387_v20 = vmul.f32 %v12922_v18, %v4319_v38  ;;  %v4388_v41 = vmul.f32 %v12922_v18, %v4320_v45  ;;  %v16288_v0 = vld [vmem:[#allocation23_spill] sm:$0xff] }
 0x4a7   :  { %v4146_v40 = vmax.f32 %v4082_v35, 0.0  ;;  %8614 = vmatmul.mubr.bf16.gmra.mrb[64].mxu1 %v4610_v24  ;;  %v4149_v13 = vmax.f32 %v4085_v58, 0.0  ;;  %v4322_v42 = vmul.f32 %v12905_v19, %v16285_v5  ;;  %v4389_v51 = vmul.f32 %v12922_v18, %v4321_v8  ;;  %v16290_v45 = vld [vmem:[#allocation163_spill] sm:$0xff] }
 0x4a8   :  { %v4207_v21 = vadd.f32 1e-05, %v4143_v47  ;;  %v13001_v10 = vpop.xlane.xlu0 %1702  ;;  %v13003_v63 = vpop.eup %9371  ;;  %9379 = vrsqrt.f32 %v4204_v33  ;;  %v4455_v44 = vadd.f32 %v12933_v60, %v4387_v20  ;;  %v4456_v29 = vadd.f32 %v12933_v60, %v4388_v41  ;;  %v16291_v47 = vld [vmem:[#allocation100_spill] sm:$0xff] }
 0x4a9   :  { %v4210_v48 = vadd.f32 1e-05, %v4146_v40  ;;  %v4213_v54 = vadd.f32 1e-05, %v4149_v13  ;;  %v4390_v15 = vmul.f32 %v12922_v18, %v4322_v42  ;;  %v4457_v50 = vadd.f32 %v12933_v60, %v4389_v51  ;;  %v13009_v1 = vpop.xlane.xlu1 %1948  ;;  %v16292_v40 = vld [vmem:[#allocation161_spill] sm:$0xff] }
 0x4aa   :  { %9381 = vrsqrt.f32 %v4207_v21  ;;  %v13011_v19 = vpop.eup %9373  ;;  %v4519_v53 = vmax.f32 %v4455_v44, 0.0  ;;  %v4520_v30 = vmax.f32 %v4456_v29, 0.0  ;;  %v4016_v27 = vsub.f32 %v12963_v17, %v16286_v59 }
 0x4ab   :  { %9383 = vrsqrt.f32 %v4210_v48  ;;  %v13015_v25 = vpop.eup %9375  ;;  %v4458_v56 = vadd.f32 %v12933_v60, %v4390_v15  ;;  %v4521_v61 = vmax.f32 %v4457_v50, 0.0  ;;  %v4019_v16 = vsub.f32 %v12971_v7, %v16287_v4  ;;  %v13050_v4 = vld [vmem:[#allocation8 + $0x80] sm:$0xff]  }
 0x4ac   :  { %9385 = vrsqrt.f32 %v4213_v54  ;;  %v1707_v3 = vpop.xlane.xlu0 %1706  ;;  %v13020_v31 = vpop.eup %9377  ;;  %v4611_v52 = vpack.c.bf16 %v4520_v30, %v4519_v53  ;;  %v4080_v46 = vmul.f32 0.03125, %v4016_v27  ;;  %v4022_v35 = vsub.f32 %v12982_v23, %v16288_v0  ;;  %8721 = vmatprep.subr.bf16.mxu1 %v13050_v4 }
 0x4ad   :  { %v2196_v38 = vsub.f32 %v1947_v55, %v16289_v11  ;;  %v4522_v17 = vmax.f32 %v4458_v56, 0.0  ;;  %v4083_v12 = vmul.f32 0.03125, %v4019_v16  ;;  %v4323_v24 = vmul.f32 %v12940_v22, %v16290_v45  ;;  %v1705_v9 = vpop.xlane.xlu1 %1704 }
 0x4ae   :  { %v4324_v58 = vmul.f32 %v12967_v49, %v16291_v47  ;;  %8617 = vmatprep.mubr.bf16.mxu1 %v4611_v52  ;;  %v4144_v7 = vmax.f32 %v4080_v46, 0.0  ;;  %v4086_v8 = vmul.f32 0.03125, %v4022_v35  ;;  %v4325_v20 = vmul.f32 %v12909_v28, %v16292_v40  ;;  %v16293_v49 = vld [vmem:[#allocation149_spill] sm:$0xff] }
 0x4af   :  { %v2260_v33 = vmul.f32 0.03125, %v2196_v38  ;;  %v4612_v41 = vpack.c.bf16 %v4522_v17, %v4521_v61  ;;  %v4147_v23 = vmax.f32 %v4083_v12, 0.0  ;;  %v4391_v55 = vmul.f32 %v12922_v18, %v4323_v24  ;;  %v16294_v46 = vld [vmem:[#allocation249_spill] sm:$0xff] }
 0x4b0   :  { %v4392_v21 = vmul.f32 %v12922_v18, %v4324_v58  ;;  %v13033_v13 = vpop.xlane.xlu0 %1950  ;;  %v4208_v22 = vadd.f32 1e-05, %v4144_v7  ;;  %v4150_v5 = vmax.f32 %v4086_v8, 0.0  ;;  %v4326_v51 = vmul.f32 %v12945_v34, %v16293_v49  ;;  %v16295_v12 = vld [vmem:[#allocation197_spill] sm:$0xff] }
 0x4b1   :  { %v2324_v42 = vmax.f32 %v2260_v33, 0.0  ;;  %8618 = vmatmul.mubr.bf16.gmra.mrb[68].mxu1 %v4612_v41  ;;  %v4211_v48 = vadd.f32 1e-05, %v4147_v23  ;;  %v4459_v44 = vadd.f32 %v12933_v60, %v4391_v55  ;;  %v4393_v29 = vmul.f32 %v12922_v18, %v4325_v20  ;;  %v16297_v33 = vld [vmem:[#allocation157_spill] sm:$0xff]  ;;  %v16298_v20 = vld [vmem:[#allocation152_spill] sm:$0xff] }
 0x4b2   :  { %v4460_v28 = vadd.f32 %v12933_v60, %v4392_v21  ;;  %v13040_v54 = vpop.xlane.xlu1 %1708  ;;  %v13042_v15 = vpop.eup %9379  ;;  %9387 = vrsqrt.f32 %v4208_v22  ;;  %v4214_v50 = vadd.f32 1e-05, %v4150_v5  ;;  %v4394_v30 = vmul.f32 %v12922_v18, %v4326_v51 }
 0x4b3   :  { %v2388_v53 = vadd.f32 1e-05, %v2324_v42  ;;  %9389 = vrsqrt.f32 %v4211_v48  ;;  %v4523_v34 = vmax.f32 %v4459_v44, 0.0  ;;  %v4461_v56 = vadd.f32 %v12933_v60, %v4393_v29  ;;  %v16300_v48 = vld [vmem:[#allocation77_spill] sm:$0xff] }
 0x4b4   :  { %v13045_v59 = vpop.eup %9381  ;;  %v4524_v27 = vmax.f32 %v4460_v28, 0.0  ;;  %v13048_v61 = vpop.xlane.xlu0 %1954  ;;  %9391 = vrsqrt.f32 %v4214_v50  ;;  %v4462_v52 = vadd.f32 %v12933_v60, %v4394_v30  ;;  %v4020_v0 = vsub.f32 %v12994_v43, %v16294_v46  ;;  %v16296_v43 = vld [vmem:[#allocation166_spill] sm:$0xff] }
 0x4b5   :  { %v13052_v16 = vpop.eup %9383  ;;  %v13058_v35 = vmul.f32 0.03125, %v13001_v10  ;;  %9393 = vrsqrt.f32 %v2388_v53  ;;  %v4525_v17 = vmax.f32 %v4461_v56, 0.0  ;;  %v2197_v45 = vsub.f32 %v13009_v1, %v16295_v12  ;;  %v16299_v1 = vld [vmem:[#allocation154_spill] sm:$0xff] }
 0x4b6   :  { %v13060_v11 = vpop.eup %9385  ;;  %v4613_v38 = vpack.c.bf16 %v4524_v27, %v4523_v34  ;;  %v13064_v24 = vpop.xlane.xlu1 %1952  ;;  %v4526_v47 = vmax.f32 %v4462_v52, 0.0  ;;  %v4084_v58 = vmul.f32 0.03125, %v4020_v0  ;;  %v13067_v7 = vmul.f32 0.03125, %v1707_v3  ;;  %v16301_v28 = vld [vmem:[#allocation206_spill] sm:$0xff] }
 0x4b7   :  { %v4327_v10 = vmul.f32 %v12973_v36, %v16296_v43  ;;  %v2261_v8 = vmul.f32 0.03125, %v2197_v45  ;;  %v4328_v40 = vmul.f32 %v13003_v63, %v16297_v33  ;;  %v4329_v41 = vmul.f32 %v12949_v39, %v16298_v20  ;;  %v16302_v43 = vld [vmem:[#allocation76_spill] sm:$0xff] }
 0x4b8   :  { %8621 = vmatprep.mubr.bf16.mxu1 %v4613_v38  ;;  %v4330_v23 = vmul.f32 %v12978_v14, %v16299_v1  ;;  %v13077_v55 = vpop.xlane.xlu0 %1710  ;;  %v4614_v21 = vpack.c.bf16 %v4526_v47, %v4525_v17  ;;  %v4148_v22 = vmax.f32 %v4084_v58, 0.0  ;;  %v13080_v5 = vmul.f32 0.03125, %v1705_v9  ;;  %v16304_v1 = vld [vmem:[#allocation105_spill] sm:$0xff] }
 0x4b9   :  { %v4395_v3 = vmul.f32 %v12922_v18, %v4327_v10  ;;  %v2325_v36 = vmax.f32 %v2261_v8, 0.0  ;;  %v4396_v42 = vmul.f32 %v12922_v18, %v4328_v40  ;;  %v4397_v49 = vmul.f32 %v12922_v18, %v4329_v41  ;;  %v16303_v8 = vld [vmem:[#allocation202_spill] sm:$0xff] }
 0x4ba   :  { %v4398_v63 = vmul.f32 %v12922_v18, %v4330_v23  ;;  %v13085_v51 = vpop.xlane.xlu1 %1956  ;;  %8622 = vmatmul.mubr.bf16.gmra.mrb[72].mxu1 %v4614_v21  ;;  %v4212_v39 = vadd.f32 1e-05, %v4148_v22  ;;  %v13090_v44 = vsub.f32 %v16300_v48, %v13058_v35  ;;  %v2198_v9 = vsub.f32 %v13033_v13, %v16301_v28  ;;  %v16305_v21 = vld [vmem:[#allocation110_spill] sm:$0xff] }
 0x4bb   :  { %v4463_v14 = vadd.f32 %v12933_v60, %v4395_v3  ;;  %v2389_v29 = vadd.f32 1e-05, %v2325_v36  ;;  %v4464_v50 = vadd.f32 %v12933_v60, %v4396_v42  ;;  %v4465_v53 = vadd.f32 %v12933_v60, %v4397_v49  ;;  %v16306_v49 = vld [vmem:[#allocation156_spill] sm:$0xff] }
 0x4bc   :  { %v4466_v30 = vadd.f32 %v12933_v60, %v4398_v63  ;;  %v13097_v34 = vpop.xlane.xlu0 %1714  ;;  %v13099_v27 = vpop.eup %9387  ;;  %9395 = vrsqrt.f32 %v4212_v39  ;;  %v1914_v52 = vmul.f32 %v13090_v44, %v13090_v44  ;;  %v2262_v46 = vmul.f32 0.03125, %v2198_v9 }
 0x4bd   :  { %v4527_v56 = vmax.f32 %v4463_v14, 0.0  ;;  %v13103_v0 = vpop.eup %9389  ;;  %9397 = vrsqrt.f32 %v2389_v29  ;;  %v4528_v13 = vmax.f32 %v4464_v50, 0.0  ;;  %v4529_v38 = vmax.f32 %v4465_v53, 0.0  ;;  %v16307_v14 = vld [vmem:[#allocation106_spill] sm:$0xff] }
 0x4be   :  { %v4530_v17 = vmax.f32 %v4466_v30, 0.0  ;;  %v13105_v12 = vpop.xlane.xlu1 %1712  ;;  %v13107_v45 = vpop.eup %9391  ;;  %2022 = vadd.xlane.f32.xlu0 %v1914_v52  ;;  %v2326_v47 = vmax.f32 %v2262_v46, 0.0  ;;  %v13110_v58 = vmul.f32 0.03125, %v13040_v54  ;;  %v13114_v10 = vsub.f32 %v16302_v43, %v13067_v7 }
 0x4bf   :  { %v2200_v33 = vsub.f32 %v13048_v61, %v16303_v8  ;;  %v13118_v40 = vpop.eup %9393  ;;  %v4615_v20 = vpack.c.bf16 %v4528_v13, %v4527_v56  ;;  %v4331_v23 = vmul.f32 %v13011_v19, %v16304_v1  ;;  %v4332_v22 = vmul.f32 %v13042_v15, %v16305_v21  ;;  %v16308_v15 = vld [vmem:[#allocation81_spill] sm:$0xff]  ;;  %v16310_v8 = vld [vmem:[#allocation79_spill] sm:$0xff]  ;;  %v16311_v21 = vld [vmem:[#allocation204_spill] sm:$0xff] }
 0x4c0   :  { %v4616_v41 = vpack.c.bf16 %v4530_v17, %v4529_v38  ;;  %v13124_v3 = vpop.xlane.xlu0 %1958  ;;  %v2390_v54 = vadd.f32 1e-05, %v2326_v47  ;;  %v1916_v36 = vmul.f32 %v13114_v10, %v13114_v10  ;;  %v4333_v61 = vmul.f32 %v12984_v6, %v16306_v49  ;;  %v16309_v6 = vld [vmem:[#allocation207_spill] sm:$0xff] }
 0x4c1   :  { %v2264_v42 = vmul.f32 0.03125, %v2200_v33  ;;  %8625 = vmatprep.mubr.bf16.mxu1 %v4615_v20  ;;  %v4399_v63 = vmul.f32 %v12922_v18, %v4331_v23  ;;  %v4400_v39 = vmul.f32 %v12922_v18, %v4332_v22  ;;  %v4334_v19 = vmul.f32 %v13015_v25, %v16307_v14  ;;  %v16312_v14 = vld [vmem:[#allocation186_spill] sm:$0xff] }
 0x4c2   :  { %v13136_v48 = vsub.f32 %v16308_v15, %v13080_v5  ;;  %v1717_v28 = vpop.xlane.xlu1 %1716  ;;  %8626 = vmatmul.mubr.bf16.gmra.mrb[76].mxu1 %v4616_v41  ;;  %9399 = vrsqrt.f32 %v2390_v54  ;;  %2026 = vadd.xlane.f32.xlu0 %v1916_v36  ;;  %v4401_v29 = vmul.f32 %v12922_v18, %v4333_v61  ;;  %v2199_v50 = vsub.f32 %v13064_v24, %v16309_v6  ;;  %v16313_v15 = vld [vmem:[#allocation115_spill] sm:$0xff] }
 0x4c3   :  { %v2328_v9 = vmax.f32 %v2264_v42, 0.0  ;;  %v4467_v53 = vadd.f32 %v12933_v60, %v4399_v63  ;;  %v4468_v30 = vadd.f32 %v12933_v60, %v4400_v39  ;;  %v4402_v25 = vmul.f32 %v12922_v18, %v4334_v19 }
 0x4c4   :  { %v1915_v56 = vmul.f32 %v13136_v48, %v13136_v48  ;;  %v13146_v52 = vpop.xlane.xlu0 %1962  ;;  %v4469_v13 = vadd.f32 %v12933_v60, %v4401_v29  ;;  %v2263_v38 = vmul.f32 0.03125, %v2199_v50  ;;  %v13150_v17 = vmul.f32 0.03125, %v13077_v55  ;;  %v16314_v29 = vld [vmem:[#allocation181_spill] sm:$0xff]  ;;  %v16315_v50 = vld [vmem:[#allocation112_spill] sm:$0xff] }
 0x4c5   :  { %v2392_v46 = vadd.f32 1e-05, %v2328_v9  ;;  %v4531_v47 = vmax.f32 %v4467_v53, 0.0  ;;  %v4532_v24 = vmax.f32 %v4468_v30, 0.0  ;;  %v4470_v43 = vadd.f32 %v12933_v60, %v4402_v25 }
 0x4c6   :  { %2024 = vadd.xlane.f32.xlu1 %v1915_v56  ;;  %v13155_v33 = vsub.f32 %v16310_v8, %v13110_v58  ;;  %v13157_v20 = vpop.xlane.xlu1 %1960  ;;  %v9396_v41 = vpop.eup %9395  ;;  %v4533_v1 = vmax.f32 %v4469_v13, 0.0  ;;  %v2327_v23 = vmax.f32 %v2263_v38, 0.0  ;;  %v2201_v22 = vsub.f32 %v13085_v51, %v16311_v21 }
 0x4c7   :  { %9401 = vrsqrt.f32 %v2392_v46  ;;  %v13161_v55 = vpop.eup %9397  ;;  %v4617_v54 = vpack.c.bf16 %v4532_v24, %v4531_v47  ;;  %v4534_v36 = vmax.f32 %v4470_v43, 0.0  ;;  %v13166_v49 = vmul.f32 0.03125, %v13097_v34 }
 0x4c8   :  { %v1917_v42 = vmul.f32 %v13155_v33, %v13155_v33  ;;  %v13168_v61 = vpop.xlane.xlu0 %1718  ;;  %v2391_v63 = vadd.f32 1e-05, %v2327_v23  ;;  %v2265_v39 = vmul.f32 0.03125, %v2201_v22  ;;  %v4335_v19 = vmul.f32 %v13045_v59, %v16312_v14 }
 0x4c9   :  { %v4336_v51 = vmul.f32 %v13099_v27, %v16313_v15  ;;  %8629 = vmatprep.mubr.bf16.mxu1 %v4617_v54  ;;  %v4618_v9 = vpack.c.bf16 %v4534_v36, %v4533_v1  ;;  %v4337_v6 = vmul.f32 %v13020_v31, %v16314_v29  ;;  %v4338_v34 = vmul.f32 %v13052_v16, %v16315_v50  ;;  %v16316_v31 = vld [vmem:[#allocation93_spill] sm:$0xff] }
 0x4ca   :  { %2028 = vadd.xlane.f32.xlu1 %v1917_v42  ;;  %v13179_v53 = vmul.f32 0.03125, %v13105_v12  ;;  %v13181_v30 = vpop.xlane.xlu1 %1964  ;;  %9403 = vrsqrt.f32 %v2391_v63  ;;  %v2329_v25 = vmax.f32 %v2265_v39, 0.0  ;;  %v4403_v59 = vmul.f32 %v12922_v18, %v4335_v19  ;;  %v16317_v16 = vld [vmem:[#allocation213_spill] sm:$0xff]  ;;  %v16318_v63 = vld [vmem:[#allocation92_spill] sm:$0xff] }
 0x4cb   :  { %v4404_v27 = vmul.f32 %v12922_v18, %v4336_v51  ;;  %8630 = vmatmul.mubr.bf16.gmra.mrb[80].mxu1 %v4618_v9  ;;  %v4405_v56 = vmul.f32 %v12922_v18, %v4337_v6  ;;  %v4406_v46 = vmul.f32 %v12922_v18, %v4338_v34  ;;  %v13189_v13 = vsub.f32 %v16316_v31, %v13150_v17  ;;  %v16319_v15 = vld [vmem:[#allocation209_spill] sm:$0xff] }
 0x4cc   :  { %v2202_v12 = vsub.f32 %v13124_v3, %v16317_v16  ;;  %v13193_v38 = vpop.xlane.xlu0 %1722  ;;  %v13195_v47 = vpop.eup %9399  ;;  %v2393_v24 = vadd.f32 1e-05, %v2329_v25  ;;  %v4471_v43 = vadd.f32 %v12933_v60, %v4403_v59  ;;  %v13199_v1 = vmul.f32 0.03125, %v1717_v28  ;;  %v16320_v34 = vld [vmem:[#allocation117_spill] sm:$0xff]  ;;  %v16321_v59 = vld [vmem:[#allocation119_spill] sm:$0xff]  ;;  %v16322_v16 = vld [vmem:[#allocation116_spill] sm:$0xff] }
 0x4cd   :  { %v4472_v8 = vadd.f32 %v12933_v60, %v4404_v27  ;;  %v4473_v23 = vadd.f32 %v12933_v60, %v4405_v56  ;;  %v4474_v21 = vadd.f32 %v12933_v60, %v4406_v46  ;;  %v1918_v22 = vmul.f32 %v13189_v13, %v13189_v13 }
 0x4ce   :  { %v2266_v54 = vmul.f32 0.03125, %v2202_v12  ;;  %v1721_v3 = vpop.xlane.xlu1 %1720  ;;  %9405 = vrsqrt.f32 %v2393_v24  ;;  %v4535_v36 = vmax.f32 %v4471_v43, 0.0  ;;  %v13207_v39 = vsub.f32 %v16318_v63, %v13166_v49 }
 0x4cf   :  { %v4536_v42 = vmax.f32 %v4472_v8, 0.0  ;;  %v4537_v14 = vmax.f32 %v4473_v23, 0.0  ;;  %v4538_v19 = vmax.f32 %v4474_v21, 0.0  ;;  %2030 = vadd.xlane.f32.xlu0 %v1918_v22  ;;  %v2204_v51 = vsub.f32 %v13146_v52, %v16319_v15  ;;  %v16323_v8 = vld [vmem:[#allocation118_spill] sm:$0xff]  ;;  %v16324_v21 = vld [vmem:[#allocation97_spill] sm:$0xff] }
 0x4d0   :  { %v2330_v28 = vmax.f32 %v2266_v54, 0.0  ;;  %v13211_v9 = vpop.xlane.xlu0 %1966  ;;  %v1920_v50 = vmul.f32 %v13207_v39, %v13207_v39  ;;  %v4339_v25 = vmul.f32 %v13103_v0, %v16320_v34  ;;  %v4340_v27 = vmul.f32 %v9396_v41, %v16321_v59  ;;  %v16326_v59 = vld [vmem:[#allocation95_spill] sm:$0xff] }
 0x4d1   :  { %v13213_v29 = vpop.eup %9401  ;;  %v4619_v6 = vpack.c.bf16 %v4536_v42, %v4535_v36  ;;  %v4620_v56 = vpack.c.bf16 %v4538_v19, %v4537_v14  ;;  %v2268_v31 = vmul.f32 0.03125, %v2204_v51  ;;  %v4341_v12 = vmul.f32 %v13060_v11, %v16322_v16  ;;  %v16325_v11 = vld [vmem:[#allocation216_spill] sm:$0xff] }
 0x4d2   :  { %v2394_v46 = vadd.f32 1e-05, %v2330_v28  ;;  %v1725_v52 = vpop.xlane.xlu1 %1724  ;;  %v4407_v24 = vmul.f32 %v12922_v18, %v4339_v25  ;;  %v4408_v43 = vmul.f32 %v12922_v18, %v4340_v27  ;;  %v4342_v23 = vmul.f32 %v13107_v45, %v16323_v8 }
 0x4d3   :  { %8633 = vmatprep.mubr.bf16.mxu1 %v4619_v6  ;;  %v13228_v0 = vsub.f32 %v16324_v21, %v13179_v53  ;;  %2034 = vadd.xlane.f32.xlu0 %v1920_v50  ;;  %v2332_v41 = vmax.f32 %v2268_v31, 0.0  ;;  %v4409_v22 = vmul.f32 %v12922_v18, %v4341_v12  ;;  %v2203_v54 = vsub.f32 %v13157_v20, %v16325_v11  ;;  %v16328_v21 = vld [vmem:[#allocation234_spill] sm:$0xff] }
 0x4d4   :  { %8634 = vmatmul.mubr.bf16.gmra.mrb[84].mxu1 %v4620_v56  ;;  %9407 = vrsqrt.f32 %v2394_v46  ;;  %v1971_v36 = vpop.xlane.xlu0 %1970  ;;  %v9404_v42 = vpop.eup %9403  ;;  %v4475_v63 = vadd.f32 %v12933_v60, %v4407_v24  ;;  %v4476_v14 = vadd.f32 %v12933_v60, %v4408_v43  ;;  %v4410_v45 = vmul.f32 %v12922_v18, %v4342_v23  ;;  %v16327_v46 = vld [vmem:[#allocation212_spill] sm:$0xff] }
 0x4d5   :  { %v1919_v19 = vmul.f32 %v13228_v0, %v13228_v0  ;;  %v2396_v28 = vadd.f32 1e-05, %v2332_v41  ;;  %v4477_v15 = vadd.f32 %v12933_v60, %v4409_v22  ;;  %v2267_v51 = vmul.f32 0.03125, %v2203_v54  ;;  %v16330_v22 = vld [vmem:[#allocation69_spill] sm:$0xff] }
 0x4d6   :  { %v13240_v6 = vmul.f32 0.03125, %v13168_v61  ;;  %v13242_v50 = vpop.xlane.xlu1 %1968  ;;  %v4539_v20 = vmax.f32 %v4475_v63, 0.0  ;;  %v4540_v34 = vmax.f32 %v4476_v14, 0.0  ;;  %v4478_v25 = vadd.f32 %v12933_v60, %v4410_v45  ;;  %v16332_v45 = vld [vmem:[#allocation109_spill] sm:$0xff] }
 0x4d7   :  { %2032 = vadd.xlane.f32.xlu1 %v1919_v19  ;;  %v13247_v18 = vsub.f32 %v16326_v59, %v13199_v1  ;;  %9409 = vrsqrt.f32 %v2396_v28  ;;  %v4541_v27 = vmax.f32 %v4477_v15, 0.0  ;;  %v2331_v56 = vmax.f32 %v2267_v51, 0.0 }
 0x4d8   :  { %v2205_v31 = vsub.f32 %v13181_v30, %v16327_v46  ;;  %v1727_v16 = vpop.xlane.xlu0 %1726  ;;  %v13251_v61 = vpop.eup %9405  ;;  %v4621_v12 = vpack.c.bf16 %v4540_v34, %v4539_v20  ;;  %v4542_v24 = vmax.f32 %v4478_v25, 0.0  ;;  %v13256_v60 = vmul.f32 0.03125, %v13193_v38  ;;  %v16333_v38 = vld [vmem:[#allocation231_spill] sm:$0xff]  ;;  %v16334_v20 = vld [vmem:[#allocation108_spill] sm:$0xff]  ;;  %v16336_v34 = vld [vmem:[#allocation229_spill] sm:$0xff] }
 0x4d9   :  { %v1921_v43 = vmul.f32 %v13247_v18, %v13247_v18  ;;  %v2395_v8 = vadd.f32 1e-05, %v2331_v56  ;;  %v16329_v41 = vmax.f32 %v16328_v21, 0.0  ;;  %v16331_v11 = vmax.f32 %v16330_v22, 0.0  ;;  %v16337_v46 = vld [vmem:[#allocation133_spill] sm:$0xff] }
 0x4da   :  { %v2269_v23 = vmul.f32 0.03125, %v2205_v31  ;;  %v13264_v30 = vmul.f32 0.03125, %v1721_v3  ;;  %v13266_v63 = vpop.xlane.xlu1 %1972  ;;  %8637 = vmatprep.mubr.bf16.mxu1 %v4621_v12  ;;  %v4622_v14 = vpack.c.bf16 %v4542_v24, %v4541_v27  ;;  %v13270_v19 = vsub.f32 %v16332_v45, %v13240_v6  ;;  %v16339_v24 = vld [vmem:[#allocation50_spill] sm:$0xff] }
 0x4db   :  { %v13262_v54 = vpack.c.bf16 %v16331_v11, %v16329_v41  ;;  %2036 = vadd.xlane.f32.xlu1 %v1921_v43  ;;  %v2206_v28 = vsub.f32 %v13211_v9, %v16333_v38  ;;  %v13274_v15 = vmul.f32 0.03125, %v1725_v52  ;;  %9411 = vrsqrt.f32 %v2395_v8  ;;  %v16338_v9 = vld [vmem:[#allocation134_spill] sm:$0xff] }
 0x4dc   :  { %v2333_v51 = vmax.f32 %v2269_v23, 0.0  ;;  %v13278_v3 = vsub.f32 %v16334_v20, %v13256_v60  ;;  %v2208_v25 = vsub.f32 %v1971_v36, %v16336_v34  ;;  %v1731_v59 = vpop.xlane.xlu0 %1730  ;;  %8638 = vmatmul.mubr.bf16.gmra.mrb[88].mxu1 %v4622_v14  ;;  %v1922_v27 = vmul.f32 %v13270_v19, %v13270_v19  ;;  %v16340_v23 = vld [vmem:[#allocation113_spill] sm:$0xff] }
 0x4dd   :  { %v2270_v56 = vmul.f32 0.03125, %v2206_v28  ;;  %v2516_v31 = vmul.f32 %v13118_v40, %v16337_v46  ;;  %v2517_v52 = vmul.f32 %v13161_v55, %v16338_v9  ;;  %8657 = vmatprep.mubr.bf16.mxu1 %v16339_v24  ;;  %v13294_v21 = vsub.f32 %v16340_v23, %v13264_v30  ;;  %v13299_v40 = vld [vmem:[%s15202_s12 + $0x1] ss:$0 sm:$0xff]  ;;  %v16342_v14 = vld [vmem:[#allocation137_spill] sm:$0xff] }
 0x4de   :  { %16335 = vst [vmem:[#allocation72_spill] sm:$0xff] %v13278_v3  ;;  %v13287_v12 = vpop.eup %9407  ;;  %v2397_v43 = vadd.f32 1e-05, %v2333_v51  ;;  %v1924_v36 = vmul.f32 %v13278_v3, %v13278_v3  ;;  %v2272_v8 = vmul.f32 0.03125, %v2208_v25  ;;  %v1729_v41 = vpop.xlane.xlu1 %1728  ;;  %2038 = vadd.xlane.f32.xlu0 %v1922_v27  ;;  %v2518_v45 = vmul.f32 %v13195_v47, %v16342_v14  ;;  %v16343_v51 = vld [vmem:[#allocation138_spill] sm:$0xff] }
 0x4df   :  { %16341 = vst [vmem:[#allocation99_spill] sm:$0xff] %v13294_v21  ;;  %v2334_v22 = vmax.f32 %v2270_v56, 0.0  ;;  %v2584_v55 = vmul.f32 %v13299_v40, %v2516_v31  ;;  %v2585_v11 = vmul.f32 %v13299_v40, %v2517_v52  ;;  %v1923_v28 = vmul.f32 %v13294_v21, %v13294_v21  ;;  %v13311_v27 = vld [vmem:[%s15202_s12 + $0x2] ss:$0 sm:$0xff] }
 0x4e0   :  { %9413 = vrsqrt.f32 %v2397_v43  ;;  %v2336_v38 = vmax.f32 %v2272_v8, 0.0  ;;  %v2519_v20 = vmul.f32 %v9404_v42, %v16343_v51  ;;  %v1975_v34 = vpop.xlane.xlu0 %1974  ;;  %v2586_v47 = vmul.f32 %v13299_v40, %v2518_v45  ;;  %v16344_v42 = vld [vmem:[#allocation233_spill] sm:$0xff] }
 0x4e1   :  { %v2398_v25 = vadd.f32 1e-05, %v2334_v22  ;;  %v2652_v56 = vadd.f32 %v13311_v27, %v2584_v55  ;;  %v2653_v46 = vadd.f32 %v13311_v27, %v2585_v11  ;;  %v13316_v31 = vpop.eup %9409  ;;  %2040 = vadd.xlane.f32.xlu1 %v1923_v28  ;;  %v2207_v24 = vsub.f32 %v13242_v50, %v16344_v42  ;;  %v9200_v11 = vld [vmem:[#allocation8 + $0x88] sm:$0xff]   ;;  %v16347_v50 = vld [vmem:[#allocation70_spill] sm:$0xff] }
 0x4e2   :  { %v2400_v9 = vadd.f32 1e-05, %v2336_v38  ;;  %v2587_v52 = vmul.f32 %v13299_v40, %v2519_v20  ;;  %v13321_v43 = vmul.f32 0.03125, %v1727_v16  ;;  %v1733_v8 = vpop.xlane.xlu1 %1732  ;;  %2042 = vadd.xlane.f32.xlu0 %v1924_v36  ;;  %v2654_v55 = vadd.f32 %v13311_v27, %v2586_v47  ;;  %v16345_v38 = vld [vmem:[#allocation111_spill] sm:$0xff] }
 0x4e3   :  { %9415 = vrsqrt.f32 %v2398_v25  ;;  %v2716_v23 = vmax.f32 %v2652_v56, 0.0  ;;  %v2717_v22 = vmax.f32 %v2653_v46, 0.0  ;;  %v2271_v45 = vmul.f32 0.03125, %v2207_v24  ;;  %v16348_v25 = vld [vmem:[#allocation232_spill] sm:$0xff]  ;;  %v16349_v42 = vld [vmem:[#allocation135_spill] sm:$0xff] }
 0x4e4   :  { %9417 = vrsqrt.f32 %v2400_v9  ;;  %v2655_v14 = vadd.f32 %v13311_v27, %v2587_v52  ;;  %v13327_v28 = vsub.f32 %v16345_v38, %v13274_v15  ;;  %v1979_v51 = vpop.xlane.xlu0 %1978  ;;  %8658 = vmatmul.mubr.bf16.vlgmr.msra.gmra.mrb[28].mxu1 %v16347_v50  ;;  %v2718_v20 = vmax.f32 %v2654_v55, 0.0  ;;  %v16351_v55 = vld [vmem:[#allocation121_spill] sm:$0xff] }
 0x4e5   :  { %v4546_v16 = vpack.c.bf16 %v2717_v22, %v2716_v23  ;;  %v2209_v36 = vsub.f32 %v13266_v63, %v16348_v25  ;;  %v13332_v56 = vmul.f32 0.03125, %v1731_v59  ;;  %v9412_v46 = vpop.eup %9411  ;;  %8661 = vmatprep.mubr.bf16.mxu1 %v13262_v54  ;;  %v2335_v9 = vmax.f32 %v2271_v45, 0.0  ;;  %8722 = vmatpush3.bf16.msra.mxu1 %v13050_v4  ;;  %v16350_v22 = vld [vmem:[#allocation136_spill] sm:$0xff]  ;;  %v16353_v25 = vld [vmem:[#allocation146_spill] sm:$0xff] }
 0x4e6   :  { %16346 = vst [vmem:[#allocation71_spill] sm:$0xff] %v13327_v28  ;;  %v2719_v47 = vmax.f32 %v2655_v14, 0.0  ;;  %v1925_v52 = vmul.f32 %v13327_v28, %v13327_v28  ;;  %v2520_v24 = vmul.f32 %v13213_v29, %v16349_v42  ;;  %v1977_v38 = vpop.xlane.xlu1 %1976  ;;  %v2521_v63 = vmul.f32 %v13251_v61, %v16350_v22  ;;  %8723 = vmatprep.subr.bf16.mxu1 %v9200_v11  ;;  %v9201_v14 = vld [vmem:[#allocation8 + $0x90] sm:$0xff]  }
 0x4e7   :  { %v2273_v23 = vmul.f32 0.03125, %v2209_v36  ;;  %v13342_v59 = vmul.f32 0.03125, %v1729_v41  ;;  %v13346_v54 = vsub.f32 %v16351_v55, %v13321_v43  ;;  %v2399_v50 = vadd.f32 1e-05, %v2335_v9 }
 0x4e8   :  { %v4547_v45 = vpack.c.bf16 %v2719_v47, %v2718_v20  ;;  %2044 = vadd.xlane.f32.xlu1 %v1925_v52  ;;  %v2588_v29 = vmul.f32 %v13299_v40, %v2520_v24  ;;  %v2210_v42 = vsub.f32 %v1975_v34, %v16353_v25  ;;  %v1735_v4 = vpop.xlane.xlu0 %1734  ;;  %v2589_v28 = vmul.f32 %v13299_v40, %v2521_v63  ;;  %v16354_v47 = vld [vmem:[#allocation120_spill] sm:$0xff] }
 0x4e9   :  { %16352 = vst [vmem:[#allocation98_spill] sm:$0xff] %v13346_v54  ;;  %v2337_v36 = vmax.f32 %v2273_v23, 0.0  ;;  %v1926_v61 = vmul.f32 %v13346_v54, %v13346_v54  ;;  %v13353_v41 = vmul.f32 0.03125, %v1733_v8  ;;  %9419 = vrsqrt.f32 %v2399_v50  ;;  %8724 = vmatpush3.bf16.msra.mxu1 %v9200_v11  ;;  %v16355_v23 = vld [vmem:[#allocation89_spill] sm:$0xff]  ;;  %v16356_v25 = vld [vmem:[#allocation28_spill] sm:$0xff] }
 0x4ea   :  { %v9414_v22 = vpop.eup %9413  ;;  %v2656_v55 = vadd.f32 %v13311_v27, %v2588_v29  ;;  %v2274_v20 = vmul.f32 0.03125, %v2210_v42  ;;  %v13358_v9 = vsub.f32 %v16354_v47, %v13332_v56  ;;  %v1981_v52 = vpop.xlane.xlu1 %1980  ;;  %v2657_v24 = vadd.f32 %v13311_v27, %v2589_v28  ;;  %8725 = vmatprep.subr.bf16.mxu1 %v9201_v14  ;;  %v16357_v42 = vld [vmem:[#allocation30_spill] sm:$0xff] }
 0x4eb   :  { %v2401_v34 = vadd.f32 1e-05, %v2337_v36  ;;  %2046 = vadd.xlane.f32.xlu0 %v1926_v61  ;;  %v2212_v63 = vsub.f32 %v1979_v51, %v16355_v23  ;;  %v2522_v8 = vmul.f32 %v13287_v12, %v16356_v25  ;;  %v2523_v47 = vmul.f32 %v9412_v46, %v16357_v42  ;;  %v16359_v46 = vld [vmem:[#allocation235_spill] sm:$0xff] }
 0x4ec   :  { %v2720_v50 = vmax.f32 %v2656_v55, 0.0  ;;  %v2338_v54 = vmax.f32 %v2274_v20, 0.0  ;;  %v1928_v29 = vmul.f32 %v13358_v9, %v13358_v9  ;;  %v1739_v3 = vpop.xlane.xlu0 %1738  ;;  %8662 = vmatmul.mubr.bf16.gmra.mrb[32].mxu1 %v4546_v16  ;;  %v2721_v11 = vmax.f32 %v2657_v24, 0.0 }
 0x4ed   :  { %v13367_v21 = vpop.eup %9415  ;;  %9421 = vrsqrt.f32 %v2401_v34  ;;  %v2276_v28 = vmul.f32 0.03125, %v2212_v63  ;;  %v2590_v51 = vmul.f32 %v13299_v40, %v2522_v8  ;;  %8665 = vmatprep.mubr.bf16.mxu1 %v4547_v45  ;;  %v2591_v61 = vmul.f32 %v13299_v40, %v2523_v47  ;;  %8726 = vmatpush3.bf16.msra.mxu1 %v9201_v14  ;;  %v9202_v47 = vld [vmem:[#allocation8 + $0x98] sm:$0xff]  }
 0x4ee   :  { %v13370_v36 = vpop.eup %9417  ;;  %v2402_v12 = vadd.f32 1e-05, %v2338_v54  ;;  %v13375_v55 = vsub.f32 %v16212_v2, %v13342_v59  ;;  %v2211_v20 = vsub.f32 %v1977_v38, %v16359_v46  ;;  %v1737_v23 = vpop.xlane.xlu1 %1736  ;;  %v4548_v16 = vpack.c.bf16 %v2721_v11, %v2720_v50  ;;  %v16360_v38 = vld [vmem:[#allocation27_spill] sm:$0xff]  ;;  %v16361_v50 = vld [vmem:[#allocation29_spill] sm:$0xff]  ;;  %8727 = vmatprep.subr.bf16.mxu1 %v9202_v47 }
 0x4ef   :  { %2050 = vadd.xlane.f32.xlu0 %v1928_v29  ;;  %v2340_v34 = vmax.f32 %v2276_v28, 0.0  ;;  %v2658_v24 = vadd.f32 %v13311_v27, %v2590_v51  ;;  %v13379_v63 = vmul.f32 0.03125, %v1735_v4  ;;  %v2659_v54 = vadd.f32 %v13311_v27, %v2591_v61  ;;  %v16363_v51 = vld [vmem:[#allocation147_spill] sm:$0xff] }
 0x4f0   :  { %16358 = vst [vmem:[#allocation210_spill] sm:$0xff] %v13375_v55  ;;  %9423 = vrsqrt.f32 %v2402_v12  ;;  %v1927_v45 = vmul.f32 %v13375_v55, %v13375_v55  ;;  %v2275_v25 = vmul.f32 0.03125, %v2211_v20  ;;  %v1983_v2 = vpop.xlane.xlu0 %1982  ;;  %v2524_v14 = vmul.f32 %v13316_v31, %v16360_v38  ;;  %v16365_v38 = vld [vmem:[#allocation164_spill] sm:$0xff] }
 0x4f1   :  { %v2404_v8 = vadd.f32 1e-05, %v2340_v34  ;;  %v2722_v42 = vmax.f32 %v2658_v24, 0.0  ;;  %v2525_v29 = vmul.f32 %v9414_v22, %v16361_v50  ;;  %v2723_v11 = vmax.f32 %v2659_v54, 0.0  ;;  %8728 = vmatpush3.bf16.msra.mxu1 %v9202_v47 }
 0x4f2   :  { %2048 = vadd.xlane.f32.xlu1 %v1927_v45  ;;  %v2339_v4 = vmax.f32 %v2275_v25, 0.0  ;;  %v13389_v28 = vsub.f32 %v16218_v57, %v13353_v41  ;;  %v2213_v12 = vsub.f32 %v1981_v52, %v16363_v51  ;;  %v1741_v61 = vpop.xlane.xlu1 %1740  ;;  %v2592_v46 = vmul.f32 %v13299_v40, %v2524_v14 }
 0x4f3   :  { %9425 = vrsqrt.f32 %v2404_v8  ;;  %v2593_v20 = vmul.f32 %v13299_v40, %v2525_v29  ;;  %v13394_v34 = vmul.f32 0.03125, %v1739_v3  ;;  %v9420_v31 = vpop.eup %9419  ;;  %v4549_v22 = vpack.c.bf16 %v2723_v11, %v2722_v42 }
 0x4f4   :  { %16362 = vst [vmem:[#allocation25_spill] sm:$0xff] %v13389_v28  ;;  %v2403_v24 = vadd.f32 1e-05, %v2339_v4  ;;  %v1929_v54 = vmul.f32 %v13389_v28, %v13389_v28  ;;  %v2277_v45 = vmul.f32 0.03125, %v2213_v12  ;;  %v1987_v57 = vpop.xlane.xlu0 %1986  ;;  %8666 = vmatmul.mubr.bf16.gmra.mrb[36].mxu1 %v4548_v16  ;;  %v2660_v52 = vadd.f32 %v13311_v27, %v2592_v46  ;;  %v16367_v12 = vld [vmem:[#allocation148_spill] sm:$0xff] }
 0x4f5   :  { %v2661_v25 = vadd.f32 %v13311_v27, %v2593_v20  ;;  %v13400_v8 = vmul.f32 0.03125, %v1737_v23  ;;  %v13404_v3 = vsub.f32 %v16222_v32, %v13379_v63  ;;  %8669 = vmatprep.mubr.bf16.mxu1 %v4549_v22  ;;  %v2214_v14 = vsub.f32 %v1983_v2, %v16365_v38  ;;  %v16368_v20 = vld [vmem:[#allocation32_spill] sm:$0xff] }
 0x4f6   :  { %9427 = vrsqrt.f32 %v2403_v24  ;;  %2052 = vadd.xlane.f32.xlu1 %v1929_v54  ;;  %v2341_v42 = vmax.f32 %v2277_v45, 0.0  ;;  %v13407_v50 = vmul.f32 0.03125, %v1741_v61  ;;  %v1985_v29 = vpop.xlane.xlu1 %1984  ;;  %v2724_v47 = vmax.f32 %v2660_v52, 0.0  ;;  %v16369_v54 = vld [vmem:[#allocation34_spill] sm:$0xff]  ;;  %v16382_v28 = vld [vmem:[#allocation36_spill] sm:$0xff] }
 0x4f7   :  { %16364 = vst [vmem:[#allocation238_spill] sm:$0xff] %v13404_v3  ;;  %v9422_v16 = vpop.eup %9421  ;;  %v2725_v11 = vmax.f32 %v2661_v25, 0.0  ;;  %v1930_v23 = vmul.f32 %v13404_v3, %v13404_v3  ;;  %v13413_v4 = vsub.f32 %v16226_v26, %v13394_v34  ;;  %v2278_v51 = vmul.f32 0.03125, %v2214_v14 }
 0x4f8   :  { %v2405_v32 = vadd.f32 1e-05, %v2341_v42  ;;  %v2216_v46 = vsub.f32 %v1987_v57, %v16367_v12  ;;  %v2526_v2 = vmul.f32 %v13367_v21, %v16368_v20  ;;  %v1991_v61 = vpop.xlane.xlu0 %1990  ;;  %v2527_v45 = vmul.f32 %v9420_v31, %v16369_v54  ;;  %v16372_v31 = vld [vmem:[#allocation155_spill] sm:$0xff] }
 0x4f9   :  { %16366 = vst [vmem:[#allocation26_spill] sm:$0xff] %v13413_v4  ;;  %v4550_v22 = vpack.c.bf16 %v2725_v11, %v2724_v47  ;;  %2054 = vadd.xlane.f32.xlu0 %v1930_v23  ;;  %v1932_v24 = vmul.f32 %v13413_v4, %v13413_v4  ;;  %v13423_v52 = vsub.f32 %v16227_v62, %v13400_v8  ;;  %v2342_v25 = vmax.f32 %v2278_v51, 0.0  ;;  %v16371_v47 = vld [vmem:[#allocation151_spill] sm:$0xff] }
 0x4fa   :  { %v13425_v26 = vpop.eup %9423  ;;  %9429 = vrsqrt.f32 %v2405_v32  ;;  %v2280_v57 = vmul.f32 0.03125, %v2216_v46  ;;  %v2594_v42 = vmul.f32 %v13299_v40, %v2526_v2  ;;  %v1989_v21 = vpop.xlane.xlu1 %1988  ;;  %v2595_v38 = vmul.f32 %v13299_v40, %v2527_v45  ;;  %v16373_v54 = vld [vmem:[#allocation31_spill] sm:$0xff] }
 0x4fb   :  { %16370 = vst [vmem:[#allocation236_spill] sm:$0xff] %v13423_v52  ;;  %v1931_v14 = vmul.f32 %v13423_v52, %v13423_v52  ;;  %v2215_v11 = vsub.f32 %v1985_v29, %v16371_v47  ;;  %v2218_v23 = vsub.f32 %v1991_v61, %v16372_v31  ;;  %v2406_v12 = vadd.f32 1e-05, %v2342_v25  ;;  %v16374_v52 = vld [vmem:[#allocation33_spill] sm:$0xff]  ;;  %v9203_v47 = vld [vmem:[#allocation8 + $0xa0] sm:$0xff]  }
 0x4fc   :  { %v2344_v62 = vmax.f32 %v2280_v57, 0.0  ;;  %v2662_v20 = vadd.f32 %v13311_v27, %v2594_v42  ;;  %v2528_v32 = vmul.f32 %v13370_v36, %v16373_v54  ;;  %v1995_v51 = vpop.xlane.xlu0 %1994  ;;  %8670 = vmatmul.mubr.bf16.gmra.mrb[40].mxu1 %v4550_v22  ;;  %v2663_v2 = vadd.f32 %v13311_v27, %v2595_v38  ;;  %8729 = vmatprep.subr.bf16.mxu1 %v9203_v47 }
 0x4fd   :  { %v13436_v46 = vpop.eup %9425  ;;  %2058 = vadd.xlane.f32.xlu0 %v1932_v24  ;;  %v2279_v45 = vmul.f32 0.03125, %v2215_v11  ;;  %v2282_v4 = vmul.f32 0.03125, %v2218_v23  ;;  %v2529_v29 = vmul.f32 %v9422_v16, %v16374_v52  ;;  %9431 = vrsqrt.f32 %v2406_v12  ;;  %2056 = vadd.xlane.f32.xlu1 %v1931_v14  ;;  %v16376_v52 = vld [vmem:[#allocation150_spill] sm:$0xff] }
 0x4fe   :  { %v2408_v61 = vadd.f32 1e-05, %v2344_v62  ;;  %v2726_v25 = vmax.f32 %v2662_v20, 0.0  ;;  %v2596_v57 = vmul.f32 %v13299_v40, %v2528_v32  ;;  %v1993_v42 = vpop.xlane.xlu1 %1992  ;;  %v2727_v36 = vmax.f32 %v2663_v2, 0.0  ;;  %8730 = vmatpush3.bf16.msra.mxu1 %v9203_v47 }
 0x4ff   :  { %v2343_v31 = vmax.f32 %v2279_v45, 0.0  ;;  %v2346_v54 = vmax.f32 %v2282_v4, 0.0  ;;  %v2597_v22 = vmul.f32 %v13299_v40, %v2529_v29  ;;  %v13445_v16 = vsub.f32 %v16233_v37, %v13407_v50  ;;  %v16377_v45 = vld [vmem:[#allocation153_spill] sm:$0xff] }
 0x500   :  { %v9428_v24 = vpop.eup %9427  ;;  %9433 = vrsqrt.f32 %v2408_v61  ;;  %v2664_v38 = vadd.f32 %v13311_v27, %v2596_v57  ;;  %v2217_v11 = vsub.f32 %v1989_v21, %v16376_v52  ;;  %v1999_v14 = vpop.xlane.xlu0 %1998  ;;  %v4551_v23 = vpack.c.bf16 %v2727_v36, %v2726_v25  ;;  %v16378_v21 = vld [vmem:[#allocation170_spill] sm:$0xff]  ;;  %v16379_v52 = vld [vmem:[#allocation172_spill] sm:$0xff] }
 0x501   :  { %16375 = vst [vmem:[#allocation208_spill] sm:$0xff] %v13445_v16  ;;  %v2407_v12 = vadd.f32 1e-05, %v2343_v31  ;;  %v2410_v62 = vadd.f32 1e-05, %v2346_v54  ;;  %v2665_v20 = vadd.f32 %v13311_v27, %v2597_v22  ;;  %v1933_v32 = vmul.f32 %v13445_v16, %v13445_v16  ;;  %v16380_v54 = vld [vmem:[#allocation165_spill] sm:$0xff] }
 0x502   :  { %v2728_v4 = vmax.f32 %v2664_v38, 0.0  ;;  %v2281_v2 = vmul.f32 0.03125, %v2217_v11  ;;  %v2220_v29 = vsub.f32 %v1995_v51, %v16377_v45  ;;  %v1997_v61 = vpop.xlane.xlu1 %1996  ;;  %8673 = vmatprep.mubr.bf16.mxu1 %v4551_v23  ;;  %v2219_v57 = vsub.f32 %v1993_v42, %v16378_v21  ;;  %v16381_v51 = vld [vmem:[#allocation167_spill] sm:$0xff] }
 0x503   :  { %9435 = vrsqrt.f32 %v2407_v12  ;;  %v2729_v37 = vmax.f32 %v2665_v20, 0.0  ;;  %v2222_v25 = vsub.f32 %v1999_v14, %v16379_v52  ;;  %2060 = vadd.xlane.f32.xlu1 %v1933_v32  ;;  %v2221_v22 = vsub.f32 %v1997_v61, %v16380_v54 }
 0x504   :  { %v9430_v36 = vpop.eup %9429  ;;  %9437 = vrsqrt.f32 %v2410_v62  ;;  %v2345_v31 = vmax.f32 %v2281_v2, 0.0  ;;  %v2284_v47 = vmul.f32 0.03125, %v2220_v29  ;;  %v2003_v38 = vpop.xlane.xlu0 %2002  ;;  %v2283_v11 = vmul.f32 0.03125, %v2219_v57  ;;  %v16383_v29 = vld [vmem:[#allocation38_spill] sm:$0xff] }
 0x505   :  { %v4552_v16 = vpack.c.bf16 %v2729_v37, %v2728_v4  ;;  %v2286_v3 = vmul.f32 0.03125, %v2222_v25  ;;  %v2224_v45 = vsub.f32 %v2003_v38, %v16381_v51  ;;  %v2285_v20 = vmul.f32 0.03125, %v2221_v22  ;;  %v16385_v51 = vld [vmem:[#allocation217_spill] sm:$0xff] }
 0x506   :  { %v2409_v23 = vadd.f32 1e-05, %v2345_v31  ;;  %v2348_v12 = vmax.f32 %v2284_v47, 0.0  ;;  %v2530_v42 = vmul.f32 %v13425_v26, %v16382_v28  ;;  %v2001_v14 = vpop.xlane.xlu1 %2000  ;;  %v2347_v62 = vmax.f32 %v2283_v11, 0.0 }
 0x507   :  { %8674 = vmatmul.mubr.bf16.gmra.mrb[44].mxu1 %v4552_v16  ;;  %v2350_v32 = vmax.f32 %v2286_v3, 0.0  ;;  %v2288_v2 = vmul.f32 0.03125, %v2224_v45  ;;  %v2531_v21 = vmul.f32 %v9428_v24, %v16383_v29  ;;  %v13459_v61 = vpop.eup %9431  ;;  %v2349_v37 = vmax.f32 %v2285_v20, 0.0  ;;  %v16384_v24 = vld [vmem:[#allocation177_spill] sm:$0xff]  ;;  %v16386_v20 = vld [vmem:[#allocation35_spill] sm:$0xff] }
 0x508   :  { %9439 = vrsqrt.f32 %v2409_v23  ;;  %v2412_v4 = vadd.f32 1e-05, %v2348_v12  ;;  %v2598_v57 = vmul.f32 %v13299_v40, %v2530_v42  ;;  %v2007_v52 = vpop.xlane.xlu0 %2006  ;;  %v2411_v25 = vadd.f32 1e-05, %v2347_v62 }
 0x509   :  { %v2414_v31 = vadd.f32 1e-05, %v2350_v32  ;;  %v2352_v47 = vmax.f32 %v2288_v2, 0.0  ;;  %v2599_v28 = vmul.f32 %v13299_v40, %v2531_v21  ;;  %v2413_v3 = vadd.f32 1e-05, %v2349_v37  ;;  %v9204_v32 = vld [vmem:[#allocation8 + $0xa8] sm:$0xff]  }
 0x50a   :  { %v13463_v26 = vpop.eup %9433  ;;  %9441 = vrsqrt.f32 %v2412_v4  ;;  %v2666_v16 = vadd.f32 %v13311_v27, %v2598_v57  ;;  %v2223_v54 = vsub.f32 %v2001_v14, %v16384_v24  ;;  %v2005_v22 = vpop.xlane.xlu1 %2004  ;;  %v2226_v45 = vsub.f32 %v2007_v52, %v16385_v51  ;;  %v16387_v14 = vld [vmem:[#allocation37_spill] sm:$0xff]  ;;  %8731 = vmatprep.subr.bf16.mxu1 %v9204_v32 }
 0x50b   :  { %9443 = vrsqrt.f32 %v2411_v25  ;;  %v2416_v38 = vadd.f32 1e-05, %v2352_v47  ;;  %v2667_v11 = vadd.f32 %v13311_v27, %v2599_v28  ;;  %v2532_v42 = vmul.f32 %v13436_v46, %v16386_v20  ;;  %v16388_v25 = vld [vmem:[#allocation158_spill] sm:$0xff]  ;;  %v16389_v24 = vld [vmem:[#allocation129_spill] sm:$0xff]  ;;  %8732 = vmatpush3.bf16.msra.mxu1 %v9204_v32 }
 0x50c   :  { %9445 = vrsqrt.f32 %v2414_v31  ;;  %v2730_v23 = vmax.f32 %v2666_v16, 0.0  ;;  %v2287_v12 = vmul.f32 0.03125, %v2223_v54  ;;  %v2011_v62 = vpop.xlane.xlu0 %2010  ;;  %v2290_v21 = vmul.f32 0.03125, %v2226_v45  ;;  %v16390_v51 = vld [vmem:[#allocation221_spill] sm:$0xff] }
 0x50d   :  { %v9436_v2 = vpop.eup %9435  ;;  %9447 = vrsqrt.f32 %v2413_v3  ;;  %v2731_v29 = vmax.f32 %v2667_v11, 0.0  ;;  %v2533_v4 = vmul.f32 %v9430_v36, %v16387_v14  ;;  %v2600_v52 = vmul.f32 %v13299_v40, %v2532_v42  ;;  %v16391_v42 = vld [vmem:[#allocation24_spill] sm:$0xff] }
 0x50e   :  { %v13472_v37 = vpop.eup %9437  ;;  %9449 = vrsqrt.f32 %v2416_v38  ;;  %v2351_v57 = vmax.f32 %v2287_v12, 0.0  ;;  %v2225_v31 = vsub.f32 %v2005_v22, %v16388_v25  ;;  %v2009_v47 = vpop.xlane.xlu1 %2008  ;;  %v2354_v46 = vmax.f32 %v2290_v21, 0.0 }
 0x50f   :  { %v4553_v28 = vpack.c.bf16 %v2731_v29, %v2730_v23  ;;  %v2601_v16 = vmul.f32 %v13299_v40, %v2533_v4  ;;  %v2228_v3 = vsub.f32 %v2011_v62, %v16389_v24  ;;  %v2668_v36 = vadd.f32 %v13311_v27, %v2600_v52 }
 0x510   :  { %v2415_v54 = vadd.f32 1e-05, %v2351_v57  ;;  %v2289_v11 = vmul.f32 0.03125, %v2225_v31  ;;  %v2227_v38 = vsub.f32 %v2009_v47, %v16390_v51  ;;  %v2015_v45 = vpop.xlane.xlu0 %2014  ;;  %v2418_v12 = vadd.f32 1e-05, %v2354_v46 }
 0x511   :  { %8677 = vmatprep.mubr.bf16.mxu1 %v4553_v28  ;;  %v2669_v22 = vadd.f32 %v13311_v27, %v2601_v16  ;;  %v2292_v20 = vmul.f32 0.03125, %v2228_v3  ;;  %v2102_v23 = vmul.f32 96.0, %v16391_v42  ;;  %v2732_v21 = vmax.f32 %v2668_v36, 0.0  ;;  %v16392_v28 = vld [vmem:[#allocation114_spill] sm:$0xff]  ;;  %v16393_v16 = vld [vmem:[#allocation48_spill] sm:$0xff] }
 0x512   :  { %v9440_v29 = vpop.eup %9439  ;;  %9451 = vrsqrt.f32 %v2415_v54  ;;  %v2353_v14 = vmax.f32 %v2289_v11, 0.0  ;;  %v2291_v62 = vmul.f32 0.03125, %v2227_v38  ;;  %v2013_v32 = vpop.xlane.xlu1 %2012  ;;  %v2104_v24 = vmul.f32 96.0, %v16393_v16  ;;  %v16394_v38 = vld [vmem:[#allocation40_spill] sm:$0xff] }
 0x513   :  { %9453 = vrsqrt.f32 %v2418_v12  ;;  %v2733_v4 = vmax.f32 %v2669_v22, 0.0  ;;  %v2356_v57 = vmax.f32 %v2292_v20, 0.0  ;;  %v2166_v52 = vmul.f32 %v2102_v23, %v16391_v42 }
 0x514   :  { %v13483_v25 = vpop.eup %9441  ;;  %v2417_v31 = vadd.f32 1e-05, %v2353_v14  ;;  %v2355_v47 = vmax.f32 %v2291_v62, 0.0  ;;  %v2229_v46 = vsub.f32 %v2013_v32, %v16392_v28  ;;  %v2019_v11 = vpop.xlane.xlu0 %2018  ;;  %v2534_v12 = vmul.f32 %v13459_v61, %v16394_v38  ;;  %v16395_v32 = vld [vmem:[#allocation42_spill] sm:$0xff]  ;;  %v16398_v38 = vld [vmem:[#allocation41_spill] sm:$0xff] }
 0x515   :  { %v9444_v3 = vpop.eup %9443  ;;  %v4554_v51 = vpack.c.bf16 %v2733_v4, %v2732_v21  ;;  %v2420_v54 = vadd.f32 1e-05, %v2356_v57  ;;  %v2230_v36 = vsub.f32 %v2015_v45, %v2166_v52  ;;  %v2168_v23 = vmul.f32 %v2104_v24, %v16393_v16  ;;  %v16396_v57 = vld [vmem:[#allocation200_spill] sm:$0xff]  ;;  %v16397_v24 = vld [vmem:[#allocation39_spill] sm:$0xff] }
 0x516   :  { %v13489_v22 = vpop.eup %9445  ;;  %9455 = vrsqrt.f32 %v2417_v31  ;;  %v2419_v20 = vadd.f32 1e-05, %v2355_v47  ;;  %v2293_v42 = vmul.f32 0.03125, %v2229_v46  ;;  %v2535_v28 = vmul.f32 %v9436_v2, %v16395_v32  ;;  %v2017_v31 = vpop.xlane.xlu1 %2016 }
 0x517   :  { %v9448_v14 = vpop.eup %9447  ;;  %8678 = vmatmul.mubr.bf16.gmra.mrb[48].mxu1 %v4554_v51  ;;  %9457 = vrsqrt.f32 %v2420_v54  ;;  %v2294_v62 = vmul.f32 0.03125, %v2230_v36  ;;  %v2602_v21 = vmul.f32 %v13299_v40, %v2534_v12  ;;  %v2232_v61 = vsub.f32 %v2019_v11, %v2168_v23 }
 0x518   :  { %v13494_v45 = vpop.eup %9449  ;;  %9459 = vrsqrt.f32 %v2419_v20  ;;  %v2357_v4 = vmax.f32 %v2293_v42, 0.0  ;;  %v2103_v52 = vmul.f32 96.0, %v16396_v57  ;;  %v2603_v46 = vmul.f32 %v13299_v40, %v2535_v28  ;;  %v9205_v20 = vld [vmem:[#allocation8 + $0xb0] sm:$0xff]  }
 0x519   :  { %v2358_v47 = vmax.f32 %v2294_v62, 0.0  ;;  %v2670_v16 = vadd.f32 %v13311_v27, %v2602_v21  ;;  %v2536_v51 = vmul.f32 %v13463_v26, %v16397_v24  ;;  %v2296_v2 = vmul.f32 0.03125, %v2232_v61  ;;  %8733 = vmatprep.subr.bf16.mxu1 %v9205_v20  ;;  %v16399_v61 = vld [vmem:[#allocation91_spill] sm:$0xff]  ;;  %v16400_v24 = vld [vmem:[#allocation44_spill] sm:$0xff] }
 0x51a   :  { %v2421_v54 = vadd.f32 1e-05, %v2357_v4  ;;  %v2167_v36 = vmul.f32 %v2103_v52, %v16396_v57  ;;  %v2537_v12 = vmul.f32 %v9440_v29, %v16398_v38  ;;  %v2671_v11 = vadd.f32 %v13311_v27, %v2603_v46  ;;  %8734 = vmatpush3.bf16.msra.mxu1 %v9205_v20 }
 0x51b   :  { %v2422_v42 = vadd.f32 1e-05, %v2358_v47  ;;  %v2734_v23 = vmax.f32 %v2670_v16, 0.0  ;;  %v2604_v62 = vmul.f32 %v13299_v40, %v2536_v51  ;;  %v2360_v28 = vmax.f32 %v2296_v2, 0.0  ;;  %v2021_v16 = vpop.xlane.xlu1 %2020 }
 0x51c   :  { %v9452_v32 = vpop.eup %9451  ;;  %9461 = vrsqrt.f32 %v2421_v54  ;;  %v2231_v21 = vsub.f32 %v2017_v31, %v2167_v36  ;;  %v2605_v55 = vmul.f32 %v13299_v40, %v2537_v12  ;;  %v2735_v4 = vmax.f32 %v2671_v11, 0.0  ;;  %v16401_v36 = vld [vmem:[#allocation46_spill] sm:$0xff] }
 0x51d   :  { %v13506_v26 = vpop.eup %9453  ;;  %9463 = vrsqrt.f32 %v2422_v42  ;;  %v2672_v29 = vadd.f32 %v13311_v27, %v2604_v62  ;;  %v2105_v57 = vmul.f32 96.0, %v16399_v61  ;;  %v2424_v52 = vadd.f32 1e-05, %v2360_v28 }
 0x51e   :  { %v2295_v47 = vmul.f32 0.03125, %v2231_v21  ;;  %v2673_v46 = vadd.f32 %v13311_v27, %v2605_v55  ;;  %v2538_v31 = vmul.f32 %v13472_v37, %v16400_v24  ;;  %v4555_v51 = vpack.c.bf16 %v2735_v4, %v2734_v23  ;;  %v16402_v21 = vld [vmem:[#allocation43_spill] sm:$0xff]  ;;  %v16403_v23 = vld [vmem:[#allocation45_spill] sm:$0xff] }
 0x51f   :  { %v2736_v54 = vmax.f32 %v2672_v29, 0.0  ;;  %v2169_v2 = vmul.f32 %v2105_v57, %v16399_v61  ;;  %v2539_v38 = vmul.f32 %v9444_v3, %v16401_v36  ;;  %9465 = vrsqrt.f32 %v2424_v52  ;;  %v9206_v29 = vld [vmem:[#allocation8 + $0xb8] sm:$0xff]  }
 0x520   :  { %v9456_v12 = vpop.eup %9455  ;;  %v2359_v42 = vmax.f32 %v2295_v47, 0.0  ;;  %v2737_v11 = vmax.f32 %v2673_v46, 0.0  ;;  %v2606_v20 = vmul.f32 %v13299_v40, %v2538_v31  ;;  %8681 = vmatprep.mubr.bf16.mxu1 %v4555_v51  ;;  %v2540_v37 = vmul.f32 %v13483_v25, %v16402_v21  ;;  %v16404_v47 = vld [vmem:[#allocation52_spill] sm:$0xff]  ;;  %8735 = vmatprep.subr.bf16.mxu1 %v9206_v29 }
 0x521   :  { %v9458_v62 = vpop.eup %9457  ;;  %v2233_v28 = vsub.f32 %v2021_v16, %v2169_v2  ;;  %v2607_v55 = vmul.f32 %v13299_v40, %v2539_v38  ;;  %v2541_v4 = vmul.f32 %v9448_v14, %v16403_v23  ;;  %v2542_v46 = vmul.f32 %v13489_v22, %v16404_v47  ;;  %v16405_v14 = vld [vmem:[#allocation54_spill] sm:$0xff]  ;;  %8736 = vmatpush3.bf16.msra.mxu1 %v9206_v29 }
 0x522   :  { %v9460_v61 = vpop.eup %9459  ;;  %v2423_v57 = vadd.f32 1e-05, %v2359_v42  ;;  %v4556_v3 = vpack.c.bf16 %v2737_v11, %v2736_v54  ;;  %v2674_v52 = vadd.f32 %v13311_v27, %v2606_v20  ;;  %v2608_v16 = vmul.f32 %v13299_v40, %v2540_v37  ;;  %v16407_v37 = vld [vmem:[#allocation53_spill] sm:$0xff] }
 0x523   :  { %v2297_v24 = vmul.f32 0.03125, %v2233_v28  ;;  %v2675_v31 = vadd.f32 %v13311_v27, %v2607_v55  ;;  %v2609_v51 = vmul.f32 %v13299_v40, %v2541_v4  ;;  %v2543_v2 = vmul.f32 %v9452_v32, %v16405_v14  ;;  %v16406_v55 = vld [vmem:[#allocation51_spill] sm:$0xff] }
 0x524   :  { %9467 = vrsqrt.f32 %v2423_v57  ;;  %8682 = vmatmul.mubr.bf16.gmra.mrb[52].mxu1 %v4556_v3  ;;  %v2738_v25 = vmax.f32 %v2674_v52, 0.0  ;;  %v2610_v54 = vmul.f32 %v13299_v40, %v2542_v46  ;;  %v2676_v42 = vadd.f32 %v13311_v27, %v2608_v16  ;;  %v16408_v16 = vld [vmem:[#allocation131_spill] sm:$0xff] }
 0x525   :  { %v2361_v36 = vmax.f32 %v2297_v24, 0.0  ;;  %v2739_v38 = vmax.f32 %v2675_v31, 0.0  ;;  %v2677_v22 = vadd.f32 %v13311_v27, %v2609_v51  ;;  %v2611_v20 = vmul.f32 %v13299_v40, %v2543_v2  ;;  %v16409_v51 = vld [vmem:[#allocation132_spill] sm:$0xff] }
 0x526   :  { %v9462_v11 = vpop.eup %9461  ;;  %v2678_v28 = vadd.f32 %v13311_v27, %v2610_v54  ;;  %v2544_v21 = vmul.f32 %v13494_v45, %v16406_v55  ;;  %v2545_v23 = vmul.f32 %v9456_v12, %v16407_v37  ;;  %v2740_v3 = vmax.f32 %v2676_v42, 0.0  ;;  %v16412_v55 = vld [vmem:[#allocation205_spill] sm:$0xff] }
 0x527   :  { %v9464_v32 = vpop.eup %9463  ;;  %v2425_v4 = vadd.f32 1e-05, %v2361_v36  ;;  %v4557_v57 = vpack.c.bf16 %v2739_v38, %v2738_v25  ;;  %v2741_v52 = vmax.f32 %v2677_v22, 0.0  ;;  %v2679_v47 = vadd.f32 %v13311_v27, %v2611_v20  ;;  %v16410_v36 = vld [vmem:[#allocation126_spill] sm:$0xff]  ;;  %v16411_v20 = vld [vmem:[#allocation47_spill] sm:$0xff] }
 0x528   :  { %v2742_v46 = vmax.f32 %v2678_v28, 0.0  ;;  %v2612_v29 = vmul.f32 %v13299_v40, %v2544_v21  ;;  %v2613_v24 = vmul.f32 %v13299_v40, %v2545_v23  ;;  %v2546_v45 = vmul.f32 %v13506_v26, %v16408_v16 }
 0x529   :  { %9469 = vrsqrt.f32 %v2425_v4  ;;  %8685 = vmatprep.mubr.bf16.mxu1 %v4557_v57  ;;  %v4558_v31 = vpack.c.bf16 %v2741_v52, %v2740_v3  ;;  %v2547_v12 = vmul.f32 %v9460_v61, %v16409_v51  ;;  %v9466_v14 = vpop.eup %9465  ;;  %v2743_v2 = vmax.f32 %v2679_v47, 0.0  ;;  %v16414_v51 = vld [vmem:[#allocation162_spill] sm:$0xff] }
 0x52a   :  { %v2680_v25 = vadd.f32 %v13311_v27, %v2612_v29  ;;  %v2681_v54 = vadd.f32 %v13311_v27, %v2613_v24  ;;  %v2548_v38 = vmul.f32 %v9458_v62, %v16410_v36  ;;  %v2614_v42 = vmul.f32 %v13299_v40, %v2546_v45 }
 0x52b   :  { %v2615_v22 = vmul.f32 %v13299_v40, %v2547_v12  ;;  %v2549_v28 = vmul.f32 %v9462_v11, %v16411_v20  ;;  %v2550_v21 = vmul.f32 %v9464_v32, %v16412_v55  ;;  %v4559_v26 = vpack.c.bf16 %v2743_v2, %v2742_v46  ;;  %v16413_v11 = vld [vmem:[#allocation96_spill] sm:$0xff] }
 0x52c   :  { %8686 = vmatmul.mubr.bf16.gmra.mrb[56].mxu1 %v4558_v31  ;;  %v2744_v37 = vmax.f32 %v2680_v25, 0.0  ;;  %v2745_v61 = vmax.f32 %v2681_v54, 0.0  ;;  %v2682_v23 = vadd.f32 %v13311_v27, %v2614_v42  ;;  %v2616_v52 = vmul.f32 %v13299_v40, %v2548_v38  ;;  %v16415_v38 = vld [vmem:[#allocation201_spill] sm:$0xff] }
 0x52d   :  { %v2683_v4 = vadd.f32 %v13311_v27, %v2615_v22  ;;  %v2617_v57 = vmul.f32 %v13299_v40, %v2549_v28  ;;  %8689 = vmatprep.mubr.bf16.mxu1 %v4559_v26  ;;  %v2618_v32 = vmul.f32 %v13299_v40, %v2550_v21  ;;  %v2552_v12 = vmul.f32 %v9466_v14, %v16414_v51 }
 0x52e   :  { %v9468_v3 = vpop.eup %9467  ;;  %v4560_v62 = vpack.c.bf16 %v2745_v61, %v2744_v37  ;;  %v2746_v47 = vmax.f32 %v2682_v23, 0.0  ;;  %v2684_v45 = vadd.f32 %v13311_v27, %v2616_v52  ;;  %v2108_v52 = vmul.f32 96.0, %v13067_v7 }
 0x52f   :  { %v2747_v29 = vmax.f32 %v2683_v4, 0.0  ;;  %v2551_v24 = vmul.f32 %v9468_v3, %v16413_v11  ;;  %v2685_v46 = vadd.f32 %v13311_v27, %v2617_v57  ;;  %v2686_v25 = vadd.f32 %v13311_v27, %v2618_v32 }
 0x530   :  { %v2748_v20 = vmax.f32 %v2684_v45, 0.0  ;;  %v2620_v28 = vmul.f32 %v13299_v40, %v2552_v12  ;;  %v2106_v3 = vmul.f32 96.0, %v13058_v35  ;;  %v2107_v11 = vmul.f32 96.0, %v13080_v5 }
 0x531   :  { %v4561_v31 = vpack.c.bf16 %v2747_v29, %v2746_v47  ;;  %v2619_v16 = vmul.f32 %v13299_v40, %v2551_v24  ;;  %v2749_v36 = vmax.f32 %v2685_v46, 0.0  ;;  %v2750_v21 = vmax.f32 %v2686_v25, 0.0 }
 0x532   :  { %v2688_v61 = vadd.f32 %v13311_v27, %v2620_v28  ;;  %v2172_v32 = vmul.f32 %v2108_v52, %v13067_v7  ;;  %v2171_v45 = vmul.f32 %v2107_v11, %v13080_v5  ;;  %v2109_v51 = vmul.f32 96.0, %v13110_v58 }
 0x533   :  { %v9470_v2 = vpop.eup %9469  ;;  %v2687_v54 = vadd.f32 %v13311_v27, %v2619_v16  ;;  %v4562_v26 = vpack.c.bf16 %v2749_v36, %v2748_v20  ;;  %v2110_v28 = vmul.f32 96.0, %v13150_v17 }
 0x534   :  { %8690 = vmatmul.mubr.bf16.gmra.mrb[60].mxu1 %v4560_v62  ;;  %v2553_v42 = vmul.f32 %v9470_v2, %v16415_v38  ;;  %v2752_v4 = vmax.f32 %v2688_v61, 0.0  ;;  %v2170_v62 = vmul.f32 %v2106_v3, %v13058_v35  ;;  %v2173_v38 = vmul.f32 %v2109_v51, %v13110_v58 }
 0x535   :  { %8693 = vmatprep.mubr.bf16.mxu1 %v4561_v31  ;;  %v2751_v22 = vmax.f32 %v2687_v54, 0.0  ;;  %v2111_v58 = vmul.f32 96.0, %v13179_v53 }
 0x536   :  { %v2621_v55 = vmul.f32 %v13299_v40, %v2553_v42 }
 0x537   :  { %v4563_v37 = vpack.c.bf16 %v2751_v22, %v2750_v21 }
 0x538   :  { %v2689_v14 = vadd.f32 %v13311_v27, %v2621_v55 }
 0x53a   :  { %v2753_v23 = vmax.f32 %v2689_v14, 0.0  ;;  %v2112_v14 = vmul.f32 96.0, %v13166_v49 }
 0x53c   :  { %8694 = vmatmul.mubr.bf16.gmra.mrb[64].mxu1 %v4562_v26  ;;  %v4564_v57 = vpack.c.bf16 %v2753_v23, %v2752_v4  ;;  %v2174_v26 = vmul.f32 %v2110_v28, %v13150_v17  ;;  %v2176_v3 = vmul.f32 %v2112_v14, %v13166_v49  ;;  %v2175_v17 = vmul.f32 %v2111_v58, %v13179_v53 }
 0x53d   :  { %8697 = vmatprep.mubr.bf16.mxu1 %v4563_v37  ;;  %v2114_v49 = vmul.f32 96.0, %v13240_v6 }
 0x544   :  { %8698 = vmatmul.mubr.bf16.gmra.mrb[68].mxu1 %v4564_v57 }
 0x54b   :  { %v2023_v47 = vpop.xlane.xlu0 %2022 }
 0x54c   :  { %v2234_v29 = vsub.f32 %v2023_v47, %v2170_v62 }
 0x54e   :  { %v2298_v24 = vmul.f32 0.03125, %v2234_v29 }
 0x54f   :  { %v2027_v46 = vpop.xlane.xlu0 %2026 }
 0x550   :  { %v2362_v31 = vmax.f32 %v2298_v24, 0.0  ;;  %v2236_v16 = vsub.f32 %v2027_v46, %v2172_v32  ;;  %v2113_v24 = vmul.f32 96.0, %v13199_v1 }
 0x552   :  { %v2426_v12 = vadd.f32 1e-05, %v2362_v31  ;;  %v2300_v2 = vmul.f32 0.03125, %v2236_v16 }
 0x553   :  { %v2025_v25 = vpop.xlane.xlu1 %2024 }
 0x554   :  { %v2235_v35 = vsub.f32 %v2025_v25, %v2171_v45  ;;  %9471 = vrsqrt.f32 %v2426_v12  ;;  %v2364_v54 = vmax.f32 %v2300_v2, 0.0  ;;  %v2177_v25 = vmul.f32 %v2113_v24, %v13199_v1 }
 0x555   :  { %v2178_v1 = vmul.f32 %v2114_v49, %v13240_v6  ;;  %v2117_v24 = vmul.f32 96.0, %v13274_v15 }
 0x556   :  { %v2299_v36 = vmul.f32 0.03125, %v2235_v35  ;;  %v2428_v42 = vadd.f32 1e-05, %v2364_v54 }
 0x557   :  { %v2029_v22 = vpop.xlane.xlu1 %2028 }
 0x558   :  { %v2363_v20 = vmax.f32 %v2299_v36, 0.0  ;;  %v2237_v7 = vsub.f32 %v2029_v22, %v2173_v38  ;;  %9473 = vrsqrt.f32 %v2428_v42  ;;  %v13591_v22 = vld [vmem:[%s15202_s12 + $0x1] ss:$0 sm:$0xff] }
 0x55a   :  { %v2427_v55 = vadd.f32 1e-05, %v2363_v20  ;;  %v2301_v5 = vmul.f32 0.03125, %v2237_v7 }
 0x55c   :  { %9475 = vrsqrt.f32 %v2427_v55  ;;  %v2365_v21 = vmax.f32 %v2301_v5, 0.0  ;;  %v2031_v37 = vpop.xlane.xlu0 %2030  ;;  %v13600_v55 = vld [vmem:[%s15202_s12 + $0x2] ss:$0 sm:$0xff] }
 0x55d   :  { %v2238_v23 = vsub.f32 %v2031_v37, %v2174_v26 }
 0x55e   :  { %v2429_v61 = vadd.f32 1e-05, %v2365_v21  ;;  %v9472_v4 = vpop.eup %9471 }
 0x55f   :  { %v2302_v57 = vmul.f32 0.03125, %v2238_v23  ;;  %v2554_v62 = vmul.f32 %v9472_v4, %v13090_v44 }
 0x560   :  { %9477 = vrsqrt.f32 %v2429_v61  ;;  %v2035_v52 = vpop.xlane.xlu0 %2034 }
 0x561   :  { %v2366_v47 = vmax.f32 %v2302_v57, 0.0  ;;  %v2240_v29 = vsub.f32 %v2035_v52, %v2176_v3  ;;  %v2622_v16 = vmul.f32 %v13299_v40, %v2554_v62  ;;  %v2116_v40 = vmul.f32 96.0, %v13256_v60 }
 0x562   :  { %v9474_v11 = vpop.eup %9473 }
 0x563   :  { %v2430_v32 = vadd.f32 1e-05, %v2366_v47  ;;  %v2304_v46 = vmul.f32 0.03125, %v2240_v29  ;;  %v2556_v44 = vmul.f32 %v9474_v11, %v13114_v10  ;;  %v2690_v36 = vadd.f32 %v13311_v27, %v2622_v16 }
 0x564   :  { %v2033_v31 = vpop.xlane.xlu1 %2032  ;;  %v2180_v62 = vmul.f32 %v2116_v40, %v13256_v60 }
 0x565   :  { %v2239_v45 = vsub.f32 %v2033_v31, %v2175_v17  ;;  %9479 = vrsqrt.f32 %v2430_v32  ;;  %v2368_v12 = vmax.f32 %v2304_v46, 0.0  ;;  %v2624_v7 = vmul.f32 %v13591_v22, %v2556_v44 }
 0x566   :  { %v9476_v51 = vpop.eup %9475  ;;  %v2754_v14 = vmax.f32 %v2690_v36, 0.0 }
 0x567   :  { %v2303_v2 = vmul.f32 0.03125, %v2239_v45  ;;  %v2555_v53 = vmul.f32 %v9476_v51, %v13136_v48  ;;  %v2432_v35 = vadd.f32 1e-05, %v2368_v12  ;;  %v2115_v48 = vmul.f32 96.0, %v13264_v30 }
 0x568   :  { %v2037_v54 = vpop.xlane.xlu1 %2036  ;;  %v2692_v58 = vadd.f32 %v13600_v55, %v2624_v7  ;;  %v2118_v12 = vmul.f32 96.0, %v13321_v43 }
 0x569   :  { %v2367_v38 = vmax.f32 %v2303_v2, 0.0  ;;  %v2241_v42 = vsub.f32 %v2037_v54, %v2177_v25  ;;  %v2623_v10 = vmul.f32 %v13591_v22, %v2555_v53  ;;  %9481 = vrsqrt.f32 %v2432_v35 }
 0x56a   :  { %v9478_v20 = vpop.eup %9477  ;;  %v2179_v23 = vmul.f32 %v2115_v48, %v13264_v30  ;;  %v2756_v16 = vmax.f32 %v2692_v58, 0.0  ;;  %v2181_v25 = vmul.f32 %v2117_v24, %v13274_v15 }
 0x56b   :  { %v2431_v27 = vadd.f32 1e-05, %v2367_v38  ;;  %v2305_v28 = vmul.f32 0.03125, %v2241_v42  ;;  %v2691_v5 = vadd.f32 %v13600_v55, %v2623_v10  ;;  %v2557_v21 = vmul.f32 %v9478_v20, %v13155_v33  ;;  %v2039_v26 = vpop.xlane.xlu0 %2038 }
 0x56c   :  { %v2242_v6 = vsub.f32 %v2039_v26, %v2178_v1  ;;  %v2182_v10 = vmul.f32 %v2118_v12, %v13321_v43  ;;  %v2120_v20 = vmul.f32 96.0, %v13332_v56 }
 0x56d   :  { %9483 = vrsqrt.f32 %v2431_v27  ;;  %v2369_v37 = vmax.f32 %v2305_v28, 0.0  ;;  %v2755_v61 = vmax.f32 %v2691_v5, 0.0  ;;  %v2625_v4 = vmul.f32 %v13591_v22, %v2557_v21 }
 0x56e   :  { %v2306_v3 = vmul.f32 0.03125, %v2242_v6  ;;  %v2041_v47 = vpop.xlane.xlu1 %2040  ;;  %v2119_v28 = vmul.f32 96.0, %v13342_v59 }
 0x56f   :  { %v2433_v57 = vadd.f32 1e-05, %v2369_v37  ;;  %v4565_v52 = vpack.c.bf16 %v2755_v61, %v2754_v14  ;;  %v9480_v29 = vpop.eup %9479  ;;  %v2043_v33 = vpop.xlane.xlu0 %2042  ;;  %v2243_v11 = vsub.f32 %v2041_v47, %v2179_v23  ;;  %v2693_v17 = vadd.f32 %v13600_v55, %v2625_v4 }
 0x570   :  { %v2370_v32 = vmax.f32 %v2306_v3, 0.0  ;;  %v2244_v30 = vsub.f32 %v2043_v33, %v2180_v62  ;;  %v2558_v46 = vmul.f32 %v9480_v29, %v13189_v13  ;;  %v2184_v14 = vmul.f32 %v2120_v20, %v13332_v56 }
 0x571   :  { %9485 = vrsqrt.f32 %v2433_v57  ;;  %8701 = vmatprep.mubr.bf16.mxu1 %v4565_v52  ;;  %v2307_v31 = vmul.f32 0.03125, %v2243_v11  ;;  %v2757_v45 = vmax.f32 %v2693_v17, 0.0  ;;  %v2121_v23 = vmul.f32 96.0, %v13353_v41 }
 0x572   :  { %v2434_v51 = vadd.f32 1e-05, %v2370_v32  ;;  %v2308_v60 = vmul.f32 0.03125, %v2244_v30  ;;  %v2626_v54 = vmul.f32 %v13591_v22, %v2558_v46  ;;  %v2183_v3 = vmul.f32 %v2119_v28, %v13342_v59 }
 0x573   :  { %v9482_v49 = vpop.eup %9481  ;;  %v2371_v44 = vmax.f32 %v2307_v31, 0.0  ;;  %v4566_v2 = vpack.c.bf16 %v2757_v45, %v2756_v16  ;;  %v2122_v17 = vmul.f32 96.0, %v13379_v63  ;;  %v2185_v46 = vmul.f32 %v2121_v23, %v13353_v41 }
 0x574   :  { %9487 = vrsqrt.f32 %v2434_v51  ;;  %v2372_v53 = vmax.f32 %v2308_v60, 0.0  ;;  %v2560_v38 = vmul.f32 %v9482_v49, %v13207_v39  ;;  %v2694_v27 = vadd.f32 %v13600_v55, %v2626_v54 }
 0x575   :  { %v2045_v35 = vpop.xlane.xlu1 %2044  ;;  %v2435_v36 = vadd.f32 1e-05, %v2371_v44  ;;  %8702 = vmatmul.mubr.bf16.gmra.mrb[72].mxu1 %v4566_v2  ;;  %v2124_v2 = vmul.f32 96.0, %v13394_v34 }
 0x576   :  { %v2245_v13 = vsub.f32 %v2045_v35, %v2181_v25  ;;  %v2436_v40 = vadd.f32 1e-05, %v2372_v53  ;;  %v2628_v21 = vmul.f32 %v13591_v22, %v2560_v38  ;;  %v2758_v57 = vmax.f32 %v2694_v27, 0.0  ;;  %v16416_v25 = vld [vmem:[#allocation99_spill] sm:$0xff]  ;;  %v16417_v38 = vld [vmem:[#allocation72_spill] sm:$0xff] }
 0x577   :  { %v9484_v42 = vpop.eup %9483  ;;  %9489 = vrsqrt.f32 %v2435_v36  ;;  %v2186_v36 = vmul.f32 %v2122_v17, %v13379_v63  ;;  %v2188_v28 = vmul.f32 %v2124_v2, %v13394_v34 }
 0x578   :  { %v2309_v1 = vmul.f32 0.03125, %v2245_v13  ;;  %v2047_v48 = vpop.xlane.xlu0 %2046  ;;  %v2559_v15 = vmul.f32 %v9484_v42, %v13228_v0  ;;  %9491 = vrsqrt.f32 %v2436_v40  ;;  %v2696_v47 = vadd.f32 %v13600_v55, %v2628_v21 }
 0x579   :  { %v2246_v7 = vsub.f32 %v2047_v48, %v2182_v10 }
 0x57a   :  { %v2373_v5 = vmax.f32 %v2309_v1, 0.0  ;;  %v2627_v39 = vmul.f32 %v13591_v22, %v2559_v15  ;;  %v2760_v45 = vmax.f32 %v2696_v47, 0.0  ;;  %v2123_v1 = vmul.f32 96.0, %v13400_v8 }
 0x57b   :  { %v9486_v26 = vpop.eup %9485  ;;  %v2310_v43 = vmul.f32 0.03125, %v2246_v7 }
 0x57c   :  { %v2437_v37 = vadd.f32 1e-05, %v2373_v5  ;;  %v2051_v6 = vpop.xlane.xlu0 %2050  ;;  %v2695_v61 = vadd.f32 %v13600_v55, %v2627_v39  ;;  %v2561_v0 = vmul.f32 %v9486_v26, %v13247_v18  ;;  %v16418_v26 = vld [vmem:[#allocation71_spill] sm:$0xff] }
 0x57d   :  { %v2374_v4 = vmax.f32 %v2310_v43, 0.0  ;;  %v2248_v58 = vsub.f32 %v2051_v6, %v2184_v14  ;;  %v2187_v6 = vmul.f32 %v2123_v1, %v13400_v8 }
 0x57e   :  { %9493 = vrsqrt.f32 %v2437_v37  ;;  %v2759_v62 = vmax.f32 %v2695_v61, 0.0  ;;  %v2629_v52 = vmul.f32 %v13591_v22, %v2561_v0  ;;  %v9488_v56 = vpop.eup %9487 }
 0x57f   :  { %v2438_v29 = vadd.f32 1e-05, %v2374_v4  ;;  %v2312_v33 = vmul.f32 0.03125, %v2248_v58  ;;  %v2049_v11 = vpop.xlane.xlu1 %2048  ;;  %v2562_v30 = vmul.f32 %v9488_v56, %v13270_v19 }
 0x580   :  { %v4567_v18 = vpack.c.bf16 %v2759_v62, %v2758_v57  ;;  %v2247_v24 = vsub.f32 %v2049_v11, %v2183_v3  ;;  %v2697_v32 = vadd.f32 %v13600_v55, %v2629_v52  ;;  %v2125_v62 = vmul.f32 96.0, %v13407_v50 }
 0x581   :  { %9495 = vrsqrt.f32 %v2438_v29  ;;  %v2376_v59 = vmax.f32 %v2312_v33, 0.0  ;;  %v9490_v31 = vpop.eup %9489  ;;  %v2630_v60 = vmul.f32 %v13591_v22, %v2562_v30  ;;  %v16419_v29 = vld [vmem:[#allocation98_spill] sm:$0xff] }
 0x582   :  { %8705 = vmatprep.mubr.bf16.mxu1 %v4567_v18  ;;  %v2311_v16 = vmul.f32 0.03125, %v2247_v24  ;;  %v2761_v51 = vmax.f32 %v2697_v32, 0.0  ;;  %v9492_v12 = vpop.eup %9491  ;;  %v2563_v53 = vmul.f32 %v9490_v31, %v16416_v25  ;;  %v2189_v30 = vmul.f32 %v2125_v62, %v13407_v50 }
 0x583   :  { %v2440_v49 = vadd.f32 1e-05, %v2376_v59  ;;  %v2053_v44 = vpop.xlane.xlu1 %2052  ;;  %v2698_v13 = vadd.f32 %v13600_v55, %v2630_v60  ;;  %v2564_v42 = vmul.f32 %v9492_v12, %v16417_v38 }
 0x584   :  { %v2375_v35 = vmax.f32 %v2311_v16, 0.0  ;;  %v4568_v19 = vpack.c.bf16 %v2761_v51, %v2760_v45  ;;  %v2249_v54 = vsub.f32 %v2053_v44, %v2185_v46  ;;  %v2631_v41 = vmul.f32 %v13591_v22, %v2563_v53 }
 0x585   :  { %9497 = vrsqrt.f32 %v2440_v49  ;;  %v2632_v7 = vmul.f32 %v13591_v22, %v2564_v42  ;;  %v2762_v39 = vmax.f32 %v2698_v13, 0.0  ;;  %v16420_v49 = vld [vmem:[#allocation210_spill] sm:$0xff] }
 0x586   :  { %v2439_v40 = vadd.f32 1e-05, %v2375_v35  ;;  %8706 = vmatmul.mubr.bf16.gmra.mrb[76].mxu1 %v4568_v19  ;;  %v2313_v10 = vmul.f32 0.03125, %v2249_v54  ;;  %v2055_v20 = vpop.xlane.xlu0 %2054  ;;  %v2699_v15 = vadd.f32 %v13600_v55, %v2631_v41 }
 0x587   :  { %v2250_v48 = vsub.f32 %v2055_v20, %v2186_v36  ;;  %v2700_v61 = vadd.f32 %v13600_v55, %v2632_v7  ;;  %v16422_v20 = vld [vmem:[#allocation238_spill] sm:$0xff] }
 0x588   :  { %v9494_v27 = vpop.eup %9493  ;;  %9499 = vrsqrt.f32 %v2439_v40  ;;  %v2377_v63 = vmax.f32 %v2313_v10, 0.0  ;;  %v2763_v21 = vmax.f32 %v2699_v15, 0.0 }
 0x589   :  { %v2314_v5 = vmul.f32 0.03125, %v2250_v48  ;;  %v2565_v43 = vmul.f32 %v9494_v27, %v16418_v26  ;;  %v2764_v18 = vmax.f32 %v2700_v61, 0.0 }
 0x58a   :  { %v2441_v14 = vadd.f32 1e-05, %v2377_v63  ;;  %v2059_v37 = vpop.xlane.xlu0 %2058  ;;  %v4569_v58 = vpack.c.bf16 %v2763_v21, %v2762_v39  ;;  %v2057_v57 = vpop.xlane.xlu1 %2056  ;;  %v16423_v21 = vld [vmem:[#allocation236_spill] sm:$0xff] }
 0x58b   :  { %v9496_v0 = vpop.eup %9495  ;;  %v2378_v23 = vmax.f32 %v2314_v5, 0.0  ;;  %v2252_v4 = vsub.f32 %v2059_v37, %v2188_v28  ;;  %v2633_v3 = vmul.f32 %v13591_v22, %v2565_v43  ;;  %v2251_v34 = vsub.f32 %v2057_v57, %v2187_v6  ;;  %v16424_v43 = vld [vmem:[#allocation26_spill] sm:$0xff]  ;;  %v16425_v57 = vld [vmem:[#allocation208_spill] sm:$0xff] }
 0x58c   :  { %9501 = vrsqrt.f32 %v2441_v14  ;;  %8709 = vmatprep.mubr.bf16.mxu1 %v4569_v58  ;;  %v2566_v8 = vmul.f32 %v9496_v0, %v16419_v29 }
 0x58d   :  { %v2442_v52 = vadd.f32 1e-05, %v2378_v23  ;;  %v2316_v47 = vmul.f32 0.03125, %v2252_v4  ;;  %v2701_v56 = vadd.f32 %v13600_v55, %v2633_v3  ;;  %v2315_v33 = vmul.f32 0.03125, %v2251_v34 }
 0x58e   :  { %v2634_v16 = vmul.f32 %v13591_v22, %v2566_v8  ;;  %v9207_v8 = vld [vmem:[%s15193_s3] sm:$0xff]  }
 0x58f   :  { %v9498_v11 = vpop.eup %9497  ;;  %9503 = vrsqrt.f32 %v2442_v52  ;;  %v2380_v17 = vmax.f32 %v2316_v47, 0.0  ;;  %v2765_v24 = vmax.f32 %v2701_v56, 0.0  ;;  %v2379_v32 = vmax.f32 %v2315_v33, 0.0 }
 0x590   :  { %v2061_v31 = vpop.xlane.xlu1 %2060  ;;  %v2568_v45 = vmul.f32 %v9498_v11, %v13358_v9  ;;  %v2702_v50 = vadd.f32 %v13600_v55, %v2634_v16  ;;  %v16421_v9 = vld [vmem:[#allocation25_spill] sm:$0xff]  ;;  %v9208_v11 = vld [vmem:[%s15193_s3 + $0x8] sm:$0xff]   ;;  %v9219_v16 = vld [vmem:[%s15193_s3 + $0x60] sm:$0xff]  }
 0x591   :  { %v2444_v59 = vadd.f32 1e-05, %v2380_v17  ;;  %v4570_v46 = vpack.c.bf16 %v2765_v24, %v2764_v18  ;;  %v2443_v60 = vadd.f32 1e-05, %v2379_v32  ;;  %v2253_v12 = vsub.f32 %v2061_v31, %v2189_v30  ;;  %v9211_v17 = vld [vmem:[%s15193_s3 + $0x20] sm:$0xff]   ;;  %v9212_v18 = vld [vmem:[%s15193_s3 + $0x28] sm:$0xff]  }
 0x592   :  { %v9500_v51 = vpop.eup %9499  ;;  %v2636_v53 = vmul.f32 %v13591_v22, %v2568_v45  ;;  %v2766_v38 = vmax.f32 %v2702_v50, 0.0  ;;  %v9213_v24 = vld [vmem:[%s15193_s3 + $0x30] sm:$0xff]   ;;  %v9214_v32 = vld [vmem:[%s15193_s3 + $0x38] sm:$0xff]   ;;  %v9215_v30 = vld [vmem:[%s15193_s3 + $0x40] sm:$0xff]  }
 0x593   :  { %9505 = vrsqrt.f32 %v2444_v59  ;;  %8710 = vmatmul.mubr.bf16.gmra.mrb[80].mxu1 %v4570_v46  ;;  %v2567_v44 = vmul.f32 %v9500_v51, %v16420_v49  ;;  %v2317_v2 = vmul.f32 0.03125, %v2253_v12  ;;  %v9216_v59 = vld [vmem:[%s15193_s3 + $0x48] sm:$0xff]   ;;  %v9217_v46 = vld [vmem:[%s15193_s3 + $0x50] sm:$0xff]   ;;  %v9218_v31 = vld [vmem:[%s15193_s3 + $0x58] sm:$0xff]  }
 0x594   :  { %9507 = vrsqrt.f32 %v2443_v60  ;;  %v2704_v10 = vadd.f32 %v13600_v55, %v2636_v53  ;;  %v9220_v45 = vld [vmem:[%s15193_s3 + $0x68] sm:$0xff]   ;;  %v9221_v51 = vld [vmem:[%s15193_s3 + $0x70] sm:$0xff]   ;;  %v9222_v60 = vld [vmem:[%s15193_s3 + $0x78] sm:$0xff]  }
 0x595   :  { %v2635_v25 = vmul.f32 %v13591_v22, %v2567_v44  ;;  %v2381_v19 = vmax.f32 %v2317_v2, 0.0  ;;  %v9223_v12 = vld [vmem:[%s15193_s3 + $0x80] sm:$0xff]   ;;  %v9224_v49 = vld [vmem:[%s15193_s3 + $0x88] sm:$0xff]   ;;  %v9225_v44 = vld [vmem:[%s15193_s3 + $0x90] sm:$0xff]  }
 0x596   :  { %v9502_v35 = vpop.eup %9501  ;;  %v2768_v27 = vmax.f32 %v2704_v10, 0.0  ;;  %v9226_v2 = vld [vmem:[%s15193_s3 + $0x98] sm:$0xff]   ;;  %v9228_v50 = vld [vmem:[%s15193_s3 + $0xa8] sm:$0xff]   ;;  %v9229_v53 = vld [vmem:[%s15193_s3 + $0xb0] sm:$0xff]  }
 0x597   :  { %v2703_v54 = vadd.f32 %v13600_v55, %v2635_v25  ;;  %v2569_v36 = vmul.f32 %v9502_v35, %v16421_v9  ;;  %v2445_v41 = vadd.f32 1e-05, %v2381_v19  ;;  %v9227_v25 = vld [vmem:[%s15193_s3 + $0xa0] sm:$0xff]   ;;  %v9230_v35 = vld [vmem:[%s15193_s3 + $0xb8] sm:$0xff]   ;;  %v9233_v9 = vld [vmem:[%s15193_s3 + $0xd0] sm:$0xff]  }
 0x598   :  { %v9231_v19 = vld [vmem:[%s15193_s3 + $0xc0] sm:$0xff]  }
 0x599   :  { %v9504_v13 = vpop.eup %9503  ;;  %v2767_v42 = vmax.f32 %v2703_v54, 0.0  ;;  %v2637_v40 = vmul.f32 %v13591_v22, %v2569_v36  ;;  %9509 = vrsqrt.f32 %v2445_v41  ;;  %v9232_v54 = vld [vmem:[%s15193_s3 + $0xc8] sm:$0xff]   ;;  %v9234_v36 = vld [vmem:[%s15193_s3 + $0xd8] sm:$0xff]   ;;  %v9235_v41 = vld [vmem:[%s15193_s3 + $0xe0] sm:$0xff]  }
 0x59a   :  { %v2570_v1 = vmul.f32 %v9504_v13, %v16422_v20  ;;  %v9236_v13 = vld [vmem:[%s15193_s3 + $0xe8] sm:$0xff]  }
 0x59b   :  { %v4571_v48 = vpack.c.bf16 %v2767_v42, %v2766_v38  ;;  %v2705_v15 = vadd.f32 %v13600_v55, %v2637_v40  ;;  %v9237_v38 = vld [vmem:[%s15193_s3 + $0xf0] sm:$0xff]   ;;  %v9238_v42 = vld [vmem:[%s15193_s3 + $0xf8] sm:$0xff]  }
 0x59c   :  { %v2638_v28 = vmul.f32 %v13591_v22, %v2570_v1 }
 0x59d   :  { %v9506_v7 = vpop.eup %9505  ;;  %8713 = vmatprep.mubr.bf16.mxu1 %v4571_v48  ;;  %v2769_v63 = vmax.f32 %v2705_v15, 0.0 }
 0x59e   :  { %v9508_v5 = vpop.eup %9507  ;;  %v2572_v14 = vmul.f32 %v9506_v7, %v16424_v43  ;;  %v2706_v6 = vadd.f32 %v13600_v55, %v2638_v28 }
 0x59f   :  { %v4572_v39 = vpack.c.bf16 %v2769_v63, %v2768_v27  ;;  %v2571_v26 = vmul.f32 %v9508_v5, %v16423_v21 }
 0x5a0   :  { %v2640_v0 = vmul.f32 %v13591_v22, %v2572_v14  ;;  %v2770_v4 = vmax.f32 %v2706_v6, 0.0 }
 0x5a1   :  { %8714 = vmatmul.mubr.bf16.gmra.mrb[84].mxu1 %v4572_v39  ;;  %v2639_v37 = vmul.f32 %v13591_v22, %v2571_v26 }
 0x5a2   :  { %v2708_v52 = vadd.f32 %v13600_v55, %v2640_v0 }
 0x5a3   :  { %v2707_v61 = vadd.f32 %v13600_v55, %v2639_v37  ;;  %v9510_v23 = vpop.eup %9509 }
 0x5a4   :  { %v2573_v3 = vmul.f32 %v9510_v23, %v16425_v57  ;;  %v2772_v56 = vmax.f32 %v2708_v52, 0.0 }
 0x5a5   :  { %v2771_v58 = vmax.f32 %v2707_v61, 0.0 }
 0x5a6   :  { %v2641_v62 = vmul.f32 %v13591_v22, %v2573_v3  ;;  %v9209_v22 = vld [vmem:[%s15193_s3 + $0x10] sm:$0xff]  }
 0x5a7   :  { %v4573_v34 = vpack.c.bf16 %v2771_v58, %v2770_v4 }
 0x5a8   :  { %v2709_v47 = vadd.f32 %v13600_v55, %v2641_v62  ;;  %v9210_v55 = vld [vmem:[%s15193_s3 + $0x18] sm:$0xff]  }
 0x5a9   :  { %8717 = vmatprep.mubr.bf16.mxu1 %v4573_v34 }
 0x5aa   :  { %v2773_v29 = vmax.f32 %v2709_v47, 0.0 }
 0x5ac   :  { %v4574_v33 = vpack.c.bf16 %v2773_v29, %v2772_v56 }
 0x5ae   :  { %8718 = vmatmul.mubr.bf16.gmra.mrb[88].mxu1 %v4574_v33 }
 0x5af   :  { %8737 = vmatprep.mubr.bf16.mxu1 %v9207_v8 }
 0x5b6   :  { %8738 = vmatmul.mubr.bf16.vlgmr.msra.gmra.mrb[28].mxu1 %v9208_v11 }
 0x5b7   :  { %8741 = vmatprep.mubr.bf16.mxu1 %v9209_v22 }
 0x5be   :  { %8742 = vmatmul.mubr.bf16.gmra.mrb[32].mxu1 %v9210_v55 }
 0x5bf   :  { %8745 = vmatprep.mubr.bf16.mxu1 %v9211_v17 }
 0x5c6   :  { %8746 = vmatmul.mubr.bf16.gmra.mrb[36].mxu1 %v9212_v18 }
 0x5c7   :  { %8749 = vmatprep.mubr.bf16.mxu1 %v9213_v24 }
 0x5ce   :  { %8750 = vmatmul.mubr.bf16.gmra.mrb[40].mxu1 %v9214_v32 }
 0x5cf   :  { %8753 = vmatprep.mubr.bf16.mxu1 %v9215_v30 }
 0x5d6   :  { %8754 = vmatmul.mubr.bf16.gmra.mrb[44].mxu1 %v9216_v59 }
 0x5d7   :  { %8757 = vmatprep.mubr.bf16.mxu1 %v9217_v46 }
 0x5de   :  { %8758 = vmatmul.mubr.bf16.gmra.mrb[48].mxu1 %v9218_v31 }
 0x5df   :  { %8761 = vmatprep.mubr.bf16.mxu1 %v9219_v16 }
 0x5e6   :  { %8762 = vmatmul.mubr.bf16.gmra.mrb[52].mxu1 %v9220_v45 }
 0x5e7   :  { %8765 = vmatprep.mubr.bf16.mxu1 %v9221_v51 }
 0x5ee   :  { %8766 = vmatmul.mubr.bf16.gmra.mrb[56].mxu1 %v9222_v60 }
 0x5ef   :  { %8769 = vmatprep.mubr.bf16.mxu1 %v9223_v12 }
 0x5f6   :  { %8770 = vmatmul.mubr.bf16.gmra.mrb[60].mxu1 %v9224_v49 }
 0x5f7   :  { %8773 = vmatprep.mubr.bf16.mxu1 %v9225_v44 }
 0x5fe   :  { %8774 = vmatmul.mubr.bf16.gmra.mrb[64].mxu1 %v9226_v2 }
 0x5ff   :  { %8777 = vmatprep.mubr.bf16.mxu1 %v9227_v25 }
 0x606   :  { %8778 = vmatmul.mubr.bf16.gmra.mrb[68].mxu1 %v9228_v50 }
 0x607   :  { %8781 = vmatprep.mubr.bf16.mxu1 %v9229_v53 }
 0x60e   :  { %8782 = vmatmul.mubr.bf16.gmra.mrb[72].mxu1 %v9230_v35 }
 0x60f   :  { %8785 = vmatprep.mubr.bf16.mxu1 %v9231_v19 }
 0x616   :  { %8786 = vmatmul.mubr.bf16.gmra.mrb[76].mxu1 %v9232_v54 }
 0x617   :  { %8789 = vmatprep.mubr.bf16.mxu1 %v9233_v9 }
 0x61e   :  { %8790 = vmatmul.mubr.bf16.gmra.mrb[80].mxu1 %v9234_v36 }
 0x61f   :  { %8793 = vmatprep.mubr.bf16.mxu1 %v9235_v41 }
 0x626   :  { %8794 = vmatmul.mubr.bf16.gmra.mrb[84].mxu1 %v9236_v13 }
 0x627   :  { %8797 = vmatprep.mubr.bf16.mxu1 %v9237_v38 }
 0x62e   :  { %8798 = vmatmul.mubr.bf16.gmra.mrb[88].mxu1 %v9238_v42 }
 0x689   :  { %v13771_v40 = vpop.f32.mrb[28].mxu1 }
 0x68a   :  { %5990 = vadd.xlane.f32.xlu0 %v13771_v40  ;;  %v13774_v10 = vpop.f32.mrb[29].mxu1 }
 0x68b   :  { %v13776_v20 = vpop.f32.mrb[30].mxu1 }
 0x68c   :  { %5992 = vadd.xlane.f32.xlu1 %v13776_v20  ;;  %v13779_v1 = vpop.f32.mrb[31].mxu1 }
 0x68e   :  { %5986 = vadd.xlane.f32.xlu0 %v13774_v10 }
 0x690   :  { %5988 = vadd.xlane.f32.xlu1 %v13779_v1 }
 0x691   :  { %v13783_v48 = vpop.f32.mrb[32].mxu1 }
 0x692   :  { %5998 = vadd.xlane.f32.xlu0 %v13783_v48  ;;  %v13786_v15 = vpop.f32.mrb[33].mxu1 }
 0x693   :  { %v13788_v7 = vpop.f32.mrb[34].mxu1 }
 0x694   :  { %6000 = vadd.xlane.f32.xlu1 %v13788_v7  ;;  %v13791_v27 = vpop.f32.mrb[35].mxu1 }
 0x696   :  { %5994 = vadd.xlane.f32.xlu0 %v13786_v15 }
 0x698   :  { %5996 = vadd.xlane.f32.xlu1 %v13791_v27 }
 0x699   :  { %v13795_v63 = vpop.f32.mrb[36].mxu1 }
 0x69a   :  { %6006 = vadd.xlane.f32.xlu0 %v13795_v63  ;;  %v13798_v28 = vpop.f32.mrb[37].mxu1 }
 0x69b   :  { %v13800_v5 = vpop.f32.mrb[38].mxu1 }
 0x69c   :  { %6008 = vadd.xlane.f32.xlu1 %v13800_v5  ;;  %v13803_v39 = vpop.f32.mrb[39].mxu1 }
 0x69e   :  { %6002 = vadd.xlane.f32.xlu0 %v13798_v28 }
 0x6a0   :  { %6004 = vadd.xlane.f32.xlu1 %v13803_v39 }
 0x6a1   :  { %v13807_v21 = vpop.f32.mrb[40].mxu1 }
 0x6a2   :  { %6014 = vadd.xlane.f32.xlu0 %v13807_v21  ;;  %v13810_v26 = vpop.f32.mrb[41].mxu1 }
 0x6a3   :  { %v13812_v43 = vpop.f32.mrb[42].mxu1 }
 0x6a4   :  { %6016 = vadd.xlane.f32.xlu1 %v13812_v43  ;;  %v13815_v14 = vpop.f32.mrb[43].mxu1 }
 0x6a6   :  { %6010 = vadd.xlane.f32.xlu0 %v13810_v26 }
 0x6a8   :  { %6012 = vadd.xlane.f32.xlu1 %v13815_v14 }
 0x6a9   :  { %v13819_v37 = vpop.f32.mrb[44].mxu1 }
 0x6aa   :  { %6022 = vadd.xlane.f32.xlu0 %v13819_v37  ;;  %v13822_v6 = vpop.f32.mrb[45].mxu1 }
 0x6ab   :  { %v13824_v61 = vpop.f32.mrb[46].mxu1 }
 0x6ac   :  { %6024 = vadd.xlane.f32.xlu1 %v13824_v61  ;;  %v13827_v0 = vpop.f32.mrb[47].mxu1 }
 0x6ae   :  { %6018 = vadd.xlane.f32.xlu0 %v13822_v6 }
 0x6b0   :  { %6020 = vadd.xlane.f32.xlu1 %v13827_v0 }
 0x6b1   :  { %v13831_v23 = vpop.f32.mrb[48].mxu1 }
 0x6b2   :  { %6030 = vadd.xlane.f32.xlu0 %v13831_v23  ;;  %v13834_v4 = vpop.f32.mrb[49].mxu1 }
 0x6b3   :  { %v13836_v58 = vpop.f32.mrb[50].mxu1 }
 0x6b4   :  { %6032 = vadd.xlane.f32.xlu1 %v13836_v58  ;;  %v13839_v57 = vpop.f32.mrb[51].mxu1 }
 0x6b6   :  { %6026 = vadd.xlane.f32.xlu0 %v13834_v4 }
 0x6b8   :  { %6028 = vadd.xlane.f32.xlu1 %v13839_v57 }
 0x6b9   :  { %v13843_v3 = vpop.f32.mrb[52].mxu1 }
 0x6ba   :  { %6038 = vadd.xlane.f32.xlu0 %v13843_v3  ;;  %v13846_v34 = vpop.f32.mrb[53].mxu1 }
 0x6bb   :  { %v13848_v62 = vpop.f32.mrb[54].mxu1 }
 0x6bc   :  { %6040 = vadd.xlane.f32.xlu1 %v13848_v62  ;;  %v13851_v52 = vpop.f32.mrb[55].mxu1 }
 0x6be   :  { %6034 = vadd.xlane.f32.xlu0 %v13846_v34 }
 0x6c0   :  { %6036 = vadd.xlane.f32.xlu1 %v13851_v52 }
 0x6c1   :  { %v13855_v47 = vpop.f32.mrb[56].mxu1 }
 0x6c2   :  { %6046 = vadd.xlane.f32.xlu0 %v13855_v47  ;;  %v13858_v56 = vpop.f32.mrb[57].mxu1 }
 0x6c3   :  { %v13860_v29 = vpop.f32.mrb[58].mxu1 }
 0x6c4   :  { %6048 = vadd.xlane.f32.xlu1 %v13860_v29  ;;  %v13863_v8 = vpop.f32.mrb[59].mxu1 }
 0x6c6   :  { %6042 = vadd.xlane.f32.xlu0 %v13858_v56 }
 0x6c8   :  { %6044 = vadd.xlane.f32.xlu1 %v13863_v8 }
 0x6c9   :  { %v13867_v33 = vpop.f32.mrb[60].mxu1 }
 0x6ca   :  { %6054 = vadd.xlane.f32.xlu0 %v13867_v33  ;;  %v13870_v11 = vpop.f32.mrb[61].mxu1 }
 0x6cb   :  { %v13872_v22 = vpop.f32.mrb[62].mxu1 }
 0x6cc   :  { %6056 = vadd.xlane.f32.xlu1 %v13872_v22  ;;  %v13875_v55 = vpop.f32.mrb[63].mxu1 }
 0x6ce   :  { %6050 = vadd.xlane.f32.xlu0 %v13870_v11 }
 0x6d0   :  { %6052 = vadd.xlane.f32.xlu1 %v13875_v55 }
 0x6d1   :  { %v13879_v17 = vpop.f32.mrb[64].mxu1 }
 0x6d2   :  { %6062 = vadd.xlane.f32.xlu0 %v13879_v17  ;;  %v13882_v18 = vpop.f32.mrb[65].mxu1 }
 0x6d3   :  { %v13884_v24 = vpop.f32.mrb[66].mxu1 }
 0x6d4   :  { %6064 = vadd.xlane.f32.xlu1 %v13884_v24  ;;  %v13887_v32 = vpop.f32.mrb[67].mxu1 }
 0x6d6   :  { %6058 = vadd.xlane.f32.xlu0 %v13882_v18 }
 0x6d8   :  { %6060 = vadd.xlane.f32.xlu1 %v13887_v32 }
 0x6d9   :  { %v13891_v30 = vpop.f32.mrb[68].mxu1 }
 0x6da   :  { %6070 = vadd.xlane.f32.xlu0 %v13891_v30  ;;  %v13894_v59 = vpop.f32.mrb[69].mxu1 }
 0x6db   :  { %v13896_v46 = vpop.f32.mrb[70].mxu1 }
 0x6dc   :  { %6072 = vadd.xlane.f32.xlu1 %v13896_v46  ;;  %v13899_v31 = vpop.f32.mrb[71].mxu1 }
 0x6de   :  { %6066 = vadd.xlane.f32.xlu0 %v13894_v59 }
 0x6e0   :  { %6068 = vadd.xlane.f32.xlu1 %v13899_v31 }
 0x6e1   :  { %v13903_v16 = vpop.f32.mrb[72].mxu1 }
 0x6e2   :  { %6078 = vadd.xlane.f32.xlu0 %v13903_v16  ;;  %v13906_v45 = vpop.f32.mrb[73].mxu1 }
 0x6e3   :  { %v13908_v51 = vpop.f32.mrb[74].mxu1 }
 0x6e4   :  { %6080 = vadd.xlane.f32.xlu1 %v13908_v51  ;;  %v13911_v60 = vpop.f32.mrb[75].mxu1 }
 0x6e6   :  { %6074 = vadd.xlane.f32.xlu0 %v13906_v45 }
 0x6e8   :  { %6076 = vadd.xlane.f32.xlu1 %v13911_v60 }
 0x6e9   :  { %v13915_v12 = vpop.f32.mrb[76].mxu1 }
 0x6ea   :  { %6086 = vadd.xlane.f32.xlu0 %v13915_v12  ;;  %v13918_v49 = vpop.f32.mrb[77].mxu1 }
 0x6eb   :  { %v13920_v44 = vpop.f32.mrb[78].mxu1 }
 0x6ec   :  { %16426 = vst [vmem:[#allocation55_spill] sm:$0xff] %v13920_v44  ;;  %6088 = vadd.xlane.f32.xlu1 %v13920_v44  ;;  %v13923_v2 = vpop.f32.mrb[79].mxu1 }
 0x6ee   :  { %6082 = vadd.xlane.f32.xlu0 %v13918_v49 }
 0x6f0   :  { %6084 = vadd.xlane.f32.xlu1 %v13923_v2 }
 0x6f1   :  { %v13927_v25 = vpop.f32.mrb[80].mxu1 }
 0x6f2   :  { %16427 = vst [vmem:[#allocation102_spill] sm:$0xff] %v13927_v25  ;;  %6094 = vadd.xlane.f32.xlu0 %v13927_v25  ;;  %v13930_v50 = vpop.f32.mrb[81].mxu1 }
 0x6f3   :  { %16428 = vst [vmem:[#allocation130_spill] sm:$0xff] %v13930_v50  ;;  %v13932_v53 = vpop.f32.mrb[82].mxu1 }
 0x6f4   :  { %16429 = vst [vmem:[#allocation101_spill] sm:$0xff] %v13932_v53  ;;  %6096 = vadd.xlane.f32.xlu1 %v13932_v53  ;;  %v13935_v35 = vpop.f32.mrb[83].mxu1 }
 0x6f5   :  { %16430 = vst [vmem:[#allocation56_spill] sm:$0xff] %v13935_v35 }
 0x6f6   :  { %6090 = vadd.xlane.f32.xlu0 %v13930_v50 }
 0x6f8   :  { %6092 = vadd.xlane.f32.xlu1 %v13935_v35 }
 0x6f9   :  { %v13939_v19 = vpop.f32.mrb[84].mxu1 }
 0x6fa   :  { %16431 = vst [vmem:[#allocation104_spill] sm:$0xff] %v13939_v19  ;;  %6102 = vadd.xlane.f32.xlu0 %v13939_v19  ;;  %v13942_v54 = vpop.f32.mrb[85].mxu1  ;;  %v9239_v19 = vld [vmem:[#allocation9] sm:$0xff]  }
 0x6fb   :  { %16432 = vst [vmem:[#allocation211_spill] sm:$0xff] %v13942_v54  ;;  %v13944_v9 = vpop.f32.mrb[86].mxu1  ;;  %8801 = vmatprep.subr.bf16.mxu0 %v9239_v19 }
 0x6fc   :  { %16433 = vst [vmem:[#allocation57_spill] sm:$0xff] %v13944_v9  ;;  %6104 = vadd.xlane.f32.xlu1 %v13944_v9  ;;  %v13947_v36 = vpop.f32.mrb[87].mxu1  ;;  %8802 = vmatpush3.bf16.msra.mxu0 %v9239_v19 }
 0x6fd   :  { %16434 = vst [vmem:[#allocation103_spill] sm:$0xff] %v13947_v36 }
 0x6fe   :  { %6098 = vadd.xlane.f32.xlu0 %v13942_v54 }
 0x700   :  { %6100 = vadd.xlane.f32.xlu1 %v13947_v36 }
 0x701   :  { %v13951_v41 = vpop.f32.mrb[88].mxu1 }
 0x702   :  { %16435 = vst [vmem:[#allocation59_spill] sm:$0xff] %v13951_v41  ;;  %v13953_v13 = vpop.f32.mrb[89].mxu1 }
 0x703   :  { %16436 = vst [vmem:[#allocation58_spill] sm:$0xff] %v13953_v13  ;;  %6106 = vadd.xlane.f32.xlu0 %v13953_v13  ;;  %v13956_v38 = vpop.f32.mrb[90].mxu1 }
 0x704   :  { %16437 = vst [vmem:[#allocation239_spill] sm:$0xff] %v13956_v38  ;;  %v13958_v42 = vpop.f32.mrb[91].mxu1 }
 0x705   :  { %16438 = vst [vmem:[#allocation218_spill] sm:$0xff] %v13958_v42  ;;  %6108 = vadd.xlane.f32.xlu1 %v13958_v42 }
 0x717   :  { %v5991_v9 = vpop.xlane.xlu0 %5990 }
 0x718   :  { %v13961_v53 = vmul.f32 0.03125, %v5991_v9  ;;  %v9240_v9 = vld [vmem:[#allocation9 + $0x8] sm:$0xff]  }
 0x719   :  { %v5993_v54 = vpop.xlane.xlu1 %5992  ;;  %8803 = vmatprep.subr.bf16.mxu0 %v9240_v9 }
 0x71a   :  { %v13963_v36 = vmul.f32 0.03125, %v5993_v54  ;;  %v13967_v35 = vsub.f32 %v13771_v40, %v13961_v53  ;;  %8804 = vmatpush3.bf16.msra.mxu0 %v9240_v9 }
 0x71b   :  { %v5987_v13 = vpop.xlane.xlu0 %5986 }
 0x71c   :  { %16439 = vst [vmem:[#allocation60_spill] sm:$0xff] %v13963_v36  ;;  %16440 = vst [vmem:[#allocation174_spill] sm:$0xff] %v13967_v35  ;;  %v13969_v25 = vmul.f32 0.03125, %v5987_v13  ;;  %v6244_v50 = vmul.f32 %v13967_v35, %v13967_v35  ;;  %v13975_v42 = vsub.f32 %v13776_v20, %v13963_v36 }
 0x71d   :  { %v5989_v44 = vpop.xlane.xlu1 %5988 }
 0x71e   :  { %16441 = vst [vmem:[#allocation214_spill] sm:$0xff] %v13975_v42  ;;  %v13977_v19 = vmul.f32 0.03125, %v5989_v44  ;;  %6310 = vadd.xlane.f32.xlu0 %v6244_v50  ;;  %v6245_v54 = vmul.f32 %v13975_v42, %v13975_v42  ;;  %v13983_v40 = vsub.f32 %v13774_v10, %v13969_v25 }
 0x71f   :  { %v5999_v13 = vpop.xlane.xlu0 %5998 }
 0x720   :  { %16442 = vst [vmem:[#allocation61_spill] sm:$0xff] %v13983_v40  ;;  %v13985_v35 = vmul.f32 0.03125, %v5999_v13  ;;  %6312 = vadd.xlane.f32.xlu1 %v6245_v54  ;;  %v6242_v20 = vmul.f32 %v13983_v40, %v13983_v40  ;;  %v13991_v44 = vsub.f32 %v13779_v1, %v13977_v19 }
 0x721   :  { %v6001_v50 = vpop.xlane.xlu1 %6000 }
 0x722   :  { %16443 = vst [vmem:[#allocation107_spill] sm:$0xff] %v13991_v44  ;;  %v13993_v36 = vmul.f32 0.03125, %v6001_v50  ;;  %6306 = vadd.xlane.f32.xlu0 %v6242_v20  ;;  %v6243_v10 = vmul.f32 %v13991_v44, %v13991_v44  ;;  %v13999_v9 = vsub.f32 %v13783_v48, %v13985_v35 }
 0x723   :  { %v5995_v13 = vpop.xlane.xlu0 %5994 }
 0x724   :  { %16444 = vst [vmem:[#allocation219_spill] sm:$0xff] %v13999_v9  ;;  %v14001_v54 = vmul.f32 0.03125, %v5995_v13  ;;  %6308 = vadd.xlane.f32.xlu1 %v6243_v10  ;;  %v6248_v40 = vmul.f32 %v13999_v9, %v13999_v9  ;;  %v14007_v1 = vsub.f32 %v13788_v7, %v13993_v36 }
 0x725   :  { %v5997_v50 = vpop.xlane.xlu1 %5996 }
 0x726   :  { %16445 = vst [vmem:[#allocation62_spill] sm:$0xff] %v14007_v1  ;;  %v14009_v20 = vmul.f32 0.03125, %v5997_v50  ;;  %6318 = vadd.xlane.f32.xlu0 %v6248_v40  ;;  %v6249_v44 = vmul.f32 %v14007_v1, %v14007_v1  ;;  %v14015_v48 = vsub.f32 %v13786_v15, %v14001_v54 }
 0x727   :  { %v6007_v13 = vpop.xlane.xlu0 %6006 }
 0x728   :  { %16446 = vst [vmem:[#allocation178_spill] sm:$0xff] %v14015_v48  ;;  %v14017_v10 = vmul.f32 0.03125, %v6007_v13  ;;  %6320 = vadd.xlane.f32.xlu1 %v6249_v44  ;;  %v6246_v9 = vmul.f32 %v14015_v48, %v14015_v48  ;;  %v14023_v7 = vsub.f32 %v13791_v27, %v14009_v20 }
 0x729   :  { %v6009_v50 = vpop.xlane.xlu1 %6008 }
 0x72a   :  { %16447 = vst [vmem:[#allocation240_spill] sm:$0xff] %v14023_v7  ;;  %v14025_v40 = vmul.f32 0.03125, %v6009_v50  ;;  %6314 = vadd.xlane.f32.xlu0 %v6246_v9  ;;  %v6247_v1 = vmul.f32 %v14023_v7, %v14023_v7  ;;  %v14031_v15 = vsub.f32 %v13795_v63, %v14017_v10 }
 0x72b   :  { %v6003_v13 = vpop.xlane.xlu0 %6002 }
 0x72c   :  { %16448 = vst [vmem:[#allocation215_spill] sm:$0xff] %v14031_v15  ;;  %v14033_v44 = vmul.f32 0.03125, %v6003_v13  ;;  %6316 = vadd.xlane.f32.xlu1 %v6247_v1  ;;  %v6252_v48 = vmul.f32 %v14031_v15, %v14031_v15  ;;  %v14039_v27 = vsub.f32 %v13800_v5, %v14025_v40 }
 0x72d   :  { %v6005_v50 = vpop.xlane.xlu1 %6004 }
 0x72e   :  { %16449 = vst [vmem:[#allocation241_spill] sm:$0xff] %v14039_v27  ;;  %v14041_v9 = vmul.f32 0.03125, %v6005_v50  ;;  %6326 = vadd.xlane.f32.xlu0 %v6252_v48  ;;  %v6253_v7 = vmul.f32 %v14039_v27, %v14039_v27  ;;  %v14047_v63 = vsub.f32 %v13798_v28, %v14033_v44 }
 0x72f   :  { %v6015_v13 = vpop.xlane.xlu0 %6014 }
 0x730   :  { %16450 = vst [vmem:[#allocation182_spill] sm:$0xff] %v14047_v63  ;;  %v14049_v1 = vmul.f32 0.03125, %v6015_v13  ;;  %6328 = vadd.xlane.f32.xlu1 %v6253_v7  ;;  %v6250_v15 = vmul.f32 %v14047_v63, %v14047_v63  ;;  %v14055_v5 = vsub.f32 %v13803_v39, %v14041_v9 }
 0x731   :  { %v6017_v50 = vpop.xlane.xlu1 %6016 }
 0x732   :  { %16451 = vst [vmem:[#allocation123_spill] sm:$0xff] %v14055_v5  ;;  %v14057_v48 = vmul.f32 0.03125, %v6017_v50  ;;  %6322 = vadd.xlane.f32.xlu0 %v6250_v15  ;;  %v6251_v27 = vmul.f32 %v14055_v5, %v14055_v5  ;;  %v14063_v28 = vsub.f32 %v13807_v21, %v14049_v1 }
 0x733   :  { %v6011_v13 = vpop.xlane.xlu0 %6010 }
 0x734   :  { %16452 = vst [vmem:[#allocation168_spill] sm:$0xff] %v14063_v28  ;;  %v14065_v7 = vmul.f32 0.03125, %v6011_v13  ;;  %6324 = vadd.xlane.f32.xlu1 %v6251_v27  ;;  %v6256_v63 = vmul.f32 %v14063_v28, %v14063_v28  ;;  %v14071_v39 = vsub.f32 %v13812_v43, %v14057_v48 }
 0x735   :  { %v6013_v50 = vpop.xlane.xlu1 %6012 }
 0x736   :  { %16453 = vst [vmem:[#allocation185_spill] sm:$0xff] %v14071_v39  ;;  %v14073_v15 = vmul.f32 0.03125, %v6013_v50  ;;  %6334 = vadd.xlane.f32.xlu0 %v6256_v63  ;;  %v6257_v5 = vmul.f32 %v14071_v39, %v14071_v39  ;;  %v14079_v21 = vsub.f32 %v13810_v26, %v14065_v7 }
 0x737   :  { %v6023_v13 = vpop.xlane.xlu0 %6022 }
 0x738   :  { %16454 = vst [vmem:[#allocation222_spill] sm:$0xff] %v14079_v21  ;;  %v14081_v27 = vmul.f32 0.03125, %v6023_v13  ;;  %6336 = vadd.xlane.f32.xlu1 %v6257_v5  ;;  %v6254_v28 = vmul.f32 %v14079_v21, %v14079_v21  ;;  %v14087_v43 = vsub.f32 %v13815_v14, %v14073_v15 }
 0x739   :  { %v6025_v50 = vpop.xlane.xlu1 %6024 }
 0x73a   :  { %16455 = vst [vmem:[#allocation65_spill] sm:$0xff] %v14087_v43  ;;  %v14089_v63 = vmul.f32 0.03125, %v6025_v50  ;;  %6330 = vadd.xlane.f32.xlu0 %v6254_v28  ;;  %v6255_v39 = vmul.f32 %v14087_v43, %v14087_v43  ;;  %v14095_v26 = vsub.f32 %v13819_v37, %v14081_v27 }
 0x73b   :  { %v6019_v13 = vpop.xlane.xlu0 %6018 }
 0x73c   :  { %16456 = vst [vmem:[#allocation63_spill] sm:$0xff] %v14095_v26  ;;  %v14097_v5 = vmul.f32 0.03125, %v6019_v13  ;;  %6332 = vadd.xlane.f32.xlu1 %v6255_v39  ;;  %v6260_v21 = vmul.f32 %v14095_v26, %v14095_v26  ;;  %v14103_v14 = vsub.f32 %v13824_v61, %v14089_v63 }
 0x73d   :  { %v6021_v50 = vpop.xlane.xlu1 %6020 }
 0x73e   :  { %16457 = vst [vmem:[#allocation122_spill] sm:$0xff] %v14103_v14  ;;  %v14105_v28 = vmul.f32 0.03125, %v6021_v50  ;;  %6342 = vadd.xlane.f32.xlu0 %v6260_v21  ;;  %v6261_v43 = vmul.f32 %v14103_v14, %v14103_v14  ;;  %v14111_v37 = vsub.f32 %v13822_v6, %v14097_v5 }
 0x73f   :  { %v6031_v13 = vpop.xlane.xlu0 %6030 }
 0x740   :  { %16458 = vst [vmem:[#allocation169_spill] sm:$0xff] %v14111_v37  ;;  %v14113_v39 = vmul.f32 0.03125, %v6031_v13  ;;  %6344 = vadd.xlane.f32.xlu1 %v6261_v43  ;;  %v6258_v26 = vmul.f32 %v14111_v37, %v14111_v37  ;;  %v14119_v61 = vsub.f32 %v13827_v0, %v14105_v28  ;;  %v9241_v43 = vld [vmem:[#allocation9 + $0x10] sm:$0xff]  }
 0x741   :  { %v6033_v50 = vpop.xlane.xlu1 %6032  ;;  %8805 = vmatprep.subr.bf16.mxu0 %v9241_v43 }
 0x742   :  { %16459 = vst [vmem:[#allocation220_spill] sm:$0xff] %v14119_v61  ;;  %v14121_v21 = vmul.f32 0.03125, %v6033_v50  ;;  %6338 = vadd.xlane.f32.xlu0 %v6258_v26  ;;  %v6259_v14 = vmul.f32 %v14119_v61, %v14119_v61  ;;  %v14127_v6 = vsub.f32 %v13831_v23, %v14113_v39  ;;  %v9242_v26 = vld [vmem:[#allocation9 + $0x18] sm:$0xff]   ;;  %8806 = vmatpush3.bf16.msra.mxu0 %v9241_v43 }
 0x743   :  { %v6027_v13 = vpop.xlane.xlu0 %6026  ;;  %8807 = vmatprep.subr.bf16.mxu0 %v9242_v26 }
 0x744   :  { %16460 = vst [vmem:[#allocation224_spill] sm:$0xff] %v14121_v21  ;;  %16461 = vst [vmem:[#allocation125_spill] sm:$0xff] %v14127_v6  ;;  %v14129_v42 = vmul.f32 0.03125, %v6027_v13  ;;  %6340 = vadd.xlane.f32.xlu1 %v6259_v14  ;;  %v6264_v0 = vmul.f32 %v14127_v6, %v14127_v6  ;;  %v14135_v50 = vsub.f32 %v13836_v58, %v14121_v21 }
 0x745   :  { %v6029_v37 = vpop.xlane.xlu1 %6028 }
 0x746   :  { %16462 = vst [vmem:[#allocation223_spill] sm:$0xff] %v14129_v42  ;;  %16463 = vst [vmem:[#allocation66_spill] sm:$0xff] %v14135_v50  ;;  %v14137_v61 = vmul.f32 0.03125, %v6029_v37  ;;  %6350 = vadd.xlane.f32.xlu0 %v6264_v0  ;;  %v6265_v23 = vmul.f32 %v14135_v50, %v14135_v50  ;;  %v14143_v13 = vsub.f32 %v13834_v4, %v14129_v42  ;;  %v9243_v37 = vld [vmem:[#allocation9 + $0x20] sm:$0xff]   ;;  %8808 = vmatpush3.bf16.msra.mxu0 %v9242_v26 }
 0x747   :  { %v6039_v14 = vpop.xlane.xlu0 %6038  ;;  %8809 = vmatprep.subr.bf16.mxu0 %v9243_v37 }
 0x748   :  { %16464 = vst [vmem:[#allocation68_spill] sm:$0xff] %v14143_v13  ;;  %6352 = vadd.xlane.f32.xlu1 %v6265_v23  ;;  %v6262_v58 = vmul.f32 %v14143_v13, %v14143_v13  ;;  %v14149_v6 = vsub.f32 %v13839_v57, %v14137_v61  ;;  %v14153_v43 = vmul.f32 0.03125, %v6039_v14  ;;  %v9244_v23 = vld [vmem:[#allocation9 + $0x28] sm:$0xff]  }
 0x749   :  { %v6041_v0 = vpop.xlane.xlu1 %6040 }
 0x74a   :  { %16465 = vst [vmem:[#allocation124_spill] sm:$0xff] %v14149_v6  ;;  %6346 = vadd.xlane.f32.xlu0 %v6262_v58  ;;  %v6263_v50 = vmul.f32 %v14149_v6, %v14149_v6  ;;  %v14157_v21 = vmul.f32 0.03125, %v6041_v0  ;;  %8810 = vmatpush3.bf16.msra.mxu0 %v9243_v37 }
 0x74b   :  { %v6035_v4 = vpop.xlane.xlu0 %6034  ;;  %8811 = vmatprep.subr.bf16.mxu0 %v9244_v23 }
 0x74c   :  { %v14155_v42 = vmul.f32 0.03125, %v6035_v4  ;;  %6348 = vadd.xlane.f32.xlu1 %v6263_v50  ;;  %v9245_v4 = vld [vmem:[#allocation9 + $0x30] sm:$0xff]   ;;  %v14181_v37 = vsub.f32 %v13848_v62, %v14157_v21 }
 0x74d   :  { %v6037_v13 = vpop.xlane.xlu1 %6036 }
 0x74e   :  { %v14159_v57 = vmul.f32 0.03125, %v6037_v13  ;;  %6110 = vadd.xlane.f32.xlu0 %v13951_v41  ;;  %v14164_v58 = vsub.f32 %v13846_v34, %v14155_v42  ;;  %v14175_v13 = vsub.f32 %v13843_v3, %v14153_v43  ;;  %16469 = vst [vmem:[#allocation242_spill] sm:$0xff] %v14181_v37  ;;  %8812 = vmatpush3.bf16.msra.mxu0 %v9244_v23 }
 0x74f   :  { %v6047_v26 = vpop.xlane.xlu0 %6046  ;;  %8813 = vmatprep.subr.bf16.mxu0 %v9245_v4  ;;  %v6269_v62 = vmul.f32 %v14181_v37, %v14181_v37 }
 0x750   :  { %16466 = vst [vmem:[#allocation128_spill] sm:$0xff] %v14164_v58  ;;  %6112 = vadd.xlane.f32.xlu1 %v13956_v38  ;;  %v6266_v50 = vmul.f32 %v14164_v58, %v14164_v58  ;;  %v14171_v14 = vsub.f32 %v13851_v52, %v14159_v57  ;;  %16468 = vst [vmem:[#allocation86_spill] sm:$0xff] %v14175_v13  ;;  %v14183_v6 = vmul.f32 0.03125, %v6047_v26  ;;  %v9246_v38 = vld [vmem:[#allocation9 + $0x38] sm:$0xff]  }
 0x751   :  { %v6049_v0 = vpop.xlane.xlu1 %6048  ;;  %v6268_v3 = vmul.f32 %v14175_v13, %v14175_v13  ;;  %v16502_v13 = vld [vmem:[#allocation130_spill] sm:$0xff] }
 0x752   :  { %16467 = vst [vmem:[#allocation171_spill] sm:$0xff] %v14171_v14  ;;  %6354 = vadd.xlane.f32.xlu0 %v6266_v50  ;;  %v6267_v34 = vmul.f32 %v14171_v14, %v14171_v14  ;;  %v14189_v41 = vmul.f32 0.03125, %v6049_v0  ;;  %8814 = vmatpush3.bf16.msra.mxu0 %v9245_v4 }
 0x753   :  { %v6043_v58 = vpop.xlane.xlu0 %6042  ;;  %8815 = vmatprep.subr.bf16.mxu0 %v9246_v38 }
 0x754   :  { %v14185_v52 = vmul.f32 0.03125, %v6043_v58  ;;  %6356 = vadd.xlane.f32.xlu1 %v6267_v34  ;;  %v14207_v34 = vsub.f32 %v13855_v47, %v14183_v6  ;;  %v14213_v4 = vsub.f32 %v13860_v29, %v14189_v41 }
 0x755   :  { %v6045_v50 = vpop.xlane.xlu1 %6044 }
 0x756   :  { %v14191_v14 = vmul.f32 0.03125, %v6045_v50  ;;  %6358 = vadd.xlane.f32.xlu0 %v6268_v3  ;;  %v14197_v23 = vsub.f32 %v13858_v56, %v14185_v52  ;;  %16472 = vst [vmem:[#allocation127_spill] sm:$0xff] %v14207_v34  ;;  %16473 = vst [vmem:[#allocation243_spill] sm:$0xff] %v14213_v4  ;;  %8816 = vmatpush3.bf16.msra.mxu0 %v9246_v38  ;;  %v6272_v47 = vmul.f32 %v14207_v34, %v14207_v34 }
 0x757   :  { %v6055_v58 = vpop.xlane.xlu0 %6054  ;;  %v6273_v29 = vmul.f32 %v14213_v4, %v14213_v4 }
 0x758   :  { %16470 = vst [vmem:[#allocation67_spill] sm:$0xff] %v14197_v23  ;;  %6360 = vadd.xlane.f32.xlu1 %v6269_v62  ;;  %v6270_v26 = vmul.f32 %v14197_v23, %v14197_v23  ;;  %v14203_v0 = vsub.f32 %v13863_v8, %v14191_v14  ;;  %v14215_v62 = vmul.f32 0.03125, %v6055_v58 }
 0x759   :  { %v6057_v3 = vpop.xlane.xlu1 %6056 }
 0x75a   :  { %16471 = vst [vmem:[#allocation244_spill] sm:$0xff] %v14203_v0  ;;  %6362 = vadd.xlane.f32.xlu0 %v6270_v26  ;;  %v6271_v56 = vmul.f32 %v14203_v0, %v14203_v0  ;;  %v14221_v37 = vmul.f32 0.03125, %v6057_v3  ;;  %v14239_v3 = vsub.f32 %v13867_v33, %v14215_v62 }
 0x75b   :  { %v6051_v50 = vpop.xlane.xlu0 %6050 }
 0x75c   :  { %v14217_v23 = vmul.f32 0.03125, %v6051_v50  ;;  %6364 = vadd.xlane.f32.xlu1 %v6271_v56  ;;  %16476 = vst [vmem:[#allocation227_spill] sm:$0xff] %v14239_v3 }
 0x75d   :  { %v6053_v8 = vpop.xlane.xlu1 %6052 }
 0x75e   :  { %v14223_v26 = vmul.f32 0.03125, %v6053_v8  ;;  %6366 = vadd.xlane.f32.xlu0 %v6272_v47  ;;  %v14229_v38 = vsub.f32 %v13870_v11, %v14217_v23  ;;  %v14245_v11 = vsub.f32 %v13872_v22, %v14221_v37 }
 0x75f   :  { %v6063_v58 = vpop.xlane.xlu0 %6062 }
 0x760   :  { %16474 = vst [vmem:[#allocation225_spill] sm:$0xff] %v14229_v38  ;;  %6368 = vadd.xlane.f32.xlu1 %v6273_v29  ;;  %v6274_v56 = vmul.f32 %v14229_v38, %v14229_v38  ;;  %v14235_v50 = vsub.f32 %v13875_v55, %v14223_v26  ;;  %16477 = vst [vmem:[#allocation180_spill] sm:$0xff] %v14245_v11  ;;  %v14247_v4 = vmul.f32 0.03125, %v6063_v58 }
 0x761   :  { %v6065_v47 = vpop.xlane.xlu1 %6064  ;;  %v6276_v55 = vmul.f32 %v14239_v3, %v14239_v3  ;;  %v6277_v22 = vmul.f32 %v14245_v11, %v14245_v11 }
 0x762   :  { %16475 = vst [vmem:[#allocation175_spill] sm:$0xff] %v14235_v50  ;;  %6370 = vadd.xlane.f32.xlu0 %v6274_v56  ;;  %v6275_v8 = vmul.f32 %v14235_v50, %v14235_v50  ;;  %v14253_v34 = vmul.f32 0.03125, %v6065_v47 }
 0x763   :  { %v6059_v29 = vpop.xlane.xlu0 %6058 }
 0x764   :  { %v14249_v38 = vmul.f32 0.03125, %v6059_v29  ;;  %6372 = vadd.xlane.f32.xlu1 %v6275_v8  ;;  %v14271_v29 = vsub.f32 %v13879_v17, %v14247_v4 }
 0x765   :  { %v6061_v33 = vpop.xlane.xlu1 %6060 }
 0x766   :  { %v14257_v56 = vsub.f32 %v13882_v18, %v14249_v38  ;;  %v14259_v50 = vmul.f32 0.03125, %v6061_v33  ;;  %6374 = vadd.xlane.f32.xlu0 %v6276_v55  ;;  %16480 = vst [vmem:[#allocation173_spill] sm:$0xff] %v14271_v29  ;;  %v14277_v33 = vsub.f32 %v13884_v24, %v14253_v34 }
 0x767   :  { %v6071_v58 = vpop.xlane.xlu0 %6070 }
 0x768   :  { %16478 = vst [vmem:[#allocation140_spill] sm:$0xff] %v14257_v56  ;;  %v14265_v8 = vsub.f32 %v13887_v32, %v14259_v50  ;;  %6376 = vadd.xlane.f32.xlu1 %v6277_v22  ;;  %v6278_v47 = vmul.f32 %v14257_v56, %v14257_v56  ;;  %16481 = vst [vmem:[#allocation176_spill] sm:$0xff] %v14277_v33  ;;  %v14279_v32 = vmul.f32 0.03125, %v6071_v58 }
 0x769   :  { %v6073_v18 = vpop.xlane.xlu1 %6072  ;;  %v6280_v56 = vmul.f32 %v14271_v29, %v14271_v29  ;;  %v6281_v24 = vmul.f32 %v14277_v33, %v14277_v33 }
 0x76a   :  { %16479 = vst [vmem:[#allocation226_spill] sm:$0xff] %v14265_v8  ;;  %6378 = vadd.xlane.f32.xlu0 %v6278_v47  ;;  %v6279_v55 = vmul.f32 %v14265_v8, %v14265_v8  ;;  %v14285_v3 = vmul.f32 0.03125, %v6073_v18 }
 0x76b   :  { %v6067_v11 = vpop.xlane.xlu0 %6066 }
 0x76c   :  { %v14281_v22 = vmul.f32 0.03125, %v6067_v11  ;;  %6380 = vadd.xlane.f32.xlu1 %v6279_v55  ;;  %v14297_v11 = vsub.f32 %v13891_v30, %v14279_v32 }
 0x76d   :  { %v6069_v17 = vpop.xlane.xlu1 %6068 }
 0x76e   :  { %v14289_v47 = vsub.f32 %v13894_v59, %v14281_v22  ;;  %v14291_v8 = vmul.f32 0.03125, %v6069_v17  ;;  %6382 = vadd.xlane.f32.xlu0 %v6280_v56  ;;  %16483 = vst [vmem:[#allocation142_spill] sm:$0xff] %v14297_v11  ;;  %v14307_v56 = vsub.f32 %v13896_v46, %v14285_v3 }
 0x76f   :  { %v6079_v58 = vpop.xlane.xlu0 %6078 }
 0x770   :  { %16482 = vst [vmem:[#allocation141_spill] sm:$0xff] %v14289_v47  ;;  %v14301_v55 = vsub.f32 %v13899_v31, %v14291_v8  ;;  %6384 = vadd.xlane.f32.xlu1 %v6281_v24  ;;  %v6282_v59 = vmul.f32 %v14289_v47, %v14289_v47  ;;  %16485 = vst [vmem:[#allocation183_spill] sm:$0xff] %v14307_v56  ;;  %v14311_v30 = vmul.f32 0.03125, %v6079_v58 }
 0x771   :  { %v6081_v18 = vpop.xlane.xlu1 %6080  ;;  %v6284_v31 = vmul.f32 %v14297_v11, %v14297_v11  ;;  %v6285_v58 = vmul.f32 %v14307_v56, %v14307_v56 }
 0x772   :  { %16484 = vst [vmem:[#allocation159_spill] sm:$0xff] %v14301_v55  ;;  %6386 = vadd.xlane.f32.xlu0 %v6282_v59  ;;  %v6283_v17 = vmul.f32 %v14301_v55, %v14301_v55  ;;  %v14317_v47 = vmul.f32 0.03125, %v6081_v18 }
 0x773   :  { %v6075_v33 = vpop.xlane.xlu0 %6074 }
 0x774   :  { %v14313_v29 = vmul.f32 0.03125, %v6075_v33  ;;  %6388 = vadd.xlane.f32.xlu1 %v6283_v17  ;;  %v14329_v33 = vsub.f32 %v13903_v16, %v14311_v30 }
 0x775   :  { %v6077_v24 = vpop.xlane.xlu1 %6076 }
 0x776   :  { %v14321_v46 = vsub.f32 %v13906_v45, %v14313_v29  ;;  %v14323_v59 = vmul.f32 0.03125, %v6077_v24  ;;  %6390 = vadd.xlane.f32.xlu0 %v6284_v31  ;;  %16487 = vst [vmem:[#allocation188_spill] sm:$0xff] %v14329_v33  ;;  %v14339_v31 = vsub.f32 %v13908_v51, %v14317_v47 }
 0x777   :  { %v6087_v55 = vpop.xlane.xlu0 %6086 }
 0x778   :  { %16486 = vst [vmem:[#allocation228_spill] sm:$0xff] %v14321_v46  ;;  %v14333_v17 = vsub.f32 %v13911_v60, %v14323_v59  ;;  %6392 = vadd.xlane.f32.xlu1 %v6285_v58  ;;  %v6286_v45 = vmul.f32 %v14321_v46, %v14321_v46  ;;  %16489 = vst [vmem:[#allocation179_spill] sm:$0xff] %v14339_v31  ;;  %v14343_v16 = vmul.f32 0.03125, %v6087_v55 }
 0x779   :  { %v6089_v18 = vpop.xlane.xlu1 %6088  ;;  %v6288_v60 = vmul.f32 %v14329_v33, %v14329_v33  ;;  %v6289_v55 = vmul.f32 %v14339_v31, %v14339_v31 }
 0x77a   :  { %16488 = vst [vmem:[#allocation230_spill] sm:$0xff] %v14333_v17  ;;  %6394 = vadd.xlane.f32.xlu0 %v6286_v45  ;;  %v6287_v24 = vmul.f32 %v14333_v17, %v14333_v17  ;;  %16490 = vst [vmem:[#allocation184_spill] sm:$0xff] %v14343_v16  ;;  %v14349_v46 = vmul.f32 0.03125, %v6089_v18 }
 0x77b   :  { %v6083_v56 = vpop.xlane.xlu0 %6082 }
 0x77c   :  { %v14345_v11 = vmul.f32 0.03125, %v6083_v56  ;;  %6396 = vadd.xlane.f32.xlu1 %v6287_v24  ;;  %16492 = vst [vmem:[#allocation192_spill] sm:$0xff] %v14349_v46  ;;  %v14361_v56 = vsub.f32 %v13915_v12, %v14343_v16  ;;  %v6445_v16 = vmul.f32 96.0, %v14025_v40 }
 0x77d   :  { %v6085_v58 = vpop.xlane.xlu1 %6084 }
 0x77e   :  { %16491 = vst [vmem:[#allocation90_spill] sm:$0xff] %v14345_v11  ;;  %v14353_v51 = vsub.f32 %v13918_v49, %v14345_v11  ;;  %v14355_v45 = vmul.f32 0.03125, %v6085_v58  ;;  %6398 = vadd.xlane.f32.xlu0 %v6288_v60  ;;  %16495 = vst [vmem:[#allocation189_spill] sm:$0xff] %v14361_v56  ;;  %v16497_v58 = vld [vmem:[#allocation55_spill] sm:$0xff] }
 0x77f   :  { %v6095_v17 = vpop.xlane.xlu0 %6094  ;;  %v14371_v60 = vsub.f32 %v16497_v58, %v14349_v46 }
 0x780   :  { %16493 = vst [vmem:[#allocation143_spill] sm:$0xff] %v14353_v51  ;;  %16494 = vst [vmem:[#allocation49_spill] sm:$0xff] %v14355_v45  ;;  %v14365_v24 = vsub.f32 %v13923_v2, %v14355_v45  ;;  %6400 = vadd.xlane.f32.xlu1 %v6289_v55  ;;  %v6290_v49 = vmul.f32 %v14353_v51, %v14353_v51  ;;  %v14375_v12 = vmul.f32 0.03125, %v6095_v17  ;;  %v6442_v45 = vmul.f32 96.0, %v14033_v44 }
 0x781   :  { %v6097_v18 = vpop.xlane.xlu1 %6096  ;;  %16498 = vst [vmem:[#allocation187_spill] sm:$0xff] %v14371_v60  ;;  %v6292_v2 = vmul.f32 %v14361_v56, %v14361_v56  ;;  %v6293_v17 = vmul.f32 %v14371_v60, %v14371_v60  ;;  %v16507_v56 = vld [vmem:[#allocation56_spill] sm:$0xff] }
 0x782   :  { %16496 = vst [vmem:[#allocation73_spill] sm:$0xff] %v14365_v24  ;;  %6402 = vadd.xlane.f32.xlu0 %v6290_v49  ;;  %v6291_v31 = vmul.f32 %v14365_v24, %v14365_v24  ;;  %16499 = vst [vmem:[#allocation193_spill] sm:$0xff] %v14375_v12  ;;  %v14381_v51 = vmul.f32 0.03125, %v6097_v18 }
 0x783   :  { %v6091_v33 = vpop.xlane.xlu0 %6090 }
 0x784   :  { %v14377_v0 = vmul.f32 0.03125, %v6091_v33  ;;  %6404 = vadd.xlane.f32.xlu1 %v6291_v31  ;;  %16501 = vst [vmem:[#allocation190_spill] sm:$0xff] %v14381_v51  ;;  %v16505_v33 = vld [vmem:[#allocation102_spill] sm:$0xff] }
 0x785   :  { %v6093_v55 = vpop.xlane.xlu1 %6092  ;;  %v14393_v31 = vsub.f32 %v16505_v33, %v14375_v12 }
 0x786   :  { %16500 = vst [vmem:[#allocation64_spill] sm:$0xff] %v14377_v0  ;;  %v14385_v58 = vsub.f32 %v16502_v13, %v14377_v0  ;;  %v14387_v49 = vmul.f32 0.03125, %v6093_v55  ;;  %6406 = vadd.xlane.f32.xlu0 %v6292_v2  ;;  %v16509_v55 = vld [vmem:[#allocation101_spill] sm:$0xff] }
 0x787   :  { %v6103_v24 = vpop.xlane.xlu0 %6102  ;;  %16506 = vst [vmem:[#allocation191_spill] sm:$0xff] %v14393_v31  ;;  %v14403_v2 = vsub.f32 %v16509_v55, %v14381_v51 }
 0x788   :  { %16503 = vst [vmem:[#allocation198_spill] sm:$0xff] %v14385_v58  ;;  %16504 = vst [vmem:[#allocation75_spill] sm:$0xff] %v14387_v49  ;;  %v14397_v46 = vsub.f32 %v16507_v56, %v14387_v49  ;;  %6408 = vadd.xlane.f32.xlu1 %v6293_v17  ;;  %v6294_v13 = vmul.f32 %v14385_v58, %v14385_v58  ;;  %v14407_v33 = vmul.f32 0.03125, %v6103_v24  ;;  %v16514_v49 = vld [vmem:[#allocation211_spill] sm:$0xff] }
 0x789   :  { %v6105_v18 = vpop.xlane.xlu1 %6104  ;;  %16510 = vst [vmem:[#allocation80_spill] sm:$0xff] %v14403_v2  ;;  %v6296_v56 = vmul.f32 %v14393_v31, %v14393_v31  ;;  %v6297_v24 = vmul.f32 %v14403_v2, %v14403_v2 }
 0x78a   :  { %16508 = vst [vmem:[#allocation74_spill] sm:$0xff] %v14397_v46  ;;  %6410 = vadd.xlane.f32.xlu0 %v6294_v13  ;;  %v6295_v60 = vmul.f32 %v14397_v46, %v14397_v46  ;;  %16511 = vst [vmem:[#allocation83_spill] sm:$0xff] %v14407_v33  ;;  %v14413_v58 = vmul.f32 0.03125, %v6105_v18 }
 0x78b   :  { %v6099_v0 = vpop.xlane.xlu0 %6098 }
 0x78c   :  { %v14409_v12 = vmul.f32 0.03125, %v6099_v0  ;;  %6412 = vadd.xlane.f32.xlu1 %v6295_v60  ;;  %16513 = vst [vmem:[#allocation82_spill] sm:$0xff] %v14413_v58  ;;  %v16517_v0 = vld [vmem:[#allocation104_spill] sm:$0xff]  ;;  %v16519_v60 = vld [vmem:[#allocation103_spill] sm:$0xff] }
 0x78d   :  { %v6101_v17 = vpop.xlane.xlu1 %6100  ;;  %v14425_v46 = vsub.f32 %v16517_v0, %v14407_v33 }
 0x78e   :  { %16512 = vst [vmem:[#allocation78_spill] sm:$0xff] %v14409_v12  ;;  %v14417_v55 = vsub.f32 %v16514_v49, %v14409_v12  ;;  %v14419_v13 = vmul.f32 0.03125, %v6101_v17  ;;  %6414 = vadd.xlane.f32.xlu0 %v6296_v56  ;;  %v16522_v56 = vld [vmem:[#allocation57_spill] sm:$0xff] }
 0x78f   :  { %16518 = vst [vmem:[#allocation195_spill] sm:$0xff] %v14425_v46  ;;  %v14437_v17 = vsub.f32 %v16522_v56, %v14413_v58 }
 0x790   :  { %16515 = vst [vmem:[#allocation237_spill] sm:$0xff] %v14417_v55  ;;  %16516 = vst [vmem:[#allocation196_spill] sm:$0xff] %v14419_v13  ;;  %v14429_v31 = vsub.f32 %v16519_v60, %v14419_v13  ;;  %v6107_v18 = vpop.xlane.xlu0 %6106  ;;  %6416 = vadd.xlane.f32.xlu1 %v6297_v24  ;;  %v6298_v49 = vmul.f32 %v14417_v55, %v14417_v55  ;;  %v16525_v60 = vld [vmem:[#allocation58_spill] sm:$0xff]  ;;  %v6300_v24 = vmul.f32 %v14425_v46, %v14425_v46  ;;  %v16527_v55 = vld [vmem:[#allocation60_spill] sm:$0xff] }
 0x791   :  { %v14433_v12 = vmul.f32 0.03125, %v6107_v18  ;;  %16523 = vst [vmem:[#allocation87_spill] sm:$0xff] %v14437_v17  ;;  %v6436_v18 = vmul.f32 96.0, %v13961_v53  ;;  %v6437_v56 = vmul.f32 96.0, %v16527_v55  ;;  %v6441_v46 = vmul.f32 96.0, %v13993_v36 }
 0x792   :  { %16520 = vst [vmem:[#allocation199_spill] sm:$0xff] %v14429_v31  ;;  %6418 = vadd.xlane.f32.xlu0 %v6298_v49  ;;  %v6109_v2 = vpop.xlane.xlu1 %6108  ;;  %v6299_v0 = vmul.f32 %v14429_v31, %v14429_v31  ;;  %v16528_v49 = vld [vmem:[#allocation218_spill] sm:$0xff]  ;;  %v6434_v31 = vmul.f32 96.0, %v13969_v25 }
 0x793   :  { %16521 = vst [vmem:[#allocation139_spill] sm:$0xff] %v14433_v12  ;;  %v14441_v33 = vmul.f32 0.03125, %v6109_v2  ;;  %v14445_v13 = vsub.f32 %v16525_v60, %v14433_v12  ;;  %v6301_v2 = vmul.f32 %v14437_v17, %v14437_v17  ;;  %v6435_v60 = vmul.f32 96.0, %v13977_v19 }
 0x794   :  { %6420 = vadd.xlane.f32.xlu1 %v6299_v0  ;;  %v6440_v0 = vmul.f32 96.0, %v13985_v35  ;;  %v14464_v51 = vmul.f32 %v6436_v18, %v13961_v53  ;;  %v14469_v17 = vmul.f32 %v6437_v56, %v16527_v55  ;;  %v14477_v53 = vmul.f32 %v6434_v31, %v13969_v25 }
 0x795   :  { %16524 = vst [vmem:[#allocation84_spill] sm:$0xff] %v14441_v33  ;;  %16526 = vst [vmem:[#allocation85_spill] sm:$0xff] %v14445_v13  ;;  %v14453_v58 = vsub.f32 %v16528_v49, %v14441_v33  ;;  %v6302_v12 = vmul.f32 %v14445_v13, %v14445_v13  ;;  %v6439_v49 = vmul.f32 96.0, %v14009_v20  ;;  %v6444_v33 = vmul.f32 96.0, %v14017_v10 }
 0x796   :  { %6422 = vadd.xlane.f32.xlu0 %v6300_v24  ;;  %v6438_v24 = vmul.f32 96.0, %v14001_v54  ;;  %v6443_v18 = vmul.f32 96.0, %v14041_v9  ;;  %v6448_v13 = vmul.f32 96.0, %v14049_v1  ;;  %v14482_v55 = vmul.f32 %v6435_v60, %v13977_v19 }
 0x797   :  { %16529 = vst [vmem:[#allocation245_spill] sm:$0xff] %v14453_v58  ;;  %v14485_v56 = vmul.f32 %v6440_v0, %v13985_v35  ;;  %v14488_v11 = vmul.f32 %v6441_v46, %v13993_v36  ;;  %v14495_v25 = vmul.f32 %v6439_v49, %v14009_v20  ;;  %v6446_v31 = vmul.f32 96.0, %v14065_v7 }
 0x798   :  { %6424 = vadd.xlane.f32.xlu1 %v6301_v2  ;;  %v6303_v2 = vmul.f32 %v14453_v58, %v14453_v58  ;;  %v14492_v58 = vmul.f32 %v6438_v24, %v14001_v54  ;;  %v6447_v19 = vmul.f32 96.0, %v14073_v15  ;;  %v14500_v60 = vmul.f32 %v6444_v33, %v14017_v10 }
 0x799   :  { %v14503_v35 = vmul.f32 %v6445_v16, %v14025_v40  ;;  %v14506_v36 = vmul.f32 %v6442_v45, %v14033_v44  ;;  %v6452_v46 = vmul.f32 96.0, %v14081_v27  ;;  %v14510_v54 = vmul.f32 %v6443_v18, %v14041_v9  ;;  %v16531_v16 = vld [vmem:[#allocation224_spill] sm:$0xff] }
 0x79a   :  { %6426 = vadd.xlane.f32.xlu0 %v6302_v12  ;;  %v6449_v12 = vmul.f32 96.0, %v14057_v48  ;;  %v14513_v20 = vmul.f32 %v6448_v13, %v14049_v1  ;;  %v6453_v0 = vmul.f32 96.0, %v14089_v63  ;;  %v6450_v24 = vmul.f32 96.0, %v14097_v5  ;;  %v16532_v1 = vld [vmem:[#allocation223_spill] sm:$0xff] }
 0x79b   :  { %v6451_v40 = vmul.f32 96.0, %v14105_v28  ;;  %v6456_v44 = vmul.f32 96.0, %v14113_v39  ;;  %v6457_v45 = vmul.f32 96.0, %v16531_v16  ;;  %v14524_v33 = vmul.f32 %v6446_v31, %v14065_v7 }
 0x79c   :  { %6428 = vadd.xlane.f32.xlu1 %v6303_v2  ;;  %v14518_v10 = vmul.f32 %v6449_v12, %v14057_v48  ;;  %v14527_v9 = vmul.f32 %v6447_v19, %v14073_v15  ;;  %v6454_v13 = vmul.f32 96.0, %v16532_v1  ;;  %v6455_v49 = vmul.f32 96.0, %v14137_v61 }
 0x79d   :  { %v14532_v2 = vmul.f32 %v6452_v46, %v14081_v27  ;;  %v6458_v48 = vmul.f32 96.0, %v14155_v42  ;;  %v6459_v18 = vmul.f32 96.0, %v14159_v57  ;;  %v6460_v12 = vmul.f32 96.0, %v14153_v43 }
 0x79e   :  { %16530 = vst [vmem:[#allocation246_spill] sm:$0xff] %v14518_v10  ;;  %v14538_v10 = vmul.f32 %v6453_v0, %v14089_v63  ;;  %v14541_v7 = vmul.f32 %v6450_v24, %v14097_v5  ;;  %v6461_v15 = vmul.f32 96.0, %v14157_v21  ;;  %v6462_v31 = vmul.f32 96.0, %v14185_v52 }
 0x79f   :  { %16533 = vst [vmem:[#allocation203_spill] sm:$0xff] %v14532_v2  ;;  %v14546_v19 = vmul.f32 %v6451_v40, %v14105_v28  ;;  %v14549_v27 = vmul.f32 %v6456_v44, %v14113_v39  ;;  %v14552_v46 = vmul.f32 %v6457_v45, %v16531_v16  ;;  %v6463_v2 = vmul.f32 96.0, %v14191_v14 }
 0x7a0   :  { %v14556_v63 = vmul.f32 %v6454_v13, %v16532_v1  ;;  %v14559_v5 = vmul.f32 %v6455_v49, %v14137_v61  ;;  %v6464_v0 = vmul.f32 96.0, %v14183_v6  ;;  %v6465_v24 = vmul.f32 96.0, %v14189_v41 }
 0x7a1   :  { %v14564_v28 = vmul.f32 %v6458_v48, %v14155_v42  ;;  %v14567_v39 = vmul.f32 %v6459_v18, %v14159_v57  ;;  %v14570_v40 = vmul.f32 %v6460_v12, %v14153_v43  ;;  %v6466_v44 = vmul.f32 96.0, %v14217_v23 }
 0x7a2   :  { %v14574_v16 = vmul.f32 %v6461_v15, %v14157_v21  ;;  %v14577_v61 = vmul.f32 %v6462_v31, %v14185_v52  ;;  %v6467_v45 = vmul.f32 96.0, %v14223_v26  ;;  %v6468_v1 = vmul.f32 96.0, %v14215_v62 }
 0x7a3   :  { %v14582_v42 = vmul.f32 %v6463_v2, %v14191_v14  ;;  %v6469_v57 = vmul.f32 96.0, %v14221_v37  ;;  %v6470_v43 = vmul.f32 96.0, %v14249_v38  ;;  %v6471_v13 = vmul.f32 96.0, %v14259_v50 }
 0x7a4   :  { %v14588_v49 = vmul.f32 %v6464_v0, %v14183_v6  ;;  %v14591_v21 = vmul.f32 %v6465_v24, %v14189_v41  ;;  %v6472_v52 = vmul.f32 96.0, %v14247_v4  ;;  %v6473_v48 = vmul.f32 96.0, %v14253_v34 }
 0x7a5   :  { %v14596_v18 = vmul.f32 %v6466_v44, %v14217_v23  ;;  %v6474_v14 = vmul.f32 96.0, %v14281_v22  ;;  %v6475_v2 = vmul.f32 96.0, %v14291_v8  ;;  %v6476_v12 = vmul.f32 96.0, %v14279_v32 }
 0x7a6   :  { %v14602_v15 = vmul.f32 %v6467_v45, %v14223_v26  ;;  %v14605_v6 = vmul.f32 %v6468_v1, %v14215_v62  ;;  %v6477_v41 = vmul.f32 96.0, %v14285_v3  ;;  %v6478_v31 = vmul.f32 96.0, %v14313_v29 }
 0x7a7   :  { %v14610_v23 = vmul.f32 %v6469_v57, %v14221_v37  ;;  %v14613_v24 = vmul.f32 %v6470_v43, %v14249_v38  ;;  %v14616_v44 = vmul.f32 %v6471_v13, %v14259_v50  ;;  %v6479_v26 = vmul.f32 96.0, %v14323_v59 }
 0x7a8   :  { %16534 = vst [vmem:[#allocation247_spill] sm:$0xff] %v14605_v6  ;;  %v14621_v62 = vmul.f32 %v6472_v52, %v14247_v4  ;;  %v14624_v1 = vmul.f32 %v6473_v48, %v14253_v34  ;;  %v6480_v6 = vmul.f32 96.0, %v14311_v30  ;;  %v14628_v57 = vmul.f32 %v6474_v14, %v14281_v22  ;;  %v16541_v14 = vld [vmem:[#allocation49_spill] sm:$0xff] }
 0x7a9   :  { %v14631_v38 = vmul.f32 %v6475_v2, %v14291_v8  ;;  %v14634_v50 = vmul.f32 %v6476_v12, %v14279_v32  ;;  %v14639_v34 = vmul.f32 %v6477_v41, %v14285_v3  ;;  %v14642_v13 = vmul.f32 %v6478_v31, %v14313_v29  ;;  %v16540_v8 = vld [vmem:[#allocation90_spill] sm:$0xff]  ;;  %v16542_v2 = vld [vmem:[#allocation184_spill] sm:$0xff] }
 0x7aa   :  { %v14645_v22 = vmul.f32 %v6479_v26, %v14323_v59  ;;  %v6482_v48 = vmul.f32 96.0, %v16540_v8  ;;  %v6483_v32 = vmul.f32 96.0, %v16541_v14  ;;  %v6484_v12 = vmul.f32 96.0, %v16542_v2  ;;  %v16544_v31 = vld [vmem:[#allocation192_spill] sm:$0xff] }
 0x7ab   :  { %v6311_v0 = vpop.xlane.xlu0 %6310  ;;  %16535 = vst [vmem:[#allocation145_spill] sm:$0xff] %v14631_v38  ;;  %16536 = vst [vmem:[#allocation94_spill] sm:$0xff] %v14634_v50  ;;  %v14652_v3 = vmul.f32 %v6480_v6, %v14311_v30  ;;  %v6485_v59 = vmul.f32 96.0, %v16544_v31  ;;  %v16545_v26 = vld [vmem:[#allocation64_spill] sm:$0xff]  ;;  %v16547_v6 = vld [vmem:[#allocation193_spill] sm:$0xff] }
 0x7ac   :  { %v6564_v45 = vsub.f32 %v6311_v0, %v14464_v51  ;;  %v6481_v51 = vmul.f32 96.0, %v14317_v47  ;;  %16537 = vst [vmem:[#allocation88_spill] sm:$0xff] %v14639_v34  ;;  %16538 = vst [vmem:[#allocation144_spill] sm:$0xff] %v14642_v13  ;;  %v14665_v30 = vmul.f32 %v6483_v32, %v16541_v14 }
 0x7ad   :  { %v6313_v37 = vpop.xlane.xlu1 %6312  ;;  %16539 = vst [vmem:[#allocation248_spill] sm:$0xff] %v14645_v22  ;;  %v16546_v22 = vld [vmem:[#allocation75_spill] sm:$0xff] }
 0x7ae   :  { %v6628_v43 = vmul.f32 0.03125, %v6564_v45  ;;  %v6565_v4 = vsub.f32 %v6313_v37, %v14469_v17  ;;  %v14655_v29 = vmul.f32 %v6481_v51, %v14317_v47  ;;  %v6486_v37 = vmul.f32 96.0, %v16545_v26 }
 0x7af   :  { %v6307_v52 = vpop.xlane.xlu0 %6306  ;;  %v6487_v13 = vmul.f32 96.0, %v16546_v22  ;;  %v14668_v47 = vmul.f32 %v6484_v12, %v16542_v2  ;;  %v6488_v51 = vmul.f32 96.0, %v16547_v6 }
 0x7b0   :  { %v6692_v0 = vmax.f32 %v6628_v43, 0.0  ;;  %v6629_v45 = vmul.f32 0.03125, %v6565_v4  ;;  %v6562_v17 = vsub.f32 %v6307_v52, %v14477_v53  ;;  %16543 = vst [vmem:[#allocation160_spill] sm:$0xff] %v14655_v29  ;;  %v14662_v53 = vmul.f32 %v6482_v48, %v16540_v8 }
 0x7b1   :  { %v6309_v41 = vpop.xlane.xlu1 %6308  ;;  %v14676_v8 = vmul.f32 %v6486_v37, %v16545_v26  ;;  %v14679_v48 = vmul.f32 %v6487_v13, %v16546_v22  ;;  %v14683_v2 = vmul.f32 %v6488_v51, %v16547_v6 }
 0x7b2   :  { %v6756_v34 = vadd.f32 1e-05, %v6692_v0  ;;  %v6693_v50 = vmax.f32 %v6629_v45, 0.0  ;;  %v6626_v38 = vmul.f32 0.03125, %v6562_v17  ;;  %v6563_v43 = vsub.f32 %v6309_v41, %v14482_v55  ;;  %v16552_v41 = vld [vmem:[#allocation78_spill] sm:$0xff] }
 0x7b3   :  { %v6319_v4 = vpop.xlane.xlu0 %6318  ;;  %v14673_v55 = vmul.f32 %v6485_v59, %v16544_v31  ;;  %16548 = vst [vmem:[#allocation23_spill] sm:$0xff] %v14676_v8  ;;  %16549 = vst [vmem:[#allocation194_spill] sm:$0xff] %v14679_v48  ;;  %v6490_v31 = vmul.f32 96.0, %v16552_v41 }
 0x7b4   :  { %9511 = vrsqrt.f32 %v6756_v34  ;;  %v6757_v52 = vadd.f32 1e-05, %v6693_v50  ;;  %v6690_v29 = vmax.f32 %v6626_v38, 0.0  ;;  %v6627_v0 = vmul.f32 0.03125, %v6563_v43  ;;  %16550 = vst [vmem:[#allocation163_spill] sm:$0xff] %v14683_v2 }
 0x7b5   :  { %v6568_v45 = vsub.f32 %v6319_v4, %v14485_v56  ;;  %v6321_v17 = vpop.xlane.xlu1 %6320  ;;  %v16551_v56 = vld [vmem:[#allocation190_spill] sm:$0xff]  ;;  %v16554_v4 = vld [vmem:[#allocation83_spill] sm:$0xff] }
 0x7b6   :  { %9513 = vrsqrt.f32 %v6757_v52  ;;  %v6754_v14 = vadd.f32 1e-05, %v6690_v29  ;;  %v6691_v32 = vmax.f32 %v6627_v0, 0.0  ;;  %v6569_v34 = vsub.f32 %v6321_v17, %v14488_v11  ;;  %v16553_v29 = vld [vmem:[#allocation196_spill] sm:$0xff]  ;;  %v16555_v52 = vld [vmem:[#allocation82_spill] sm:$0xff] }
 0x7b7   :  { %v6632_v50 = vmul.f32 0.03125, %v6568_v45  ;;  %v6315_v38 = vpop.xlane.xlu0 %6314  ;;  %v6489_v12 = vmul.f32 96.0, %v16551_v56  ;;  %v6491_v43 = vmul.f32 96.0, %v16553_v29  ;;  %v6492_v11 = vmul.f32 96.0, %v16554_v4 }
 0x7b8   :  { %9515 = vrsqrt.f32 %v6754_v14  ;;  %v6755_v59 = vadd.f32 1e-05, %v6691_v32  ;;  %v6633_v26 = vmul.f32 0.03125, %v6569_v34  ;;  %v6566_v13 = vsub.f32 %v6315_v38, %v14492_v58  ;;  %v16556_v32 = vld [vmem:[#allocation139_spill] sm:$0xff] }
 0x7b9   :  { %v6696_v22 = vmax.f32 %v6632_v50, 0.0  ;;  %v6317_v37 = vpop.xlane.xlu1 %6316  ;;  %v6493_v0 = vmul.f32 96.0, %v16555_v52  ;;  %v14693_v14 = vmul.f32 %v6489_v12, %v16551_v56  ;;  %v14696_v58 = vmul.f32 %v6490_v31, %v16552_v41  ;;  %v16558_v12 = vld [vmem:[#allocation84_spill] sm:$0xff] }
 0x7ba   :  { %9517 = vrsqrt.f32 %v6755_v59  ;;  %v6697_v6 = vmax.f32 %v6633_v26, 0.0  ;;  %v6630_v51 = vmul.f32 0.03125, %v6566_v13  ;;  %v6567_v45 = vsub.f32 %v6317_v37, %v14495_v25  ;;  %v14713_v13 = vld [vmem:[%s15203_s13] ss:$0 sm:$0xff] }
 0x7bb   :  { %v6760_v17 = vadd.f32 1e-05, %v6696_v22  ;;  %v6327_v2 = vpop.xlane.xlu0 %6326  ;;  %v6494_v34 = vmul.f32 96.0, %v16556_v32  ;;  %v14701_v26 = vmul.f32 %v6491_v43, %v16553_v29  ;;  %v14704_v25 = vmul.f32 %v6492_v11, %v16554_v4  ;;  %v16559_v37 = vld [vmem:[#allocation174_spill] sm:$0xff] }
 0x7bc   :  { %v6761_v50 = vadd.f32 1e-05, %v6697_v6  ;;  %v6694_v38 = vmax.f32 %v6630_v51, 0.0  ;;  %v6631_v48 = vmul.f32 0.03125, %v6567_v45  ;;  %v6572_v8 = vsub.f32 %v6327_v2, %v14500_v60  ;;  %v16561_v45 = vld [vmem:[#allocation214_spill] sm:$0xff] }
 0x7bd   :  { %v6329_v59 = vpop.xlane.xlu1 %6328  ;;  %v14707_v56 = vmul.f32 %v6493_v0, %v16555_v52  ;;  %v6495_v41 = vmul.f32 96.0, %v16558_v12  ;;  %9519 = vrsqrt.f32 %v6760_v17  ;;  %v14718_v11 = vmul.f32 %v6494_v34, %v16556_v32 }
 0x7be   :  { %v9512_v31 = vpop.eup %9511  ;;  %v6758_v60 = vadd.f32 1e-05, %v6694_v38  ;;  %v6695_v2 = vmax.f32 %v6631_v48, 0.0  ;;  %v6636_v22 = vmul.f32 0.03125, %v6572_v8  ;;  %9521 = vrsqrt.f32 %v6761_v50  ;;  %v14724_v48 = vld [vmem:[%s15203_s13 + $0x1] ss:$0 sm:$0xff] }
 0x7bf   :  { %16557 = vst [vmem:[#allocation100_spill] sm:$0xff] %v14707_v56  ;;  %v6884_v29 = vmul.f32 %v9512_v31, %v16559_v37  ;;  %v6573_v43 = vsub.f32 %v6329_v59, %v14503_v35  ;;  %v6323_v4 = vpop.xlane.xlu0 %6322  ;;  %16560 = vst [vmem:[#allocation161_spill] sm:$0xff] %v14718_v11  ;;  %v14729_v32 = vmul.f32 %v6495_v41, %v16558_v12  ;;  %v16567_v11 = vld [vmem:[#allocation203_spill] sm:$0xff] }
 0x7c0   :  { %v9514_v52 = vpop.eup %9513  ;;  %9523 = vrsqrt.f32 %v6758_v60  ;;  %v6759_v0 = vadd.f32 1e-05, %v6695_v2  ;;  %v6700_v6 = vmax.f32 %v6636_v22, 0.0  ;;  %v6570_v51 = vsub.f32 %v6323_v4, %v14506_v36  ;;  %v16563_v22 = vld [vmem:[#allocation61_spill] sm:$0xff] }
 0x7c1   :  { %v6952_v8 = vmul.f32 %v14713_v13, %v6884_v29  ;;  %v6885_v17 = vmul.f32 %v9514_v52, %v16561_v45  ;;  %v6637_v35 = vmul.f32 0.03125, %v6573_v43  ;;  %v6325_v50 = vpop.xlane.xlu1 %6324  ;;  %16562 = vst [vmem:[#allocation149_spill] sm:$0xff] %v14729_v32 }
 0x7c2   :  { %v9516_v34 = vpop.eup %9515  ;;  %9525 = vrsqrt.f32 %v6759_v0  ;;  %v6764_v38 = vadd.f32 1e-05, %v6700_v6  ;;  %v6634_v59 = vmul.f32 0.03125, %v6570_v51  ;;  %v6571_v36 = vsub.f32 %v6325_v50, %v14510_v54  ;;  %v16564_v6 = vld [vmem:[#allocation107_spill] sm:$0xff] }
 0x7c3   :  { %v6953_v31 = vmul.f32 %v14713_v13, %v6885_v17  ;;  %v6701_v60 = vmax.f32 %v6637_v35, 0.0  ;;  %v6335_v2 = vpop.xlane.xlu0 %6334  ;;  %v6882_v37 = vmul.f32 %v9516_v34, %v16563_v22  ;;  %v7020_v29 = vadd.f32 %v14724_v48, %v6952_v8  ;;  %v16565_v34 = vld [vmem:[#allocation246_spill] sm:$0xff] }
 0x7c4   :  { %v9518_v4 = vpop.eup %9517  ;;  %9527 = vrsqrt.f32 %v6764_v38  ;;  %v6698_v43 = vmax.f32 %v6634_v59, 0.0  ;;  %v6635_v52 = vmul.f32 0.03125, %v6571_v36  ;;  %v6576_v12 = vsub.f32 %v6335_v2, %v14513_v20 }
 0x7c5   :  { %v6765_v41 = vadd.f32 1e-05, %v6701_v60  ;;  %v6337_v0 = vpop.xlane.xlu1 %6336  ;;  %v6883_v51 = vmul.f32 %v9518_v4, %v16564_v6  ;;  %v6950_v54 = vmul.f32 %v14713_v13, %v6882_v37  ;;  %v7021_v45 = vadd.f32 %v14724_v48, %v6953_v31 }
 0x7c6   :  { %v6762_v17 = vadd.f32 1e-05, %v6698_v43  ;;  %v6699_v35 = vmax.f32 %v6635_v52, 0.0  ;;  %v6640_v50 = vmul.f32 0.03125, %v6576_v12  ;;  %v6577_v22 = vsub.f32 %v6337_v0, %v16565_v34 }
 0x7c7   :  { %9529 = vrsqrt.f32 %v6765_v41  ;;  %v6331_v8 = vpop.xlane.xlu0 %6330  ;;  %v6951_v38 = vmul.f32 %v14713_v13, %v6883_v51  ;;  %v7018_v59 = vadd.f32 %v14724_v48, %v6950_v54  ;;  %v7084_v20 = vmax.f32 %v7020_v29, 0.0  ;;  %v9520_v36 = vpop.eup %9519 }
 0x7c8   :  { %9531 = vrsqrt.f32 %v6762_v17  ;;  %v6763_v60 = vadd.f32 1e-05, %v6699_v35  ;;  %v6704_v2 = vmax.f32 %v6640_v50, 0.0  ;;  %v6641_v4 = vmul.f32 0.03125, %v6577_v22  ;;  %v9522_v37 = vpop.eup %9521  ;;  %v16566_v50 = vld [vmem:[#allocation178_spill] sm:$0xff] }
 0x7c9   :  { %v6574_v31 = vsub.f32 %v6331_v8, %v14524_v33  ;;  %v6333_v43 = vpop.xlane.xlu1 %6332  ;;  %v7019_v52 = vadd.f32 %v14724_v48, %v6951_v38  ;;  %v7082_v12 = vmax.f32 %v7018_v59, 0.0  ;;  %v7085_v0 = vmax.f32 %v7021_v45, 0.0 }
 0x7ca   :  { %v9524_v41 = vpop.eup %9523  ;;  %9533 = vrsqrt.f32 %v6763_v60  ;;  %v6768_v6 = vadd.f32 1e-05, %v6704_v2  ;;  %v6705_v51 = vmax.f32 %v6641_v4, 0.0  ;;  %v6575_v54 = vsub.f32 %v6333_v43, %v14527_v9  ;;  %v16568_v60 = vld [vmem:[#allocation240_spill] sm:$0xff] }
 0x7cb   :  { %v6638_v29 = vmul.f32 0.03125, %v6574_v31  ;;  %v6343_v34 = vpop.xlane.xlu0 %6342  ;;  %v7083_v17 = vmax.f32 %v7019_v52, 0.0  ;;  %v7147_v35 = vpack.c.bf16 %v7085_v0, %v7084_v20  ;;  %v6886_v22 = vmul.f32 %v9524_v41, %v16566_v50 }
 0x7cc   :  { %v9526_v32 = vpop.eup %9525  ;;  %9535 = vrsqrt.f32 %v6768_v6  ;;  %v6769_v33 = vadd.f32 1e-05, %v6705_v51  ;;  %v6639_v8 = vmul.f32 0.03125, %v6575_v54  ;;  %v6580_v38 = vsub.f32 %v6343_v34, %v16567_v11  ;;  %v16569_v6 = vld [vmem:[#allocation219_spill] sm:$0xff] }
 0x7cd   :  { %v6702_v59 = vmax.f32 %v6638_v29, 0.0  ;;  %v6345_v45 = vpop.xlane.xlu1 %6344  ;;  %v7146_v56 = vpack.c.bf16 %v7083_v17, %v7082_v12  ;;  %v6887_v2 = vmul.f32 %v9526_v32, %v16568_v60  ;;  %v6954_v4 = vmul.f32 %v14713_v13, %v6886_v22 }
 0x7ce   :  { %v14749_v9 = vpop.eup %9527  ;;  %9537 = vrsqrt.f32 %v6769_v33  ;;  %v6703_v31 = vmax.f32 %v6639_v8, 0.0  ;;  %v6644_v20 = vmul.f32 0.03125, %v6580_v38  ;;  %v6581_v43 = vsub.f32 %v6345_v45, %v14538_v10 }
 0x7cf   :  { %v6766_v52 = vadd.f32 1e-05, %v6702_v59  ;;  %v6339_v0 = vpop.xlane.xlu0 %6338  ;;  %8817 = vmatprep.mubr.bf16.mxu0 %v7146_v56  ;;  %v6955_v41 = vmul.f32 %v14713_v13, %v6887_v2  ;;  %v7022_v11 = vadd.f32 %v14724_v48, %v6954_v4  ;;  %v6888_v12 = vmul.f32 %v9520_v36, %v16569_v6  ;;  %v16570_v56 = vld [vmem:[#allocation62_spill] sm:$0xff] }
 0x7d0   :  { %v6767_v51 = vadd.f32 1e-05, %v6703_v31  ;;  %v6708_v32 = vmax.f32 %v6644_v20, 0.0  ;;  %v6645_v54 = vmul.f32 0.03125, %v6581_v43  ;;  %v6578_v29 = vsub.f32 %v6339_v0, %v14541_v7  ;;  %8818 = vmatmul.mubr.bf16.vlgmr.msra.gmra.mrb[104].mxu0 %v7147_v35 }
 0x7d1   :  { %v14756_v34 = vpop.eup %9529  ;;  %9539 = vrsqrt.f32 %v6766_v52  ;;  %v6341_v17 = vpop.xlane.xlu1 %6340  ;;  %v7023_v10 = vadd.f32 %v14724_v48, %v6955_v41  ;;  %v7086_v50 = vmax.f32 %v7022_v11, 0.0  ;;  %v6889_v22 = vmul.f32 %v9522_v37, %v16570_v56 }
 0x7d2   :  { %v9532_v33 = vpop.eup %9531  ;;  %9541 = vrsqrt.f32 %v6767_v51  ;;  %v6772_v8 = vadd.f32 1e-05, %v6708_v32  ;;  %v6709_v38 = vmax.f32 %v6645_v54, 0.0  ;;  %v6642_v36 = vmul.f32 0.03125, %v6578_v29 }
 0x7d3   :  { %v6579_v59 = vsub.f32 %v6341_v17, %v14546_v19  ;;  %v6351_v45 = vpop.xlane.xlu0 %6350  ;;  %v7087_v60 = vmax.f32 %v7023_v10, 0.0  ;;  %v6956_v7 = vmul.f32 %v14713_v13, %v6888_v12  ;;  %v6957_v35 = vmul.f32 %v14713_v13, %v6889_v22 }
 0x7d4   :  { %v9534_v2 = vpop.eup %9533  ;;  %9543 = vrsqrt.f32 %v6772_v8  ;;  %v6773_v4 = vadd.f32 1e-05, %v6709_v38  ;;  %v6706_v31 = vmax.f32 %v6642_v36, 0.0  ;;  %v6584_v20 = vsub.f32 %v6351_v45, %v14549_v27  ;;  %v16571_v27 = vld [vmem:[#allocation182_spill] sm:$0xff] }
 0x7d5   :  { %v6643_v37 = vmul.f32 0.03125, %v6579_v59  ;;  %v6353_v43 = vpop.xlane.xlu1 %6352  ;;  %v7148_v52 = vpack.c.bf16 %v7087_v60, %v7086_v50  ;;  %v7024_v0 = vadd.f32 %v14724_v48, %v6956_v7  ;;  %v7025_v41 = vadd.f32 %v14724_v48, %v6957_v35  ;;  %v16572_v59 = vld [vmem:[#allocation123_spill] sm:$0xff] }
 0x7d6   :  { %v14766_v19 = vpop.eup %9535  ;;  %9545 = vrsqrt.f32 %v6773_v4  ;;  %v6770_v11 = vadd.f32 1e-05, %v6706_v31  ;;  %v6648_v6 = vmul.f32 0.03125, %v6584_v20  ;;  %v6585_v12 = vsub.f32 %v6353_v43, %v14552_v46 }
 0x7d7   :  { %v6707_v51 = vmax.f32 %v6643_v37, 0.0  ;;  %v6347_v32 = vpop.xlane.xlu0 %6346  ;;  %8821 = vmatprep.mubr.bf16.mxu0 %v7148_v52  ;;  %v7088_v54 = vmax.f32 %v7024_v0, 0.0  ;;  %v7089_v29 = vmax.f32 %v7025_v41, 0.0  ;;  %v6890_v17 = vmul.f32 %v9532_v33, %v16571_v27  ;;  %v16573_v37 = vld [vmem:[#allocation215_spill] sm:$0xff] }
 0x7d8   :  { %v14770_v10 = vpop.eup %9537  ;;  %9547 = vrsqrt.f32 %v6770_v11  ;;  %v6712_v50 = vmax.f32 %v6648_v6, 0.0  ;;  %v6649_v56 = vmul.f32 0.03125, %v6585_v12  ;;  %v6582_v22 = vsub.f32 %v6347_v32, %v14556_v63 }
 0x7d9   :  { %v6771_v8 = vadd.f32 1e-05, %v6707_v51  ;;  %v7149_v38 = vpack.c.bf16 %v7089_v29, %v7088_v54  ;;  %v6349_v36 = vpop.xlane.xlu1 %6348  ;;  %v6891_v45 = vmul.f32 %v9534_v2, %v16572_v59  ;;  %v6958_v46 = vmul.f32 %v14713_v13, %v6890_v17  ;;  %v16574_v51 = vld [vmem:[#allocation241_spill] sm:$0xff]  ;;  %v16575_v17 = vld [vmem:[#allocation59_spill] sm:$0xff] }
 0x7da   :  { %v6776_v60 = vadd.f32 1e-05, %v6712_v50  ;;  %v6713_v7 = vmax.f32 %v6649_v56, 0.0  ;;  %v6646_v35 = vmul.f32 0.03125, %v6582_v22  ;;  %v6583_v4 = vsub.f32 %v6349_v36, %v14559_v5  ;;  %v16576_v59 = vld [vmem:[#allocation239_spill] sm:$0xff] }
 0x7db   :  { %v9540_v33 = vpop.eup %9539  ;;  %9549 = vrsqrt.f32 %v6771_v8  ;;  %8822 = vmatmul.mubr.bf16.gmra.mrb[108].mxu0 %v7149_v38  ;;  %v6111_v31 = vpop.xlane.xlu0 %6110  ;;  %v6959_v20 = vmul.f32 %v14713_v13, %v6891_v45  ;;  %v7026_v63 = vadd.f32 %v14724_v48, %v6958_v46  ;;  %v6892_v43 = vmul.f32 %v14749_v9, %v16573_v37 }
 0x7dc   :  { %v9542_v52 = vpop.eup %9541  ;;  %9551 = vrsqrt.f32 %v6776_v60  ;;  %v6777_v2 = vadd.f32 1e-05, %v6713_v7  ;;  %v6710_v0 = vmax.f32 %v6646_v35, 0.0  ;;  %v6647_v41 = vmul.f32 0.03125, %v6583_v4 }
 0x7dd   :  { %v14780_v11 = vmul.f32 0.03125, %v6111_v31  ;;  %v6113_v6 = vpop.xlane.xlu1 %6112  ;;  %v7027_v5 = vadd.f32 %v14724_v48, %v6959_v20  ;;  %v7090_v12 = vmax.f32 %v7026_v63, 0.0  ;;  %v6893_v32 = vmul.f32 %v14756_v34, %v16574_v51 }
 0x7de   :  { %v14785_v54 = vpop.eup %9543  ;;  %9553 = vrsqrt.f32 %v6777_v2  ;;  %v6774_v29 = vadd.f32 1e-05, %v6710_v0  ;;  %v6711_v27 = vmax.f32 %v6647_v41, 0.0  ;;  %v14787_v9 = vmul.f32 0.03125, %v6113_v6  ;;  %v16577_v41 = vld [vmem:[#allocation222_spill] sm:$0xff] }
 0x7df   :  { %v14791_v50 = vsub.f32 %v16575_v17, %v14780_v11  ;;  %v6355_v56 = vpop.xlane.xlu0 %6354  ;;  %v7091_v22 = vmax.f32 %v7027_v5, 0.0  ;;  %v6960_v8 = vmul.f32 %v14713_v13, %v6892_v43  ;;  %v6961_v38 = vmul.f32 %v14713_v13, %v6893_v32  ;;  %v16578_v5 = vld [vmem:[#allocation65_spill] sm:$0xff] }
 0x7e0   :  { %v14795_v36 = vpop.eup %9545  ;;  %9555 = vrsqrt.f32 %v6774_v29  ;;  %v6775_v34 = vadd.f32 1e-05, %v6711_v27  ;;  %v14799_v45 = vsub.f32 %v16576_v59, %v14787_v9  ;;  %v6586_v46 = vsub.f32 %v6355_v56, %v14564_v28  ;;  %v16579_v27 = vld [vmem:[#allocation168_spill] sm:$0xff] }
 0x7e1   :  { %v7150_v60 = vpack.c.bf16 %v7091_v22, %v7090_v12  ;;  %v7028_v7 = vadd.f32 %v14724_v48, %v6960_v8  ;;  %v7029_v35 = vadd.f32 %v14724_v48, %v6961_v38  ;;  %v6357_v4 = vpop.xlane.xlu1 %6356  ;;  %v6304_v31 = vmul.f32 %v14791_v50, %v14791_v50 }
 0x7e2   :  { %v14806_v20 = vpop.eup %9547  ;;  %9557 = vrsqrt.f32 %v6775_v34  ;;  %v6650_v63 = vmul.f32 0.03125, %v6586_v46  ;;  %v6587_v37 = vsub.f32 %v6357_v4, %v14567_v39  ;;  %v6305_v43 = vmul.f32 %v14799_v45, %v14799_v45  ;;  %v16580_v34 = vld [vmem:[#allocation185_spill] sm:$0xff] }
 0x7e3   :  { %8825 = vmatprep.mubr.bf16.mxu0 %v7150_v60  ;;  %v7092_v28 = vmax.f32 %v7028_v7, 0.0  ;;  %v7093_v2 = vmax.f32 %v7029_v35, 0.0  ;;  %6430 = vadd.xlane.f32.xlu0 %v6304_v31  ;;  %v6359_v0 = vpop.xlane.xlu0 %6358  ;;  %v6894_v6 = vmul.f32 %v9540_v33, %v16577_v41  ;;  %v6895_v12 = vmul.f32 %v9542_v52, %v16578_v5 }
 0x7e4   :  { %v6714_v51 = vmax.f32 %v6650_v63, 0.0  ;;  %v6651_v32 = vmul.f32 0.03125, %v6587_v37  ;;  %v6588_v29 = vsub.f32 %v6359_v0, %v14570_v40  ;;  %6432 = vadd.xlane.f32.xlu1 %v6305_v43  ;;  %v6896_v39 = vmul.f32 %v14766_v19, %v16579_v27 }
 0x7e5   :  { %v9550_v17 = vpop.eup %9549  ;;  %v7151_v56 = vpack.c.bf16 %v7093_v2, %v7092_v28  ;;  %v6361_v22 = vpop.xlane.xlu1 %6360  ;;  %v6962_v8 = vmul.f32 %v14713_v13, %v6894_v6  ;;  %v6963_v38 = vmul.f32 %v14713_v13, %v6895_v12  ;;  %v6897_v33 = vmul.f32 %v14770_v10, %v16580_v34 }
 0x7e6   :  { %v14820_v59 = vpop.eup %9551  ;;  %v6778_v52 = vadd.f32 1e-05, %v6714_v51  ;;  %v6715_v46 = vmax.f32 %v6651_v32, 0.0  ;;  %v6652_v60 = vmul.f32 0.03125, %v6588_v29  ;;  %v6589_v40 = vsub.f32 %v6361_v22, %v14574_v16 }
 0x7e7   :  { %8826 = vmatmul.mubr.bf16.gmra.mrb[112].mxu0 %v7151_v56  ;;  %v6363_v7 = vpop.xlane.xlu0 %6362  ;;  %v7030_v19 = vadd.f32 %v14724_v48, %v6962_v8  ;;  %v7031_v35 = vadd.f32 %v14724_v48, %v6963_v38  ;;  %v6964_v4 = vmul.f32 %v14713_v13, %v6896_v39  ;;  %v6965_v31 = vmul.f32 %v14713_v13, %v6897_v33 }
 0x7e8   :  { %v14827_v63 = vpop.eup %9553  ;;  %9559 = vrsqrt.f32 %v6778_v52  ;;  %v6779_v10 = vadd.f32 1e-05, %v6715_v46  ;;  %v6716_v37 = vmax.f32 %v6652_v60, 0.0  ;;  %v6653_v43 = vmul.f32 0.03125, %v6589_v40  ;;  %v16581_v46 = vld [vmem:[#allocation169_spill] sm:$0xff]  ;;  %v16582_v40 = vld [vmem:[#allocation220_spill] sm:$0xff] }
 0x7e9   :  { %v6590_v28 = vsub.f32 %v6363_v7, %v14577_v61  ;;  %v7094_v2 = vmax.f32 %v7030_v19, 0.0  ;;  %v7095_v16 = vmax.f32 %v7031_v35, 0.0  ;;  %v7032_v0 = vadd.f32 %v14724_v48, %v6964_v4  ;;  %v6365_v41 = vpop.xlane.xlu1 %6364 }
 0x7ea   :  { %v14831_v6 = vpop.eup %9555  ;;  %9561 = vrsqrt.f32 %v6779_v10  ;;  %v6780_v5 = vadd.f32 1e-05, %v6716_v37  ;;  %v6717_v12 = vmax.f32 %v6653_v43, 0.0  ;;  %v7033_v51 = vadd.f32 %v14724_v48, %v6965_v31 }
 0x7eb   :  { %v6654_v32 = vmul.f32 0.03125, %v6590_v28  ;;  %v7152_v29 = vpack.c.bf16 %v7095_v16, %v7094_v2  ;;  %v7096_v27 = vmax.f32 %v7032_v0, 0.0  ;;  %v6591_v39 = vsub.f32 %v6365_v41, %v14582_v42  ;;  %v6367_v56 = vpop.xlane.xlu0 %6366 }
 0x7ec   :  { %v14835_v22 = vpop.eup %9557  ;;  %9563 = vrsqrt.f32 %v6780_v5  ;;  %v6781_v61 = vadd.f32 1e-05, %v6717_v12  ;;  %v7097_v8 = vmax.f32 %v7033_v51, 0.0  ;;  %v6592_v38 = vsub.f32 %v6367_v56, %v14588_v49 }
 0x7ed   :  { %v6718_v34 = vmax.f32 %v6654_v32, 0.0  ;;  %8829 = vmatprep.mubr.bf16.mxu0 %v7152_v29  ;;  %v6655_v33 = vmul.f32 0.03125, %v6591_v39  ;;  %v6369_v52 = vpop.xlane.xlu1 %6368  ;;  %v6898_v60 = vmul.f32 %v14806_v20, %v16581_v46  ;;  %v6899_v7 = vmul.f32 %v9550_v17, %v16582_v40  ;;  %v16583_v20 = vld [vmem:[#allocation63_spill] sm:$0xff]  ;;  %v16584_v29 = vld [vmem:[#allocation122_spill] sm:$0xff] }
 0x7ee   :  { %9565 = vrsqrt.f32 %v6781_v61  ;;  %v7153_v19 = vpack.c.bf16 %v7097_v8, %v7096_v27  ;;  %v6656_v42 = vmul.f32 0.03125, %v6592_v38  ;;  %v6593_v35 = vsub.f32 %v6369_v52, %v14591_v21 }
 0x7ef   :  { %v6782_v4 = vadd.f32 1e-05, %v6718_v34  ;;  %v6719_v31 = vmax.f32 %v6655_v33, 0.0  ;;  %v6371_v10 = vpop.xlane.xlu0 %6370  ;;  %v6966_v37 = vmul.f32 %v14713_v13, %v6898_v60  ;;  %v6967_v49 = vmul.f32 %v14713_v13, %v6899_v7  ;;  %v16585_v60 = vld [vmem:[#allocation247_spill] sm:$0xff] }
 0x7f0   :  { %8830 = vmatmul.mubr.bf16.gmra.mrb[116].mxu0 %v7153_v19  ;;  %v6720_v43 = vmax.f32 %v6656_v42, 0.0  ;;  %v6657_v28 = vmul.f32 0.03125, %v6593_v35  ;;  %v6594_v2 = vsub.f32 %v6371_v10, %v14596_v18  ;;  %v6900_v17 = vmul.f32 %v14785_v54, %v16583_v20 }
 0x7f1   :  { %9567 = vrsqrt.f32 %v6782_v4  ;;  %v6783_v16 = vadd.f32 1e-05, %v6719_v31  ;;  %v7034_v0 = vadd.f32 %v14724_v48, %v6966_v37  ;;  %v7035_v21 = vadd.f32 %v14724_v48, %v6967_v49  ;;  %v6373_v41 = vpop.xlane.xlu1 %6372  ;;  %v16586_v49 = vld [vmem:[#allocation68_spill] sm:$0xff] }
 0x7f2   :  { %v14849_v5 = vpop.eup %9559  ;;  %v6784_v12 = vadd.f32 1e-05, %v6720_v43  ;;  %v6721_v51 = vmax.f32 %v6657_v28, 0.0  ;;  %v6658_v32 = vmul.f32 0.03125, %v6594_v2  ;;  %v6901_v27 = vmul.f32 %v14795_v36, %v16584_v29  ;;  %v16588_v29 = vld [vmem:[#allocation125_spill] sm:$0xff] }
 0x7f3   :  { %9569 = vrsqrt.f32 %v6783_v16  ;;  %v7098_v18 = vmax.f32 %v7034_v0, 0.0  ;;  %v7099_v39 = vmax.f32 %v7035_v21, 0.0  ;;  %v6968_v54 = vmul.f32 %v14713_v13, %v6900_v17  ;;  %v6375_v56 = vpop.xlane.xlu0 %6374  ;;  %v16587_v0 = vld [vmem:[#allocation124_spill] sm:$0xff] }
 0x7f4   :  { %v14854_v61 = vpop.eup %9561  ;;  %9571 = vrsqrt.f32 %v6784_v12  ;;  %v6785_v8 = vadd.f32 1e-05, %v6721_v51  ;;  %v6722_v38 = vmax.f32 %v6658_v32, 0.0  ;;  %v6969_v34 = vmul.f32 %v14713_v13, %v6901_v27 }
 0x7f5   :  { %v7154_v33 = vpack.c.bf16 %v7099_v39, %v7098_v18  ;;  %v7036_v52 = vadd.f32 %v14724_v48, %v6968_v54  ;;  %v6595_v46 = vsub.f32 %v6373_v41, %v14602_v15  ;;  %v6596_v36 = vsub.f32 %v6375_v56, %v16585_v60  ;;  %v6377_v40 = vpop.xlane.xlu1 %6376 }
 0x7f6   :  { %v14860_v7 = vpop.eup %9563  ;;  %9573 = vrsqrt.f32 %v6785_v8  ;;  %v6786_v19 = vadd.f32 1e-05, %v6722_v38  ;;  %v7037_v42 = vadd.f32 %v14724_v48, %v6969_v34  ;;  %v6597_v35 = vsub.f32 %v6377_v40, %v14610_v23  ;;  %v16589_v38 = vld [vmem:[#allocation66_spill] sm:$0xff] }
 0x7f7   :  { %8833 = vmatprep.mubr.bf16.mxu0 %v7154_v33  ;;  %v7100_v4 = vmax.f32 %v7036_v52, 0.0  ;;  %v6659_v31 = vmul.f32 0.03125, %v6595_v46  ;;  %v6660_v10 = vmul.f32 0.03125, %v6596_v36  ;;  %v6379_v37 = vpop.xlane.xlu0 %6378  ;;  %v6902_v43 = vmul.f32 %v14831_v6, %v16586_v49 }
 0x7f8   :  { %v14866_v15 = vpop.eup %9565  ;;  %9575 = vrsqrt.f32 %v6786_v19  ;;  %v7101_v28 = vmax.f32 %v7037_v42, 0.0  ;;  %v6661_v2 = vmul.f32 0.03125, %v6597_v35  ;;  %v6598_v20 = vsub.f32 %v6379_v37, %v14613_v24 }
 0x7f9   :  { %v6723_v17 = vmax.f32 %v6659_v31, 0.0  ;;  %v6724_v16 = vmax.f32 %v6660_v10, 0.0  ;;  %v6903_v23 = vmul.f32 %v14835_v22, %v16587_v0  ;;  %v6970_v21 = vmul.f32 %v14713_v13, %v6902_v43  ;;  %v6381_v41 = vpop.xlane.xlu1 %6380 }
 0x7fa   :  { %v7155_v12 = vpack.c.bf16 %v7101_v28, %v7100_v4  ;;  %v6725_v51 = vmax.f32 %v6661_v2, 0.0  ;;  %v6662_v32 = vmul.f32 0.03125, %v6598_v20  ;;  %v6904_v6 = vmul.f32 %v14820_v59, %v16588_v29 }
 0x7fb   :  { %v14874_v27 = vpop.eup %9567  ;;  %v6787_v18 = vadd.f32 1e-05, %v6723_v17  ;;  %v6788_v39 = vadd.f32 1e-05, %v6724_v16  ;;  %v6971_v24 = vmul.f32 %v14713_v13, %v6903_v23  ;;  %v7038_v54 = vadd.f32 %v14724_v48, %v6970_v21  ;;  %v6383_v56 = vpop.xlane.xlu0 %6382 }
 0x7fc   :  { %8834 = vmatmul.mubr.bf16.gmra.mrb[120].mxu0 %v7155_v12  ;;  %v6789_v22 = vadd.f32 1e-05, %v6725_v51  ;;  %v6726_v8 = vmax.f32 %v6662_v32, 0.0  ;;  %v6905_v34 = vmul.f32 %v14827_v63, %v16589_v38  ;;  %v6972_v33 = vmul.f32 %v14713_v13, %v6904_v6  ;;  %v16591_v12 = vld [vmem:[#allocation171_spill] sm:$0xff]  ;;  %v16592_v6 = vld [vmem:[#allocation145_spill] sm:$0xff] }
 0x7fd   :  { %v14881_v52 = vpop.eup %9569  ;;  %9577 = vrsqrt.f32 %v6787_v18  ;;  %v7039_v59 = vadd.f32 %v14724_v48, %v6971_v24  ;;  %v7102_v46 = vmax.f32 %v7038_v54, 0.0  ;;  %v6599_v60 = vsub.f32 %v6381_v41, %v14616_v44  ;;  %v6385_v36 = vpop.xlane.xlu1 %6384 }
 0x7fe   :  { %v14885_v40 = vpop.eup %9571  ;;  %9579 = vrsqrt.f32 %v6788_v39  ;;  %v6790_v19 = vadd.f32 1e-05, %v6726_v8  ;;  %v6973_v42 = vmul.f32 %v14713_v13, %v6905_v34  ;;  %v7040_v35 = vadd.f32 %v14724_v48, %v6972_v33 }
 0x7ff   :  { %9581 = vrsqrt.f32 %v6789_v22  ;;  %v7103_v63 = vmax.f32 %v7039_v59, 0.0  ;;  %v6663_v4 = vmul.f32 0.03125, %v6599_v60  ;;  %v6600_v31 = vsub.f32 %v6383_v56, %v14621_v62  ;;  %v6387_v10 = vpop.xlane.xlu0 %6386  ;;  %v16590_v62 = vld [vmem:[#allocation128_spill] sm:$0xff]  ;;  %v16593_v59 = vld [vmem:[#allocation94_spill] sm:$0xff] }
 0x800   :  { %v14890_v37 = vpop.eup %9573  ;;  %9583 = vrsqrt.f32 %v6790_v19  ;;  %v7041_v44 = vadd.f32 %v14724_v48, %v6973_v42  ;;  %v7104_v49 = vmax.f32 %v7040_v35, 0.0  ;;  %v6601_v43 = vsub.f32 %v6385_v36, %v14624_v1  ;;  %v16594_v42 = vld [vmem:[#allocation86_spill] sm:$0xff] }
 0x801   :  { %v7156_v28 = vpack.c.bf16 %v7103_v63, %v7102_v46  ;;  %v6727_v2 = vmax.f32 %v6663_v4, 0.0  ;;  %v6664_v20 = vmul.f32 0.03125, %v6600_v31  ;;  %v6602_v17 = vsub.f32 %v6387_v10, %v14628_v57  ;;  %v6389_v16 = vpop.xlane.xlu1 %6388 }
 0x802   :  { %v14895_v0 = vpop.eup %9575  ;;  %v7105_v23 = vmax.f32 %v7041_v44, 0.0  ;;  %v6665_v21 = vmul.f32 0.03125, %v6601_v43  ;;  %v6906_v41 = vmul.f32 %v14849_v5, %v16590_v62  ;;  %v6907_v51 = vmul.f32 %v14854_v61, %v16591_v12 }
 0x803   :  { %8837 = vmatprep.mubr.bf16.mxu0 %v7156_v28  ;;  %v6791_v32 = vadd.f32 1e-05, %v6727_v2  ;;  %v6728_v29 = vmax.f32 %v6664_v20, 0.0  ;;  %v6666_v1 = vmul.f32 0.03125, %v6602_v17  ;;  %v6603_v18 = vsub.f32 %v6389_v16, %v16592_v6  ;;  %v6391_v39 = vpop.xlane.xlu0 %6390  ;;  %v16595_v28 = vld [vmem:[#allocation242_spill] sm:$0xff] }
 0x804   :  { %v7157_v24 = vpack.c.bf16 %v7105_v23, %v7104_v49  ;;  %v6729_v57 = vmax.f32 %v6665_v21, 0.0  ;;  %v6974_v54 = vmul.f32 %v14713_v13, %v6906_v41  ;;  %v6975_v56 = vmul.f32 %v14713_v13, %v6907_v51  ;;  %v16596_v21 = vld [vmem:[#allocation88_spill] sm:$0xff] }
 0x805   :  { %9585 = vrsqrt.f32 %v6791_v32  ;;  %v6792_v22 = vadd.f32 1e-05, %v6728_v29  ;;  %v6730_v8 = vmax.f32 %v6666_v1, 0.0  ;;  %v6667_v5 = vmul.f32 0.03125, %v6603_v18  ;;  %v6393_v38 = vpop.xlane.xlu1 %6392  ;;  %v16597_v41 = vld [vmem:[#allocation144_spill] sm:$0xff]  ;;  %v16598_v29 = vld [vmem:[#allocation67_spill] sm:$0xff] }
 0x806   :  { %8838 = vmatmul.mubr.bf16.gmra.mrb[124].mxu0 %v7157_v24  ;;  %v6793_v61 = vadd.f32 1e-05, %v6729_v57  ;;  %v7042_v34 = vadd.f32 %v14724_v48, %v6974_v54  ;;  %v7043_v33 = vadd.f32 %v14724_v48, %v6975_v56  ;;  %v6604_v46 = vsub.f32 %v6391_v39, %v16593_v59  ;;  %v16599_v24 = vld [vmem:[#allocation244_spill] sm:$0xff] }
 0x807   :  { %v14907_v60 = vpop.eup %9577  ;;  %9587 = vrsqrt.f32 %v6792_v22  ;;  %v6794_v36 = vadd.f32 1e-05, %v6730_v8  ;;  %v6731_v19 = vmax.f32 %v6667_v5, 0.0  ;;  %v6908_v35 = vmul.f32 %v14860_v7, %v16594_v42  ;;  %v6395_v63 = vpop.xlane.xlu0 %6394  ;;  %v16600_v8 = vld [vmem:[#allocation248_spill] sm:$0xff] }
 0x808   :  { %v14911_v4 = vpop.eup %9579  ;;  %9589 = vrsqrt.f32 %v6793_v61  ;;  %v7106_v31 = vmax.f32 %v7042_v34, 0.0  ;;  %v7107_v10 = vmax.f32 %v7043_v33, 0.0  ;;  %v6668_v44 = vmul.f32 0.03125, %v6604_v46 }
 0x809   :  { %v14913_v49 = vpop.eup %9581  ;;  %9591 = vrsqrt.f32 %v6794_v36  ;;  %v6795_v43 = vadd.f32 1e-05, %v6731_v19  ;;  %v6909_v2 = vmul.f32 %v14866_v15, %v16595_v28  ;;  %v6976_v20 = vmul.f32 %v14713_v13, %v6908_v35  ;;  %v6397_v17 = vpop.xlane.xlu1 %6396 }
 0x80a   :  { %v14918_v16 = vpop.eup %9583  ;;  %v7158_v7 = vpack.c.bf16 %v7107_v10, %v7106_v31  ;;  %v6732_v23 = vmax.f32 %v6668_v44, 0.0  ;;  %v6605_v62 = vsub.f32 %v6393_v38, %v16596_v21  ;;  %v6606_v12 = vsub.f32 %v6395_v63, %v16597_v41  ;;  %v16601_v31 = vld [vmem:[#allocation127_spill] sm:$0xff] }
 0x80b   :  { %9593 = vrsqrt.f32 %v6795_v43  ;;  %v6977_v51 = vmul.f32 %v14713_v13, %v6909_v2  ;;  %v7044_v32 = vadd.f32 %v14724_v48, %v6976_v20  ;;  %v6910_v1 = vmul.f32 %v14874_v27, %v16598_v29  ;;  %v6399_v15 = vpop.xlane.xlu0 %6398 }
 0x80c   :  { %8841 = vmatprep.mubr.bf16.mxu0 %v7158_v7  ;;  %v6796_v6 = vadd.f32 1e-05, %v6732_v23  ;;  %v6669_v18 = vmul.f32 0.03125, %v6605_v62  ;;  %v6670_v39 = vmul.f32 0.03125, %v6606_v12  ;;  %v6911_v57 = vmul.f32 %v14881_v52, %v16599_v24 }
 0x80d   :  { %v7045_v54 = vadd.f32 %v14724_v48, %v6977_v51  ;;  %v7108_v56 = vmax.f32 %v7044_v32, 0.0  ;;  %v6978_v22 = vmul.f32 %v14713_v13, %v6910_v1  ;;  %v6607_v5 = vsub.f32 %v6397_v17, %v16600_v8  ;;  %v6401_v38 = vpop.xlane.xlu1 %6400  ;;  %v16603_v51 = vld [vmem:[#allocation160_spill] sm:$0xff] }
 0x80e   :  { %9595 = vrsqrt.f32 %v6796_v6  ;;  %v6733_v61 = vmax.f32 %v6669_v18, 0.0  ;;  %v6734_v34 = vmax.f32 %v6670_v39, 0.0  ;;  %v6979_v27 = vmul.f32 %v14713_v13, %v6911_v57  ;;  %v16604_v57 = vld [vmem:[#allocation225_spill] sm:$0xff] }
 0x80f   :  { %v14932_v33 = vpop.eup %9585  ;;  %v7109_v59 = vmax.f32 %v7045_v54, 0.0  ;;  %v7046_v46 = vadd.f32 %v14724_v48, %v6978_v22  ;;  %v6671_v36 = vmul.f32 0.03125, %v6607_v5  ;;  %v6608_v52 = vsub.f32 %v6399_v15, %v14652_v3  ;;  %v6403_v19 = vpop.xlane.xlu0 %6402  ;;  %v16602_v3 = vld [vmem:[#allocation243_spill] sm:$0xff] }
 0x810   :  { %v6797_v42 = vadd.f32 1e-05, %v6733_v61  ;;  %v6798_v35 = vadd.f32 1e-05, %v6734_v34  ;;  %v7047_v63 = vadd.f32 %v14724_v48, %v6979_v27  ;;  %v6912_v10 = vmul.f32 %v14885_v40, %v16601_v31 }
 0x811   :  { %v14939_v44 = vpop.eup %9587  ;;  %v7159_v43 = vpack.c.bf16 %v7109_v59, %v7108_v56  ;;  %v7110_v28 = vmax.f32 %v7046_v46, 0.0  ;;  %v6735_v2 = vmax.f32 %v6671_v36, 0.0  ;;  %v6672_v20 = vmul.f32 0.03125, %v6608_v52  ;;  %v6405_v17 = vpop.xlane.xlu1 %6404 }
 0x812   :  { %v14941_v7 = vpop.eup %9589  ;;  %9597 = vrsqrt.f32 %v6797_v42  ;;  %v7111_v23 = vmax.f32 %v7047_v63, 0.0  ;;  %v6913_v21 = vmul.f32 %v14890_v37, %v16602_v3  ;;  %v6980_v62 = vmul.f32 %v14713_v13, %v6912_v10 }
 0x813   :  { %v14946_v41 = vpop.eup %9591  ;;  %8842 = vmatmul.mubr.bf16.gmra.mrb[128].mxu0 %v7159_v43  ;;  %9599 = vrsqrt.f32 %v6798_v35  ;;  %v6799_v40 = vadd.f32 1e-05, %v6735_v2  ;;  %v6736_v12 = vmax.f32 %v6672_v20, 0.0  ;;  %v6609_v32 = vsub.f32 %v6401_v38, %v16603_v51  ;;  %v6407_v29 = vpop.xlane.xlu0 %6406  ;;  %v16605_v38 = vld [vmem:[#allocation175_spill] sm:$0xff] }
 0x814   :  { %v7160_v1 = vpack.c.bf16 %v7111_v23, %v7110_v28  ;;  %v6981_v15 = vmul.f32 %v14713_v13, %v6913_v21  ;;  %v7048_v6 = vadd.f32 %v14724_v48, %v6980_v62  ;;  %v6610_v18 = vsub.f32 %v6403_v19, %v14662_v53  ;;  %v16607_v23 = vld [vmem:[#allocation180_spill] sm:$0xff] }
 0x815   :  { %v14952_v39 = vpop.eup %9593  ;;  %9601 = vrsqrt.f32 %v6799_v40  ;;  %v6800_v37 = vadd.f32 1e-05, %v6736_v12  ;;  %v6673_v24 = vmul.f32 0.03125, %v6609_v32  ;;  %v6914_v54 = vmul.f32 %v14895_v0, %v16604_v57  ;;  %v6409_v56 = vpop.xlane.xlu1 %6408 }
 0x816   :  { %8845 = vmatprep.mubr.bf16.mxu0 %v7160_v1  ;;  %v7049_v22 = vadd.f32 %v14724_v48, %v6981_v15  ;;  %v7112_v8 = vmax.f32 %v7048_v6, 0.0  ;;  %v6674_v5 = vmul.f32 0.03125, %v6610_v18  ;;  %v6915_v61 = vmul.f32 %v14907_v60, %v16605_v38  ;;  %v16606_v60 = vld [vmem:[#allocation227_spill] sm:$0xff] }
 0x817   :  { %9603 = vrsqrt.f32 %v6800_v37  ;;  %v6737_v34 = vmax.f32 %v6673_v24, 0.0  ;;  %v6982_v53 = vmul.f32 %v14713_v13, %v6914_v54  ;;  %v6611_v27 = vsub.f32 %v6405_v17, %v14665_v30  ;;  %v6411_v59 = vpop.xlane.xlu0 %6410  ;;  %v16608_v1 = vld [vmem:[#allocation23_spill] sm:$0xff]  ;;  %v16609_v37 = vld [vmem:[#allocation140_spill] sm:$0xff] }
 0x818   :  { %v14961_v46 = vpop.eup %9595  ;;  %v7113_v36 = vmax.f32 %v7049_v22, 0.0  ;;  %v6738_v0 = vmax.f32 %v6674_v5, 0.0  ;;  %v6983_v52 = vmul.f32 %v14713_v13, %v6915_v61  ;;  %v6612_v19 = vsub.f32 %v6407_v29, %v14668_v47 }
 0x819   :  { %v6801_v42 = vadd.f32 1e-05, %v6737_v34  ;;  %v7050_v35 = vadd.f32 %v14724_v48, %v6982_v53  ;;  %v6675_v63 = vmul.f32 0.03125, %v6611_v27  ;;  %v6916_v31 = vmul.f32 %v14911_v4, %v16606_v60  ;;  %v6413_v10 = vpop.xlane.xlu1 %6412 }
 0x81a   :  { %v7161_v43 = vpack.c.bf16 %v7113_v36, %v7112_v8  ;;  %v6802_v28 = vadd.f32 1e-05, %v6738_v0  ;;  %v7051_v30 = vadd.f32 %v14724_v48, %v6983_v52  ;;  %v6676_v2 = vmul.f32 0.03125, %v6612_v19  ;;  %v14994_v52 = vld [vmem:[%s15203_s13] ss:$0 sm:$0xff] }
 0x81b   :  { %9605 = vrsqrt.f32 %v6801_v42  ;;  %v7114_v20 = vmax.f32 %v7050_v35, 0.0  ;;  %v6739_v17 = vmax.f32 %v6675_v63, 0.0  ;;  %v6917_v3 = vmul.f32 %v14913_v49, %v16607_v23  ;;  %v6415_v47 = vpop.xlane.xlu0 %6414 }
 0x81c   :  { %v14971_v21 = vpop.eup %9597  ;;  %8846 = vmatmul.mubr.bf16.gmra.mrb[132].mxu0 %v7161_v43  ;;  %9607 = vrsqrt.f32 %v6802_v28  ;;  %v7115_v62 = vmax.f32 %v7051_v30, 0.0  ;;  %v6740_v40 = vmax.f32 %v6676_v2, 0.0  ;;  %v6984_v4 = vmul.f32 %v14713_v13, %v6916_v31 }
 0x81d   :  { %v14974_v12 = vpop.eup %9599  ;;  %v6803_v51 = vadd.f32 1e-05, %v6739_v17  ;;  %v6985_v32 = vmul.f32 %v14713_v13, %v6917_v3  ;;  %v6613_v29 = vsub.f32 %v6409_v56, %v14673_v55  ;;  %v6614_v15 = vsub.f32 %v6411_v59, %v16608_v1  ;;  %v6417_v5 = vpop.xlane.xlu1 %6416  ;;  %v16610_v56 = vld [vmem:[#allocation226_spill] sm:$0xff] }
 0x81e   :  { %v7162_v6 = vpack.c.bf16 %v7115_v62, %v7114_v20  ;;  %v6804_v49 = vadd.f32 1e-05, %v6740_v40  ;;  %v7052_v18 = vadd.f32 %v14724_v48, %v6984_v4  ;;  %v6918_v24 = vmul.f32 %v14918_v16, %v16609_v37  ;;  %v16611_v59 = vld [vmem:[#allocation194_spill] sm:$0xff]  ;;  %v16614_v20 = vld [vmem:[#allocation176_spill] sm:$0xff]  ;;  %v16615_v37 = vld [vmem:[#allocation141_spill] sm:$0xff] }
 0x81f   :  { %v14982_v57 = vpop.eup %9601  ;;  %9609 = vrsqrt.f32 %v6803_v51  ;;  %v7053_v54 = vadd.f32 %v14724_v48, %v6985_v32  ;;  %v6677_v22 = vmul.f32 0.03125, %v6613_v29  ;;  %v6678_v8 = vmul.f32 0.03125, %v6614_v15  ;;  %v6419_v0 = vpop.xlane.xlu0 %6418 }
 0x820   :  { %8849 = vmatprep.mubr.bf16.mxu0 %v7162_v6  ;;  %9611 = vrsqrt.f32 %v6804_v49  ;;  %v7116_v55 = vmax.f32 %v7052_v18, 0.0  ;;  %v6919_v38 = vmul.f32 %v14932_v33, %v16610_v56  ;;  %v6986_v61 = vmul.f32 %v14713_v13, %v6918_v24  ;;  %v16612_v33 = vld [vmem:[#allocation163_spill] sm:$0xff]  ;;  %v16613_v13 = vld [vmem:[#allocation173_spill] sm:$0xff] }
 0x821   :  { %v14988_v34 = vpop.eup %9603  ;;  %v7117_v53 = vmax.f32 %v7053_v54, 0.0  ;;  %v6741_v16 = vmax.f32 %v6677_v22, 0.0  ;;  %v6742_v27 = vmax.f32 %v6678_v8, 0.0  ;;  %v6615_v36 = vsub.f32 %v6413_v10, %v16611_v59  ;;  %v6421_v62 = vpop.xlane.xlu1 %6420 }
 0x822   :  { %v6987_v19 = vmul.f32 %v14994_v52, %v6919_v38  ;;  %v7054_v42 = vadd.f32 %v14724_v48, %v6986_v61  ;;  %v6616_v35 = vsub.f32 %v6415_v47, %v16612_v33  ;;  %v6920_v63 = vmul.f32 %v14939_v44, %v16613_v13 }
 0x823   :  { %v7163_v60 = vpack.c.bf16 %v7117_v53, %v7116_v55  ;;  %v6805_v31 = vadd.f32 1e-05, %v6741_v16  ;;  %v6806_v43 = vadd.f32 1e-05, %v6742_v27  ;;  %v6679_v28 = vmul.f32 0.03125, %v6615_v36 }
 0x824   :  { %v7055_v10 = vadd.f32 %v14724_v48, %v6987_v19  ;;  %v7118_v30 = vmax.f32 %v7054_v42, 0.0  ;;  %v6680_v2 = vmul.f32 0.03125, %v6616_v35  ;;  %v6921_v17 = vmul.f32 %v14941_v7, %v16614_v20  ;;  %v15014_v7 = vld [vmem:[%s15203_s13 + $0x1] ss:$0 sm:$0xff] }
 0x825   :  { %v15004_v23 = vpop.eup %9605  ;;  %8850 = vmatmul.mubr.bf16.gmra.mrb[136].mxu0 %v7163_v60  ;;  %9613 = vrsqrt.f32 %v6805_v31  ;;  %v6743_v3 = vmax.f32 %v6679_v28, 0.0  ;;  %v6988_v47 = vmul.f32 %v14994_v52, %v6920_v63  ;;  %v6617_v44 = vsub.f32 %v6417_v5, %v14693_v14  ;;  %v6423_v14 = vpop.xlane.xlu0 %6422  ;;  %v16617_v42 = vld [vmem:[#allocation142_spill] sm:$0xff]  ;;  %v16618_v31 = vld [vmem:[#allocation183_spill] sm:$0xff] }
 0x826   :  { %v15008_v40 = vpop.eup %9607  ;;  %9615 = vrsqrt.f32 %v6806_v43  ;;  %v7119_v4 = vmax.f32 %v7055_v10, 0.0  ;;  %v6744_v48 = vmax.f32 %v6680_v2, 0.0  ;;  %v6989_v51 = vmul.f32 %v14994_v52, %v6921_v17  ;;  %v6425_v59 = vpop.xlane.xlu1 %6424  ;;  %v16619_v2 = vld [vmem:[#allocation100_spill] sm:$0xff] }
 0x827   :  { %v6807_v32 = vadd.f32 1e-05, %v6743_v3  ;;  %v7056_v29 = vadd.f32 %v15014_v7, %v6988_v47  ;;  %v6681_v1 = vmul.f32 0.03125, %v6617_v44  ;;  %v6618_v15 = vsub.f32 %v6419_v0, %v14696_v58  ;;  %v16616_v58 = vld [vmem:[#allocation159_spill] sm:$0xff]  ;;  %v16620_v44 = vld [vmem:[#allocation161_spill] sm:$0xff] }
 0x828   :  { %v7164_v6 = vpack.c.bf16 %v7119_v4, %v7118_v30  ;;  %v6808_v49 = vadd.f32 1e-05, %v6744_v48  ;;  %v7057_v18 = vadd.f32 %v15014_v7, %v6989_v51  ;;  %v6922_v24 = vmul.f32 %v14946_v41, %v16615_v37  ;;  %v16621_v51 = vld [vmem:[#allocation228_spill] sm:$0xff]  ;;  %v16622_v37 = vld [vmem:[#allocation230_spill] sm:$0xff] }
 0x829   :  { %v15021_v54 = vpop.eup %9609  ;;  %9617 = vrsqrt.f32 %v6807_v32  ;;  %v7120_v22 = vmax.f32 %v7056_v29, 0.0  ;;  %v6745_v8 = vmax.f32 %v6681_v1, 0.0  ;;  %v6682_v5 = vmul.f32 0.03125, %v6618_v15  ;;  %v6427_v63 = vpop.xlane.xlu0 %6426 }
 0x82a   :  { %v15023_v55 = vpop.eup %9611  ;;  %8853 = vmatprep.mubr.bf16.mxu0 %v7164_v6  ;;  %9619 = vrsqrt.f32 %v6808_v49  ;;  %v7121_v56 = vmax.f32 %v7057_v18, 0.0  ;;  %v6923_v38 = vmul.f32 %v14952_v39, %v16616_v58  ;;  %v6990_v61 = vmul.f32 %v14994_v52, %v6922_v24  ;;  %v6429_v29 = vpop.xlane.xlu1 %6428 }
 0x82b   :  { %v6809_v53 = vadd.f32 1e-05, %v6745_v8  ;;  %v6746_v16 = vmax.f32 %v6682_v5, 0.0  ;;  %v6619_v41 = vsub.f32 %v6421_v62, %v14701_v26  ;;  %v6620_v27 = vsub.f32 %v6423_v14, %v14704_v25 }
 0x82c   :  { %v7165_v36 = vpack.c.bf16 %v7121_v56, %v7120_v22  ;;  %v6991_v0 = vmul.f32 %v14994_v52, %v6923_v38  ;;  %v7058_v19 = vadd.f32 %v15014_v7, %v6990_v61  ;;  %v6924_v33 = vmul.f32 %v14961_v46, %v16617_v42 }
 0x82d   :  { %9621 = vrsqrt.f32 %v6809_v53  ;;  %v6810_v35 = vadd.f32 1e-05, %v6746_v16  ;;  %v6683_v39 = vmul.f32 0.03125, %v6619_v41  ;;  %v6684_v13 = vmul.f32 0.03125, %v6620_v27  ;;  %v16624_v16 = vld [vmem:[#allocation188_spill] sm:$0xff] }
 0x82e   :  { %8854 = vmatmul.mubr.bf16.gmra.mrb[140].mxu0 %v7165_v36  ;;  %v7059_v60 = vadd.f32 %v15014_v7, %v6991_v0  ;;  %v7122_v26 = vmax.f32 %v7058_v19, 0.0  ;;  %v6925_v25 = vmul.f32 %v14971_v21, %v16618_v31  ;;  %v6992_v43 = vmul.f32 %v14994_v52, %v6924_v33  ;;  %v16625_v36 = vld [vmem:[#allocation179_spill] sm:$0xff] }
 0x82f   :  { %v9614_v28 = vpop.eup %9613  ;;  %9623 = vrsqrt.f32 %v6810_v35  ;;  %v6747_v10 = vmax.f32 %v6683_v39, 0.0  ;;  %v6748_v30 = vmax.f32 %v6684_v13, 0.0  ;;  %v6621_v46 = vsub.f32 %v6425_v59, %v16619_v2 }
 0x830   :  { %v15039_v20 = vpop.eup %9615  ;;  %v7123_v17 = vmax.f32 %v7059_v60, 0.0  ;;  %v6993_v3 = vmul.f32 %v14994_v52, %v6925_v25  ;;  %v7060_v47 = vadd.f32 %v15014_v7, %v6992_v43  ;;  %v6622_v62 = vsub.f32 %v6427_v63, %v16620_v44  ;;  %v16626_v63 = vld [vmem:[#allocation143_spill] sm:$0xff]  ;;  %v16628_v43 = vld [vmem:[#allocation189_spill] sm:$0xff] }
 0x831   :  { %v6811_v4 = vadd.f32 1e-05, %v6747_v10  ;;  %v6812_v48 = vadd.f32 1e-05, %v6748_v30  ;;  %v6685_v21 = vmul.f32 0.03125, %v6621_v46  ;;  %v6926_v32 = vmul.f32 %v14974_v12, %v16621_v51  ;;  %v16623_v12 = vld [vmem:[#allocation149_spill] sm:$0xff] }
 0x832   :  { %v7166_v1 = vpack.c.bf16 %v7123_v17, %v7122_v26  ;;  %v7061_v15 = vadd.f32 %v15014_v7, %v6993_v3  ;;  %v7124_v14 = vmax.f32 %v7060_v47, 0.0  ;;  %v6686_v6 = vmul.f32 0.03125, %v6622_v62  ;;  %v16629_v17 = vld [vmem:[#allocation187_spill] sm:$0xff] }
 0x833   :  { %v9618_v49 = vpop.eup %9617  ;;  %9625 = vrsqrt.f32 %v6811_v4  ;;  %v6749_v18 = vmax.f32 %v6685_v21, 0.0  ;;  %v6927_v24 = vmul.f32 %v14982_v57, %v16622_v37  ;;  %v6994_v22 = vmul.f32 %v14994_v52, %v6926_v32  ;;  %v16630_v32 = vld [vmem:[#allocation198_spill] sm:$0xff]  ;;  %v16632_v37 = vld [vmem:[#allocation191_spill] sm:$0xff] }
 0x834   :  { %v9620_v8 = vpop.eup %9619  ;;  %8857 = vmatprep.mubr.bf16.mxu0 %v7166_v1  ;;  %9627 = vrsqrt.f32 %v6812_v48  ;;  %v7125_v5 = vmax.f32 %v7061_v15, 0.0  ;;  %v6750_v56 = vmax.f32 %v6686_v6, 0.0  ;;  %v6623_v58 = vsub.f32 %v6429_v29, %v16623_v12  ;;  %v16631_v29 = vld [vmem:[#allocation74_spill] sm:$0xff] }
 0x835   :  { %v6813_v38 = vadd.f32 1e-05, %v6749_v18  ;;  %v6995_v61 = vmul.f32 %v14994_v52, %v6927_v24  ;;  %v7062_v53 = vadd.f32 %v15014_v7, %v6994_v22  ;;  %v6928_v41 = vmul.f32 %v14988_v34, %v16624_v16 }
 0x836   :  { %v7167_v27 = vpack.c.bf16 %v7125_v5, %v7124_v14  ;;  %v6814_v59 = vadd.f32 1e-05, %v6750_v56  ;;  %v6687_v57 = vmul.f32 0.03125, %v6623_v58  ;;  %v6929_v0 = vmul.f32 %v15004_v23, %v16625_v36  ;;  %v16627_v23 = vld [vmem:[#allocation73_spill] sm:$0xff] }
 0x837   :  { %v9622_v19 = vpop.eup %9621  ;;  %9629 = vrsqrt.f32 %v6813_v38  ;;  %v7063_v42 = vadd.f32 %v15014_v7, %v6995_v61  ;;  %v7126_v33 = vmax.f32 %v7062_v53, 0.0  ;;  %v6996_v35 = vmul.f32 %v14994_v52, %v6928_v41  ;;  %v16633_v38 = vld [vmem:[#allocation80_spill] sm:$0xff] }
 0x838   :  { %8858 = vmatmul.mubr.bf16.gmra.mrb[144].mxu0 %v7167_v27  ;;  %9631 = vrsqrt.f32 %v6814_v59  ;;  %v6751_v39 = vmax.f32 %v6687_v57, 0.0  ;;  %v6997_v13 = vmul.f32 %v14994_v52, %v6929_v0  ;;  %v6930_v34 = vmul.f32 %v15008_v40, %v16626_v63  ;;  %v16635_v59 = vld [vmem:[#allocation199_spill] sm:$0xff] }
 0x839   :  { %v9624_v60 = vpop.eup %9623  ;;  %v7127_v26 = vmax.f32 %v7063_v42, 0.0  ;;  %v7064_v31 = vadd.f32 %v15014_v7, %v6996_v35  ;;  %v6931_v25 = vmul.f32 %v15021_v54, %v16627_v23  ;;  %v6932_v10 = vmul.f32 %v15023_v55, %v16628_v43  ;;  %v16636_v63 = vld [vmem:[#allocation195_spill] sm:$0xff] }
 0x83a   :  { %v6815_v30 = vadd.f32 1e-05, %v6751_v39  ;;  %v7065_v2 = vadd.f32 %v15014_v7, %v6997_v13  ;;  %v6998_v46 = vmul.f32 %v14994_v52, %v6930_v34  ;;  %v6933_v3 = vmul.f32 %v9614_v28, %v16629_v17 }
 0x83b   :  { %v7168_v47 = vpack.c.bf16 %v7127_v26, %v7126_v33  ;;  %v7128_v44 = vmax.f32 %v7064_v31, 0.0  ;;  %v6999_v40 = vmul.f32 %v14994_v52, %v6931_v25  ;;  %v7000_v62 = vmul.f32 %v14994_v52, %v6932_v10  ;;  %v16637_v31 = vld [vmem:[#allocation87_spill] sm:$0xff] }
 0x83c   :  { %9633 = vrsqrt.f32 %v6815_v30  ;;  %v7129_v4 = vmax.f32 %v7065_v2, 0.0  ;;  %v7066_v54 = vadd.f32 %v15014_v7, %v6998_v46  ;;  %v7001_v48 = vmul.f32 %v14994_v52, %v6933_v3  ;;  %v16638_v30 = vld [vmem:[#allocation85_spill] sm:$0xff] }
 0x83d   :  { %v9626_v55 = vpop.eup %9625  ;;  %8861 = vmatprep.mubr.bf16.mxu0 %v7168_v47  ;;  %v7067_v21 = vadd.f32 %v15014_v7, %v6999_v40  ;;  %v7068_v51 = vadd.f32 %v15014_v7, %v7000_v62  ;;  %v6934_v28 = vmul.f32 %v15039_v20, %v16630_v32  ;;  %v6935_v1 = vmul.f32 %v9618_v49, %v16631_v29  ;;  %v16634_v49 = vld [vmem:[#allocation237_spill] sm:$0xff] }
 0x83e   :  { %v9628_v15 = vpop.eup %9627  ;;  %v7169_v14 = vpack.c.bf16 %v7129_v4, %v7128_v44  ;;  %v7130_v6 = vmax.f32 %v7066_v54, 0.0  ;;  %v7069_v18 = vadd.f32 %v15014_v7, %v7001_v48  ;;  %v6936_v24 = vmul.f32 %v9620_v8, %v16632_v37  ;;  %v16639_v4 = vld [vmem:[#allocation245_spill] sm:$0xff] }
 0x83f   :  { %v7131_v22 = vmax.f32 %v7067_v21, 0.0  ;;  %v7132_v5 = vmax.f32 %v7068_v51, 0.0  ;;  %v7002_v56 = vmul.f32 %v14994_v52, %v6934_v28  ;;  %v7003_v12 = vmul.f32 %v14994_v52, %v6935_v1 }
 0x840   :  { %8862 = vmatmul.mubr.bf16.gmra.mrb[148].mxu0 %v7169_v14  ;;  %v7133_v58 = vmax.f32 %v7069_v18, 0.0  ;;  %v6937_v61 = vmul.f32 %v9622_v19, %v16633_v38  ;;  %v7004_v20 = vmul.f32 %v14994_v52, %v6936_v24  ;;  %v6938_v53 = vmul.f32 %v9624_v60, %v16634_v49 }
 0x841   :  { %v9630_v16 = vpop.eup %9629  ;;  %v7170_v41 = vpack.c.bf16 %v7131_v22, %v7130_v6  ;;  %v7070_v27 = vadd.f32 %v15014_v7, %v7002_v56  ;;  %v7071_v8 = vadd.f32 %v15014_v7, %v7003_v12  ;;  %v6939_v57 = vmul.f32 %v9626_v55, %v16635_v59 }
 0x842   :  { %v9632_v36 = vpop.eup %9631  ;;  %v7171_v0 = vpack.c.bf16 %v7133_v58, %v7132_v5  ;;  %v7005_v42 = vmul.f32 %v14994_v52, %v6937_v61  ;;  %v7072_v33 = vadd.f32 %v15014_v7, %v7004_v20  ;;  %v7006_v19 = vmul.f32 %v14994_v52, %v6938_v53 }
 0x843   :  { %8865 = vmatprep.mubr.bf16.mxu0 %v7170_v41  ;;  %v7134_v35 = vmax.f32 %v7070_v27, 0.0  ;;  %v7135_v39 = vmax.f32 %v7071_v8, 0.0  ;;  %v7007_v13 = vmul.f32 %v14994_v52, %v6939_v57  ;;  %v6940_v34 = vmul.f32 %v9628_v15, %v16636_v63 }
 0x844   :  { %v7073_v60 = vadd.f32 %v15014_v7, %v7005_v42  ;;  %v7074_v26 = vadd.f32 %v15014_v7, %v7006_v19  ;;  %v6941_v23 = vmul.f32 %v9630_v16, %v16637_v31  ;;  %v6942_v2 = vmul.f32 %v9632_v36, %v16638_v30 }
 0x845   :  { %v7172_v25 = vpack.c.bf16 %v7135_v39, %v7134_v35  ;;  %v7075_v43 = vadd.f32 %v15014_v7, %v7007_v13  ;;  %v7008_v10 = vmul.f32 %v14994_v52, %v6940_v34  ;;  %v7136_v17 = vmax.f32 %v7072_v33, 0.0  ;;  %v16640_v39 = vld [vmem:[#allocation20_spill] sm:$0xff] }
 0x846   :  { %v9634_v46 = vpop.eup %9633  ;;  %v7137_v3 = vmax.f32 %v7073_v60, 0.0  ;;  %v7138_v47 = vmax.f32 %v7074_v26, 0.0  ;;  %v7009_v44 = vmul.f32 %v14994_v52, %v6941_v23  ;;  %v7010_v48 = vmul.f32 %v14994_v52, %v6942_v2 }
 0x847   :  { %v7139_v40 = vmax.f32 %v7075_v43, 0.0  ;;  %v7076_v62 = vadd.f32 %v15014_v7, %v7008_v10  ;;  %v6943_v54 = vmul.f32 %v9634_v46, %v16639_v4  ;;  %v6496_v24 = vmul.f32 96.0, %v14780_v11 }
 0x848   :  { %8866 = vmatmul.mubr.bf16.gmra.mrb[152].mxu0 %v7171_v0  ;;  %v7173_v55 = vpack.c.bf16 %v7137_v3, %v7136_v17  ;;  %v7077_v21 = vadd.f32 %v15014_v7, %v7009_v44  ;;  %v7078_v28 = vadd.f32 %v15014_v7, %v7010_v48  ;;  %v6497_v22 = vmul.f32 96.0, %v14787_v9 }
 0x849   :  { %8869 = vmatprep.mubr.bf16.mxu0 %v7172_v25  ;;  %v7174_v51 = vpack.c.bf16 %v7139_v40, %v7138_v47  ;;  %v7011_v32 = vmul.f32 %v14994_v52, %v6943_v54  ;;  %v7140_v29 = vmax.f32 %v7076_v62, 0.0  ;;  %v6560_v5 = vmul.f32 %v6496_v24, %v14780_v11 }
 0x84a   :  { %v7141_v1 = vmax.f32 %v7077_v21, 0.0  ;;  %v7142_v6 = vmax.f32 %v7078_v28, 0.0  ;;  %v6561_v12 = vmul.f32 %v6497_v22, %v14787_v9  ;;  %v15119_v13 = vadd.s32 8, %v16640_v39 }
 0x84b   :  { %v7079_v15 = vadd.f32 %v15014_v7, %v7011_v32  ;;  %v9832_v34 = vmov 1.0|1.0  }
 0x84c   :  { %v7175_v14 = vpack.c.bf16 %v7141_v1, %v7140_v29 }
 0x84d   :  { %v7143_v18 = vmax.f32 %v7079_v15, 0.0 }
 0x84f   :  { %v7176_v37 = vpack.c.bf16 %v7143_v18, %v7142_v6 }
 0x850   :  { %8870 = vmatmul.mubr.bf16.gmra.mrb[156].mxu0 %v7173_v55 }
 0x851   :  { %8873 = vmatprep.mubr.bf16.mxu0 %v7174_v51 }
 0x858   :  { %8874 = vmatmul.mubr.bf16.gmra.mrb[160].mxu0 %v7175_v14 }
 0x859   :  { %8877 = vmatprep.mubr.bf16.mxu0 %v7176_v37 }
 0x870   :  { %v6431_v56 = vpop.xlane.xlu0 %6430 }
 0x871   :  { %v6624_v58 = vsub.f32 %v6431_v56, %v6560_v5  ;;  %v6433_v38 = vpop.xlane.xlu1 %6432 }
 0x872   :  { %v6625_v61 = vsub.f32 %v6433_v38, %v6561_v12 }
 0x873   :  { %v6688_v20 = vmul.f32 0.03125, %v6624_v58 }
 0x874   :  { %v6689_v49 = vmul.f32 0.03125, %v6625_v61 }
 0x875   :  { %v6752_v53 = vmax.f32 %v6688_v20, 0.0 }
 0x876   :  { %v6753_v16 = vmax.f32 %v6689_v49, 0.0 }
 0x877   :  { %v6816_v41 = vadd.f32 1e-05, %v6752_v53 }
 0x878   :  { %v6817_v27 = vadd.f32 1e-05, %v6753_v16  ;;  %v7549_v16 = vsub.s32 3, %v16640_v39 }
 0x879   :  { %9635 = vrsqrt.f32 %v6816_v41 }
 0x87a   :  { %9637 = vrsqrt.f32 %v6817_v27 }
 0x883   :  { %v9636_v8 = vpop.eup %9635 }
 0x884   :  { %v9638_v59 = vpop.eup %9637  ;;  %v6944_v57 = vmul.f32 %v9636_v8, %v14791_v50  ;;  %v15124_v50 = vld [vmem:[%s15190_s0] sm:$0xf] }
 0x885   :  { %v6945_v11 = vmul.f32 %v9638_v59, %v14799_v45  ;;  %v16641_v45 = vsub.s32 1, %v16640_v39 }
 0x886   :  { %v7012_v36 = vmul.f32 %v14994_v52, %v6944_v57  ;;  %v16642_v57 = vsub.s32 0, %v16640_v39 }
 0x887   :  { %v7013_v9 = vmul.f32 %v14994_v52, %v6945_v11  ;;  %v7542_v52 = vrot.slane %v15124_v50, %v16641_v45 }
 0x888   :  { %v7080_v0 = vadd.f32 %v15014_v7, %v7012_v36  ;;  %v7538_v11 = vrot.slane %v15124_v50, %v16642_v57  ;;  %v7550_v36 = vrot.slane %v15124_v50, %v7549_v16 }
 0x889   :  { %v7081_v42 = vadd.f32 %v15014_v7, %v7013_v9  ;;  %vm7552_vm1 = vcmp.eq.s32.totalorder %v16640_v39, %v7542_v52  ;;  %vm7556_vm2 = vcmp.eq.s32.totalorder %v15119_v13, %v7542_v52 }
 0x88a   :  { %v7144_v33 = vmax.f32 %v7080_v0, 0.0  ;;  %vm8059_vm3 = vmpackc.low %vm7556_vm2, %vm7552_vm1  ;;  %vm7551_vm4 = vcmp.eq.s32.totalorder %v16640_v39, %v7538_v11  ;;  %vm7555_vm5 = vcmp.eq.s32.totalorder %v15119_v13, %v7538_v11  ;;  %vm7554_vm6 = vcmp.eq.s32.totalorder %v16640_v39, %v7550_v36 }
 0x88b   :  { %v7145_v19 = vmax.f32 %v7081_v42, 0.0  ;;  %vm7558_vm7 = vcmp.eq.s32.totalorder %v15119_v13, %v7550_v36  ;;  %vm8061_vm8 = vmpackc.low %vm7555_vm5, %vm7551_vm4 }
 0x88c   :  { %vm8063_vm9 = vmpackc.low %vm7558_vm7, %vm7554_vm6 }
 0x88d   :  { %v7177_v35 = vpack.c.bf16 %v7145_v19, %v7144_v33 }
 0x88f   :  { %8878 = vmatmul.mubr.bf16.gmra.mrb[164].mxu0 %v7177_v35 }
 0x890   :  { %8060 = vmatprep.mubr.msk.bf16.mxu0 %vm8059_vm3, %v9832_v34 }
 0x8a3   :  { %v8819_v7 = vpop.f32.mrb[104].mxu0 }
 0x8a4   :  { %v7276_v63 = vpop.f32.mrb[105].mxu0 }
 0x8a5   :  { %v8820_v60 = vpop.f32.mrb[106].mxu0 }
 0x8a6   :  { %v7582_v26 = vpack.c.bf16 %v8820_v60, %v8819_v7  ;;  %v7279_v31 = vpop.f32.mrb[107].mxu0 }
 0x8a7   :  { %v7581_v23 = vpack.c.bf16 %v7279_v31, %v7276_v63 }
 0x8ae   :  { %v8823_v25 = vpop.f32.mrb[108].mxu0 }
 0x8af   :  { %v7292_v43 = vpop.f32.mrb[109].mxu0 }
 0x8b0   :  { %v8824_v10 = vpop.f32.mrb[110].mxu0 }
 0x8b1   :  { %v7584_v30 = vpack.c.bf16 %v8824_v10, %v8823_v25  ;;  %v7295_v2 = vpop.f32.mrb[111].mxu0 }
 0x8b2   :  { %v7583_v46 = vpack.c.bf16 %v7295_v2, %v7292_v43 }
 0x8ba   :  { %v8827_v17 = vpop.f32.mrb[112].mxu0 }
 0x8bb   :  { %v7308_v3 = vpop.f32.mrb[113].mxu0 }
 0x8bc   :  { %v8828_v47 = vpop.f32.mrb[114].mxu0 }
 0x8bd   :  { %v7586_v44 = vpack.c.bf16 %v8828_v47, %v8827_v17  ;;  %v7311_v40 = vpop.f32.mrb[115].mxu0 }
 0x8be   :  { %v7585_v62 = vpack.c.bf16 %v7311_v40, %v7308_v3 }
 0x8c3   :  { %v8831_v4 = vpop.f32.mrb[116].mxu0 }
 0x8c4   :  { %v7324_v54 = vpop.f32.mrb[117].mxu0 }
 0x8c5   :  { %v8832_v48 = vpop.f32.mrb[118].mxu0 }
 0x8c6   :  { %v7588_v55 = vpack.c.bf16 %v8832_v48, %v8831_v4  ;;  %v7327_v21 = vpop.f32.mrb[119].mxu0 }
 0x8c7   :  { %v7587_v51 = vpack.c.bf16 %v7327_v21, %v7324_v54 }
 0x8cf   :  { %v8835_v32 = vpop.f32.mrb[120].mxu0 }
 0x8d0   :  { %v7340_v28 = vpop.f32.mrb[121].mxu0 }
 0x8d1   :  { %v8836_v29 = vpop.f32.mrb[122].mxu0 }
 0x8d2   :  { %v7590_v1 = vpack.c.bf16 %v8836_v29, %v8835_v32  ;;  %v7343_v15 = vpop.f32.mrb[123].mxu0 }
 0x8d3   :  { %v7589_v14 = vpack.c.bf16 %v7343_v15, %v7340_v28 }
 0x8d5   :  { %8328 = vmatprep.subr.bf16.mxu0 %v7589_v14 }
 0x8d6   :  { %8329 = vmatpush3.bf16.msra.mxu0 %v7581_v23 }
 0x8d7   :  { %8330 = vmatprep.subr.bf16.mxu0 %v7590_v1 }
 0x8d9   :  { %v8839_v6 = vpop.f32.mrb[124].mxu0 }
 0x8da   :  { %v7356_v18 = vpop.f32.mrb[125].mxu0  ;;  %8331 = vmatpush3.bf16.msra.mxu0 %v7582_v26 }
 0x8db   :  { %v8840_v37 = vpop.f32.mrb[126].mxu0 }
 0x8dc   :  { %v7592_v24 = vpack.c.bf16 %v8840_v37, %v8839_v6  ;;  %v7359_v22 = vpop.f32.mrb[127].mxu0 }
 0x8dd   :  { %v7591_v5 = vpack.c.bf16 %v7359_v22, %v7356_v18 }
 0x8df   :  { %8332 = vmatprep.subr.bf16.mxu0 %v7591_v5  ;;  %v7545_v5 = vsub.s32 2, %v16640_v39 }
 0x8e0   :  { %8333 = vmatpush3.bf16.msra.mxu0 %v7583_v46 }
 0x8e1   :  { %8334 = vmatprep.subr.bf16.mxu0 %v7592_v24 }
 0x8e4   :  { %8335 = vmatpush3.bf16.msra.mxu0 %v7584_v30 }
 0x8e6   :  { %v8843_v56 = vpop.f32.mrb[128].mxu0 }
 0x8e7   :  { %v7372_v12 = vpop.f32.mrb[129].mxu0 }
 0x8e8   :  { %v8844_v58 = vpop.f32.mrb[130].mxu0 }
 0x8e9   :  { %v7594_v38 = vpack.c.bf16 %v8844_v58, %v8843_v56  ;;  %v7375_v61 = vpop.f32.mrb[131].mxu0 }
 0x8ea   :  { %v7593_v20 = vpack.c.bf16 %v7375_v61, %v7372_v12 }
 0x8ec   :  { %8336 = vmatprep.subr.bf16.mxu0 %v7593_v20  ;;  %v7546_v20 = vrot.slane %v15124_v50, %v7545_v5 }
 0x8ed   :  { %8337 = vmatpush3.bf16.msra.mxu0 %v7585_v62 }
 0x8ee   :  { %8338 = vmatprep.subr.bf16.mxu0 %v7594_v38  ;;  %vm7553_vm10 = vcmp.eq.s32.totalorder %v16640_v39, %v7546_v20  ;;  %vm7557_vm11 = vcmp.eq.s32.totalorder %v15119_v13, %v7546_v20 }
 0x8ef   :  { %v8847_v49 = vpop.f32.mrb[132].mxu0  ;;  %vm8065_vm12 = vmpackc.low %vm7557_vm11, %vm7553_vm10 }
 0x8f0   :  { %v7388_v53 = vpop.f32.mrb[133].mxu0 }
 0x8f1   :  { %v8848_v41 = vpop.f32.mrb[134].mxu0  ;;  %8339 = vmatpush3.bf16.msra.mxu0 %v7586_v44 }
 0x8f2   :  { %v7596_v27 = vpack.c.bf16 %v8848_v41, %v8847_v49  ;;  %v7391_v8 = vpop.f32.mrb[135].mxu0  ;;  %v16643_v49 = vmov 0.0  }
 0x8f3   :  { %v7595_v59 = vpack.c.bf16 %v7391_v8, %v7388_v53 }
 0x8f5   :  { %8340 = vmatprep.subr.bf16.mxu0 %v7595_v59 }
 0x8f6   :  { %8341 = vmatpush3.bf16.msra.mxu0 %v7587_v51 }
 0x8f7   :  { %8342 = vmatprep.subr.bf16.mxu0 %v7596_v27 }
 0x8f8   :  { %v8851_v9 = vpop.f32.mrb[136].mxu0 }
 0x8f9   :  { %v7404_v0 = vpop.f32.mrb[137].mxu0 }
 0x8fa   :  { %v8852_v42 = vpop.f32.mrb[138].mxu0  ;;  %8343 = vmatpush3.bf16.msra.mxu0 %v7588_v55 }
 0x8fb   :  { %v7598_v33 = vpack.c.bf16 %v8852_v42, %v8851_v9  ;;  %v7407_v19 = vpop.f32.mrb[139].mxu0  ;;  %v16644_v42 = vld [vmem:[#allocation21_spill] sm:$0xff] }
 0x8fc   :  { %v7597_v35 = vpack.c.bf16 %v7407_v19, %v7404_v0 }
 0x8fd   :  { %8062 = vmatmul.mubr.msk.bf16.vlgmr.msra.gmra.mrb[168].mxu0 %vm8061_vm8, %v9832_v34 }
 0x8fe   :  { %8064 = vmatprep.mubr.msk.bf16.mxu0 %vm8063_vm9, %v9832_v34 }
 0x901   :  { %v8855_v45 = vpop.f32.mrb[140].mxu0 }
 0x902   :  { %v7420_v52 = vpop.f32.mrb[141].mxu0 }
 0x903   :  { %v8856_v7 = vpop.f32.mrb[142].mxu0 }
 0x904   :  { %v7600_v63 = vpack.c.bf16 %v8856_v7, %v8855_v45  ;;  %v7423_v60 = vpop.f32.mrb[143].mxu0 }
 0x905   :  { %v7599_v26 = vpack.c.bf16 %v7423_v60, %v7420_v52 }
 0x90b   :  { %v8859_v31 = vpop.f32.mrb[144].mxu0 }
 0x90c   :  { %v7436_v23 = vpop.f32.mrb[145].mxu0 }
 0x90d   :  { %v8860_v25 = vpop.f32.mrb[146].mxu0 }
 0x90e   :  { %v7602_v43 = vpack.c.bf16 %v8860_v25, %v8859_v31  ;;  %v7439_v10 = vpop.f32.mrb[147].mxu0  ;;  %v9248_v25 = vld [vmem:[#allocation12 + $0x8] sm:$0xff]  }
 0x90f   :  { %v7601_v30 = vpack.c.bf16 %v7439_v10, %v7436_v23  ;;  %v9247_v23 = vld [vmem:[#allocation12] sm:$0xff]   ;;  %v9250_v10 = vld [vmem:[#allocation12 + $0x18] sm:$0xff]  }
 0x913   :  { %v8863_v2 = vpop.f32.mrb[148].mxu0 }
 0x914   :  { %v7452_v46 = vpop.f32.mrb[149].mxu0 }
 0x915   :  { %v8864_v17 = vpop.f32.mrb[150].mxu0 }
 0x916   :  { %v7604_v3 = vpack.c.bf16 %v8864_v17, %v8863_v2  ;;  %v7455_v47 = vpop.f32.mrb[151].mxu0  ;;  %v9252_v2 = vld [vmem:[#allocation12 + $0x28] sm:$0xff]   ;;  %v9254_v17 = vld [vmem:[#allocation12 + $0x38] sm:$0xff]  }
 0x917   :  { %v7603_v44 = vpack.c.bf16 %v7455_v47, %v7452_v46  ;;  %v9253_v46 = vld [vmem:[#allocation12 + $0x30] sm:$0xff]  }
 0x91b   :  { %v8867_v40 = vpop.f32.mrb[152].mxu0 }
 0x91c   :  { %v7468_v62 = vpop.f32.mrb[153].mxu0 }
 0x91d   :  { %v8868_v4 = vpop.f32.mrb[154].mxu0 }
 0x91e   :  { %v7606_v54 = vpack.c.bf16 %v8868_v4, %v8867_v40  ;;  %v7471_v48 = vpop.f32.mrb[155].mxu0 }
 0x91f   :  { %v7605_v55 = vpack.c.bf16 %v7471_v48, %v7468_v62 }
 0x921   :  { %8350 = vmatprep.subr.bf16.mxu0 %v7605_v55 }
 0x922   :  { %8351 = vmatpush3.bf16.msra.mxu0 %v7597_v35 }
 0x923   :  { %v8871_v21 = vpop.f32.mrb[156].mxu0  ;;  %8352 = vmatprep.subr.bf16.mxu0 %v7606_v54 }
 0x924   :  { %v7484_v51 = vpop.f32.mrb[157].mxu0 }
 0x925   :  { %v8872_v32 = vpop.f32.mrb[158].mxu0 }
 0x926   :  { %v7608_v28 = vpack.c.bf16 %v8872_v32, %v8871_v21  ;;  %v7487_v29 = vpop.f32.mrb[159].mxu0  ;;  %8353 = vmatpush3.bf16.msra.mxu0 %v7598_v33 }
 0x927   :  { %v7607_v1 = vpack.c.bf16 %v7487_v29, %v7484_v51 }
 0x929   :  { %8354 = vmatprep.subr.bf16.mxu0 %v7607_v1 }
 0x92a   :  { %8355 = vmatpush3.bf16.msra.mxu0 %v7599_v26 }
 0x92b   :  { %v8875_v15 = vpop.f32.mrb[160].mxu0  ;;  %8356 = vmatprep.subr.bf16.mxu0 %v7608_v28 }
 0x92c   :  { %v7500_v14 = vpop.f32.mrb[161].mxu0 }
 0x92d   :  { %v8876_v6 = vpop.f32.mrb[162].mxu0 }
 0x92e   :  { %v7610_v18 = vpack.c.bf16 %v8876_v6, %v8875_v15  ;;  %v7503_v37 = vpop.f32.mrb[163].mxu0  ;;  %8357 = vmatpush3.bf16.msra.mxu0 %v7600_v63  ;;  %v8067_v15 = vld [vmem:[%s15203_s13 + $0x2] ss:$0 sm:$0xff] }
 0x92f   :  { %v7609_v24 = vpack.c.bf16 %v7503_v37, %v7500_v14 }
 0x931   :  { %8358 = vmatprep.subr.bf16.mxu0 %v7609_v24 }
 0x932   :  { %8359 = vmatpush3.bf16.msra.mxu0 %v7601_v30  ;;  %v9251_v30 = vld [vmem:[#allocation12 + $0x20] sm:$0xff]  }
 0x933   :  { %8360 = vmatprep.subr.bf16.mxu0 %v7610_v18  ;;  %v8068_v18 = vld [vmem:[%s15203_s13 + $0x3] ss:$0 sm:$0xff] }
 0x936   :  { %8361 = vmatpush3.bf16.msra.mxu0 %v7602_v43  ;;  %v9249_v43 = vld [vmem:[#allocation12 + $0x10] sm:$0xff]  }
 0x962   :  { %v8879_v22 = vpop.f32.mrb[164].mxu0 }
 0x963   :  { %v7516_v56 = vpop.f32.mrb[165].mxu0 }
 0x964   :  { %v8880_v12 = vpop.f32.mrb[166].mxu0 }
 0x965   :  { %v7612_v58 = vpack.c.bf16 %v8880_v12, %v8879_v22  ;;  %v7519_v38 = vpop.f32.mrb[167].mxu0 }
 0x966   :  { %v7611_v61 = vpack.c.bf16 %v7519_v38, %v7516_v56 }
 0x968   :  { %8362 = vmatprep.subr.bf16.mxu0 %v7611_v61 }
 0x969   :  { %8363 = vmatpush3.bf16.msra.mxu0 %v7603_v44 }
 0x96a   :  { %8364 = vmatprep.subr.bf16.mxu0 %v7612_v58 }
 0x96d   :  { %8365 = vmatpush3.bf16.msra.mxu0 %v7604_v3 }
 0x96e   :  { %8881 = vmatprep.subr.bf16.mxu0 %v16643_v49 }
 0x970   :  { %8066 = vmatmul.mubr.msk.bf16.vlgmr.msra.gmra.mrb[172].mxu0 %vm8065_vm12, %v9832_v34  ;;  %v16645_v34 = vld [vmem:[#allocation22_spill] sm:$0xff] }
 0x971   :  { %8897 = vmatprep.mubr.msk.bf16.mxu0 %vm9831_vm0, %v16643_v49  ;;  %8882 = vmatpush3.bf16.msra.mxu0 %v9247_v23 }
 0x972   :  { %8883 = vmatprep.subr.bf16.mxu0 %v16643_v49 }
 0x975   :  { %8884 = vmatpush3.bf16.msra.mxu0 %v9248_v25  ;;  %v8078_v25 = vld [vmem:[%s15203_s13 + $0x5] ss:$0 sm:$0xff] }
 0x976   :  { %8885 = vmatprep.subr.bf16.mxu0 %v16643_v49 }
 0x979   :  { %8886 = vmatpush3.bf16.msra.mxu0 %v9249_v43 }
 0x97a   :  { %8887 = vmatprep.subr.bf16.mxu0 %v16643_v49 }
 0x97d   :  { %8888 = vmatpush3.bf16.msra.mxu0 %v9250_v10 }
 0x97e   :  { %8889 = vmatprep.subr.bf16.mxu0 %v16643_v49 }
 0x981   :  { %8890 = vmatpush3.bf16.msra.mxu0 %v9251_v30  ;;  %v7702_v30 = vld [vmem:[%s15194_s4] sm:$0xff] }
 0x982   :  { %8891 = vmatprep.subr.bf16.mxu0 %v16643_v49 }
 0x985   :  { %8892 = vmatpush3.bf16.msra.mxu0 %v9252_v2 }
 0x986   :  { %8893 = vmatprep.subr.bf16.mxu0 %v16643_v49 }
 0x989   :  { %8894 = vmatpush3.bf16.msra.mxu0 %v9253_v46 }
 0x98a   :  { %8895 = vmatprep.subr.bf16.mxu0 %v16643_v49 }
 0x98d   :  { %8896 = vmatpush3.bf16.msra.mxu0 %v9254_v17  ;;  %v7703_v17 = vld [vmem:[%s15194_s4 + $0x8] sm:$0xff] }
 0x9d0   :  { %v8344_v53 = vpop.f32.mrb[168].mxu0 }
 0x9d1   :  { %v8345_v16 = vpop.f32.mrb[169].mxu0 }
 0x9d2   :  { %v8346_v41 = vadd.f32 %v8345_v16, %v8344_v53  ;;  %v8347_v50 = vpop.f32.mrb[170].mxu0 }
 0x9d3   :  { %v8348_v27 = vpop.f32.mrb[171].mxu0 }
 0x9d4   :  { %v8349_v8 = vadd.f32 %v8348_v27, %v8347_v50 }
 0xa43   :  { %v8366_v59 = vpop.f32.mrb[172].mxu0 }
 0xa44   :  { %v8367_v57 = vpop.f32.mrb[173].mxu0 }
 0xa45   :  { %v8368_v39 = vadd.f32 %v8367_v57, %v8366_v59  ;;  %v8369_v11 = vpop.f32.mrb[174].mxu0 }
 0xa46   :  { %v8370_v13 = vpop.f32.mrb[175].mxu0 }
 0xa47   :  { %v7689_v36 = vadd.f32 %v8368_v39, %v8346_v41  ;;  %v8371_v9 = vadd.f32 %v8370_v13, %v8369_v11 }
 0xa49   :  { %v7692_v0 = vadd.f32 %v8371_v9, %v8349_v8  ;;  %v7695_v33 = vadd.f32 %v7689_v36, %v16644_v42 }
 0xa4b   :  { %7706 = vadd.xlane.f32.xlu0 %v7695_v33  ;;  %v7696_v19 = vadd.f32 %v7692_v0, %v16645_v34 }
 0xa4d   :  { %7708 = vadd.xlane.f32.xlu1 %v7696_v19 }
 0xad8   :  { %v7707_v35 = vpop.xlane.xlu0 %7706 }
 0xad9   :  { %v7710_v45 = vmul.f32 0.03125, %v7707_v35 }
 0xada   :  { %v7709_v52 = vpop.xlane.xlu1 %7708 }
 0xadb   :  { %v7712_v7 = vsub.f32 %v7695_v33, %v7710_v45  ;;  %v7711_v63 = vmul.f32 0.03125, %v7709_v52  ;;  %v7720_v3 = vmul.f32 96.0, %v7710_v45 }
 0xadd   :  { %v7713_v60 = vsub.f32 %v7696_v19, %v7711_v63  ;;  %v7714_v26 = vmul.f32 %v7712_v7, %v7712_v7  ;;  %v7721_v47 = vmul.f32 96.0, %v7711_v63  ;;  %v7722_v44 = vmul.f32 %v7720_v3, %v7710_v45 }
 0xadf   :  { %7716 = vadd.xlane.f32.xlu0 %v7714_v26  ;;  %v7715_v31 = vmul.f32 %v7713_v60, %v7713_v60  ;;  %v7723_v4 = vmul.f32 %v7721_v47, %v7711_v63  ;;  %v8077_v26 = vld [vmem:[%s15203_s13 + $0x4] ss:$0 sm:$0xff]  ;;  %s9788_s13 = scalar_lea.vmem %s7910_s16, 256 }
 0xae0   :  { %p9789_p6 = scmp.ne.s32.totalorder %s7910_s16, %s9788_s13  ;;  %p9794_p8 = scmp.lt.s32.totalorder %s9788_s13, %s9788_s13 }
 0xae1   :  { %7718 = vadd.xlane.f32.xlu1 %v7715_v31 }
 0xae2   :  { %p9795_p9 = por %p9794_p8, %p9793_p7 }
 0xae4   :  { %p9796_p10 = pnand %p9795_p9, %p9789_p6 }
 0xb6c   :  { %v7717_v40 = vpop.xlane.xlu0 %7716 }
 0xb6d   :  { %v7724_v62 = vsub.f32 %v7717_v40, %v7722_v44 }
 0xb6e   :  { %v7719_v54 = vpop.xlane.xlu1 %7718 }
 0xb6f   :  { %v7726_v48 = vmul.f32 0.03125, %v7724_v62  ;;  %v7725_v55 = vsub.f32 %v7719_v54, %v7723_v4 }
 0xb71   :  { %v7728_v21 = vmax.f32 %v7726_v48, 0.0  ;;  %v7727_v51 = vmul.f32 0.03125, %v7725_v55 }
 0xb73   :  { %v7730_v32 = vadd.f32 1e-05, %v7728_v21  ;;  %v7729_v28 = vmax.f32 %v7727_v51, 0.0 }
 0xb75   :  { %9639 = vrsqrt.f32 %v7730_v32  ;;  %v7731_v29 = vadd.f32 1e-05, %v7729_v28 }
 0xb77   :  { %9641 = vrsqrt.f32 %v7731_v29 }
 0xb7f   :  { %v9640_v1 = vpop.eup %9639 }
 0xb80   :  { %v7734_v14 = vmul.f32 %v9640_v1, %v7712_v7 }
 0xb81   :  { %v9642_v6 = vpop.eup %9641 }
 0xb82   :  { %v7735_v37 = vmul.f32 %v9642_v6, %v7713_v60  ;;  %v7740_v24 = vmul.f32 %v8067_v15, %v7734_v14 }
 0xb84   :  { %v7741_v22 = vmul.f32 %v8067_v15, %v7735_v37  ;;  %v7746_v5 = vadd.f32 %v8068_v18, %v7740_v24 }
 0xb86   :  { %v7747_v56 = vadd.f32 %v8068_v18, %v7741_v22  ;;  %v7748_v12 = vmax.f32 %v7746_v5, 0.0 }
 0xb88   :  { %v7749_v58 = vmax.f32 %v7747_v56, 0.0 }
 0xb8a   :  { %v7750_v38 = vpack.c.bf16 %v7749_v58, %v7748_v12 }
 0xb8c   :  { %8898 = vmatmul.mubr.bf16.vlgmr.msra.gmra.mrb[176].mxu0 %v7750_v38 }
 0xc5f   :  { %v7849_v61 = vpop.f32.mrb[176].mxu0 }
 0xc60   :  { %7856 = vadd.xlane.f32.xlu0 %v7849_v61  ;;  %v8899_v20 = vpop.f32.mrb[177].mxu0 }
 0xc61   :  { %v7852_v49 = vpop.f32.mrb[178].mxu0 }
 0xc62   :  { %7858 = vadd.xlane.f32.xlu1 %v7852_v49  ;;  %v8900_v53 = vpop.f32.mrb[179].mxu0 }
 0xced   :  { %v7857_v16 = vpop.xlane.xlu0 %7856 }
 0xcee   :  { %v7860_v41 = vmul.f32 0.03125, %v7857_v16 }
 0xcef   :  { %v7859_v50 = vpop.xlane.xlu1 %7858 }
 0xcf0   :  { %v7862_v27 = vsub.f32 %v7849_v61, %v7860_v41  ;;  %v7861_v8 = vmul.f32 0.03125, %v7859_v50  ;;  %v7870_v11 = vmul.f32 96.0, %v7860_v41 }
 0xcf2   :  { %v7863_v59 = vsub.f32 %v7852_v49, %v7861_v8  ;;  %v7864_v57 = vmul.f32 %v7862_v27, %v7862_v27  ;;  %v7871_v13 = vmul.f32 96.0, %v7861_v8  ;;  %v7872_v36 = vmul.f32 %v7870_v11, %v7860_v41 }
 0xcf4   :  { %7866 = vadd.xlane.f32.xlu0 %v7864_v57  ;;  %v7865_v39 = vmul.f32 %v7863_v59, %v7863_v59  ;;  %v7873_v42 = vmul.f32 %v7871_v13, %v7861_v8 }
 0xcf6   :  { %7868 = vadd.xlane.f32.xlu1 %v7865_v39 }
 0xd81   :  { %v7867_v9 = vpop.xlane.xlu0 %7866 }
 0xd82   :  { %v7874_v0 = vsub.f32 %v7867_v9, %v7872_v36 }
 0xd83   :  { %v7869_v33 = vpop.xlane.xlu1 %7868 }
 0xd84   :  { %v7876_v34 = vmul.f32 0.03125, %v7874_v0  ;;  %v7875_v19 = vsub.f32 %v7869_v33, %v7873_v42 }
 0xd86   :  { %v7878_v35 = vmax.f32 %v7876_v34, 0.0  ;;  %v7877_v45 = vmul.f32 0.03125, %v7875_v19 }
 0xd88   :  { %v7880_v52 = vadd.f32 1e-05, %v7878_v35  ;;  %v7879_v7 = vmax.f32 %v7877_v45, 0.0 }
 0xd8a   :  { %9643 = vrsqrt.f32 %v7880_v52  ;;  %v7881_v63 = vadd.f32 1e-05, %v7879_v7 }
 0xd8c   :  { %9645 = vrsqrt.f32 %v7881_v63 }
 0xd94   :  { %v9644_v60 = vpop.eup %9643 }
 0xd95   :  { %v7884_v31 = vmul.f32 %v9644_v60, %v7862_v27 }
 0xd96   :  { %v9646_v23 = vpop.eup %9645 }
 0xd97   :  { %v7885_v43 = vmul.f32 %v9646_v23, %v7863_v59  ;;  %v7890_v10 = vmul.f32 %v8077_v26, %v7884_v31 }
 0xd99   :  { %v7891_v2 = vmul.f32 %v8077_v26, %v7885_v43  ;;  %v7896_v46 = vadd.f32 %v8078_v25, %v7890_v10 }
 0xd9b   :  { %v7897_v3 = vadd.f32 %v8078_v25, %v7891_v2  ;;  %v7898_v47 = vadd.f32 %v7896_v46, %v7702_v30 }
 0xd9d   :  { %v7899_v44 = vadd.f32 %v7897_v3, %v7703_v17  ;;  %v7900_v40 = vmax.f32 %v7898_v47, 0.0 }
 0xd9f   :  { %v7901_v62 = vmax.f32 %v7899_v44, 0.0  ;;  %7902 = vst [vmem:[#allocation14] sm:$0xff] %v7900_v40 }
 0xda1   :  { %7903 = vst [vmem:[#allocation14 + $0x8] sm:$0xff] %v7901_v62 }
 0xda2   :  { %9799 = shalt.err (!%p9796_p10)
}
 0xda3   :  { %s9800_s4 = scalar_lea.hbm %s15204_s14, 256 }
 0xda4   :  { %p9801_p11 = scmp.ne.s32.totalorder %s15204_s14, %s9800_s4  ;;  %p9804_p12 = scmp.lt.u32.totalorder %s9800_s4, %s15204_s14 }
 0xda6   :  { %p9806_p13 = pnand %p9804_p12, %p9801_p11 }
 0xda8   :  { %9809 = shalt.err (!%p9806_p13)
}
 0xda9   :  { %s9834_s11 = smov 128   ;;  %s9835_s25 = smov 8  }
 0xdaa   :  { %7915 = dma.vmem_to_hbm [thread:$0]  %s7910_s16, 256, %s15204_s14, [#allocation5], %s9834_s11, %s9834_s11, %s9835_s25  }
 0xdab   :  { %9818 = dma.done.wait [#allocation5], 256  }
 0xdac   :  { %9819 = vsyncadd [#allocation5], 4294967040 }
 0xdad   :  { %7919 = vsyncpa [#allocation4], 1 }
 0xdae   :  { %7920 = vsyncpa [#allocation7], 1 }
 0xdaf   :  { %7921 = vsyncpa [#allocation10], 1 }
 0xdb0   :  { %7922 = vsyncpa [#allocation13], 1 }
 0xdb1   :  { %7923 = vsyncpa [#allocation5], 1 }

</bundles_post_ra>
